<compile_context>
chip_gen: v7x
topology: tpu7x:2x2x1
jax: 0.10.0
libtpu: 0.0.40
codegen_flags: <defaults>
</compile_context>

<pallas_src>
import numpy as np
import jax
import jax.numpy as jnp
from jax.experimental import pallas as pl
from jax.experimental.pallas import tpu as pltpu


def _round_up(x, m):
    return (x + m - 1) // m * m


def _vmem_capacity_bytes(default=64 << 20):
    try:
        info = pltpu.get_tpu_info()
        return int(getattr(info, "vmem_capacity_bytes", default))
    except Exception:
        return default


def make_monotonic_lsa_step(memory, processed_memory, Wq, Wconv, Wproj, v, r,
                            *, mem_dtype=None, batch_block=None):
    """Per-utterance factory: pads/repacks the constants once and returns a jitted
    per-decoder-step function `step(query, attention_weights_cat) -> (context, weights)`.

    memory:            (B, T, embedding_dim)
    processed_memory:  (B, T, attention_dim)
    Wq:     (attention_rnn_dim, attention_dim)   query projection (transposed)
    Wconv:  (n_filters, 2, kernel_size)          Conv1d weight (OIW, no bias)
    Wproj:  (n_filters, attention_dim)           location projection (transposed)
    v:      (attention_dim,)                     energy vector
    r:      scalar                               bias added to energies
    mem_dtype: dtype used for the `memory` blocks inside the kernel (e.g. jnp.bfloat16
               to halve the dominant HBM/VMEM term); context is accumulated in f32.
    """
    f32 = jnp.float32
    B, T, E = memory.shape
    D = processed_memory.shape[-1]
    Rq = Wq.shape[0]
    F, two, K = Wconv.shape
    assert two == 2
    pad = (K - 1) // 2
    TWOK = 2 * K
    if mem_dtype is None:
        mem_dtype = memory.dtype

    vmem_cap = _vmem_capacity_bytes()

    # Batch tile: 8 by default; on 128-MiB VMEM parts (v5e/v6e) a larger tile fills more
    # MXU rows and amortizes the ~0.35 us per-grid-step overhead when B is large.
    if batch_block is None:
        batch_block = 8
        if B > 8 and vmem_cap >= (96 << 20):
            batch_block = int(min(32, _round_up(B, 8)))
    BB = int(batch_block)
    assert BB % 8 == 0

    B_pad = _round_up(B, BB)
    T_pad = _round_up(T, 128)
    D_pad = _round_up(D, 128)
    E_pad = _round_up(E, 128)
    R_pad = _round_up(Rq, 128)

    # ---------------- per-utterance prep (hoisted out of the decoder loop) ----------------
    mem_p = jnp.pad(memory.astype(mem_dtype),
                    ((0, B_pad - B), (0, T_pad - T), (0, E_pad - E)))
    pmem_p = jnp.pad(processed_memory.astype(f32),
                     ((0, B_pad - B), (0, T_pad - T), (0, D_pad - D)))
    Wq_p = jnp.pad(Wq.astype(f32), ((0, R_pad - Rq), (0, D_pad - D)))
    # Fuse Conv1d(2->F, K taps) with the F->D projection into one (2K, D) matrix.
    Wloc = Wconv.reshape(F, TWOK).astype(f32).T @ Wproj.astype(f32)          # (2K, D)
    Wloc_p = jnp.pad(Wloc, ((0, 0), (0, D_pad - D)))
    v_p = jnp.pad(v.astype(f32), (0, D_pad - D)).reshape(1, D_pad)
    r_p = jnp.asarray(r, f32).reshape(1, 1)
    # strict upper-triangular ones: tri[i, j] = 1 iff i < j  -> exclusive prefix sums.
    tri = jnp.asarray(np.triu(np.ones((T_pad, T_pad), np.float32), k=1))

    # ---------------------------------------- kernel ----------------------------------------
    def kernel(flag_ref, r_ref, q_ref, csum_ref, shf_ref, pmem_ref, mem_ref,
               wq_ref, wloc_ref, v_ref, tri_ref, ctx_ref, attn_ref):
        # ---- alignment energies: both projections on the MXU, tanh on the EUP ----
        pq = jnp.dot(q_ref[...], wq_ref[...], preferred_element_type=f32)        # (BB, Dp)
        ploc = jnp.dot(shf_ref[...], wloc_ref[...], preferred_element_type=f32)  # (BB*Tp, Dp)
        ploc = ploc.reshape(BB, T_pad, D_pad)        # leading-dim split: no lane relayout
        s = jnp.tanh(pq[:, None, :] + ploc + pmem_ref[...])                      # (BB, Tp, Dp)
        energies = jnp.sum(s * v_ref[...], axis=-1) + r_ref[...]                 # (BB, Tp)

        cols = jax.lax.broadcasted_iota(jnp.int32, (BB, T_pad), 1)
        valid = cols < T

        # ---- monotonic attention, eval branch ----
        above = (energies > 0.0).astype(f32)
        p_sel = jnp.where(valid, above * csum_ref[...], 0.0)

        # exclusive cumprod of a = (1 - p_sel) via exp(exclusive-cumsum(log|a|)) with
        # exact zero AND sign tracking.  All three exclusive prefix sums in one stacked
        # (3*BB, Tp) @ (Tp, Tp) matmul against the resident strict-upper-tri matrix.
        a = 1.0 - p_sel
        absa = jnp.abs(a)
        is_zero = absa == 0.0
        logabs = jnp.log(jnp.where(is_zero, 1.0, absa))
        zed = jnp.where(is_zero, 1.0, 0.0)
        neg = jnp.where(a < 0.0, 1.0, 0.0)
        stacked = jnp.concatenate([logabs, zed, neg], axis=0)                    # (3*BB, Tp)
        scans = jnp.dot(stacked, tri_ref[...], preferred_element_type=f32)       # sum_{i<j}
        log_excl = scans[:BB]
        n_zero = scans[BB:2 * BB]
        n_neg = scans[2 * BB:]
        half = n_neg * 0.5
        sign = jnp.where(half - jnp.floor(half) > 0.25, -1.0, 1.0)               # (-1)^n_neg
        excl = jnp.where(n_zero > 0.0, 0.0, sign * jnp.exp(log_excl))

        attn = p_sel * excl
        attended = jnp.sum(attn, axis=1, keepdims=True)                          # (BB, 1)
        attn = jnp.where((cols == T - 1) & (attended == 0.0), 1.0, attn)

        # first decoder step (attention_weights_cat.sum() == 0): one-hot at position 0.
        first = (flag_ref[0] > 0).astype(f32)                                    # SMEM scalar
        onehot0 = (cols == 0).astype(f32)
        attn = first * onehot0 + (1.0 - first) * attn

        attn_ref[...] = attn

        # ---- context: one batched multiply + sublane reduce, f32 accumulation ----
        ctx_ref[...] = jnp.sum(attn[:, :, None] * mem_ref[...].astype(f32), axis=1)

    # -------------------------------------- pallas_call -------------------------------------
    grid = (B_pad // BB,)

    in_specs = [
        pl.BlockSpec((1, 1), lambda i, *_: (0, 0)),                  # r               (resident)
        pl.BlockSpec((BB, R_pad), lambda i, *_: (i, 0)),             # query
        pl.BlockSpec((BB, T_pad), lambda i, *_: (i, 0)),             # cumsum(prev attention)
        pl.BlockSpec((BB * T_pad, TWOK), lambda i, *_: (i, 0)),      # conv taps, 2D lane layout
        pl.BlockSpec((BB, T_pad, D_pad), lambda i, *_: (i, 0, 0)),   # processed_memory
        pl.BlockSpec((BB, T_pad, E_pad), lambda i, *_: (i, 0, 0)),   # memory (f32 or bf16)
        pl.BlockSpec((R_pad, D_pad), lambda i, *_: (0, 0)),          # Wq              (resident)
        pl.BlockSpec((TWOK, D_pad), lambda i, *_: (0, 0)),           # Wloc fused conv+proj (res.)
        pl.BlockSpec((1, D_pad), lambda i, *_: (0, 0)),              # v               (resident)
        pl.BlockSpec((T_pad, T_pad), lambda i, *_: (0, 0)),          # strict-upper tri (resident)
    ]
    out_specs = [
        pl.BlockSpec((BB, E_pad), lambda i, *_: (i, 0)),             # context
        pl.BlockSpec((BB, T_pad), lambda i, *_: (i, 0)),             # attention weights
    ]

    # VMEM accounting: per-step blocks are double-buffered; constant-index blocks are
    # resident (counted once); explicit headroom for s/ploc/context temporaries.
    mem_itemsize = jnp.dtype(mem_dtype).itemsize
    per_step = 4 * (BB * R_pad                      # query
                    + BB * T_pad                    # prev-cumsum
                    + BB * T_pad * 128              # taps block: 2K lanes pad to 128
                    + BB * T_pad * D_pad            # processed_memory
                    + BB * E_pad + BB * T_pad)      # outputs
    per_step += mem_itemsize * BB * T_pad * E_pad   # memory block
    resident = 4 * (R_pad * D_pad                   # Wq
                    + _round_up(TWOK, 8) * D_pad    # Wloc
                    + 8 * D_pad + 8 * 128           # v, r (sublane-padded)
                    + T_pad * T_pad)                # triangular scan matrix
    temps = 4 * (2 * BB * T_pad * D_pad             # ploc + tanh argument
                 + BB * T_pad * E_pad               # f32 attn*mem product
                 + 8 * BB * T_pad)                  # energies / scan rows / masks
    vmem_needed = 2 * per_step + resident + temps + (4 << 20)
    # TODO(synk): for very long utterances (T_pad >~ 1024) on 64-MiB-VMEM parts, tile the
    #             energy computation over T inside the kernel to shrink the temporaries.
    vmem_limit = int(min(int(0.9 * vmem_cap), max(32 << 20, vmem_needed)))

    grid_spec = pltpu.PrefetchScalarGridSpec(
        num_scalar_prefetch=1,                      # first-step flag, lives in SMEM
        grid=grid,
        in_specs=in_specs,
        out_specs=out_specs,
    )

    attention_call = pl.pallas_call(
        kernel,
        grid_spec=grid_spec,
        out_shape=(jax.ShapeDtypeStruct((B_pad, E_pad), f32),
                   jax.ShapeDtypeStruct((B_pad, T_pad), f32)),
        compiler_params=pltpu.CompilerParams(
            dimension_semantics=("parallel",),
            vmem_limit_bytes=vmem_limit,
        ),
    )

    # ------------------------------- per-decoder-step wrapper -------------------------------
    @jax.jit
    def step(query, attention_weights_cat):
        awc = attention_weights_cat.astype(f32)                           # (B, 2, T)
        flag = (jnp.sum(awc) == 0.0).astype(jnp.int32).reshape(1)         # first-step flag
        csum = jnp.cumsum(awc[:, 0, :], axis=-1)                          # cumsum(prev)
        csum_p = jnp.pad(csum, ((0, B_pad - B), (0, T_pad - T)))

        # K time-shifted copies of both channels stacked on the tap axis (pure layout),
        # pre-reshaped to 2D so the kernel's matmul LHS needs no relayout.
        awc_cpad = jnp.pad(awc, ((0, 0), (0, 0), (pad, pad)))             # (B, 2, T+2p)
        taps = [awc_cpad[:, c, k:k + T] for c in range(2) for k in range(K)]
        shifted = jnp.stack(taps, axis=-1)                                # (B, T, 2K)
        shifted = jnp.pad(shifted, ((0, B_pad - B), (0, T_pad - T), (0, 0)))
        shf2d = shifted.reshape(B_pad * T_pad, TWOK)

        q_p = jnp.pad(query.astype(f32),
                      ((0, B_pad - B), (0, R_pad - query.shape[-1])))

        ctx_p, attn_p = attention_call(flag, r_p, q_p, csum_p, shf2d, pmem_p, mem_p,
                                       Wq_p, Wloc_p, v_p, tri)
        return ctx_p[:B, :E], attn_p[:B, :T]

    return step


def reference_forward(query, memory, pmem, awc, Wq, Wconv, Wproj, v, r):
    """Plain-JAX reference of the same (eval-mode) math, mirroring the torch module."""
    HI = jax.lax.Precision.HIGHEST
    B, _, T = awc.shape
    F, _, K = Wconv.shape
    pad = (K - 1) // 2
    pq = jnp.einsum('br,rd->bd', query, Wq, precision=HI)
    xp = jnp.pad(awc, ((0, 0), (0, 0), (pad, pad)))
    conv = jnp.zeros((B, F, T), jnp.float32)
    for k in range(K):
        conv = conv + jnp.einsum('fc,bct->bft', Wconv[:, :, k], xp[:, :, k:k + T], precision=HI)
    ploc = jnp.einsum('bft,fd->btd', conv, Wproj, precision=HI)
    energies = jnp.einsum('btd,d->bt', jnp.tanh(pq[:, None, :] + ploc + pmem), v,
                          precision=HI) + r
    prev = awc[:, 0]
    above = (energies > 0.0).astype(jnp.float32)
    p_sel = above * jnp.cumsum(prev, axis=1)
    one_x = jnp.concatenate([jnp.ones((B, 1), jnp.float32), 1.0 - p_sel], axis=1)[:, :-1]
    attn = p_sel * jnp.cumprod(one_x, axis=1)
    attended = attn.sum(axis=1)
    attn = attn.at[:, -1].set(jnp.where(attended == 0.0, 1.0, attn[:, -1]))
    onehot0 = jnp.zeros((B, T), jnp.float32).at[:, 0].set(1.0)
    attn = jnp.where(jnp.sum(awc) == 0.0, onehot0, attn)
    ctx = jnp.einsum('bt,bte->be', attn, memory, precision=HI)
    return ctx, attn


if __name__ == "__main__":
    B, T = 2, 16
    RNN_DIM, EMB_DIM, ATT_DIM = 32, 32, 32
    N_FILTERS, KSIZE = 4, 5

    key = jax.random.PRNGKey(0)
    ks = jax.random.split(key, 8)

    # deterministic synthetic parameters (shapes from the module's __init__)
    Wq = 0.3 * jax.random.normal(ks[0], (RNN_DIM, ATT_DIM), jnp.float32)
    Wconv = 0.3 * jax.random.normal(ks[1], (N_FILTERS, 2, KSIZE), jnp.float32)
    Wproj = 0.3 * jax.random.normal(ks[2], (N_FILTERS, ATT_DIM), jnp.float32)
    v = 0.5 * jax.random.normal(ks[3], (ATT_DIM,), jnp.float32)
    r = jnp.float32(0.0)   # init_r chosen 0.0 so the eval-mode threshold path is exercised

    # inputs
    query = jax.random.normal(ks[4], (B, RNN_DIM), jnp.float32)
    memory = jax.random.normal(ks[5], (B, T, EMB_DIM), jnp.float32)
    pmem = jax.random.normal(ks[6], (B, T, ATT_DIM), jnp.float32)
    prev_w = jax.nn.softmax(jax.random.normal(ks[7], (B, T), jnp.float32), axis=-1)
    awc = jnp.stack([prev_w, jnp.cumsum(prev_w, axis=-1)], axis=1)   # (B, 2, T)

    # per-utterance prep hoisted out of the decoder step (review item)
    step = make_monotonic_lsa_step(memory, pmem, Wq, Wconv, Wproj, v, r)

    # main path
    ctx, attn = step(query, awc)
    jax.block_until_ready((ctx, attn))
    ref_ctx, ref_attn = reference_forward(query, memory, pmem, awc, Wq, Wconv, Wproj, v, r)
    np.testing.assert_allclose(np.asarray(attn), np.asarray(ref_attn), rtol=1e-4, atol=1e-5)
    np.testing.assert_allclose(np.asarray(ctx), np.asarray(ref_ctx), rtol=1e-4, atol=1e-5)

    # first decoder step branch: all-zero attention_weights_cat -> one-hot at position 0
    ctx0, attn0 = step(query, jnp.zeros_like(awc))
    jax.block_until_ready((ctx0, attn0))
    expected_attn0 = jnp.zeros((B, T), jnp.float32).at[:, 0].set(1.0)
    np.testing.assert_allclose(np.asarray(attn0), np.asarray(expected_attn0), atol=1e-6)
    np.testing.assert_allclose(np.asarray(ctx0), np.asarray(memory[:, 0, :]), rtol=1e-5, atol=1e-5)

    # bf16-memory path (review item): halves the dominant HBM/VMEM term; f32 accumulation
    step_bf16 = make_monotonic_lsa_step(memory, pmem, Wq, Wconv, Wproj, v, r,
                                        mem_dtype=jnp.bfloat16)
    ctx_b, attn_b = step_bf16(query, awc)
    jax.block_until_ready((ctx_b, attn_b))
    mem_rounded = memory.astype(jnp.bfloat16).astype(jnp.float32)
    ref_ctx_b, _ = reference_forward(query, mem_rounded, pmem, awc, Wq, Wconv, Wproj, v, r)
    np.testing.assert_allclose(np.asarray(attn_b), np.asarray(ref_attn), rtol=1e-4, atol=1e-5)
    np.testing.assert_allclose(np.asarray(ctx_b), np.asarray(ref_ctx_b), rtol=2e-3, atol=2e-3)

    print("KERNEL_OK")
</pallas_src>

<mosaic_0001>
module attributes {stable_mosaic.version = 11 : i64} {
  func.func @kernel(%arg0: i32, %arg1: memref<1xi32, #tpu.memory_space<smem>>, %arg2: memref<1x1xf32, #tpu.memory_space<vmem>>, %arg3: memref<8x128xf32, #tpu.memory_space<vmem>>, %arg4: memref<8x128xf32, #tpu.memory_space<vmem>>, %arg5: memref<1024x10xf32, #tpu.memory_space<vmem>>, %arg6: memref<8x128x128xf32, #tpu.memory_space<vmem>>, %arg7: memref<8x128x128xf32, #tpu.memory_space<vmem>>, %arg8: memref<128x128xf32, #tpu.memory_space<vmem>>, %arg9: memref<10x128xf32, #tpu.memory_space<vmem>>, %arg10: memref<1x128xf32, #tpu.memory_space<vmem>>, %arg11: memref<128x128xf32, #tpu.memory_space<vmem>>, %arg12: memref<8x128xf32, #tpu.memory_space<vmem>>, %arg13: memref<8x128xf32, #tpu.memory_space<vmem>>) attributes {dimension_semantics = [#tpu.dimension_semantics<parallel>], iteration_bounds = array<i64: 1>, scalar_prefetch = 1 : i64, scratch_operands = 0 : i64, tpu.core_type = #tpu.core_type<tc>, window_params = [{pipeline_mode = #tpu.pipeline_mode<synchronous>, transform_indices = @transform_0, window_bounds = array<i64: 1, 1>}, {transform_indices = @transform_1, window_bounds = array<i64: 8, 128>}, {transform_indices = @transform_2, window_bounds = array<i64: 8, 128>}, {transform_indices = @transform_3, window_bounds = array<i64: 1024, 10>}, {transform_indices = @transform_4, window_bounds = array<i64: 8, 128, 128>}, {transform_indices = @transform_5, window_bounds = array<i64: 8, 128, 128>}, {pipeline_mode = #tpu.pipeline_mode<synchronous>, transform_indices = @transform_6, window_bounds = array<i64: 128, 128>}, {pipeline_mode = #tpu.pipeline_mode<synchronous>, transform_indices = @transform_7, window_bounds = array<i64: 10, 128>}, {pipeline_mode = #tpu.pipeline_mode<synchronous>, transform_indices = @transform_8, window_bounds = array<i64: 1, 128>}, {pipeline_mode = #tpu.pipeline_mode<synchronous>, transform_indices = @transform_9, window_bounds = array<i64: 128, 128>}, {transform_indices = @transform_10, window_bounds = array<i64: 8, 128>}, {transform_indices = @transform_11, window_bounds = array<i64: 8, 128>}]} {
    %c0 = arith.constant 0 : index
    %c0_0 = arith.constant 0 : index
    %0 = vector.load %arg3[%c0, %c0_0] : memref<8x128xf32, #tpu.memory_space<vmem>>, vector<8x128xf32>
    %c0_1 = arith.constant 0 : index
    %c0_2 = arith.constant 0 : index
    %1 = vector.load %arg8[%c0_1, %c0_2] : memref<128x128xf32, #tpu.memory_space<vmem>>, vector<128x128xf32>
    %cst = arith.constant dense<0.000000e+00> : vector<8x128xf32>
    %2 = tpu.matmul %0, %1, %cst {dimension_numbers = #tpu.dot_dimension_numbers<[1], [0], [0], [1], [0, 0, 1, 1], [], []>} : vector<8x128xf32>, vector<128x128xf32>, vector<8x128xf32> -> vector<8x128xf32>
    %c0_3 = arith.constant 0 : index
    %c0_4 = arith.constant 0 : index
    %3 = vector.load %arg5[%c0_3, %c0_4] : memref<1024x10xf32, #tpu.memory_space<vmem>>, vector<1024x10xf32>
    %c0_5 = arith.constant 0 : index
    %c0_6 = arith.constant 0 : index
    %4 = vector.load %arg9[%c0_5, %c0_6] : memref<10x128xf32, #tpu.memory_space<vmem>>, vector<10x128xf32>
    %cst_7 = arith.constant dense<0.000000e+00> : vector<1024x128xf32>
    %5 = tpu.matmul %3, %4, %cst_7 {dimension_numbers = #tpu.dot_dimension_numbers<[1], [0], [0], [1], [0, 0, 1, 1], [], []>} : vector<1024x10xf32>, vector<10x128xf32>, vector<1024x128xf32> -> vector<1024x128xf32>
    %6 = vector.shape_cast %5 : vector<1024x128xf32> to vector<8x128x128xf32>
    %7 = vector.shape_cast %2 : vector<8x128xf32> to vector<8x1x128xf32>
    %8 = vector.broadcast %7 : vector<8x1x128xf32> to vector<8x128x128xf32>
    %9 = arith.addf %8, %6 : vector<8x128x128xf32>
    %c0_8 = arith.constant 0 : index
    %c0_9 = arith.constant 0 : index
    %c0_10 = arith.constant 0 : index
    %10 = vector.load %arg6[%c0_8, %c0_9, %c0_10] : memref<8x128x128xf32, #tpu.memory_space<vmem>>, vector<8x128x128xf32>
    %11 = arith.addf %9, %10 : vector<8x128x128xf32>
    %12 = math.tanh %11 : vector<8x128x128xf32>
    %c0_11 = arith.constant 0 : index
    %c0_12 = arith.constant 0 : index
    %13 = vector.load %arg10[%c0_11, %c0_12] : memref<1x128xf32, #tpu.memory_space<vmem>>, vector<1x128xf32>
    %14 = vector.shape_cast %13 : vector<1x128xf32> to vector<1x1x128xf32>
    %15 = vector.broadcast %14 : vector<1x1x128xf32> to vector<8x128x128xf32>
    %16 = arith.mulf %12, %15 : vector<8x128x128xf32>
    %cst_13 = arith.constant dense<0.000000e+00> : vector<8x128xf32>
    %17 = vector.multi_reduction <add>, %16, %cst_13 [2] : vector<8x128x128xf32> to vector<8x128xf32>
    %c0_14 = arith.constant 0 : index
    %c0_15 = arith.constant 0 : index
    %18 = vector.load %arg2[%c0_14, %c0_15] : memref<1x1xf32, #tpu.memory_space<vmem>>, vector<1x1xf32>
    %19 = vector.broadcast %18 : vector<1x1xf32> to vector<8x128xf32>
    %20 = arith.addf %17, %19 : vector<8x128xf32>
    %21 = tpu.iota {dimensions = array<i32: 1>} : vector<8x128xi32>
    %c16_i32 = arith.constant 16 : i32
    %22 = vector.broadcast %c16_i32 : i32 to vector<8x128xi32>
    %23 = arith.cmpi slt, %21, %22 : vector<8x128xi32>
    %cst_16 = arith.constant 0.000000e+00 : f32
    %24 = vector.broadcast %cst_16 : f32 to vector<8x128xf32>
    %25 = arith.cmpf ogt, %20, %24 : vector<8x128xf32>
    %26 = arith.extui %25 : vector<8x128xi1> to vector<8x128xi32>
    %27 = arith.sitofp %26 : vector<8x128xi32> to vector<8x128xf32>
    %c0_17 = arith.constant 0 : index
    %c0_18 = arith.constant 0 : index
    %28 = vector.load %arg4[%c0_17, %c0_18] : memref<8x128xf32, #tpu.memory_space<vmem>>, vector<8x128xf32>
    %29 = arith.mulf %27, %28 : vector<8x128xf32>
    %cst_19 = arith.constant 0.000000e+00 : f32
    %30 = vector.broadcast %cst_19 : f32 to vector<8x128xf32>
    %31 = arith.select %23, %29, %30 : vector<8x128xi1>, vector<8x128xf32>
    %cst_20 = arith.constant 1.000000e+00 : f32
    %32 = vector.broadcast %cst_20 : f32 to vector<8x128xf32>
    %33 = arith.subf %32, %31 : vector<8x128xf32>
    %34 = math.absf %33 : vector<8x128xf32>
    %cst_21 = arith.constant 0.000000e+00 : f32
    %35 = vector.broadcast %cst_21 : f32 to vector<8x128xf32>
    %36 = arith.cmpf oeq, %34, %35 : vector<8x128xf32>
    %cst_22 = arith.constant 1.000000e+00 : f32
    %37 = vector.broadcast %cst_22 : f32 to vector<8x128xf32>
    %38 = arith.select %36, %37, %34 : vector<8x128xi1>, vector<8x128xf32>
    %39 = math.log %38 : vector<8x128xf32>
    %cst_23 = arith.constant 1.000000e+00 : f32
    %cst_24 = arith.constant 0.000000e+00 : f32
    %40 = vector.broadcast %cst_23 : f32 to vector<8x128xf32>
    %41 = vector.broadcast %cst_24 : f32 to vector<8x128xf32>
    %42 = arith.select %36, %40, %41 : vector<8x128xi1>, vector<8x128xf32>
    %cst_25 = arith.constant 0.000000e+00 : f32
    %43 = vector.broadcast %cst_25 : f32 to vector<8x128xf32>
    %44 = arith.cmpf olt, %33, %43 : vector<8x128xf32>
    %cst_26 = arith.constant 1.000000e+00 : f32
    %cst_27 = arith.constant 0.000000e+00 : f32
    %45 = vector.broadcast %cst_26 : f32 to vector<8x128xf32>
    %46 = vector.broadcast %cst_27 : f32 to vector<8x128xf32>
    %47 = arith.select %44, %45, %46 : vector<8x128xi1>, vector<8x128xf32>
    %48 = tpu.concatenate %39, %42, %47 in 0 : vector<8x128xf32>, vector<8x128xf32>, vector<8x128xf32> -> vector<24x128xf32>
    %c0_28 = arith.constant 0 : index
    %c0_29 = arith.constant 0 : index
    %49 = vector.load %arg11[%c0_28, %c0_29] : memref<128x128xf32, #tpu.memory_space<vmem>>, vector<128x128xf32>
    %cst_30 = arith.constant dense<0.000000e+00> : vector<24x128xf32>
    %50 = tpu.matmul %48, %49, %cst_30 {dimension_numbers = #tpu.dot_dimension_numbers<[1], [0], [0], [1], [0, 0, 1, 1], [], []>} : vector<24x128xf32>, vector<128x128xf32>, vector<24x128xf32> -> vector<24x128xf32>
    %51 = vector.extract_strided_slice %50 {offsets = [0, 0], sizes = [8, 128], strides = [1, 1]} : vector<24x128xf32> to vector<8x128xf32>
    %52 = vector.extract_strided_slice %50 {offsets = [8, 0], sizes = [8, 128], strides = [1, 1]} : vector<24x128xf32> to vector<8x128xf32>
    %53 = vector.extract_strided_slice %50 {offsets = [16, 0], sizes = [8, 128], strides = [1, 1]} : vector<24x128xf32> to vector<8x128xf32>
    %cst_31 = arith.constant 5.000000e-01 : f32
    %54 = vector.broadcast %cst_31 : f32 to vector<8x128xf32>
    %55 = arith.mulf %53, %54 : vector<8x128xf32>
    %56 = math.floor %55 : vector<8x128xf32>
    %57 = arith.subf %55, %56 : vector<8x128xf32>
    %cst_32 = arith.constant 2.500000e-01 : f32
    %58 = vector.broadcast %cst_32 : f32 to vector<8x128xf32>
    %59 = arith.cmpf ogt, %57, %58 : vector<8x128xf32>
    %cst_33 = arith.constant -1.000000e+00 : f32
    %cst_34 = arith.constant 1.000000e+00 : f32
    %60 = vector.broadcast %cst_33 : f32 to vector<8x128xf32>
    %61 = vector.broadcast %cst_34 : f32 to vector<8x128xf32>
    %62 = arith.select %59, %60, %61 : vector<8x128xi1>, vector<8x128xf32>
    %cst_35 = arith.constant 0.000000e+00 : f32
    %63 = vector.broadcast %cst_35 : f32 to vector<8x128xf32>
    %64 = arith.cmpf ogt, %52, %63 : vector<8x128xf32>
    %65 = math.exp %51 : vector<8x128xf32>
    %66 = arith.mulf %62, %65 : vector<8x128xf32>
    %cst_36 = arith.constant 0.000000e+00 : f32
    %67 = vector.broadcast %cst_36 : f32 to vector<8x128xf32>
    %68 = arith.select %64, %67, %66 : vector<8x128xi1>, vector<8x128xf32>
    %69 = arith.mulf %31, %68 : vector<8x128xf32>
    %cst_37 = arith.constant dense<0.000000e+00> : vector<8xf32>
    %70 = vector.multi_reduction <add>, %69, %cst_37 [1] : vector<8x128xf32> to vector<8xf32>
    %71 = vector.shape_cast %70 : vector<8xf32> to vector<8x1xf32>
    %c15_i32 = arith.constant 15 : i32
    %72 = vector.broadcast %c15_i32 : i32 to vector<8x128xi32>
    %73 = arith.cmpi eq, %21, %72 : vector<8x128xi32>
    %cst_38 = arith.constant 0.000000e+00 : f32
    %74 = vector.broadcast %cst_38 : f32 to vector<8x1xf32>
    %75 = arith.cmpf oeq, %71, %74 : vector<8x1xf32>
    %76 = vector.broadcast %75 : vector<8x1xi1> to vector<8x128xi1>
    %77 = arith.andi %73, %76 : vector<8x128xi1>
    %cst_39 = arith.constant 1.000000e+00 : f32
    %78 = vector.broadcast %cst_39 : f32 to vector<8x128xf32>
    %79 = arith.select %77, %78, %69 : vector<8x128xi1>, vector<8x128xf32>
    %c0_40 = arith.constant 0 : index
    %80 = memref.load %arg1[%c0_40] : memref<1xi32, #tpu.memory_space<smem>>
    %c0_i32 = arith.constant 0 : i32
    %81 = arith.cmpi sgt, %80, %c0_i32 : i32
    %82 = arith.extui %81 : i1 to i32
    %83 = arith.sitofp %82 : i32 to f32
    %c0_i32_41 = arith.constant 0 : i32
    %84 = vector.broadcast %c0_i32_41 : i32 to vector<8x128xi32>
    %85 = arith.cmpi eq, %21, %84 : vector<8x128xi32>
    %86 = arith.extui %85 : vector<8x128xi1> to vector<8x128xi32>
    %87 = arith.sitofp %86 : vector<8x128xi32> to vector<8x128xf32>
    %88 = vector.broadcast %83 : f32 to vector<8x128xf32>
    %89 = arith.mulf %88, %87 : vector<8x128xf32>
    %cst_42 = arith.constant 1.000000e+00 : f32
    %90 = arith.subf %cst_42, %83 : f32
    %91 = vector.broadcast %90 : f32 to vector<8x128xf32>
    %92 = arith.mulf %91, %79 : vector<8x128xf32>
    %93 = arith.addf %89, %92 : vector<8x128xf32>
    %c0_43 = arith.constant 0 : index
    %c0_44 = arith.constant 0 : index
    %94 = vector.load %arg13[%c0_43, %c0_44] : memref<8x128xf32, #tpu.memory_space<vmem>>, vector<8x128xf32>
    tpu.vector_store %arg13[%c0_43, %c0_44], %93 {strides = array<i32>} : memref<8x128xf32, #tpu.memory_space<vmem>>, vector<8x128xf32>,
    %95 = vector.shape_cast %93 : vector<8x128xf32> to vector<8x128x1xf32>
    %c0_45 = arith.constant 0 : index
    %c0_46 = arith.constant 0 : index
    %c0_47 = arith.constant 0 : index
    %96 = vector.load %arg7[%c0_45, %c0_46, %c0_47] : memref<8x128x128xf32, #tpu.memory_space<vmem>>, vector<8x128x128xf32>
    %97 = vector.broadcast %95 : vector<8x128x1xf32> to vector<8x128x128xf32>
    %98 = arith.mulf %97, %96 : vector<8x128x128xf32>
    %cst_48 = arith.constant dense<0.000000e+00> : vector<8x128xf32>
    %99 = vector.multi_reduction <add>, %98, %cst_48 [1] : vector<8x128x128xf32> to vector<8x128xf32>
    %c0_49 = arith.constant 0 : index
    %c0_50 = arith.constant 0 : index
    %100 = vector.load %arg12[%c0_49, %c0_50] : memref<8x128xf32, #tpu.memory_space<vmem>>, vector<8x128xf32>
    tpu.vector_store %arg12[%c0_49, %c0_50], %99 {strides = array<i32>} : memref<8x128xf32, #tpu.memory_space<vmem>>, vector<8x128xf32>,
    return
  }
  func.func @transform_0(%arg0: i32, %arg1: memref<1xi32, #tpu.memory_space<smem>>) -> (i32, i32) {
    %c0_i32 = arith.constant 0 : i32
    %c0_i32_0 = arith.constant 0 : i32
    %c0_i32_1 = arith.constant 0 : i32
    return %c0_i32, %c0_i32_0 : i32, i32
  }
  func.func @transform_1(%arg0: i32, %arg1: memref<1xi32, #tpu.memory_space<smem>>) -> (i32, i32) {
    %c0_i32 = arith.constant 0 : i32
    %c0_i32_0 = arith.constant 0 : i32
    return %arg0, %c0_i32 : i32, i32
  }
  func.func @transform_2(%arg0: i32, %arg1: memref<1xi32, #tpu.memory_space<smem>>) -> (i32, i32) {
    %c0_i32 = arith.constant 0 : i32
    %c0_i32_0 = arith.constant 0 : i32
    return %arg0, %c0_i32 : i32, i32
  }
  func.func @transform_3(%arg0: i32, %arg1: memref<1xi32, #tpu.memory_space<smem>>) -> (i32, i32) {
    %c0_i32 = arith.constant 0 : i32
    %c0_i32_0 = arith.constant 0 : i32
    return %arg0, %c0_i32 : i32, i32
  }
  func.func @transform_4(%arg0: i32, %arg1: memref<1xi32, #tpu.memory_space<smem>>) -> (i32, i32, i32) {
    %c0_i32 = arith.constant 0 : i32
    %c0_i32_0 = arith.constant 0 : i32
    %c0_i32_1 = arith.constant 0 : i32
    return %arg0, %c0_i32, %c0_i32_0 : i32, i32, i32
  }
  func.func @transform_5(%arg0: i32, %arg1: memref<1xi32, #tpu.memory_space<smem>>) -> (i32, i32, i32) {
    %c0_i32 = arith.constant 0 : i32
    %c0_i32_0 = arith.constant 0 : i32
    %c0_i32_1 = arith.constant 0 : i32
    return %arg0, %c0_i32, %c0_i32_0 : i32, i32, i32
  }
  func.func @transform_6(%arg0: i32, %arg1: memref<1xi32, #tpu.memory_space<smem>>) -> (i32, i32) {
    %c0_i32 = arith.constant 0 : i32
    %c0_i32_0 = arith.constant 0 : i32
    %c0_i32_1 = arith.constant 0 : i32
    return %c0_i32, %c0_i32_0 : i32, i32
  }
  func.func @transform_7(%arg0: i32, %arg1: memref<1xi32, #tpu.memory_space<smem>>) -> (i32, i32) {
    %c0_i32 = arith.constant 0 : i32
    %c0_i32_0 = arith.constant 0 : i32
    %c0_i32_1 = arith.constant 0 : i32
    return %c0_i32, %c0_i32_0 : i32, i32
  }
  func.func @transform_8(%arg0: i32, %arg1: memref<1xi32, #tpu.memory_space<smem>>) -> (i32, i32) {
    %c0_i32 = arith.constant 0 : i32
    %c0_i32_0 = arith.constant 0 : i32
    %c0_i32_1 = arith.constant 0 : i32
    return %c0_i32, %c0_i32_0 : i32, i32
  }
  func.func @transform_9(%arg0: i32, %arg1: memref<1xi32, #tpu.memory_space<smem>>) -> (i32, i32) {
    %c0_i32 = arith.constant 0 : i32
    %c0_i32_0 = arith.constant 0 : i32
    %c0_i32_1 = arith.constant 0 : i32
    return %c0_i32, %c0_i32_0 : i32, i32
  }
  func.func @transform_10(%arg0: i32, %arg1: memref<1xi32, #tpu.memory_space<smem>>) -> (i32, i32) {
    %c0_i32 = arith.constant 0 : i32
    %c0_i32_0 = arith.constant 0 : i32
    return %arg0, %c0_i32 : i32, i32
  }
  func.func @transform_11(%arg0: i32, %arg1: memref<1xi32, #tpu.memory_space<smem>>) -> (i32, i32) {
    %c0_i32 = arith.constant 0 : i32
    %c0_i32_0 = arith.constant 0 : i32
    return %arg0, %c0_i32 : i32, i32
  }
}

</mosaic_0001>

<bundles_post_ra>
// kernel: step.1
= control target key start
LH: loop header
LB: loop body
LE: loop exit
PB: predicated region body
PF: predicated region fallthrough
CT: control target
= control target key end

     0   :  { %s11048_s0 = inlined_call_operand.<no memory space> [shape: s32[1], index: 0, kind: input, shape index: {}]   ;;  %s11049_s1 = inlined_call_operand.<no memory space> [shape: f32[1,1], index: 1, kind: input, shape index: {}]   ;;  %s11050_s2 = inlined_call_operand.vmem [shape: f32[8,128], index: 2, kind: input, shape index: {}]   ;;  %s11051_s3 = inlined_call_operand.vmem [shape: f32[8,128], index: 3, kind: input, shape index: {}]   ;;  %s11052_s4 = inlined_call_operand.vmem [shape: f32[1024,10], index: 4, kind: input, shape index: {}]   ;;  %s11053_s5 = inlined_call_operand.vmem [shape: f32[8,128,128], index: 5, kind: input, shape index: {}]   ;;  %s11054_s6 = inlined_call_operand.hbm [shape: f32[8,128,128], index: 6, kind: input, shape index: {}]   ;;  %s11055_s7 = inlined_call_operand.vmem [shape: f32[128,128], index: 7, kind: input, shape index: {}]   ;;  %s11056_s8 = inlined_call_operand.vmem [shape: f32[10,128], index: 8, kind: input, shape index: {}]   ;;  %s11057_s9 = inlined_call_operand.vmem [shape: f32[1,128], index: 9, kind: input, shape index: {}]   ;;  %s11058_s10 = inlined_call_operand.vmem [shape: f32[128,128], index: 10, kind: input, shape index: {}]   ;;  %s11059_s11 = inlined_call_operand.vmem [shape: f32[8,128], index: 11, kind: output, shape index: {0}]   ;;  %s11060_s12 = inlined_call_operand.vmem [shape: f32[8,128], index: 12, kind: output, shape index: {1}]  }
   0x1   :  { %v19_v0 = vstv %s11049_s1 }
   0x2   :  { %20 = vst [vmem:[#allocation4] sm:$0x1] %v19_v0 }
   0x3   :  { %21 = vsyncpa [#allocation6], 0  ;;  %s7047_s23 = smov [#allocation5]   ;;  %s7023_s27 = scalar_lea.hbm %s11054_s6, 16384 }
   0x4   :  { %s37_s24 = sshll.u32 %s7047_s23, 4  ;;  %p7024_p0 = scmp.ne.s32.totalorder %s11054_s6, %s7023_s27  ;;  %s38_s24 = int_to_ptr.vmem [resolvable:$true] %s37_s24 }
   0x5   :  { %p7027_p1 = scmp.lt.u32.totalorder %s7023_s27, %s11054_s6 }
   0x7   :  { %p7029_p2 = pnand %p7027_p1, %p7024_p0 }
   0x9   :  { %7032 = shalt.err (!%p7029_p2)
}
   0xa   :  { %s7033_s1 = scalar_lea.vmem %s38_s24, 16384  ;;  %p7038_p4 = scmp.lt.s32.totalorder %s38_s24, %s38_s24 }
   0xb   :  { %p7034_p3 = scmp.ne.s32.totalorder %s38_s24, %s7033_s1  ;;  %p7039_p5 = scmp.lt.s32.totalorder %s7033_s1, %s7033_s1 }
   0xd   :  { %p7040_p6 = por %p7039_p5, %p7038_p4 }
   0xf   :  { %p7041_p7 = pnand %p7040_p6, %p7034_p3 }
  0x11   :  { %7044 = shalt.err (!%p7041_p7)
}
  0x12   :  { %s7048_s14 = smov 128   ;;  %s7049_s15 = smov 8  }
  0x13   :  { %43 = dma.hbm_to_vmem [thread:$0]  %s11054_s6, 16384, %s38_s24, [#allocation6], %s7048_s14, %s7048_s14, %s7049_s15  }
  0x14   :  { %7045 = dma.done.wait [#allocation6], 16384  }
  0x15   :  { %7046 = vsyncadd [#allocation6], 4294950912  ;;  %v11065_v1 = vmov 0.0|0.0   ;;  %vm11083_vm0 = vmmov 0   ;;  %v11067_v2 = vmov 0.0   ;;  %vm657_vm1 = vcmask 1041408  }
  0x16   :  { %6692 = vmatprep.subr.bf16.mxu0 %v11065_v1  ;;  %6452 = vmatprep.mubr.msk.f32.mxu0 %vm11083_vm0, %v11067_v2  ;;  %vm7053_vm2 = vmmov 1   ;;  %vm272_vm4 = vcmask 80896   ;;  %v56_v4 = vld [vmem:[%s11055_s7] sm:$0xff]  ;;  %v57_v5 = vld [vmem:[%s11055_s7 + $0x8] sm:$0xff]  ;;  %v58_v10 = vld [vmem:[%s11055_s7 + $0x10] sm:$0xff]  ;;  %v7054_v11 = vmov 0   ;;  %v11064_v45 = vlaneseq }
  0x17   :  { %vm7140_vm3 = vmpackc.low %vm657_vm1, %vm7053_vm2  ;;  %v270_v6 = vld [vmem:[%s11056_s8] sm:$0xff]  ;;  %v6693_v7 = vpack.c.bf16 %v57_v5, %v56_v4  ;;  %v271_v8 = vld [vmem:[%s11056_s8 + $0x8] sm:$0x3]  ;;  %6758 = vset.pattern.permute.xlu0 %v7054_v11  ;;  %6759 = vset.pattern.permute.xlu1 %v7054_v11  ;;  %p4993_p8 = scmp.gt.s32.totalorder %s11048_s0, 0 }
  0x18   :  { %v194_v9 = vld [vmem:[%s11052_s4 + $0x1a0] sm:$0xff]  ;;  %v7162_v12 = vpack.c.bf16 %v271_v8, %v270_v6  ;;  %v59_v13 = vld [vmem:[%s11055_s7 + $0x18] sm:$0xff]  ;;  %v61_v16 = vld [vmem:[%s11055_s7 + $0x28] sm:$0xff]  ;;  %v7275_v49 = vshrl.u32 %v11064_v45, 7 }
  0x19   :  { %6537 = vmatprep.mubr.msk.f32.mxu1 %vm272_vm4, %v194_v9  ;;  %6694 = vmatpush3.bf16.msra.mxu0 %v6693_v7  ;;  %v6696_v14 = vpack.c.bf16 %v59_v13, %v58_v10  ;;  %v60_v15 = vld [vmem:[%s11055_s7 + $0x20] sm:$0xff]  ;;  %v195_v17 = vld [vmem:[%s11052_s4 + $0x1a8] sm:$0xff]  ;;  %v196_v18 = vld [vmem:[%s11052_s4 + $0x1b0] sm:$0xff]  ;;  %s4994_s21 = scalar_select %p4993_p8, 1, 0 }
  0x1a   :  { %6746 = vmatprep.subr.msk.bf16.mxu1 %vm7140_vm3, %v7162_v12  ;;  %6695 = vmatprep.subr.bf16.mxu0 %v11065_v1  ;;  %v6699_v19 = vpack.c.bf16 %v61_v16, %v60_v15  ;;  %v62_v20 = vld [vmem:[%s11055_s7 + $0x30] sm:$0xff]  ;;  %v63_v21 = vld [vmem:[%s11055_s7 + $0x38] sm:$0xff]  ;;  %v198_v23 = vld [vmem:[%s11052_s4 + $0x1c0] sm:$0xff]  ;;  %11093 = vst [vmem:[#allocation8_spill] sm:$0xff] %v7275_v49  ;;  %v7299_v54 = vsub.s32 0, %v7275_v49 }
  0x1b   :  { %6747 = vmatpush3.bf16.msk.msra.mxu1 %vm7140_vm3, %v7162_v12  ;;  %v197_v22 = vld [vmem:[%s11052_s4 + $0x1b8] sm:$0xff]  ;;  %v6702_v24 = vpack.c.bf16 %v63_v21, %v62_v20  ;;  %v64_v25 = vld [vmem:[%s11055_s7 + $0x40] sm:$0xff]  ;;  %v65_v26 = vld [vmem:[%s11055_s7 + $0x48] sm:$0xff]  ;;  %s4995_s22 = scvt.s32.f32 %s4994_s21 }
  0x1c   :  { %v199_v27 = vld [vmem:[%s11052_s4 + $0x1c8] sm:$0xff]  ;;  %v200_v28 = vld [vmem:[%s11052_s4 + $0x1d0] sm:$0xff]  ;;  %v6705_v29 = vpack.c.bf16 %v65_v26, %v64_v25  ;;  %v67_v31 = vld [vmem:[%s11055_s7 + $0x58] sm:$0xff]  ;;  %11094 = vst [vmem:[#allocation9_spill] sm:$0xff] %v7299_v54 }
  0x1d   :  { %6697 = vmatpush3.bf16.msra.mxu0 %v6696_v14  ;;  %v66_v30 = vld [vmem:[%s11055_s7 + $0x50] sm:$0xff]  ;;  %v201_v32 = vld [vmem:[%s11052_s4 + $0x1d8] sm:$0xff]  ;;  %v202_v33 = vld [vmem:[%s11052_s4 + $0x1e0] sm:$0xff]  ;;  %s5001_s23 = ssub.f32 1.0, %s4995_s22 }
  0x1e   :  { %6538 = vmatmul.mubr.msk.f32.vlgmr.msra.gmra.mrb[0].mxu1 %vm272_vm4, %v195_v17  ;;  %6698 = vmatprep.subr.bf16.mxu0 %v11065_v1  ;;  %v6708_v34 = vpack.c.bf16 %v67_v31, %v66_v30  ;;  %v68_v35 = vld [vmem:[%s11055_s7 + $0x60] sm:$0xff]  ;;  %v69_v36 = vld [vmem:[%s11055_s7 + $0x68] sm:$0xff]  ;;  %v204_v38 = vld [vmem:[%s11052_s4 + $0x1f0] sm:$0xff]  ;;  %v11063_v17 = vsub.s32 1, %v7275_v49 }
  0x1f   :  { %6540 = vmatprep.mubr.msk.f32.mxu1 %vm272_vm4, %v196_v18  ;;  %v203_v37 = vld [vmem:[%s11052_s4 + $0x1e8] sm:$0xff]  ;;  %v6711_v39 = vpack.c.bf16 %v69_v36, %v68_v35  ;;  %v70_v40 = vld [vmem:[%s11055_s7 + $0x70] sm:$0xff]  ;;  %v71_v41 = vld [vmem:[%s11055_s7 + $0x78] sm:$0xff] }
  0x20   :  { %v205_v42 = vld [vmem:[%s11052_s4 + $0x1f8] sm:$0xff]  ;;  %v206_v43 = vld [vmem:[%s11052_s4 + $0x200] sm:$0xff]  ;;  %v6714_v44 = vpack.c.bf16 %v71_v41, %v70_v40  ;;  %v207_v46 = vld [vmem:[%s11052_s4 + $0x208] sm:$0xff] }
  0x21   :  { %6700 = vmatpush3.bf16.msra.mxu0 %v6699_v19  ;;  %v208_v47 = vld [vmem:[%s11052_s4 + $0x210] sm:$0xff]  ;;  %v55_v48 = vld [vmem:[%s11050_s2] sm:$0xff]  ;;  %v209_v51 = vld [vmem:[%s11052_s4 + $0x218] sm:$0xff] }
  0x22   :  { %6541 = vmatmul.mubr.msk.f32.gmra.mrb[2].mxu1 %vm272_vm4, %v197_v22  ;;  %6701 = vmatprep.subr.bf16.mxu0 %v11065_v1  ;;  %v142_v50 = vld [vmem:[%s11052_s4] sm:$0xff]  ;;  %v143_v53 = vld [vmem:[%s11052_s4 + $0x8] sm:$0xff]  ;;  %v144_v55 = vld [vmem:[%s11052_s4 + $0x10] sm:$0xff] }
  0x23   :  { %6543 = vmatprep.mubr.msk.f32.mxu1 %vm272_vm4, %v198_v23  ;;  %v210_v52 = vld [vmem:[%s11052_s4 + $0x220] sm:$0xff]  ;;  %v211_v56 = vld [vmem:[%s11052_s4 + $0x228] sm:$0xff]  ;;  %v212_v57 = vld [vmem:[%s11052_s4 + $0x230] sm:$0xff] }
  0x24   :  { %v7317_v58 = vld [vmem:[%s11051_s3] sm:$0xff]  ;;  %v145_v59 = vld [vmem:[%s11052_s4 + $0x18] sm:$0xff]  ;;  %v147_v0 = vld [vmem:[%s11052_s4 + $0x28] sm:$0xff] }
  0x25   :  { %6703 = vmatpush3.bf16.msra.mxu0 %v6702_v24  ;;  %v7325_v60 = vrot.slane %v7317_v58, %v7299_v54  ;;  %v146_v61 = vld [vmem:[%s11052_s4 + $0x20] sm:$0xff]  ;;  %v213_v62 = vld [vmem:[%s11052_s4 + $0x238] sm:$0xff]  ;;  %v148_v4 = vld [vmem:[%s11052_s4 + $0x30] sm:$0xff]  ;;  %v7424_v22 = vrot.slane %v7317_v58, %v11063_v17 }
  0x26   :  { %6544 = vmatmul.mubr.msk.f32.gmra.mrb[4].mxu1 %vm272_vm4, %v199_v27  ;;  %6704 = vmatprep.subr.bf16.mxu0 %v11065_v1  ;;  %v214_v63 = vld [vmem:[%s11052_s4 + $0x240] sm:$0xff]  ;;  %v215_v5 = vld [vmem:[%s11052_s4 + $0x248] sm:$0xff]  ;;  %v216_v6 = vld [vmem:[%s11052_s4 + $0x250] sm:$0xff] }
  0x27   :  { %6546 = vmatprep.mubr.msk.f32.mxu1 %vm272_vm4, %v200_v28  ;;  %2891 = vbcast.lane.b32.xlu1 %v7325_v60, 256  ;;  %v6122_v3 = vld [vmem:[#allocation4] ss:$0 sm:$0xff]  ;;  %v149_v7 = vld [vmem:[%s11052_s4 + $0x38] sm:$0xff]  ;;  %v151_v11 = vld [vmem:[%s11052_s4 + $0x48] sm:$0xff] }
  0x28   :  { %2366 = vperm.xlu0 %6758, %v6122_v3   ;;  %v150_v8 = vld [vmem:[%s11052_s4 + $0x40] sm:$0xff]  ;;  %v217_v9 = vld [vmem:[%s11052_s4 + $0x258] sm:$0xff]  ;;  %v219_v13 = vld [vmem:[%s11052_s4 + $0x268] sm:$0xff] }
  0x29   :  { %6706 = vmatpush3.bf16.msra.mxu0 %v6705_v29  ;;  %v218_v10 = vld [vmem:[%s11052_s4 + $0x260] sm:$0xff]  ;;  %v220_v14 = vld [vmem:[%s11052_s4 + $0x270] sm:$0xff]  ;;  %v153_v15 = vld [vmem:[%s11052_s4 + $0x58] sm:$0xff] }
  0x2a   :  { %6547 = vmatmul.mubr.msk.f32.gmra.mrb[6].mxu1 %vm272_vm4, %v201_v32  ;;  %6707 = vmatprep.subr.bf16.mxu0 %v11065_v1  ;;  %v154_v16 = vld [vmem:[%s11052_s4 + $0x60] sm:$0xff]  ;;  %v221_v18 = vld [vmem:[%s11052_s4 + $0x278] sm:$0xff]  ;;  %v155_v20 = vld [vmem:[%s11052_s4 + $0x68] sm:$0xff] }
  0x2b   :  { %6549 = vmatprep.mubr.msk.f32.mxu1 %vm272_vm4, %v202_v33  ;;  %2895 = vbcast.lane.b32.xlu1 %v7325_v60, 264  ;;  %v222_v19 = vld [vmem:[%s11052_s4 + $0x280] sm:$0xff]  ;;  %v156_v21 = vld [vmem:[%s11052_s4 + $0x70] sm:$0xff]  ;;  %v223_v23 = vld [vmem:[%s11052_s4 + $0x288] sm:$0xff] }
  0x2c   :  { %2923 = vbcast.lane.b32.xlu0 %v7325_v60, 320  ;;  %v224_v24 = vld [vmem:[%s11052_s4 + $0x290] sm:$0xff]  ;;  %v157_v25 = vld [vmem:[%s11052_s4 + $0x78] sm:$0xff]  ;;  %v158_v26 = vld [vmem:[%s11052_s4 + $0x80] sm:$0xff] }
  0x2d   :  { %6709 = vmatpush3.bf16.msra.mxu0 %v6708_v34  ;;  %v225_v27 = vld [vmem:[%s11052_s4 + $0x298] sm:$0xff]  ;;  %v226_v28 = vld [vmem:[%s11052_s4 + $0x2a0] sm:$0xff]  ;;  %v159_v29 = vld [vmem:[%s11052_s4 + $0x88] sm:$0xff] }
  0x2e   :  { %6550 = vmatmul.mubr.msk.f32.gmra.mrb[8].mxu1 %vm272_vm4, %v203_v37  ;;  %6710 = vmatprep.subr.bf16.mxu0 %v11065_v1  ;;  %v160_v30 = vld [vmem:[%s11052_s4 + $0x90] sm:$0xff]  ;;  %v227_v31 = vld [vmem:[%s11052_s4 + $0x2a8] sm:$0xff]  ;;  %v161_v33 = vld [vmem:[%s11052_s4 + $0x98] sm:$0xff] }
  0x2f   :  { %6552 = vmatprep.mubr.msk.f32.mxu1 %vm272_vm4, %v204_v38  ;;  %2899 = vbcast.lane.b32.xlu1 %v7325_v60, 272  ;;  %v228_v32 = vld [vmem:[%s11052_s4 + $0x2b0] sm:$0xff]  ;;  %v162_v34 = vld [vmem:[%s11052_s4 + $0xa0] sm:$0xff]  ;;  %v229_v35 = vld [vmem:[%s11052_s4 + $0x2b8] sm:$0xff] }
  0x30   :  { %2931 = vbcast.lane.b32.xlu0 %v7325_v60, 336  ;;  %v230_v36 = vld [vmem:[%s11052_s4 + $0x2c0] sm:$0xff]  ;;  %v163_v37 = vld [vmem:[%s11052_s4 + $0xa8] sm:$0xff]  ;;  %v164_v38 = vld [vmem:[%s11052_s4 + $0xb0] sm:$0xff] }
  0x31   :  { %6712 = vmatpush3.bf16.msra.mxu0 %v6711_v39  ;;  %v231_v39 = vld [vmem:[%s11052_s4 + $0x2c8] sm:$0xff]  ;;  %v232_v40 = vld [vmem:[%s11052_s4 + $0x2d0] sm:$0xff]  ;;  %v165_v41 = vld [vmem:[%s11052_s4 + $0xb8] sm:$0xff] }
  0x32   :  { %6553 = vmatmul.mubr.msk.f32.gmra.mrb[10].mxu1 %vm272_vm4, %v205_v42  ;;  %6713 = vmatprep.subr.bf16.mxu0 %v11065_v1  ;;  %v166_v42 = vld [vmem:[%s11052_s4 + $0xc0] sm:$0xff]  ;;  %v241_v3 = vld [vmem:[%s11052_s4 + $0x318] sm:$0xff] }
  0x33   :  { %6555 = vmatprep.mubr.msk.f32.mxu1 %vm272_vm4, %v206_v43  ;;  %2903 = vbcast.lane.b32.xlu1 %v7325_v60, 280  ;;  %v233_v43 = vld [vmem:[%s11052_s4 + $0x2d8] sm:$0xff] }
  0x34   :  { %2939 = vbcast.lane.b32.xlu0 %v7325_v60, 352 }
  0x35   :  { %6715 = vmatpush3.bf16.msra.mxu0 %v6714_v44  ;;  %v234_v44 = vld [vmem:[%s11052_s4 + $0x2e0] sm:$0xff] }
  0x36   :  { %6556 = vmatmul.mubr.msk.f32.gmra.mrb[12].mxu1 %vm272_vm4, %v207_v46  ;;  %6718 = vmatprep.subr.msk.bf16.mxu0 %vm7140_vm3, %v7162_v12  ;;  %v167_v46 = vld [vmem:[%s11052_s4 + $0xc8] sm:$0xff] }
  0x37   :  { %6558 = vmatprep.mubr.msk.f32.mxu1 %vm272_vm4, %v208_v47  ;;  %2907 = vbcast.lane.b32.xlu1 %v7325_v60, 288  ;;  %v168_v47 = vld [vmem:[%s11052_s4 + $0xd0] sm:$0xff] }
  0x38   :  { %6453 = vmatmul.mubr.f32.vlgmr.msra.gmra.mrb[0].mxu0 %v55_v48  ;;  %2947 = vbcast.lane.b32.xlu0 %v7325_v60, 368  ;;  %v235_v48 = vld [vmem:[%s11052_s4 + $0x2e8] sm:$0xff] }
  0x39   :  { %6721 = vmatpush3.bf16.msk.msra.mxu0 %vm7140_vm3, %v7162_v12  ;;  %6459 = vmatprep.mubr.msk.f32.mxu0 %vm272_vm4, %v142_v50  ;;  %v152_v12 = vld [vmem:[%s11052_s4 + $0x50] sm:$0xff] }
  0x3a   :  { %6559 = vmatmul.mubr.msk.f32.gmra.mrb[14].mxu1 %vm272_vm4, %v209_v51  ;;  %6722 = vmatprep.subr.bf16.mxu0 %v11065_v1  ;;  %v236_v50 = vld [vmem:[%s11052_s4 + $0x2f0] sm:$0xff]  ;;  %v169_v51 = vld [vmem:[%s11052_s4 + $0xd8] sm:$0xff] }
  0x3b   :  { %6561 = vmatprep.mubr.msk.f32.mxu1 %vm272_vm4, %v210_v52  ;;  %2911 = vbcast.lane.b32.xlu1 %v7325_v60, 296  ;;  %v170_v52 = vld [vmem:[%s11052_s4 + $0xe0] sm:$0xff] }
  0x3c   :  { %6460 = vmatmul.mubr.msk.f32.vlgmr.msra.gmra.mrb[2].mxu0 %vm272_vm4, %v143_v53  ;;  %2958 = vbcast.lane.b32.xlu0 %v7424_v22, 256  ;;  %v11062_v53 = vsub.s32 2, %v7275_v49 }
  0x3d   :  { %6462 = vmatprep.mubr.msk.f32.mxu0 %vm272_vm4, %v144_v55  ;;  %v237_v55 = vld [vmem:[%s11052_s4 + $0x2f8] sm:$0xff] }
  0x3e   :  { %6562 = vmatmul.mubr.msk.f32.gmra.mrb[16].mxu1 %vm272_vm4, %v211_v56  ;;  %v238_v56 = vld [vmem:[%s11052_s4 + $0x300] sm:$0xff] }
  0x3f   :  { %6564 = vmatprep.mubr.msk.f32.mxu1 %vm272_vm4, %v212_v57  ;;  %2915 = vbcast.lane.b32.xlu1 %v7325_v60, 304  ;;  %v171_v57 = vld [vmem:[%s11052_s4 + $0xe8] sm:$0xff] }
  0x40   :  { %6463 = vmatmul.mubr.msk.f32.gmra.mrb[4].mxu0 %vm272_vm4, %v145_v59  ;;  %2966 = vbcast.lane.b32.xlu0 %v7424_v22, 272  ;;  %v172_v59 = vld [vmem:[%s11052_s4 + $0xf0] sm:$0xff] }
  0x41   :  { %6465 = vmatprep.mubr.msk.f32.mxu0 %vm272_vm4, %v146_v61  ;;  %v239_v61 = vld [vmem:[%s11052_s4 + $0x308] sm:$0xff] }
  0x42   :  { %6565 = vmatmul.mubr.msk.f32.gmra.mrb[18].mxu1 %vm272_vm4, %v213_v62  ;;  %v240_v62 = vld [vmem:[%s11052_s4 + $0x310] sm:$0xff] }
  0x43   :  { %6567 = vmatprep.mubr.msk.f32.mxu1 %vm272_vm4, %v214_v63  ;;  %2919 = vbcast.lane.b32.xlu1 %v7325_v60, 312  ;;  %v173_v63 = vld [vmem:[%s11052_s4 + $0xf8] sm:$0xff] }
  0x44   :  { %6466 = vmatmul.mubr.msk.f32.gmra.mrb[6].mxu0 %vm272_vm4, %v147_v0  ;;  %2974 = vbcast.lane.b32.xlu0 %v7424_v22, 288  ;;  %v174_v0 = vld [vmem:[%s11052_s4 + $0x100] sm:$0xff] }
  0x45   :  { %6468 = vmatprep.mubr.msk.f32.mxu0 %vm272_vm4, %v148_v4  ;;  %v242_v4 = vld [vmem:[%s11052_s4 + $0x320] sm:$0xff] }
  0x46   :  { %6568 = vmatmul.mubr.msk.f32.gmra.mrb[20].mxu1 %vm272_vm4, %v215_v5  ;;  %v175_v5 = vld [vmem:[%s11052_s4 + $0x108] sm:$0xff] }
  0x47   :  { %6570 = vmatprep.mubr.msk.f32.mxu1 %vm272_vm4, %v216_v6  ;;  %2927 = vbcast.lane.b32.xlu1 %v7325_v60, 328  ;;  %v176_v6 = vld [vmem:[%s11052_s4 + $0x110] sm:$0xff] }
  0x48   :  { %6469 = vmatmul.mubr.msk.f32.gmra.mrb[8].mxu0 %vm272_vm4, %v149_v7  ;;  %2982 = vbcast.lane.b32.xlu0 %v7424_v22, 304  ;;  %v243_v7 = vld [vmem:[%s11052_s4 + $0x328] sm:$0xff] }
  0x49   :  { %6471 = vmatprep.mubr.msk.f32.mxu0 %vm272_vm4, %v150_v8  ;;  %v244_v8 = vld [vmem:[%s11052_s4 + $0x330] sm:$0xff] }
  0x4a   :  { %6571 = vmatmul.mubr.msk.f32.gmra.mrb[22].mxu1 %vm272_vm4, %v217_v9  ;;  %v177_v9 = vld [vmem:[%s11052_s4 + $0x118] sm:$0xff] }
  0x4b   :  { %6573 = vmatprep.mubr.msk.f32.mxu1 %vm272_vm4, %v218_v10  ;;  %2935 = vbcast.lane.b32.xlu1 %v7325_v60, 344  ;;  %v178_v10 = vld [vmem:[%s11052_s4 + $0x120] sm:$0xff] }
  0x4c   :  { %6472 = vmatmul.mubr.msk.f32.gmra.mrb[10].mxu0 %vm272_vm4, %v151_v11  ;;  %2990 = vbcast.lane.b32.xlu0 %v7424_v22, 320  ;;  %v245_v11 = vld [vmem:[%s11052_s4 + $0x338] sm:$0xff] }
  0x4d   :  { %6474 = vmatprep.mubr.msk.f32.mxu0 %vm272_vm4, %v152_v12  ;;  %v246_v12 = vld [vmem:[%s11052_s4 + $0x340] sm:$0xff] }
  0x4e   :  { %6574 = vmatmul.mubr.msk.f32.gmra.mrb[24].mxu1 %vm272_vm4, %v219_v13  ;;  %v179_v13 = vld [vmem:[%s11052_s4 + $0x128] sm:$0xff] }
  0x4f   :  { %6576 = vmatprep.mubr.msk.f32.mxu1 %vm272_vm4, %v220_v14  ;;  %2943 = vbcast.lane.b32.xlu1 %v7325_v60, 360  ;;  %v180_v14 = vld [vmem:[%s11052_s4 + $0x130] sm:$0xff] }
  0x50   :  { %6475 = vmatmul.mubr.msk.f32.gmra.mrb[12].mxu0 %vm272_vm4, %v153_v15  ;;  %2998 = vbcast.lane.b32.xlu0 %v7424_v22, 336  ;;  %v247_v15 = vld [vmem:[%s11052_s4 + $0x348] sm:$0xff] }
  0x51   :  { %6477 = vmatprep.mubr.msk.f32.mxu0 %vm272_vm4, %v154_v16  ;;  %v248_v16 = vld [vmem:[%s11052_s4 + $0x350] sm:$0xff] }
  0x52   :  { %6577 = vmatmul.mubr.msk.f32.gmra.mrb[26].mxu1 %vm272_vm4, %v221_v18  ;;  %v181_v18 = vld [vmem:[%s11052_s4 + $0x138] sm:$0xff] }
  0x53   :  { %6579 = vmatprep.mubr.msk.f32.mxu1 %vm272_vm4, %v222_v19  ;;  %2951 = vbcast.lane.b32.xlu1 %v7325_v60, 376  ;;  %v7574_v60 = vrot.slane %v7317_v58, %v11062_v53  ;;  %v182_v19 = vld [vmem:[%s11052_s4 + $0x140] sm:$0xff] }
  0x54   :  { %6478 = vmatmul.mubr.msk.f32.gmra.mrb[14].mxu0 %vm272_vm4, %v155_v20  ;;  %3006 = vbcast.lane.b32.xlu0 %v7424_v22, 352  ;;  %v249_v20 = vld [vmem:[%s11052_s4 + $0x358] sm:$0xff] }
  0x55   :  { %6480 = vmatprep.mubr.msk.f32.mxu0 %vm272_vm4, %v156_v21  ;;  %v250_v21 = vld [vmem:[%s11052_s4 + $0x360] sm:$0xff] }
  0x56   :  { %6580 = vmatmul.mubr.msk.f32.gmra.mrb[28].mxu1 %vm272_vm4, %v223_v23  ;;  %v183_v23 = vld [vmem:[%s11052_s4 + $0x148] sm:$0xff] }
  0x57   :  { %6582 = vmatprep.mubr.msk.f32.mxu1 %vm272_vm4, %v224_v24  ;;  %2962 = vbcast.lane.b32.xlu1 %v7424_v22, 264  ;;  %v184_v24 = vld [vmem:[%s11052_s4 + $0x150] sm:$0xff] }
  0x58   :  { %6481 = vmatmul.mubr.msk.f32.gmra.mrb[16].mxu0 %vm272_vm4, %v157_v25  ;;  %3014 = vbcast.lane.b32.xlu0 %v7424_v22, 368  ;;  %v251_v25 = vld [vmem:[%s11052_s4 + $0x368] sm:$0xff] }
  0x59   :  { %6483 = vmatprep.mubr.msk.f32.mxu0 %vm272_vm4, %v158_v26  ;;  %v252_v26 = vld [vmem:[%s11052_s4 + $0x370] sm:$0xff] }
  0x5a   :  { %6583 = vmatmul.mubr.msk.f32.gmra.mrb[30].mxu1 %vm272_vm4, %v225_v27  ;;  %v185_v27 = vld [vmem:[%s11052_s4 + $0x158] sm:$0xff] }
  0x5b   :  { %6585 = vmatprep.mubr.msk.f32.mxu1 %vm272_vm4, %v226_v28  ;;  %2970 = vbcast.lane.b32.xlu1 %v7424_v22, 280  ;;  %v186_v28 = vld [vmem:[%s11052_s4 + $0x160] sm:$0xff] }
  0x5c   :  { %6484 = vmatmul.mubr.msk.f32.gmra.mrb[18].mxu0 %vm272_vm4, %v159_v29  ;;  %3025 = vbcast.lane.b32.xlu0 %v7574_v60, 256  ;;  %v253_v29 = vld [vmem:[%s11052_s4 + $0x378] sm:$0xff] }
  0x5d   :  { %6486 = vmatprep.mubr.msk.f32.mxu0 %vm272_vm4, %v160_v30  ;;  %v254_v30 = vld [vmem:[%s11052_s4 + $0x380] sm:$0xff] }
  0x5e   :  { %6586 = vmatmul.mubr.msk.f32.gmra.mrb[32].mxu1 %vm272_vm4, %v227_v31  ;;  %v187_v31 = vld [vmem:[%s11052_s4 + $0x168] sm:$0xff] }
  0x5f   :  { %6588 = vmatprep.mubr.msk.f32.mxu1 %vm272_vm4, %v228_v32  ;;  %2978 = vbcast.lane.b32.xlu1 %v7424_v22, 296  ;;  %v188_v32 = vld [vmem:[%s11052_s4 + $0x170] sm:$0xff] }
  0x60   :  { %6487 = vmatmul.mubr.msk.f32.gmra.mrb[20].mxu0 %vm272_vm4, %v161_v33  ;;  %3033 = vbcast.lane.b32.xlu0 %v7574_v60, 272 }
  0x61   :  { %6489 = vmatprep.mubr.msk.f32.mxu0 %vm272_vm4, %v162_v34  ;;  %v255_v34 = vld [vmem:[%s11052_s4 + $0x388] sm:$0xff] }
  0x62   :  { %6589 = vmatmul.mubr.msk.f32.gmra.mrb[34].mxu1 %vm272_vm4, %v229_v35  ;;  %v256_v35 = vld [vmem:[%s11052_s4 + $0x390] sm:$0xff] }
  0x63   :  { %6591 = vmatprep.mubr.msk.f32.mxu1 %vm272_vm4, %v230_v36  ;;  %2986 = vbcast.lane.b32.xlu1 %v7424_v22, 312  ;;  %v190_v36 = vld [vmem:[%s11052_s4 + $0x180] sm:$0xff] }
  0x64   :  { %6490 = vmatmul.mubr.msk.f32.gmra.mrb[22].mxu0 %vm272_vm4, %v163_v37  ;;  %3041 = vbcast.lane.b32.xlu0 %v7574_v60, 288  ;;  %v257_v37 = vld [vmem:[%s11052_s4 + $0x398] sm:$0xff] }
  0x65   :  { %6492 = vmatprep.mubr.msk.f32.mxu0 %vm272_vm4, %v164_v38  ;;  %v258_v38 = vld [vmem:[%s11052_s4 + $0x3a0] sm:$0xff] }
  0x66   :  { %6592 = vmatmul.mubr.msk.f32.gmra.mrb[36].mxu1 %vm272_vm4, %v231_v39  ;;  %v191_v39 = vld [vmem:[%s11052_s4 + $0x188] sm:$0xff] }
  0x67   :  { %6594 = vmatprep.mubr.msk.f32.mxu1 %vm272_vm4, %v232_v40  ;;  %2994 = vbcast.lane.b32.xlu1 %v7424_v22, 328  ;;  %v192_v40 = vld [vmem:[%s11052_s4 + $0x190] sm:$0xff] }
  0x68   :  { %6493 = vmatmul.mubr.msk.f32.gmra.mrb[24].mxu0 %vm272_vm4, %v165_v41  ;;  %3049 = vbcast.lane.b32.xlu0 %v7574_v60, 304  ;;  %v259_v41 = vld [vmem:[%s11052_s4 + $0x3a8] sm:$0xff] }
  0x69   :  { %6495 = vmatprep.mubr.msk.f32.mxu0 %vm272_vm4, %v166_v42  ;;  %v260_v42 = vld [vmem:[%s11052_s4 + $0x3b0] sm:$0xff] }
  0x6a   :  { %6595 = vmatmul.mubr.msk.f32.gmra.mrb[38].mxu1 %vm272_vm4, %v233_v43  ;;  %v193_v43 = vld [vmem:[%s11052_s4 + $0x198] sm:$0xff] }
  0x6b   :  { %6597 = vmatprep.mubr.msk.f32.mxu1 %vm272_vm4, %v234_v44  ;;  %3002 = vbcast.lane.b32.xlu1 %v7424_v22, 344  ;;  %v261_v44 = vld [vmem:[%s11052_s4 + $0x3b8] sm:$0xff] }
  0x6c   :  { %6496 = vmatmul.mubr.msk.f32.gmra.mrb[26].mxu0 %vm272_vm4, %v167_v46  ;;  %3057 = vbcast.lane.b32.xlu0 %v7574_v60, 320  ;;  %v262_v46 = vld [vmem:[%s11052_s4 + $0x3c0] sm:$0xff] }
  0x6d   :  { %6498 = vmatprep.mubr.msk.f32.mxu0 %vm272_vm4, %v168_v47  ;;  %v263_v47 = vld [vmem:[%s11052_s4 + $0x3c8] sm:$0xff] }
  0x6e   :  { %6598 = vmatmul.mubr.msk.f32.gmra.mrb[40].mxu1 %vm272_vm4, %v235_v48  ;;  %v264_v48 = vld [vmem:[%s11052_s4 + $0x3d0] sm:$0xff] }
  0x6f   :  { %6600 = vmatprep.mubr.msk.f32.mxu1 %vm272_vm4, %v236_v50  ;;  %3010 = vbcast.lane.b32.xlu1 %v7424_v22, 360  ;;  %v265_v50 = vld [vmem:[%s11052_s4 + $0x3d8] sm:$0xff] }
  0x70   :  { %6499 = vmatmul.mubr.msk.f32.gmra.mrb[28].mxu0 %vm272_vm4, %v169_v51  ;;  %3065 = vbcast.lane.b32.xlu0 %v7574_v60, 336  ;;  %v266_v51 = vld [vmem:[%s11052_s4 + $0x3e0] sm:$0xff] }
  0x71   :  { %6501 = vmatprep.mubr.msk.f32.mxu0 %vm272_vm4, %v170_v52  ;;  %v267_v52 = vld [vmem:[%s11052_s4 + $0x3e8] sm:$0xff] }
  0x72   :  { %6601 = vmatmul.mubr.msk.f32.gmra.mrb[42].mxu1 %vm272_vm4, %v237_v55  ;;  %v268_v55 = vld [vmem:[%s11052_s4 + $0x3f0] sm:$0xff] }
  0x73   :  { %6603 = vmatprep.mubr.msk.f32.mxu1 %vm272_vm4, %v238_v56  ;;  %3018 = vbcast.lane.b32.xlu1 %v7424_v22, 376  ;;  %v11061_v22 = vsub.s32 3, %v7275_v49  ;;  %v269_v56 = vld [vmem:[%s11052_s4 + $0x3f8] sm:$0xff] }
  0x74   :  { %6502 = vmatmul.mubr.msk.f32.gmra.mrb[30].mxu0 %vm272_vm4, %v171_v57  ;;  %3073 = vbcast.lane.b32.xlu0 %v7574_v60, 352 }
  0x75   :  { %6504 = vmatprep.mubr.msk.f32.mxu0 %vm272_vm4, %v172_v59  ;;  %v7724_v33 = vrot.slane %v7317_v58, %v11061_v22  ;;  %v189_v58 = vld [vmem:[%s11052_s4 + $0x178] sm:$0xff] }
  0x76   :  { %6604 = vmatmul.mubr.msk.f32.gmra.mrb[44].mxu1 %vm272_vm4, %v239_v61 }
  0x77   :  { %6606 = vmatprep.mubr.msk.f32.mxu1 %vm272_vm4, %v240_v62  ;;  %3029 = vbcast.lane.b32.xlu1 %v7574_v60, 264  ;;  %11095 = vst [vmem:[#allocation10_spill] sm:$0xff] %v7724_v33 }
  0x78   :  { %6505 = vmatmul.mubr.msk.f32.gmra.mrb[32].mxu0 %vm272_vm4, %v173_v63  ;;  %3081 = vbcast.lane.b32.xlu0 %v7574_v60, 368 }
  0x79   :  { %6507 = vmatprep.mubr.msk.f32.mxu0 %vm272_vm4, %v174_v0 }
  0x7a   :  { %6607 = vmatmul.mubr.msk.f32.gmra.mrb[46].mxu1 %vm272_vm4, %v241_v3 }
  0x7b   :  { %6609 = vmatprep.mubr.msk.f32.mxu1 %vm272_vm4, %v242_v4  ;;  %3037 = vbcast.lane.b32.xlu1 %v7574_v60, 280  ;;  %v7055_v4 = vmov 1966171168  }
  0x7c   :  { %6508 = vmatmul.mubr.msk.f32.gmra.mrb[34].mxu0 %vm272_vm4, %v175_v5  ;;  %3092 = vbcast.lane.b32.xlu0 %v7724_v33, 256  ;;  %v1369_v5 = vunpack.c.l.s4 %v7055_v4 }
  0x7d   :  { %6510 = vmatprep.mubr.msk.f32.mxu0 %vm272_vm4, %v176_v6 }
  0x7e   :  { %6610 = vmatmul.mubr.msk.f32.gmra.mrb[48].mxu1 %vm272_vm4, %v243_v7 }
  0x7f   :  { %6612 = vmatprep.mubr.msk.f32.mxu1 %vm272_vm4, %v244_v8  ;;  %3045 = vbcast.lane.b32.xlu1 %v7574_v60, 296  ;;  %v1370_v8 = vunpack.c.0.s8 %v1369_v5 }
  0x80   :  { %6511 = vmatmul.mubr.msk.f32.gmra.mrb[36].mxu0 %vm272_vm4, %v177_v9  ;;  %3100 = vbcast.lane.b32.xlu0 %v7724_v33, 272 }
  0x81   :  { %6513 = vmatprep.mubr.msk.f32.mxu0 %vm272_vm4, %v178_v10 }
  0x82   :  { %6613 = vmatmul.mubr.msk.f32.gmra.mrb[50].mxu1 %vm272_vm4, %v245_v11  ;;  %v7850_v11 = vsub.s32 %v1370_v8, %v7275_v49 }
  0x83   :  { %6615 = vmatprep.mubr.msk.f32.mxu1 %vm272_vm4, %v246_v12  ;;  %3053 = vbcast.lane.b32.xlu1 %v7574_v60, 312 }
  0x84   :  { %6514 = vmatmul.mubr.msk.f32.gmra.mrb[38].mxu0 %vm272_vm4, %v179_v13  ;;  %3108 = vbcast.lane.b32.xlu0 %v7724_v33, 288 }
  0x85   :  { %6516 = vmatprep.mubr.msk.f32.mxu0 %vm272_vm4, %v180_v14 }
  0x86   :  { %6616 = vmatmul.mubr.msk.f32.gmra.mrb[52].mxu1 %vm272_vm4, %v247_v15 }
  0x87   :  { %6618 = vmatprep.mubr.msk.f32.mxu1 %vm272_vm4, %v248_v16  ;;  %3061 = vbcast.lane.b32.xlu1 %v7574_v60, 328 }
  0x88   :  { %6517 = vmatmul.mubr.msk.f32.gmra.mrb[40].mxu0 %vm272_vm4, %v181_v18  ;;  %3116 = vbcast.lane.b32.xlu0 %v7724_v33, 304 }
  0x89   :  { %6519 = vmatprep.mubr.msk.f32.mxu0 %vm272_vm4, %v182_v19 }
  0x8a   :  { %6619 = vmatmul.mubr.msk.f32.gmra.mrb[54].mxu1 %vm272_vm4, %v249_v20 }
  0x8b   :  { %6621 = vmatprep.mubr.msk.f32.mxu1 %vm272_vm4, %v250_v21  ;;  %3069 = vbcast.lane.b32.xlu1 %v7574_v60, 344 }
  0x8c   :  { %6520 = vmatmul.mubr.msk.f32.gmra.mrb[42].mxu0 %vm272_vm4, %v183_v23 }
  0x8d   :  { %6522 = vmatprep.mubr.msk.f32.mxu0 %vm272_vm4, %v184_v24 }
  0x8e   :  { %6622 = vmatmul.mubr.msk.f32.gmra.mrb[56].mxu1 %vm272_vm4, %v251_v25 }
  0x8f   :  { %6624 = vmatprep.mubr.msk.f32.mxu1 %vm272_vm4, %v252_v26  ;;  %3077 = vbcast.lane.b32.xlu1 %v7574_v60, 360 }
  0x90   :  { %6523 = vmatmul.mubr.msk.f32.gmra.mrb[44].mxu0 %vm272_vm4, %v185_v27 }
  0x91   :  { %6525 = vmatprep.mubr.msk.f32.mxu0 %vm272_vm4, %v186_v28 }
  0x92   :  { %6625 = vmatmul.mubr.msk.f32.gmra.mrb[58].mxu1 %vm272_vm4, %v253_v29 }
  0x93   :  { %6627 = vmatprep.mubr.msk.f32.mxu1 %vm272_vm4, %v254_v30  ;;  %3085 = vbcast.lane.b32.xlu1 %v7574_v60, 376 }
  0x94   :  { %6526 = vmatmul.mubr.msk.f32.gmra.mrb[46].mxu0 %vm272_vm4, %v187_v31 }
  0x95   :  { %6528 = vmatprep.mubr.msk.f32.mxu0 %vm272_vm4, %v188_v32  ;;  %v1584_v32 = vld [vmem:[%s11053_s5] sm:$0xff] }
  0x96   :  { %6628 = vmatmul.mubr.msk.f32.gmra.mrb[60].mxu1 %vm272_vm4, %v255_v34 }
  0x97   :  { %6630 = vmatprep.mubr.msk.f32.mxu1 %vm272_vm4, %v256_v35  ;;  %3096 = vbcast.lane.b32.xlu1 %v7724_v33, 264 }
  0x98   :  { %6529 = vmatmul.mubr.msk.f32.gmra.mrb[48].mxu0 %vm272_vm4, %v189_v58 }
  0x99   :  { %6531 = vmatprep.mubr.msk.f32.mxu0 %vm272_vm4, %v190_v36  ;;  %v7855_v20 = vpop.permute.xlu1 %2891 }
  0x9a   :  { %6631 = vmatmul.mubr.msk.f32.gmra.mrb[62].mxu1 %vm272_vm4, %v257_v37  ;;  %11096 = vst [vmem:[#allocation11_spill] sm:$0xff] %v7855_v20 }
  0x9b   :  { %6633 = vmatprep.mubr.msk.f32.mxu1 %vm272_vm4, %v258_v38  ;;  %3104 = vbcast.lane.b32.xlu1 %v7724_v33, 280 }
  0x9c   :  { %6532 = vmatmul.mubr.msk.f32.gmra.mrb[50].mxu0 %vm272_vm4, %v191_v39 }
  0x9d   :  { %6534 = vmatprep.mubr.msk.f32.mxu0 %vm272_vm4, %v192_v40  ;;  %v7881_v38 = vpop.permute.xlu1 %2895 }
  0x9e   :  { %6634 = vmatmul.mubr.msk.f32.gmra.mrb[64].mxu1 %vm272_vm4, %v259_v41  ;;  %11097 = vst [vmem:[#allocation12_spill] sm:$0xff] %v7881_v38  ;;  %v1585_v41 = vld [vmem:[%s11053_s5 + $0x8] sm:$0xff] }
  0x9f   :  { %6636 = vmatprep.mubr.msk.f32.mxu1 %vm272_vm4, %v260_v42  ;;  %3112 = vbcast.lane.b32.xlu1 %v7724_v33, 296 }
  0xa0   :  { %6535 = vmatmul.mubr.msk.f32.gmra.mrb[52].mxu0 %vm272_vm4, %v193_v43 }
  0xa1   :  { %6683 = vmatprep.mubr.msk.f32.mxu0 %vm11083_vm0, %v11067_v2  ;;  %v7894_v5 = vpop.permute.xlu1 %2899  ;;  %vm4852_vm0 = vcmask 1041409  }
  0xa2   :  { %6637 = vmatmul.mubr.msk.f32.gmra.mrb[66].mxu1 %vm272_vm4, %v261_v44  ;;  %11098 = vst [vmem:[#allocation13_spill] sm:$0xff] %v7894_v5 }
  0xa3   :  { %6639 = vmatprep.mubr.msk.f32.mxu1 %vm272_vm4, %v262_v46 }
  0xa6   :  { %6640 = vmatmul.mubr.msk.f32.gmra.mrb[68].mxu1 %vm272_vm4, %v263_v47 }
  0xa7   :  { %6642 = vmatprep.mubr.msk.f32.mxu1 %vm272_vm4, %v264_v48 }
  0xaa   :  { %6643 = vmatmul.mubr.msk.f32.gmra.mrb[70].mxu1 %vm272_vm4, %v265_v50 }
  0xab   :  { %6645 = vmatprep.mubr.msk.f32.mxu1 %vm272_vm4, %v266_v51 }
  0xae   :  { %6646 = vmatmul.mubr.msk.f32.gmra.mrb[72].mxu1 %vm272_vm4, %v267_v52  ;;  %v1648_v52 = vld [vmem:[%s11053_s5 + $0x200] sm:$0xff] }
  0xaf   :  { %6648 = vmatprep.mubr.msk.f32.mxu1 %vm272_vm4, %v268_v55 }
  0xb2   :  { %6649 = vmatmul.mubr.msk.f32.gmra.mrb[74].mxu1 %vm272_vm4, %v269_v56 }
  0xf1   :  { %v7825_v57 = vpop.f32.mrb[0].mxu1 }
  0xf2   :  { %v7827_v59 = vpop.f32.mrb[1].mxu1 }
  0xf5   :  { %v7829_v60 = vpop.f32.mrb[2].mxu1 }
  0xf6   :  { %v7831_v61 = vpop.f32.mrb[3].mxu1 }
  0xf9   :  { %v7833_v62 = vpop.f32.mrb[4].mxu1 }
  0xfa   :  { %v7835_v63 = vpop.f32.mrb[5].mxu1 }
  0xfd   :  { %v7837_v0 = vpop.f32.mrb[6].mxu1 }
  0xfe   :  { %v7839_v3 = vpop.f32.mrb[7].mxu1 }
 0x101   :  { %v7841_v6 = vpop.f32.mrb[8].mxu1 }
 0x102   :  { %v7843_v7 = vpop.f32.mrb[9].mxu1 }
 0x105   :  { %v7845_v9 = vpop.f32.mrb[10].mxu1 }
 0x106   :  { %v7847_v10 = vpop.f32.mrb[11].mxu1 }
 0x109   :  { %v6557_v12 = vpop.f32.mrb[12].mxu1 }
 0x10a   :  { %v1047_v13 = vpop.f32.mrb[13].mxu1 }
 0x10b   :  { %v138_v14 = vpop.f32.mrb[0].mxu0 }
 0x10c   :  { %v1367_v15 = vcombine.high %v138_v14, %v138_v14  ;;  %v7853_v16 = vrot.slane %v138_v14, %v7850_v11  ;;  %v6454_v18 = vpop.f32.mrb[1].mxu0 }
 0x10d   :  { %v6560_v19 = vpop.f32.mrb[14].mxu1 }
 0x10e   :  { %v1381_v21 = vrot.slane %v1367_v15, %v7850_v11  ;;  %v7860_v23 = vrot.slane %v7853_v16, %v7850_v11  ;;  %v1057_v24 = vpop.f32.mrb[15].mxu1 }
 0x10f   :  { %v6461_v25 = vpop.f32.mrb[2].mxu0 }
 0x110   :  { %v1383_v26 = vcombine.high %v1381_v21, %v1381_v21  ;;  %v7863_v27 = vrot.slane %v1381_v21, %v7850_v11  ;;  %v727_v28 = vpop.f32.mrb[3].mxu0  ;;  %v7867_v29 = vrot.slane %v7860_v23, %v7299_v54  ;;  %v1649_v21 = vld [vmem:[%s11053_s5 + $0x208] sm:$0xff] }
 0x111   :  { %v6563_v30 = vpop.f32.mrb[16].mxu1 }
 0x112   :  { %v7870_v31 = vrot.slane %v1383_v26, %v7850_v11  ;;  %v1067_v34 = vpop.f32.mrb[17].mxu1  ;;  %v7877_v35 = vrot.slane %v7863_v27, %v7299_v54  ;;  %v1457_v58 = vadd.f32 %v6461_v25, %v7867_v29  ;;  %v1456_v36 = vadd.f32 %v7867_v29, %v727_v28  ;;  %v1650_v26 = vld [vmem:[%s11053_s5 + $0x210] sm:$0xff] }
 0x113   :  { %v6464_v37 = vpop.f32.mrb[4].mxu0 }
 0x114   :  { %v737_v39 = vpop.f32.mrb[5].mxu0  ;;  %v1521_v40 = vadd.f32 %v6557_v12, %v7877_v35  ;;  %v1520_v42 = vadd.f32 %v7877_v35, %v1047_v13  ;;  %v1712_v43 = vadd.f32 %v1584_v32, %v1456_v36  ;;  %v1523_v47 = vadd.f32 %v6560_v19, %v7877_v35  ;;  %v1587_v12 = vld [vmem:[%s11053_s5 + $0x18] sm:$0xff] }
 0x115   :  { %v6566_v44 = vpop.f32.mrb[18].mxu1  ;;  %v1713_v50 = vadd.f32 %v1585_v41, %v1457_v58  ;;  %v1522_v55 = vadd.f32 %v7877_v35, %v1057_v24  ;;  %v1525_v56 = vadd.f32 %v6563_v30, %v7877_v35  ;;  %v1459_v8 = vadd.f32 %v6464_v37, %v7867_v29 }
 0x116   :  { %v1077_v46 = vpop.f32.mrb[19].mxu1  ;;  %6760 = vtanh.f32 %v1712_v43  ;;  %v1524_v13 = vadd.f32 %v7877_v35, %v1067_v34  ;;  %v7902_v14 = vadd.f32 %v7867_v29, %v737_v39  ;;  %v7905_v18 = vadd.f32 %v6566_v44, %v7877_v35  ;;  %v7931_v44 = vpop.permute.xlu1 %2903 }
 0x117   :  { %v6467_v48 = vpop.f32.mrb[6].mxu0  ;;  %6762 = vtanh.f32 %v1713_v50  ;;  %v1776_v24 = vadd.f32 %v1648_v52, %v1520_v42  ;;  %v1715_v28 = vadd.f32 %v1587_v12, %v1459_v8  ;;  %v7914_v30 = vadd.f32 %v7877_v35, %v1077_v46  ;;  %11099 = vst [vmem:[#allocation14_spill] sm:$0xff] %v7931_v44  ;;  %v1651_v46 = vld [vmem:[%s11053_s5 + $0x218] sm:$0xff] }
 0x118   :  { %v747_v51 = vpop.f32.mrb[7].mxu0  ;;  %v7917_v32 = vadd.f32 %v6467_v48, %v7867_v29  ;;  %v1777_v41 = vadd.f32 %v1649_v21, %v1521_v40  ;;  %v1778_v48 = vadd.f32 %v1650_v26, %v1522_v55  ;;  %v7957_v21 = vld [vmem:[%s11057_s9] ss:$0 sm:$0xff] }
 0x119   :  { %v6569_v4 = vpop.f32.mrb[20].mxu1  ;;  %v7920_v58 = vadd.f32 %v7867_v29, %v747_v51  ;;  %6764 = vtanh.f32 %v1776_v24  ;;  %v1652_v51 = vld [vmem:[%s11053_s5 + $0x220] sm:$0xff]  ;;  %v1779_v24 = vadd.f32 %v1651_v46, %v1523_v47  ;;  %v1382_v47 = vcombine.high %v7853_v16, %v7853_v16 }
 0x11a   :  { %v1087_v15 = vpop.f32.mrb[21].mxu1  ;;  %v7923_v36 = vadd.f32 %v6569_v4, %v7877_v35  ;;  %6766 = vtanh.f32 %v1715_v28  ;;  %v1653_v28 = vld [vmem:[%s11053_s5 + $0x228] sm:$0xff]  ;;  %v7987_v16 = vrot.slane %v7870_v31, %v7299_v54 }
 0x11b   :  { %v6470_v19 = vpop.f32.mrb[8].mxu0  ;;  %v7926_v37 = vadd.f32 %v7877_v35, %v1087_v15  ;;  %6768 = vtanh.f32 %v1777_v41  ;;  %v7971_v41 = vpop.permute.xlu1 %2907 }
 0x11c   :  { %v757_v25 = vpop.f32.mrb[9].mxu0  ;;  %v7929_v42 = vadd.f32 %v6470_v19, %v7867_v29  ;;  %6770 = vtanh.f32 %v1778_v48  ;;  %11100 = vst [vmem:[#allocation15_spill] sm:$0xff] %v7971_v41 }
 0x11d   :  { %v6572_v34 = vpop.f32.mrb[22].mxu1  ;;  %v7940_v40 = vadd.f32 %v7867_v29, %v757_v25  ;;  %6772 = vtanh.f32 %v1779_v24 }
 0x11e   :  { %v1097_v39 = vpop.f32.mrb[23].mxu1  ;;  %v7943_v52 = vadd.f32 %v6572_v34, %v7877_v35  ;;  %v1780_v34 = vadd.f32 %v1652_v51, %v1524_v13 }
 0x11f   :  { %v6473_v43 = vpop.f32.mrb[10].mxu0  ;;  %v7946_v12 = vadd.f32 %v7877_v35, %v1097_v39 }
 0x120   :  { %v767_v50 = vpop.f32.mrb[11].mxu0  ;;  %v6761_v8 = vpop.eup %6760  ;;  %v7949_v15 = vadd.f32 %v6473_v43, %v7867_v29  ;;  %6774 = vtanh.f32 %v1780_v34 }
 0x121   :  { %v6575_v4 = vpop.f32.mrb[24].mxu1  ;;  %v7952_v55 = vadd.f32 %v7867_v29, %v767_v50  ;;  %v1975_v50 = vmul.f32 %v6761_v8, %v7957_v21  ;;  %v6763_v53 = vpop.eup %6762 }
 0x122   :  { %v1107_v19 = vpop.f32.mrb[25].mxu1  ;;  %v7960_v25 = vadd.f32 %v6575_v4, %v7877_v35  ;;  %v1781_v4 = vadd.f32 %v1653_v28, %v1525_v56 }
 0x123   :  { %v6476_v26 = vpop.f32.mrb[12].mxu0  ;;  %v7966_v43 = vadd.f32 %v7877_v35, %v1107_v19  ;;  %2103 = vadd.xlane.f32.xlu0 %v1975_v50  ;;  %v6765_v28 = vpop.eup %6764  ;;  %v8000_v50 = vrot.slane %v1382_v47, %v7850_v11  ;;  %v1655_v11 = vld [vmem:[%s11053_s5 + $0x238] sm:$0xff] }
 0x124   :  { %v777_v39 = vpop.f32.mrb[13].mxu0  ;;  %v7974_v46 = vadd.f32 %v6476_v26, %v7867_v29  ;;  %v1586_v26 = vld [vmem:[%s11053_s5 + $0x10] sm:$0xff]  ;;  %v6767_v17 = vpop.eup %6766  ;;  %6776 = vtanh.f32 %v1781_v4  ;;  %v1783_v44 = vadd.f32 %v1655_v11, %v7905_v18 }
 0x125   :  { %v6578_v22 = vpop.f32.mrb[26].mxu1  ;;  %v7977_v48 = vadd.f32 %v7867_v29, %v777_v39  ;;  %v1714_v45 = vadd.f32 %v1586_v26, %v7902_v14  ;;  %v1978_v47 = vmul.f32 %v6767_v17, %v7957_v21  ;;  %v6769_v4 = vpop.eup %6768  ;;  %v2039_v14 = vmul.f32 %v6765_v28, %v7957_v21 }
 0x126   :  { %v7980_v13 = vadd.f32 %v6578_v22, %v7877_v35  ;;  %v1117_v51 = vpop.f32.mrb[27].mxu1  ;;  %v1976_v22 = vmul.f32 %v6763_v53, %v7957_v21  ;;  %v8024_v2 = vrot.slane %v8000_v50, %v7299_v54  ;;  %v2040_v28 = vmul.f32 %v6769_v4, %v7957_v21 }
 0x127   :  { %v7983_v8 = vadd.f32 %v7877_v35, %v1117_v51  ;;  %v6479_v19 = vpop.f32.mrb[14].mxu0  ;;  %2109 = vadd.xlane.f32.xlu1 %v1978_v47  ;;  %6778 = vtanh.f32 %v1714_v45 }
 0x128   :  { %v787_v39 = vpop.f32.mrb[15].mxu0  ;;  %v7994_v24 = vadd.f32 %v6479_v19, %v7867_v29  ;;  %2105 = vadd.xlane.f32.xlu0 %v1976_v22  ;;  %6780 = vtanh.f32 %v1783_v44 }
 0x129   :  { %v7997_v56 = vadd.f32 %v7867_v29, %v787_v39  ;;  %v6581_v35 = vpop.f32.mrb[28].mxu1  ;;  %v8009_v39 = vpop.permute.xlu1 %2911 }
 0x12a   :  { %v8003_v34 = vadd.f32 %v6581_v35, %v7987_v16  ;;  %v1127_v51 = vpop.f32.mrb[29].mxu1  ;;  %11101 = vst [vmem:[#allocation16_spill] sm:$0xff] %v8009_v39  ;;  %v8026_v39 = vpop.permute.xlu0 %2366 }
 0x12b   :  { %v8007_v53 = vadd.f32 %v7987_v16, %v1127_v51  ;;  %v6482_v19 = vpop.f32.mrb[16].mxu0  ;;  %v6771_v51 = vpop.eup %6770  ;;  %11102 = vst [vmem:[#allocation17_spill] sm:$0xff] %v8026_v39  ;;  %2233 = vadd.xlane.f32.xlu1 %v2040_v28 }
 0x12c   :  { %v8016_v35 = vadd.f32 %v6482_v19, %v7867_v29  ;;  %v797_v1 = vpop.f32.mrb[17].mxu0  ;;  %2231 = vadd.xlane.f32.xlu0 %v2039_v14  ;;  %v6773_v5 = vpop.eup %6772  ;;  %v2041_v47 = vmul.f32 %v6771_v51, %v7957_v21 }
 0x12d   :  { %v8020_v26 = vadd.f32 %v7867_v29, %v797_v1  ;;  %v6584_v22 = vpop.f32.mrb[30].mxu1  ;;  %v6775_v20 = vpop.eup %6774 }
 0x12e   :  { %v8029_v17 = vadd.f32 %v6584_v22, %v7987_v16  ;;  %v1137_v19 = vpop.f32.mrb[31].mxu1  ;;  %v8043_v18 = vpop.permute.xlu1 %2915  ;;  %v2043_v28 = vmul.f32 %v6775_v20, %v7957_v21 }
 0x12f   :  { %v8033_v1 = vadd.f32 %v7987_v16, %v1137_v19  ;;  %v6485_v29 = vpop.f32.mrb[18].mxu0  ;;  %11103 = vst [vmem:[#allocation18_spill] sm:$0xff] %v8043_v18  ;;  %v6777_v18 = vpop.eup %6776 }
 0x130   :  { %v8037_v41 = vadd.f32 %v6485_v29, %v8024_v2  ;;  %v807_v38 = vpop.f32.mrb[19].mxu0  ;;  %2235 = vadd.xlane.f32.xlu0 %v2041_v47  ;;  %v8051_v29 = vpop.permute.xlu0 %2923  ;;  %v1414_v47 = vcombine.high %v8000_v50, %v8000_v50  ;;  %v2044_v20 = vmul.f32 %v6777_v18, %v7957_v21 }
 0x131   :  { %v8041_v22 = vadd.f32 %v8024_v2, %v807_v38  ;;  %v6587_v45 = vpop.f32.mrb[32].mxu1  ;;  %11104 = vst [vmem:[#allocation19_spill] sm:$0xff] %v8051_v29  ;;  %v2042_v38 = vmul.f32 %v6773_v5, %v7957_v21 }
 0x132   :  { %v8046_v11 = vadd.f32 %v6587_v45, %v7987_v16  ;;  %v1147_v14 = vpop.f32.mrb[33].mxu1  ;;  %v8069_v49 = vpop.permute.xlu1 %2919 }
 0x133   :  { %v8049_v4 = vadd.f32 %v7987_v16, %v1147_v14  ;;  %v6488_v19 = vpop.f32.mrb[20].mxu0  ;;  %2237 = vadd.xlane.f32.xlu1 %v2042_v38  ;;  %11107 = vst [vmem:[#allocation22_spill] sm:$0xff] %v8069_v49 }
 0x134   :  { %v8055_v51 = vadd.f32 %v6488_v19, %v8024_v2  ;;  %v817_v39 = vpop.f32.mrb[21].mxu0  ;;  %2239 = vadd.xlane.f32.xlu0 %v2043_v28  ;;  %v8081_v28 = vpop.permute.xlu0 %2931 }
 0x135   :  { %v8059_v45 = vadd.f32 %v8024_v2, %v817_v39  ;;  %v6590_v44 = vpop.f32.mrb[34].mxu1  ;;  %11111 = vst [vmem:[#allocation26_spill] sm:$0xff] %v8081_v28 }
 0x136   :  { %11105 = vst [vmem:[#allocation20_spill] sm:$0xff] %v8055_v51  ;;  %v8064_v14 = vadd.f32 %v6590_v44, %v7987_v16  ;;  %v1157_v29 = vpop.f32.mrb[35].mxu1  ;;  %v6779_v51 = vpop.eup %6778  ;;  %v8079_v44 = vrot.slane %v1414_v47, %v7299_v54 }
 0x137   :  { %v8067_v5 = vadd.f32 %v7987_v16, %v1157_v29  ;;  %v6491_v19 = vpop.f32.mrb[22].mxu0  ;;  %2241 = vadd.xlane.f32.xlu1 %v2044_v20  ;;  %v8096_v20 = vpop.permute.xlu1 %2927 }
 0x138   :  { %11106 = vst [vmem:[#allocation21_spill] sm:$0xff] %v8064_v14  ;;  %v8073_v39 = vadd.f32 %v6491_v19, %v8024_v2  ;;  %v827_v33 = vpop.f32.mrb[23].mxu0  ;;  %11110 = vst [vmem:[#allocation25_spill] sm:$0xff] %v8079_v44 }
 0x139   :  { %v8076_v50 = vadd.f32 %v8024_v2, %v827_v33  ;;  %v6593_v38 = vpop.f32.mrb[36].mxu1  ;;  %11116 = vst [vmem:[#allocation31_spill] sm:$0xff] %v8096_v20 }
 0x13a   :  { %11108 = vst [vmem:[#allocation23_spill] sm:$0xff] %v8073_v39  ;;  %v8084_v29 = vadd.f32 %v6593_v38, %v7987_v16  ;;  %v1167_v49 = vpop.f32.mrb[37].mxu1  ;;  %v1977_v39 = vmul.f32 %v6779_v51, %v7957_v21  ;;  %v1508_v38 = vadd.f32 %v8079_v44, %v7827_v59  ;;  %v1636_v51 = vld [vmem:[%s11053_s5 + $0x1a0] sm:$0xff] }
 0x13b   :  { %11109 = vst [vmem:[#allocation24_spill] sm:$0xff] %v8076_v50  ;;  %v8087_v18 = vadd.f32 %v7987_v16, %v1167_v49  ;;  %v6494_v19 = vpop.f32.mrb[24].mxu0  ;;  %v6781_v50 = vpop.eup %6780 }
 0x13c   :  { %11112 = vst [vmem:[#allocation27_spill] sm:$0xff] %v8084_v29  ;;  %v8091_v33 = vadd.f32 %v6494_v19, %v8024_v2  ;;  %v837_v14 = vpop.f32.mrb[25].mxu0  ;;  %2107 = vadd.xlane.f32.xlu1 %v1977_v39  ;;  %v2046_v20 = vmul.f32 %v6781_v50, %v7957_v21 }
 0x13d   :  { %11113 = vst [vmem:[#allocation28_spill] sm:$0xff] %v8087_v18  ;;  %v8094_v47 = vadd.f32 %v8024_v2, %v837_v14  ;;  %v6596_v28 = vpop.f32.mrb[38].mxu1 }
 0x13e   :  { %11114 = vst [vmem:[#allocation29_spill] sm:$0xff] %v8091_v33  ;;  %v8101_v49 = vadd.f32 %v6596_v28, %v7987_v16  ;;  %v1177_v29 = vpop.f32.mrb[39].mxu1  ;;  %v8109_v33 = vpop.permute.xlu0 %2939 }
 0x13f   :  { %11115 = vst [vmem:[#allocation30_spill] sm:$0xff] %v8094_v47  ;;  %v8107_v19 = vadd.f32 %v7987_v16, %v1177_v29  ;;  %v6497_v14 = vpop.f32.mrb[26].mxu0  ;;  %11119 = vst [vmem:[#allocation34_spill] sm:$0xff] %v8109_v33  ;;  %v1764_v47 = vadd.f32 %v1636_v51, %v1508_v38 }
 0x140   :  { %11117 = vst [vmem:[#allocation32_spill] sm:$0xff] %v8101_v49  ;;  %v8113_v39 = vadd.f32 %v6497_v14, %v8024_v2  ;;  %v847_v59 = vpop.f32.mrb[27].mxu0  ;;  %2245 = vadd.xlane.f32.xlu1 %v2046_v20  ;;  %v1413_v14 = vcombine.high %v7863_v27, %v7863_v27  ;;  %v1638_v20 = vld [vmem:[%s11053_s5 + $0x1b0] sm:$0xff] }
 0x141   :  { %11118 = vst [vmem:[#allocation33_spill] sm:$0xff] %v8107_v19  ;;  %v8116_v28 = vadd.f32 %v8024_v2, %v847_v59  ;;  %v6599_v49 = vpop.f32.mrb[40].mxu1  ;;  %v1510_v19 = vadd.f32 %v8079_v44, %v7831_v61  ;;  %6782 = vtanh.f32 %v1764_v47  ;;  %v1637_v47 = vld [vmem:[%s11053_s5 + $0x1a8] sm:$0xff] }
 0x142   :  { %11120 = vst [vmem:[#allocation35_spill] sm:$0xff] %v8113_v39  ;;  %v8119_v18 = vadd.f32 %v6599_v49, %v7987_v16  ;;  %v1187_v29 = vpop.f32.mrb[41].mxu1  ;;  %v8128_v39 = vpop.permute.xlu1 %2935 }
 0x143   :  { %v8124_v33 = vadd.f32 %v7987_v16, %v1187_v29  ;;  %v6500_v50 = vpop.f32.mrb[28].mxu0  ;;  %11123 = vst [vmem:[#allocation38_spill] sm:$0xff] %v8128_v39  ;;  %v8139_v59 = vpop.permute.xlu0 %2947  ;;  %v1766_v39 = vadd.f32 %v1638_v20, %v1510_v19  ;;  %v1512_v19 = vadd.f32 %v8079_v44, %v7835_v63 }
 0x144   :  { %11121 = vst [vmem:[#allocation36_spill] sm:$0xff] %v8119_v18  ;;  %v8134_v38 = vadd.f32 %v6500_v50, %v8024_v2  ;;  %v857_v49 = vpop.f32.mrb[29].mxu0  ;;  %11126 = vst [vmem:[#allocation41_spill] sm:$0xff] %v8139_v59  ;;  %v8148_v50 = vrot.slane %v1413_v14, %v7299_v54  ;;  %v1412_v14 = vcombine.high %v7860_v23, %v7860_v23 }
 0x145   :  { %11122 = vst [vmem:[#allocation37_spill] sm:$0xff] %v8124_v33  ;;  %v8137_v51 = vadd.f32 %v8024_v2, %v857_v49  ;;  %v6602_v61 = vpop.f32.mrb[42].mxu1  ;;  %v1509_v49 = vadd.f32 %v7825_v57, %v8079_v44  ;;  %v1640_v57 = vld [vmem:[%s11053_s5 + $0x1c0] sm:$0xff]  ;;  %6784 = vtanh.f32 %v1766_v39  ;;  %v1511_v39 = vadd.f32 %v7829_v60, %v8079_v44  ;;  %v1642_v60 = vld [vmem:[%s11053_s5 + $0x1d0] sm:$0xff] }
 0x146   :  { %11124 = vst [vmem:[#allocation39_spill] sm:$0xff] %v8134_v38  ;;  %v8142_v29 = vadd.f32 %v6602_v61, %v7987_v16  ;;  %v1197_v27 = vpop.f32.mrb[43].mxu1  ;;  %v8165_v61 = vpop.permute.xlu1 %2943 }
 0x147   :  { %11125 = vst [vmem:[#allocation40_spill] sm:$0xff] %v8137_v51  ;;  %v8145_v18 = vadd.f32 %v7987_v16, %v1197_v27  ;;  %v6503_v33 = vpop.f32.mrb[30].mxu0  ;;  %11131 = vst [vmem:[#allocation46_spill] sm:$0xff] %v8165_v61 }
 0x148   :  { %11127 = vst [vmem:[#allocation42_spill] sm:$0xff] %v8142_v29  ;;  %v8153_v38 = vadd.f32 %v6503_v33, %v8024_v2  ;;  %v867_v59 = vpop.f32.mrb[31].mxu0  ;;  %v1765_v29 = vadd.f32 %v1637_v47, %v1509_v49  ;;  %v1639_v49 = vld [vmem:[%s11053_s5 + $0x1b8] sm:$0xff]  ;;  %v1514_v47 = vadd.f32 %v8079_v44, %v7839_v3 }
 0x149   :  { %11128 = vst [vmem:[#allocation43_spill] sm:$0xff] %v8145_v18  ;;  %v8161_v16 = vadd.f32 %v8024_v2, %v867_v59  ;;  %v6605_v20 = vpop.f32.mrb[44].mxu1 }
 0x14a   :  { %11129 = vst [vmem:[#allocation44_spill] sm:$0xff] %v8153_v38  ;;  %v8171_v33 = vadd.f32 %v6605_v20, %v8148_v50  ;;  %v1207_v27 = vpop.f32.mrb[45].mxu1  ;;  %v8176_v38 = vpop.permute.xlu0 %2958  ;;  %v8185_v20 = vrot.slane %v1412_v14, %v7299_v54  ;;  %6786 = vtanh.f32 %v1765_v29  ;;  %v1644_v29 = vld [vmem:[%s11053_s5 + $0x1e0] sm:$0xff] }
 0x14b   :  { %11130 = vst [vmem:[#allocation45_spill] sm:$0xff] %v8161_v16  ;;  %v8174_v63 = vadd.f32 %v8148_v50, %v1207_v27  ;;  %v6506_v59 = vpop.f32.mrb[32].mxu0  ;;  %11133 = vst [vmem:[#allocation48_spill] sm:$0xff] %v8176_v38  ;;  %v1768_v16 = vadd.f32 %v1640_v57, %v1512_v19  ;;  %v6783_v14 = vpop.eup %6782 }
 0x14c   :  { %11132 = vst [vmem:[#allocation47_spill] sm:$0xff] %v8171_v33  ;;  %v8179_v23 = vadd.f32 %v6506_v59, %v8024_v2  ;;  %v877_v61 = vpop.f32.mrb[33].mxu0  ;;  %v1516_v59 = vadd.f32 %v8079_v44, %v7843_v7  ;;  %v2027_v3 = vmul.f32 %v6783_v14, %v7957_v21  ;;  %v1770_v7 = vadd.f32 %v1642_v60, %v1514_v47 }
 0x14d   :  { %v8182_v18 = vadd.f32 %v8024_v2, %v877_v61  ;;  %v6608_v51 = vpop.f32.mrb[46].mxu1  ;;  %v8200_v61 = vpop.permute.xlu1 %2951  ;;  %6788 = vtanh.f32 %v1768_v16 }
 0x14e   :  { %11134 = vst [vmem:[#allocation49_spill] sm:$0xff] %v8179_v23  ;;  %v8190_v27 = vadd.f32 %v6608_v51, %v8148_v50  ;;  %v1217_v38 = vpop.f32.mrb[47].mxu1  ;;  %11137 = vst [vmem:[#allocation52_spill] sm:$0xff] %v8200_v61  ;;  %v8217_v61 = vpop.permute.xlu0 %2966  ;;  %v1767_v23 = vadd.f32 %v1639_v49, %v1511_v39  ;;  %2207 = vadd.xlane.f32.xlu0 %v2027_v3  ;;  %v1518_v39 = vadd.f32 %v8079_v44, %v7847_v10 }
 0x14f   :  { %v8198_v2 = vadd.f32 %v8148_v50, %v1217_v38  ;;  %v6509_v19 = vpop.f32.mrb[34].mxu0  ;;  %11140 = vst [vmem:[#allocation55_spill] sm:$0xff] %v8217_v61  ;;  %v6785_v33 = vpop.eup %6784  ;;  %v1772_v61 = vadd.f32 %v1644_v29, %v1516_v59 }
 0x150   :  { %11135 = vst [vmem:[#allocation50_spill] sm:$0xff] %v8190_v27  ;;  %v8206_v51 = vadd.f32 %v6509_v19, %v8185_v20  ;;  %v887_v57 = vpop.f32.mrb[35].mxu0  ;;  %6790 = vtanh.f32 %v1767_v23  ;;  %v1654_v23 = vld [vmem:[%s11053_s5 + $0x230] sm:$0xff] }
 0x151   :  { %11136 = vst [vmem:[#allocation51_spill] sm:$0xff] %v8198_v2  ;;  %v8212_v38 = vadd.f32 %v8185_v20, %v887_v57  ;;  %v6611_v27 = vpop.f32.mrb[48].mxu1  ;;  %v1513_v57 = vadd.f32 %v7833_v62, %v8079_v44  ;;  %v1646_v62 = vld [vmem:[%s11053_s5 + $0x1f0] sm:$0xff]  ;;  %v8241_v60 = vpop.permute.xlu1 %2962  ;;  %6792 = vtanh.f32 %v1770_v7  ;;  %v1515_v7 = vadd.f32 %v7837_v0, %v8079_v44 }
 0x152   :  { %11138 = vst [vmem:[#allocation53_spill] sm:$0xff] %v8206_v51  ;;  %v8220_v19 = vadd.f32 %v6611_v27, %v8148_v50  ;;  %v1227_v51 = vpop.f32.mrb[49].mxu1  ;;  %v1641_v27 = vld [vmem:[%s11053_s5 + $0x1c8] sm:$0xff]  ;;  %11142 = vst [vmem:[#allocation57_spill] sm:$0xff] %v8241_v60  ;;  %v8250_v29 = vpop.permute.xlu0 %2974  ;;  %6794 = vtanh.f32 %v1772_v61 }
 0x153   :  { %11139 = vst [vmem:[#allocation54_spill] sm:$0xff] %v8212_v38  ;;  %v8223_v14 = vadd.f32 %v8148_v50, %v1227_v51  ;;  %v6512_v16 = vpop.f32.mrb[36].mxu0  ;;  %v2029_v51 = vmul.f32 %v6785_v33, %v7957_v21  ;;  %11144 = vst [vmem:[#allocation59_spill] sm:$0xff] %v8250_v29  ;;  %v1774_v33 = vadd.f32 %v1646_v62, %v1518_v39 }
 0x154   :  { %v8228_v38 = vadd.f32 %v6512_v16, %v8185_v20  ;;  %v897_v2 = vpop.f32.mrb[37].mxu0  ;;  %v1769_v16 = vadd.f32 %v1641_v27, %v1513_v57  ;;  %v6787_v29 = vpop.eup %6786  ;;  %v1643_v57 = vld [vmem:[%s11053_s5 + $0x1d8] sm:$0xff] }
 0x155   :  { %v8236_v49 = vadd.f32 %v8185_v20, %v897_v2  ;;  %v6614_v47 = vpop.f32.mrb[50].mxu1  ;;  %2211 = vadd.xlane.f32.xlu0 %v2029_v51  ;;  %v2028_v62 = vmul.f32 %v6787_v29, %v7957_v21 }
 0x156   :  { %11141 = vst [vmem:[#allocation56_spill] sm:$0xff] %v8228_v38  ;;  %v8245_v59 = vadd.f32 %v6614_v47, %v8148_v50  ;;  %v1237_v10 = vpop.f32.mrb[51].mxu1  ;;  %6796 = vtanh.f32 %v1769_v16  ;;  %v1517_v16 = vadd.f32 %v7841_v6, %v8079_v44 }
 0x157   :  { %v8248_v3 = vadd.f32 %v8148_v50, %v1237_v10  ;;  %v6515_v2 = vpop.f32.mrb[38].mxu0  ;;  %v6789_v39 = vpop.eup %6788  ;;  %6798 = vtanh.f32 %v1774_v33  ;;  %2209 = vadd.xlane.f32.xlu1 %v2028_v62 }
 0x158   :  { %11143 = vst [vmem:[#allocation58_spill] sm:$0xff] %v8245_v59  ;;  %v8253_v38 = vadd.f32 %v6515_v2, %v8185_v20  ;;  %v907_v60 = vpop.f32.mrb[39].mxu0  ;;  %v8274_v2 = vpop.permute.xlu1 %2970 }
 0x159   :  { %v8261_v47 = vadd.f32 %v8185_v20, %v907_v60  ;;  %v6617_v10 = vpop.f32.mrb[52].mxu1  ;;  %v1782_v60 = vadd.f32 %v1654_v23, %v7914_v30  ;;  %11147 = vst [vmem:[#allocation62_spill] sm:$0xff] %v8274_v2  ;;  %v1588_v30 = vld [vmem:[%s11053_s5 + $0x20] sm:$0xff]  ;;  %v8286_v23 = vpop.permute.xlu0 %2982 }
 0x15a   :  { %11145 = vst [vmem:[#allocation60_spill] sm:$0xff] %v8253_v38  ;;  %v8267_v27 = vadd.f32 %v6617_v10, %v8148_v50  ;;  %v1247_v61 = vpop.f32.mrb[53].mxu1  ;;  %v2031_v38 = vmul.f32 %v6789_v39, %v7957_v21  ;;  %11149 = vst [vmem:[#allocation64_spill] sm:$0xff] %v8286_v23  ;;  %v1647_v23 = vld [vmem:[%s11053_s5 + $0x1f8] sm:$0xff]  ;;  %v1716_v2 = vadd.f32 %v1588_v30, %v7920_v58 }
 0x15b   :  { %v8271_v51 = vadd.f32 %v8148_v50, %v1247_v61  ;;  %v6518_v0 = vpop.f32.mrb[40].mxu0  ;;  %6800 = vtanh.f32 %v1782_v60 }
 0x15c   :  { %11146 = vst [vmem:[#allocation61_spill] sm:$0xff] %v8267_v27  ;;  %v8278_v59 = vadd.f32 %v6518_v0, %v8185_v20  ;;  %v917_v10 = vpop.f32.mrb[41].mxu0  ;;  %v1771_v27 = vadd.f32 %v1643_v57, %v1515_v7  ;;  %2215 = vadd.xlane.f32.xlu0 %v2031_v38  ;;  %v1645_v7 = vld [vmem:[%s11053_s5 + $0x1e8] sm:$0xff]  ;;  %v6791_v0 = vpop.eup %6790 }
 0x15d   :  { %v8281_v29 = vadd.f32 %v8185_v20, %v917_v10  ;;  %v6620_v61 = vpop.f32.mrb[54].mxu1  ;;  %v1519_v10 = vadd.f32 %v7845_v9, %v8079_v44  ;;  %v1656_v9 = vld [vmem:[%s11053_s5 + $0x240] sm:$0xff]  ;;  %v8315_v60 = vpop.permute.xlu1 %2978  ;;  %v1773_v44 = vadd.f32 %v1645_v7, %v1517_v16 }
 0x15e   :  { %11148 = vst [vmem:[#allocation63_spill] sm:$0xff] %v8278_v59  ;;  %v8291_v39 = vadd.f32 %v6620_v61, %v8148_v50  ;;  %v1257_v33 = vpop.f32.mrb[55].mxu1  ;;  %v6793_v61 = vpop.eup %6792  ;;  %6802 = vtanh.f32 %v1771_v27  ;;  %11154 = vst [vmem:[#allocation69_spill] sm:$0xff] %v8315_v60  ;;  %v1784_v7 = vadd.f32 %v1656_v9, %v7926_v37 }
 0x15f   :  { %v8297_v57 = vadd.f32 %v8148_v50, %v1257_v33  ;;  %v6521_v62 = vpop.f32.mrb[42].mxu0  ;;  %v2030_v33 = vmul.f32 %v6791_v0, %v7957_v21  ;;  %v6795_v30 = vpop.eup %6794  ;;  %6804 = vtanh.f32 %v1716_v2 }
 0x160   :  { %11150 = vst [vmem:[#allocation65_spill] sm:$0xff] %v8291_v39  ;;  %v8302_v38 = vadd.f32 %v6521_v62, %v8185_v20  ;;  %v927_v6 = vpop.f32.mrb[43].mxu0  ;;  %v2033_v62 = vmul.f32 %v6793_v61, %v7957_v21  ;;  %6806 = vtanh.f32 %v1773_v44 }
 0x161   :  { %11151 = vst [vmem:[#allocation66_spill] sm:$0xff] %v8297_v57  ;;  %v8310_v39 = vadd.f32 %v8185_v20, %v927_v6  ;;  %v6623_v59 = vpop.f32.mrb[56].mxu1  ;;  %2213 = vadd.xlane.f32.xlu1 %v2030_v33  ;;  %v1415_v6 = vcombine.high %v7870_v31, %v7870_v31  ;;  %v8326_v57 = vpop.permute.xlu0 %2990 }
 0x162   :  { %11152 = vst [vmem:[#allocation67_spill] sm:$0xff] %v8302_v38  ;;  %v8319_v38 = vadd.f32 %v6623_v59, %v8148_v50  ;;  %v1267_v58 = vpop.f32.mrb[57].mxu1  ;;  %11155 = vst [vmem:[#allocation70_spill] sm:$0xff] %v8326_v57  ;;  %2219 = vadd.xlane.f32.xlu0 %v2033_v62  ;;  %v1589_v59 = vld [vmem:[%s11053_s5 + $0x28] sm:$0xff]  ;;  %v6797_v31 = vpop.eup %6796 }
 0x163   :  { %11153 = vst [vmem:[#allocation68_spill] sm:$0xff] %v8310_v39  ;;  %v8322_v27 = vadd.f32 %v8148_v50, %v1267_v58  ;;  %v6524_v0 = vpop.f32.mrb[44].mxu0  ;;  %v1775_v39 = vadd.f32 %v1647_v23, %v1519_v10  ;;  %v1590_v23 = vld [vmem:[%s11053_s5 + $0x30] sm:$0xff]  ;;  %v2035_v10 = vmul.f32 %v6795_v30, %v7957_v21  ;;  %v6799_v57 = vpop.eup %6798  ;;  %v2032_v2 = vmul.f32 %v6797_v31, %v7957_v21 }
 0x164   :  { %v8329_v61 = vadd.f32 %v6524_v0, %v8185_v20  ;;  %v937_v16 = vpop.f32.mrb[45].mxu0  ;;  %v1717_v60 = vadd.f32 %v1589_v59, %v7917_v32  ;;  %v1658_v59 = vld [vmem:[%s11053_s5 + $0x250] sm:$0xff] }
 0x165   :  { %v8336_v33 = vadd.f32 %v8185_v20, %v937_v16  ;;  %v6626_v58 = vpop.f32.mrb[58].mxu1  ;;  %v8350_v16 = vrot.slane %v1415_v6, %v7299_v54  ;;  %6808 = vtanh.f32 %v1775_v39  ;;  %2217 = vadd.xlane.f32.xlu1 %v2032_v2  ;;  %v6801_v32 = vpop.eup %6800 }
 0x166   :  { %11156 = vst [vmem:[#allocation71_spill] sm:$0xff] %v8329_v61  ;;  %v8343_v62 = vadd.f32 %v6626_v58, %v8148_v50  ;;  %v1277_v0 = vpop.f32.mrb[59].mxu1  ;;  %v8353_v61 = vpop.permute.xlu1 %2986  ;;  %2223 = vadd.xlane.f32.xlu0 %v2035_v10  ;;  %v1657_v58 = vld [vmem:[%s11053_s5 + $0x248] sm:$0xff]  ;;  %6810 = vtanh.f32 %v1784_v7  ;;  %v2037_v10 = vmul.f32 %v6799_v57, %v7957_v21  ;;  %v1591_v57 = vld [vmem:[%s11053_s5 + $0x38] sm:$0xff] }
 0x167   :  { %v8347_v37 = vadd.f32 %v8148_v50, %v1277_v0  ;;  %v6527_v9 = vpop.f32.mrb[46].mxu0  ;;  %11157 = vst [vmem:[#allocation72_spill] sm:$0xff] %v8353_v61  ;;  %v1718_v50 = vadd.f32 %v1590_v23, %v7940_v40  ;;  %v8368_v31 = vpop.permute.xlu0 %2998  ;;  %6812 = vtanh.f32 %v1717_v60  ;;  %v1785_v2 = vadd.f32 %v1657_v58, %v7923_v36  ;;  %v1592_v36 = vld [vmem:[%s11053_s5 + $0x40] sm:$0xff] }
 0x168   :  { %v8356_v44 = vadd.f32 %v6527_v9, %v8185_v20  ;;  %v947_v30 = vpop.f32.mrb[47].mxu0  ;;  %11158 = vst [vmem:[#allocation73_spill] sm:$0xff] %v8368_v31  ;;  %v6803_v9 = vpop.eup %6802 }
 0x169   :  { %v8363_v6 = vadd.f32 %v8185_v20, %v947_v30  ;;  %v6629_v39 = vpop.f32.mrb[60].mxu1  ;;  %v2034_v30 = vmul.f32 %v6803_v9, %v7957_v21  ;;  %6814 = vtanh.f32 %v1718_v50  ;;  %v6805_v50 = vpop.eup %6804 }
 0x16a   :  { %v8372_v0 = vadd.f32 %v6629_v39, %v8350_v16  ;;  %v1287_v7 = vpop.f32.mrb[61].mxu1  ;;  %2227 = vadd.xlane.f32.xlu0 %v2037_v10  ;;  %v1786_v39 = vadd.f32 %v1658_v59, %v7946_v12  ;;  %v8392_v58 = vpop.permute.xlu1 %2994  ;;  %v2045_v10 = vmul.f32 %v6801_v32, %v7957_v21  ;;  %6816 = vtanh.f32 %v1785_v2  ;;  %v1659_v32 = vld [vmem:[%s11053_s5 + $0x258] sm:$0xff] }
 0x16b   :  { %v8375_v40 = vadd.f32 %v8350_v16, %v1287_v7  ;;  %v6530_v23 = vpop.f32.mrb[48].mxu0  ;;  %11159 = vst [vmem:[#allocation74_spill] sm:$0xff] %v8392_v58  ;;  %2221 = vadd.xlane.f32.xlu1 %v2034_v30  ;;  %v6807_v59 = vpop.eup %6806  ;;  %v1979_v2 = vmul.f32 %v6805_v50, %v7957_v21 }
 0x16c   :  { %v8380_v54 = vadd.f32 %v6530_v23, %v8185_v20  ;;  %v957_v31 = vpop.f32.mrb[49].mxu0  ;;  %v8404_v61 = vpop.permute.xlu0 %3006  ;;  %6818 = vtanh.f32 %v1786_v39 }
 0x16d   :  { %v8387_v7 = vadd.f32 %v8185_v20, %v957_v31  ;;  %v6632_v60 = vpop.f32.mrb[62].mxu1  ;;  %v1719_v31 = vadd.f32 %v1591_v57, %v7929_v42  ;;  %11162 = vst [vmem:[#allocation77_spill] sm:$0xff] %v8404_v61  ;;  %v1660_v42 = vld [vmem:[%s11053_s5 + $0x260] sm:$0xff] }
 0x16e   :  { %v8396_v9 = vadd.f32 %v6632_v60, %v8350_v16  ;;  %v1297_v23 = vpop.f32.mrb[63].mxu1  ;;  %2243 = vadd.xlane.f32.xlu0 %v2045_v10  ;;  %v1720_v60 = vadd.f32 %v1592_v36, %v7952_v55  ;;  %v1787_v36 = vadd.f32 %v1659_v32, %v7943_v52  ;;  %v1788_v50 = vadd.f32 %v1660_v42, %v7966_v43  ;;  %v1594_v52 = vld [vmem:[%s11053_s5 + $0x50] sm:$0xff] }
 0x16f   :  { %v8399_v12 = vadd.f32 %v8350_v16, %v1297_v23  ;;  %v8401_v20 = vpop.f32.mrb[50].mxu0  ;;  %v2036_v23 = vmul.f32 %v6807_v59, %v7957_v21  ;;  %6820 = vtanh.f32 %v1719_v31  ;;  %v8426_v59 = vpop.permute.xlu1 %3002 }
 0x170   :  { %11160 = vst [vmem:[#allocation75_spill] sm:$0xff] %v8396_v9  ;;  %11161 = vst [vmem:[#allocation76_spill] sm:$0xff] %v8401_v20  ;;  %v8406_v30 = vpop.f32.mrb[51].mxu0  ;;  %v6809_v20 = vpop.eup %6808  ;;  %6822 = vtanh.f32 %v1720_v60  ;;  %v1661_v60 = vld [vmem:[%s11053_s5 + $0x268] sm:$0xff] }
 0x171   :  { %v6635_v58 = vpop.f32.mrb[64].mxu1  ;;  %v6811_v61 = vpop.eup %6810  ;;  %2225 = vadd.xlane.f32.xlu1 %v2036_v23  ;;  %11165 = vst [vmem:[#allocation80_spill] sm:$0xff] %v8426_v59  ;;  %v2038_v23 = vmul.f32 %v6809_v20, %v7957_v21  ;;  %6824 = vtanh.f32 %v1787_v36 }
 0x172   :  { %v8418_v57 = vadd.f32 %v6635_v58, %v8350_v16  ;;  %v1307_v10 = vpop.f32.mrb[65].mxu1  ;;  %2111 = vadd.xlane.f32.xlu0 %v1979_v2  ;;  %v1593_v58 = vld [vmem:[%s11053_s5 + $0x48] sm:$0xff]  ;;  %v8438_v31 = vpop.permute.xlu0 %3014  ;;  %v2047_v32 = vmul.f32 %v6811_v61, %v7957_v21  ;;  %6826 = vtanh.f32 %v1788_v50  ;;  %v1722_v61 = vadd.f32 %v1594_v52, %v7977_v48  ;;  %v1595_v52 = vld [vmem:[%s11053_s5 + $0x58] sm:$0xff] }
 0x173   :  { %v8421_v39 = vadd.f32 %v8350_v16, %v1307_v10  ;;  %v8423_v55 = vpop.f32.mrb[52].mxu0  ;;  %11166 = vst [vmem:[#allocation81_spill] sm:$0xff] %v8438_v31  ;;  %v1721_v20 = vadd.f32 %v1593_v58, %v7949_v15 }
 0x174   :  { %11163 = vst [vmem:[#allocation78_spill] sm:$0xff] %v8418_v57  ;;  %11164 = vst [vmem:[#allocation79_spill] sm:$0xff] %v8423_v55  ;;  %v8428_v9 = vpop.f32.mrb[53].mxu0  ;;  %v6813_v57 = vpop.eup %6812 }
 0x175   :  { %v6638_v10 = vpop.f32.mrb[66].mxu1  ;;  %v6815_v55 = vpop.eup %6814  ;;  %2229 = vadd.xlane.f32.xlu1 %v2038_v23  ;;  %v1980_v42 = vmul.f32 %v6813_v57, %v7957_v21  ;;  %6828 = vtanh.f32 %v1721_v20  ;;  %v1789_v57 = vadd.f32 %v1661_v60, %v7960_v25  ;;  %v1596_v20 = vld [vmem:[%s11053_s5 + $0x60] sm:$0xff] }
 0x176   :  { %v8442_v2 = vadd.f32 %v6638_v10, %v8350_v16  ;;  %v1317_v59 = vpop.f32.mrb[67].mxu1  ;;  %2247 = vadd.xlane.f32.xlu0 %v2047_v32  ;;  %v6817_v31 = vpop.eup %6816  ;;  %v1981_v15 = vmul.f32 %v6815_v55, %v7957_v21  ;;  %6830 = vtanh.f32 %v1722_v61 }
 0x177   :  { %v8445_v43 = vadd.f32 %v8350_v16, %v1317_v59  ;;  %v1662_v59 = vld [vmem:[%s11053_s5 + $0x270] sm:$0xff]  ;;  %v8456_v23 = vpop.permute.xlu1 %3010  ;;  %v6819_v32 = vpop.eup %6818  ;;  %6832 = vtanh.f32 %v1789_v57  ;;  %v1664_v57 = vld [vmem:[%s11053_s5 + $0x280] sm:$0xff] }
 0x178   :  { %11167 = vst [vmem:[#allocation82_spill] sm:$0xff] %v8456_v23  ;;  %v8466_v50 = vpop.permute.xlu0 %3025  ;;  %v1790_v55 = vadd.f32 %v1662_v59, %v7983_v8  ;;  %v2049_v25 = vmul.f32 %v6819_v32, %v7957_v21  ;;  %v1723_v8 = vadd.f32 %v1595_v52, %v7974_v46  ;;  %v1663_v59 = vld [vmem:[%s11053_s5 + $0x278] sm:$0xff] }
 0x179   :  { %v6641_v10 = vpop.f32.mrb[68].mxu1  ;;  %2113 = vadd.xlane.f32.xlu1 %v1980_v42  ;;  %11168 = vst [vmem:[#allocation83_spill] sm:$0xff] %v8466_v50  ;;  %v6821_v42 = vpop.eup %6820 }
 0x17a   :  { %v8460_v36 = vadd.f32 %v6641_v10, %v8350_v16  ;;  %v1327_v58 = vpop.f32.mrb[69].mxu1  ;;  %2115 = vadd.xlane.f32.xlu0 %v1981_v15  ;;  %v2048_v10 = vmul.f32 %v6817_v31, %v7957_v21  ;;  %6834 = vtanh.f32 %v1790_v55  ;;  %v1982_v32 = vmul.f32 %v6821_v42, %v7957_v21  ;;  %v1597_v42 = vld [vmem:[%s11053_s5 + $0x68] sm:$0xff] }
 0x17b   :  { %v8463_v48 = vadd.f32 %v8350_v16, %v1327_v58  ;;  %v6823_v58 = vpop.eup %6822  ;;  %v8484_v31 = vpop.permute.xlu1 %3018  ;;  %6836 = vtanh.f32 %v1723_v8  ;;  %v1791_v55 = vadd.f32 %v1663_v59, %v7980_v13 }
 0x17c   :  { %11169 = vst [vmem:[#allocation84_spill] sm:$0xff] %v8484_v31  ;;  %v1983_v46 = vmul.f32 %v6823_v58, %v7957_v21 }
 0x17d   :  { %v6644_v23 = vpop.f32.mrb[70].mxu1  ;;  %2249 = vadd.xlane.f32.xlu1 %v2048_v10  ;;  %v6825_v10 = vpop.eup %6824 }
 0x17e   :  { %v8478_v60 = vadd.f32 %v6644_v23, %v8350_v16  ;;  %v1337_v15 = vpop.f32.mrb[71].mxu1  ;;  %2251 = vadd.xlane.f32.xlu0 %v2049_v25  ;;  %v1724_v23 = vadd.f32 %v1596_v20, %v7997_v56  ;;  %v6827_v31 = vpop.eup %6826  ;;  %v1792_v20 = vadd.f32 %v1664_v57, %v8007_v53  ;;  %v1665_v57 = vld [vmem:[%s11053_s5 + $0x288] sm:$0xff] }
 0x17f   :  { %v8481_v61 = vadd.f32 %v8350_v16, %v1337_v15  ;;  %v8494_v15 = vpop.permute.xlu0 %3033  ;;  %v2051_v13 = vmul.f32 %v6827_v31, %v7957_v21 }
 0x180   :  { %11170 = vst [vmem:[#allocation85_spill] sm:$0xff] %v8494_v15  ;;  %6838 = vtanh.f32 %v1724_v23  ;;  %v6829_v15 = vpop.eup %6828  ;;  %v1725_v23 = vadd.f32 %v1597_v42, %v7994_v24  ;;  %v1793_v42 = vadd.f32 %v1665_v57, %v8003_v34 }
 0x181   :  { %v6647_v50 = vpop.f32.mrb[72].mxu1  ;;  %2117 = vadd.xlane.f32.xlu1 %v1982_v32  ;;  %v1598_v32 = vld [vmem:[%s11053_s5 + $0x70] sm:$0xff]  ;;  %6840 = vtanh.f32 %v1791_v55 }
 0x182   :  { %v8498_v52 = vadd.f32 %v6647_v50, %v8350_v16  ;;  %v1347_v25 = vpop.f32.mrb[73].mxu1  ;;  %2119 = vadd.xlane.f32.xlu0 %v1983_v46  ;;  %v2050_v50 = vmul.f32 %v6825_v10, %v7957_v21  ;;  %v6831_v46 = vpop.eup %6830  ;;  %6842 = vtanh.f32 %v1792_v20  ;;  %v1726_v31 = vadd.f32 %v1598_v32, %v8020_v26  ;;  %v1599_v26 = vld [vmem:[%s11053_s5 + $0x78] sm:$0xff] }
 0x183   :  { %v8501_v56 = vadd.f32 %v8350_v16, %v1347_v25  ;;  %v8512_v25 = vpop.permute.xlu1 %3029  ;;  %v8522_v10 = vpop.permute.xlu0 %3041  ;;  %v1985_v55 = vmul.f32 %v6831_v46, %v7957_v21  ;;  %6844 = vtanh.f32 %v1725_v23  ;;  %v1727_v23 = vadd.f32 %v1599_v26, %v8016_v35 }
 0x184   :  { %11171 = vst [vmem:[#allocation86_spill] sm:$0xff] %v8512_v25  ;;  %v6833_v25 = vpop.eup %6832  ;;  %6846 = vtanh.f32 %v1726_v31 }
 0x185   :  { %v6650_v58 = vpop.f32.mrb[74].mxu1  ;;  %2253 = vadd.xlane.f32.xlu1 %v2050_v50  ;;  %v6835_v24 = vpop.eup %6834  ;;  %v2052_v20 = vmul.f32 %v6833_v25, %v7957_v21  ;;  %6848 = vtanh.f32 %v1793_v42 }
 0x186   :  { %v8516_v8 = vadd.f32 %v6650_v58, %v8350_v16  ;;  %v1357_v59 = vpop.f32.mrb[75].mxu1  ;;  %2255 = vadd.xlane.f32.xlu0 %v2051_v13  ;;  %v1984_v58 = vmul.f32 %v6829_v15, %v7957_v21  ;;  %v6837_v32 = vpop.eup %6836  ;;  %v1600_v13 = vld [vmem:[%s11053_s5 + $0x80] sm:$0xff]  ;;  %v2053_v34 = vmul.f32 %v6835_v24, %v7957_v21 }
 0x187   :  { %v8519_v53 = vadd.f32 %v8350_v16, %v1357_v59  ;;  %v1666_v16 = vld [vmem:[%s11053_s5 + $0x290] sm:$0xff]  ;;  %v8534_v50 = vpop.permute.xlu1 %3037  ;;  %v8544_v59 = vpop.permute.xlu0 %3049  ;;  %v1728_v25 = vadd.f32 %v1600_v13, %v8041_v22  ;;  %v1986_v57 = vmul.f32 %v6837_v32, %v7957_v21  ;;  %v1601_v22 = vld [vmem:[%s11053_s5 + $0x88] sm:$0xff] }
 0x188   :  { %v1794_v15 = vadd.f32 %v1666_v16, %v8033_v1  ;;  %v1667_v1 = vld [vmem:[%s11053_s5 + $0x298] sm:$0xff]  ;;  %v1602_v32 = vld [vmem:[%s11053_s5 + $0x90] sm:$0xff] }
 0x189   :  { %2121 = vadd.xlane.f32.xlu1 %v1984_v58  ;;  %v1668_v58 = vld [vmem:[%s11053_s5 + $0x2a0] sm:$0xff]  ;;  %v1795_v24 = vadd.f32 %v1667_v1, %v8029_v17 }
 0x18a   :  { %2123 = vadd.xlane.f32.xlu0 %v1985_v55  ;;  %v6839_v46 = vpop.eup %6838  ;;  %6850 = vtanh.f32 %v1794_v15  ;;  %v1796_v26 = vadd.f32 %v1668_v58, %v8049_v4  ;;  %v1669_v4 = vld [vmem:[%s11053_s5 + $0x2a8] sm:$0xff] }
 0x18b   :  { %v6841_v31 = vpop.eup %6840  ;;  %v8556_v16 = vpop.permute.xlu1 %3045  ;;  %v1987_v55 = vmul.f32 %v6839_v46, %v7957_v21  ;;  %6852 = vtanh.f32 %v1727_v23  ;;  %v1730_v23 = vadd.f32 %v1602_v32, %v8059_v45  ;;  %v1797_v45 = vadd.f32 %v1669_v4, %v8046_v11  ;;  %v11173_v32 = vld [vmem:[#allocation20_spill] sm:$0xff] }
 0x18c   :  { %v6843_v35 = vpop.eup %6842  ;;  %v8560_v42 = vpop.permute.xlu0 %3057  ;;  %6854 = vtanh.f32 %v1728_v25  ;;  %v2054_v15 = vmul.f32 %v6841_v31, %v7957_v21 }
 0x18d   :  { %2257 = vadd.xlane.f32.xlu1 %v2052_v20  ;;  %v6845_v20 = vpop.eup %6844  ;;  %v2055_v13 = vmul.f32 %v6843_v35, %v7957_v21  ;;  %6856 = vtanh.f32 %v1795_v24 }
 0x18e   :  { %2259 = vadd.xlane.f32.xlu0 %v2053_v34  ;;  %v6847_v17 = vpop.eup %6846  ;;  %v1729_v34 = vadd.f32 %v1601_v22, %v8037_v41  ;;  %6858 = vtanh.f32 %v1796_v26  ;;  %v1988_v1 = vmul.f32 %v6845_v20, %v7957_v21  ;;  %v8587_v41 = vld [vmem:[%s11057_s9] ss:$0 sm:$0xff]  ;;  %v1603_v21 = vld [vmem:[%s11053_s5 + $0x98] sm:$0xff] }
 0x18f   :  { %v8572_v46 = vpop.permute.xlu1 %3053  ;;  %v6849_v25 = vpop.eup %6848  ;;  %v1989_v58 = vmul.f32 %v8587_v41, %v6847_v17  ;;  %v1604_v26 = vld [vmem:[%s11053_s5 + $0xa0] sm:$0xff] }
 0x190   :  { %v8582_v31 = vpop.permute.xlu0 %3065  ;;  %6860 = vtanh.f32 %v1729_v34  ;;  %v2056_v24 = vmul.f32 %v8587_v41, %v6849_v25  ;;  %v11175_v34 = vld [vmem:[#allocation24_spill] sm:$0xff] }
 0x191   :  { %2125 = vadd.xlane.f32.xlu1 %v1986_v57  ;;  %v1670_v57 = vld [vmem:[%s11053_s5 + $0x2b0] sm:$0xff]  ;;  %6862 = vtanh.f32 %v1730_v23  ;;  %v1732_v4 = vadd.f32 %v1604_v26, %v11175_v34  ;;  %v1672_v25 = vld [vmem:[%s11053_s5 + $0x2c0] sm:$0xff] }
 0x192   :  { %2127 = vadd.xlane.f32.xlu0 %v1987_v55  ;;  %v1798_v35 = vadd.f32 %v1670_v57, %v8067_v5  ;;  %6864 = vtanh.f32 %v1797_v45  ;;  %v1671_v5 = vld [vmem:[%s11053_s5 + $0x2b8] sm:$0xff] }
 0x193   :  { %v11180_v34 = vld [vmem:[#allocation23_spill] sm:$0xff] }
 0x194   :  { %v6851_v55 = vpop.eup %6850  ;;  %v8603_v17 = vpop.permute.xlu0 %3073  ;;  %6866 = vtanh.f32 %v1798_v35  ;;  %v1605_v35 = vld [vmem:[%s11053_s5 + $0xa8] sm:$0xff] }
 0x195   :  { %2261 = vadd.xlane.f32.xlu1 %v2054_v15  ;;  %v6853_v22 = vpop.eup %6852  ;;  %v8599_v15 = vpop.permute.xlu1 %3061  ;;  %v2057_v20 = vmul.f32 %v8587_v41, %v6851_v55  ;;  %11174 = vst [vmem:[#allocation20_spill] sm:$0xff] %v8603_v17  ;;  %v11176_v55 = vld [vmem:[#allocation21_spill] sm:$0xff] }
 0x196   :  { %2263 = vadd.xlane.f32.xlu0 %v2055_v13  ;;  %11172 = vst [vmem:[#allocation87_spill] sm:$0xff] %v8599_v15  ;;  %v6855_v11 = vpop.eup %6854  ;;  %v1731_v13 = vadd.f32 %v1603_v21, %v11173_v32  ;;  %v1990_v23 = vmul.f32 %v8587_v41, %v6853_v22  ;;  %v1799_v45 = vadd.f32 %v1671_v5, %v11176_v55 }
 0x197   :  { %v1991_v57 = vmul.f32 %v8587_v41, %v6855_v11  ;;  %v1606_v11 = vld [vmem:[%s11053_s5 + $0xb0] sm:$0xff] }
 0x198   :  { %6868 = vtanh.f32 %v1731_v13  ;;  %v8625_v32 = vpop.permute.xlu0 %3081 }
 0x199   :  { %2129 = vadd.xlane.f32.xlu1 %v1988_v1  ;;  %v6857_v1 = vpop.eup %6856  ;;  %v8615_v21 = vpop.permute.xlu1 %3069  ;;  %6870 = vtanh.f32 %v1732_v4  ;;  %11179 = vst [vmem:[#allocation21_spill] sm:$0xff] %v8625_v32  ;;  %v1673_v4 = vld [vmem:[%s11053_s5 + $0x2c8] sm:$0xff] }
 0x19a   :  { %2131 = vadd.xlane.f32.xlu0 %v1989_v58  ;;  %v6859_v58 = vpop.eup %6858  ;;  %11177 = vst [vmem:[#allocation24_spill] sm:$0xff] %v8615_v21  ;;  %v2058_v26 = vmul.f32 %v8587_v41, %v6857_v1  ;;  %6872 = vtanh.f32 %v1799_v45  ;;  %v11181_v1 = vld [vmem:[#allocation30_spill] sm:$0xff] }
 0x19b   :  { %v2059_v13 = vmul.f32 %v8587_v41, %v6859_v58  ;;  %v1674_v58 = vld [vmem:[%s11053_s5 + $0x2d0] sm:$0xff] }
 0x19d   :  { %2265 = vadd.xlane.f32.xlu1 %v2056_v24  ;;  %v11178_v24 = vld [vmem:[#allocation28_spill] sm:$0xff] }
 0x19e   :  { %2267 = vadd.xlane.f32.xlu0 %v2057_v20  ;;  %v1800_v22 = vadd.f32 %v1672_v25, %v11178_v24  ;;  %v6861_v20 = vpop.eup %6860  ;;  %v1734_v25 = vadd.f32 %v1606_v11, %v11181_v1  ;;  %v8637_v24 = vpop.permute.xlu1 %3077 }
 0x19f   :  { %v6863_v5 = vpop.eup %6862  ;;  %11182 = vst [vmem:[#allocation28_spill] sm:$0xff] %v8637_v24 }
 0x1a0   :  { %6874 = vtanh.f32 %v1800_v22  ;;  %v6865_v55 = vpop.eup %6864  ;;  %v1993_v45 = vmul.f32 %v8587_v41, %v6863_v5  ;;  %v1607_v22 = vld [vmem:[%s11053_s5 + $0xb8] sm:$0xff]  ;;  %v1608_v5 = vld [vmem:[%s11053_s5 + $0xc0] sm:$0xff] }
 0x1a1   :  { %2133 = vadd.xlane.f32.xlu1 %v1990_v23  ;;  %v1733_v23 = vadd.f32 %v1605_v35, %v11180_v34  ;;  %v6867_v35 = vpop.eup %6866  ;;  %v8641_v34 = vpop.permute.xlu0 %3092  ;;  %v2060_v1 = vmul.f32 %v8587_v41, %v6865_v55  ;;  %v1736_v55 = vadd.f32 %v1608_v5, %v8116_v28  ;;  %v1609_v28 = vld [vmem:[%s11053_s5 + $0xc8] sm:$0xff] }
 0x1a2   :  { %2135 = vadd.xlane.f32.xlu0 %v1991_v57  ;;  %v1992_v57 = vmul.f32 %v8587_v41, %v6861_v20  ;;  %11184 = vst [vmem:[#allocation23_spill] sm:$0xff] %v8641_v34  ;;  %v11185_v20 = vld [vmem:[#allocation33_spill] sm:$0xff]  ;;  %v6869_v24 = vpop.eup %6868 }
 0x1a3   :  { %6876 = vtanh.f32 %v1733_v23  ;;  %v1802_v11 = vadd.f32 %v1674_v58, %v11185_v20  ;;  %v2061_v23 = vmul.f32 %v8587_v41, %v6867_v35  ;;  %v1994_v58 = vmul.f32 %v8587_v41, %v6869_v24  ;;  %v1676_v35 = vld [vmem:[%s11053_s5 + $0x2e0] sm:$0xff]  ;;  %v11190_v24 = vld [vmem:[#allocation37_spill] sm:$0xff] }
 0x1a4   :  { %6878 = vtanh.f32 %v1734_v25  ;;  %v1675_v25 = vld [vmem:[%s11053_s5 + $0x2d8] sm:$0xff] }
 0x1a5   :  { %2269 = vadd.xlane.f32.xlu1 %v2058_v26  ;;  %v11183_v26 = vld [vmem:[#allocation27_spill] sm:$0xff] }
 0x1a6   :  { %2271 = vadd.xlane.f32.xlu0 %v2059_v13  ;;  %v1801_v13 = vadd.f32 %v1673_v4, %v11183_v26  ;;  %v6871_v4 = vpop.eup %6870  ;;  %v8653_v26 = vpop.permute.xlu1 %3085 }
 0x1a7   :  { %11187 = vst [vmem:[#allocation30_spill] sm:$0xff] %v8653_v26  ;;  %v6873_v20 = vpop.eup %6872 }
 0x1a8   :  { %6880 = vtanh.f32 %v1801_v13  ;;  %v8663_v13 = vpop.permute.xlu0 %3100  ;;  %v2062_v5 = vmul.f32 %v8587_v41, %v6873_v20  ;;  %v11194_v20 = vld [vmem:[#allocation40_spill] sm:$0xff] }
 0x1a9   :  { %2137 = vadd.xlane.f32.xlu1 %v1992_v57  ;;  %v11186_v57 = vld [vmem:[#allocation29_spill] sm:$0xff]  ;;  %6882 = vtanh.f32 %v1802_v11  ;;  %11188 = vst [vmem:[#allocation27_spill] sm:$0xff] %v8663_v13  ;;  %v1804_v11 = vadd.f32 %v1676_v35, %v11190_v24 }
 0x1aa   :  { %2139 = vadd.xlane.f32.xlu0 %v1993_v45  ;;  %v1735_v45 = vadd.f32 %v1607_v22, %v11186_v57  ;;  %v1995_v22 = vmul.f32 %v8587_v41, %v6871_v4  ;;  %v1610_v4 = vld [vmem:[%s11053_s5 + $0xd0] sm:$0xff]  ;;  %v8675_v13 = vpop.permute.xlu1 %3096 }
 0x1ab   :  { %11191 = vst [vmem:[#allocation33_spill] sm:$0xff] %v8675_v13  ;;  %v1738_v35 = vadd.f32 %v1610_v4, %v11194_v20 }
 0x1ac   :  { %6884 = vtanh.f32 %v1735_v45 }
 0x1ad   :  { %2273 = vadd.xlane.f32.xlu1 %v2060_v1  ;;  %v6875_v1 = vpop.eup %6874  ;;  %6886 = vtanh.f32 %v1736_v55  ;;  %v1677_v55 = vld [vmem:[%s11053_s5 + $0x2e8] sm:$0xff] }
 0x1ae   :  { %2275 = vadd.xlane.f32.xlu0 %v2061_v23  ;;  %v11189_v23 = vld [vmem:[#allocation32_spill] sm:$0xff]  ;;  %v6877_v26 = vpop.eup %6876  ;;  %v2063_v45 = vmul.f32 %v8587_v41, %v6875_v1  ;;  %v1678_v1 = vld [vmem:[%s11053_s5 + $0x2f0] sm:$0xff] }
 0x1af   :  { %v1803_v57 = vadd.f32 %v1675_v25, %v11189_v23  ;;  %v6879_v25 = vpop.eup %6878  ;;  %v8679_v23 = vpop.permute.xlu0 %3108  ;;  %v1996_v24 = vmul.f32 %v8587_v41, %v6877_v26  ;;  %v11197_v26 = vld [vmem:[#allocation43_spill] sm:$0xff] }
 0x1b0   :  { %11193 = vst [vmem:[#allocation29_spill] sm:$0xff] %v8679_v23  ;;  %v1806_v4 = vadd.f32 %v1678_v1, %v11197_v26 }
 0x1b1   :  { %2141 = vadd.xlane.f32.xlu1 %v1994_v58  ;;  %6888 = vtanh.f32 %v1803_v57  ;;  %v11192_v58 = vld [vmem:[#allocation35_spill] sm:$0xff]  ;;  %v1997_v57 = vmul.f32 %v8587_v41, %v6879_v25 }
 0x1b2   :  { %2143 = vadd.xlane.f32.xlu0 %v1995_v22  ;;  %v1737_v22 = vadd.f32 %v1609_v28, %v11192_v58  ;;  %6890 = vtanh.f32 %v1804_v11  ;;  %v6881_v13 = vpop.eup %6880  ;;  %v8691_v58 = vpop.permute.xlu1 %3104  ;;  %v1611_v11 = vld [vmem:[%s11053_s5 + $0xd8] sm:$0xff]  ;;  %v1612_v25 = vld [vmem:[%s11053_s5 + $0xe0] sm:$0xff] }
 0x1b3   :  { %v6883_v28 = vpop.eup %6882  ;;  %11196 = vst [vmem:[#allocation32_spill] sm:$0xff] %v8691_v58  ;;  %v2064_v20 = vmul.f32 %v8587_v41, %v6881_v13  ;;  %v11200_v13 = vld [vmem:[#allocation45_spill] sm:$0xff] }
 0x1b4   :  { %6892 = vtanh.f32 %v1737_v22  ;;  %v8701_v22 = vpop.permute.xlu0 %3116  ;;  %v1740_v1 = vadd.f32 %v1612_v25, %v11200_v13 }
 0x1b5   :  { %2277 = vadd.xlane.f32.xlu1 %v2062_v5  ;;  %v11195_v5 = vld [vmem:[#allocation36_spill] sm:$0xff]  ;;  %6894 = vtanh.f32 %v1738_v35  ;;  %11198 = vst [vmem:[#allocation37_spill] sm:$0xff] %v8701_v22  ;;  %v1679_v35 = vld [vmem:[%s11053_s5 + $0x2f8] sm:$0xff] }
 0x1b6   :  { %2279 = vadd.xlane.f32.xlu0 %v2063_v45  ;;  %v1805_v45 = vadd.f32 %v1677_v55, %v11195_v5  ;;  %v6885_v23 = vpop.eup %6884  ;;  %v2065_v55 = vmul.f32 %v8587_v41, %v6883_v28  ;;  %v1680_v28 = vld [vmem:[%s11053_s5 + $0x300] sm:$0xff]  ;;  %v8713_v22 = vpop.permute.xlu1 %3112 }
 0x1b7   :  { %v1998_v26 = vmul.f32 %v8587_v41, %v6885_v23  ;;  %11201 = vst [vmem:[#allocation35_spill] sm:$0xff] %v8713_v22  ;;  %v1613_v23 = vld [vmem:[%s11053_s5 + $0xe8] sm:$0xff]  ;;  %v1808_v25 = vadd.f32 %v1680_v28, %v8174_v63 }
 0x1b8   :  { %6896 = vtanh.f32 %v1805_v45  ;;  %v1681_v63 = vld [vmem:[%s11053_s5 + $0x308] sm:$0xff] }
 0x1b9   :  { %2145 = vadd.xlane.f32.xlu1 %v1996_v24  ;;  %v6887_v24 = vpop.eup %6886  ;;  %6898 = vtanh.f32 %v1806_v4 }
 0x1ba   :  { %2147 = vadd.xlane.f32.xlu0 %v1997_v57  ;;  %v11199_v57 = vld [vmem:[#allocation39_spill] sm:$0xff]  ;;  %v1999_v45 = vmul.f32 %v8587_v41, %v6887_v24  ;;  %v1614_v24 = vld [vmem:[%s11053_s5 + $0xf0] sm:$0xff] }
 0x1bb   :  { %v1739_v5 = vadd.f32 %v1611_v11, %v11199_v57  ;;  %v6889_v58 = vpop.eup %6888  ;;  %v8716_v11 = vpop.xlane.xlu0 %2103 }
 0x1bc   :  { %v2066_v57 = vmul.f32 %v8587_v41, %v6889_v58  ;;  %v1742_v58 = vadd.f32 %v1614_v24, %v8182_v18  ;;  %v1615_v18 = vld [vmem:[%s11053_s5 + $0xf8] sm:$0xff] }
 0x1bd   :  { %2281 = vadd.xlane.f32.xlu1 %v2064_v20  ;;  %v6891_v20 = vpop.eup %6890  ;;  %6900 = vtanh.f32 %v1739_v5  ;;  %v8728_v5 = vpop.xlane.xlu1 %2109 }
 0x1be   :  { %2283 = vadd.xlane.f32.xlu0 %v2065_v55  ;;  %v11202_v55 = vld [vmem:[#allocation42_spill] sm:$0xff]  ;;  %6902 = vtanh.f32 %v1740_v1  ;;  %v6893_v13 = vpop.eup %6892 }
 0x1bf   :  { %v1807_v4 = vadd.f32 %v1679_v35, %v11202_v55  ;;  %v6895_v35 = vpop.eup %6894  ;;  %v8731_v1 = vpop.xlane.xlu0 %2105  ;;  %v2000_v28 = vmul.f32 %v8587_v41, %v6893_v13 }
 0x1c1   :  { %2149 = vadd.xlane.f32.xlu1 %v1998_v26  ;;  %v2067_v26 = vmul.f32 %v8587_v41, %v6891_v20  ;;  %6904 = vtanh.f32 %v1807_v4  ;;  %v2001_v4 = vmul.f32 %v8587_v41, %v6895_v35  ;;  %v8743_v22 = vpop.xlane.xlu1 %2233  ;;  %v1616_v35 = vld [vmem:[%s11053_s5 + $0x100] sm:$0xff] }
 0x1c2   :  { %2151 = vadd.xlane.f32.xlu0 %v1999_v45  ;;  %v11203_v45 = vld [vmem:[#allocation44_spill] sm:$0xff]  ;;  %6906 = vtanh.f32 %v1808_v25  ;;  %v6897_v20 = vpop.eup %6896  ;;  %11205 = vst [vmem:[#allocation40_spill] sm:$0xff] %v8743_v22  ;;  %v11206_v25 = vld [vmem:[#allocation51_spill] sm:$0xff] }
 0x1c3   :  { %v1741_v55 = vadd.f32 %v1613_v23, %v11203_v45  ;;  %v6899_v23 = vpop.eup %6898  ;;  %v2068_v24 = vmul.f32 %v8587_v41, %v6897_v20  ;;  %v11209_v20 = vld [vmem:[#allocation54_spill] sm:$0xff] }
 0x1c5   :  { %2285 = vadd.xlane.f32.xlu1 %v2066_v57  ;;  %v1682_v57 = vld [vmem:[%s11053_s5 + $0x310] sm:$0xff]  ;;  %6908 = vtanh.f32 %v1741_v55  ;;  %v2069_v55 = vmul.f32 %v8587_v41, %v6899_v23  ;;  %v1684_v23 = vld [vmem:[%s11053_s5 + $0x320] sm:$0xff] }
 0x1c6   :  { %2287 = vadd.xlane.f32.xlu0 %v2067_v26  ;;  %v11204_v26 = vld [vmem:[#allocation47_spill] sm:$0xff]  ;;  %6910 = vtanh.f32 %v1742_v58  ;;  %v1810_v13 = vadd.f32 %v1682_v57, %v11206_v25  ;;  %v1744_v57 = vadd.f32 %v1616_v35, %v11209_v20  ;;  %v1812_v35 = vadd.f32 %v1684_v23, %v8223_v14  ;;  %v1685_v14 = vld [vmem:[%s11053_s5 + $0x328] sm:$0xff] }
 0x1c7   :  { %v1809_v45 = vadd.f32 %v1681_v63, %v11204_v26  ;;  %v6901_v34 = vpop.eup %6900  ;;  %v8754_v63 = vpop.xlane.xlu0 %2231  ;;  %v1683_v58 = vld [vmem:[%s11053_s5 + $0x318] sm:$0xff] }
 0x1c8   :  { %11207 = vst [vmem:[#allocation36_spill] sm:$0xff] %v8754_v63  ;;  %v2002_v25 = vmul.f32 %v8587_v41, %v6901_v34  ;;  %v1617_v34 = vld [vmem:[%s11053_s5 + $0x108] sm:$0xff] }
 0x1c9   :  { %2153 = vadd.xlane.f32.xlu1 %v2000_v28  ;;  %v6903_v28 = vpop.eup %6902  ;;  %6912 = vtanh.f32 %v1809_v45  ;;  %v8766_v45 = vpop.xlane.xlu1 %2237 }
 0x1ca   :  { %2155 = vadd.xlane.f32.xlu0 %v2001_v4  ;;  %v11208_v4 = vld [vmem:[#allocation49_spill] sm:$0xff]  ;;  %6914 = vtanh.f32 %v1810_v13  ;;  %11210 = vst [vmem:[#allocation43_spill] sm:$0xff] %v8766_v45 }
 0x1cb   :  { %v1743_v26 = vadd.f32 %v1615_v18, %v11208_v4  ;;  %v6905_v22 = vpop.eup %6904  ;;  %v8769_v13 = vpop.xlane.xlu0 %2235 }
 0x1cc   :  { %v6907_v18 = vpop.eup %6906  ;;  %11212 = vst [vmem:[#allocation39_spill] sm:$0xff] %v8769_v13  ;;  %v2070_v20 = vmul.f32 %v8587_v41, %v6905_v22 }
 0x1cd   :  { %2289 = vadd.xlane.f32.xlu1 %v2068_v24  ;;  %v2003_v24 = vmul.f32 %v8587_v41, %v6903_v28  ;;  %6916 = vtanh.f32 %v1743_v26  ;;  %v2071_v26 = vmul.f32 %v8587_v41, %v6907_v18  ;;  %v8781_v45 = vpop.xlane.xlu1 %2241  ;;  %v1686_v18 = vld [vmem:[%s11053_s5 + $0x330] sm:$0xff] }
 0x1ce   :  { %2291 = vadd.xlane.f32.xlu0 %v2069_v55  ;;  %v11211_v55 = vld [vmem:[#allocation50_spill] sm:$0xff]  ;;  %6918 = vtanh.f32 %v1744_v57  ;;  %11214 = vst [vmem:[#allocation45_spill] sm:$0xff] %v8781_v45 }
 0x1cf   :  { %v1811_v4 = vadd.f32 %v1683_v58, %v11211_v55  ;;  %v6909_v28 = vpop.eup %6908 }
 0x1d0   :  { %v6911_v58 = vpop.eup %6910  ;;  %v2004_v57 = vmul.f32 %v8587_v41, %v6909_v28 }
 0x1d1   :  { %2157 = vadd.xlane.f32.xlu1 %v2002_v25  ;;  %v1618_v25 = vld [vmem:[%s11053_s5 + $0x110] sm:$0xff]  ;;  %6920 = vtanh.f32 %v1811_v4  ;;  %v2005_v4 = vmul.f32 %v8587_v41, %v6911_v58  ;;  %v1620_v58 = vld [vmem:[%s11053_s5 + $0x120] sm:$0xff] }
 0x1d2   :  { %2159 = vadd.xlane.f32.xlu0 %v2003_v24  ;;  %v11213_v24 = vld [vmem:[#allocation53_spill] sm:$0xff]  ;;  %6922 = vtanh.f32 %v1812_v35  ;;  %v1746_v22 = vadd.f32 %v1618_v25, %v8236_v49  ;;  %v1619_v49 = vld [vmem:[%s11053_s5 + $0x118] sm:$0xff]  ;;  %v1814_v35 = vadd.f32 %v1686_v18, %v8248_v3 }
 0x1d3   :  { %v1745_v55 = vadd.f32 %v1617_v34, %v11213_v24  ;;  %v6913_v23 = vpop.eup %6912  ;;  %v8792_v34 = vpop.xlane.xlu0 %2239  ;;  %v1687_v3 = vld [vmem:[%s11053_s5 + $0x338] sm:$0xff] }
 0x1d4   :  { %11215 = vst [vmem:[#allocation42_spill] sm:$0xff] %v8792_v34  ;;  %v2072_v28 = vmul.f32 %v8587_v41, %v6913_v23  ;;  %v1748_v23 = vadd.f32 %v1620_v58, %v8261_v47  ;;  %v1621_v47 = vld [vmem:[%s11053_s5 + $0x128] sm:$0xff] }
 0x1d5   :  { %2293 = vadd.xlane.f32.xlu1 %v2070_v20  ;;  %v6915_v20 = vpop.eup %6914  ;;  %6924 = vtanh.f32 %v1745_v55  ;;  %v8804_v55 = vpop.xlane.xlu1 %2107 }
 0x1d6   :  { %2295 = vadd.xlane.f32.xlu0 %v2071_v26  ;;  %v1813_v26 = vadd.f32 %v1685_v14, %v8220_v19  ;;  %6926 = vtanh.f32 %v1746_v22  ;;  %v2073_v24 = vmul.f32 %v8587_v41, %v6915_v20  ;;  %v11216_v14 = vld [vmem:[#allocation56_spill] sm:$0xff] }
 0x1d7   :  { %v6917_v25 = vpop.eup %6916  ;;  %v1688_v20 = vld [vmem:[%s11053_s5 + $0x340] sm:$0xff] }
 0x1d8   :  { %v6919_v19 = vpop.eup %6918  ;;  %6928 = vtanh.f32 %v1813_v26  ;;  %v2006_v18 = vmul.f32 %v8587_v41, %v6917_v25 }
 0x1d9   :  { %2161 = vadd.xlane.f32.xlu1 %v2004_v57  ;;  %v1747_v57 = vadd.f32 %v1619_v49, %v11216_v14  ;;  %6930 = vtanh.f32 %v1814_v35  ;;  %v2007_v26 = vmul.f32 %v8587_v41, %v6919_v19  ;;  %v8819_v14 = vpop.xlane.xlu1 %2245  ;;  %v1816_v35 = vadd.f32 %v1688_v20, %v8271_v51  ;;  %v1689_v51 = vld [vmem:[%s11053_s5 + $0x348] sm:$0xff] }
 0x1da   :  { %2163 = vadd.xlane.f32.xlu0 %v2005_v4  ;;  %11219 = vst [vmem:[#allocation47_spill] sm:$0xff] %v8819_v14 }
 0x1db   :  { %v8807_v22 = vpop.xlane.xlu0 %2207  ;;  %v6921_v4 = vpop.eup %6920  ;;  %6932 = vtanh.f32 %v1747_v57  ;;  %v1622_v57 = vld [vmem:[%s11053_s5 + $0x130] sm:$0xff] }
 0x1dc   :  { %11217 = vst [vmem:[#allocation44_spill] sm:$0xff] %v8807_v22  ;;  %v6923_v49 = vpop.eup %6922  ;;  %6934 = vtanh.f32 %v1748_v23  ;;  %v2074_v25 = vmul.f32 %v8587_v41, %v6921_v4  ;;  %v1750_v23 = vadd.f32 %v1622_v57, %v8281_v29  ;;  %v1623_v29 = vld [vmem:[%s11053_s5 + $0x138] sm:$0xff] }
 0x1dd   :  { %2297 = vadd.xlane.f32.xlu1 %v2072_v28  ;;  %v11218_v28 = vld [vmem:[#allocation58_spill] sm:$0xff] }
 0x1de   :  { %2299 = vadd.xlane.f32.xlu0 %v2073_v24  ;;  %v1815_v24 = vadd.f32 %v1687_v3, %v11218_v28  ;;  %v2075_v3 = vmul.f32 %v8587_v41, %v6923_v49  ;;  %v1690_v49 = vld [vmem:[%s11053_s5 + $0x350] sm:$0xff] }
 0x1df   :  { %v6925_v19 = vpop.eup %6924 }
 0x1e0   :  { %6936 = vtanh.f32 %v1815_v24  ;;  %v2008_v4 = vmul.f32 %v8587_v41, %v6925_v19  ;;  %v11225_v19 = vld [vmem:[#allocation66_spill] sm:$0xff] }
 0x1e1   :  { %2165 = vadd.xlane.f32.xlu1 %v2006_v18  ;;  %v6927_v18 = vpop.eup %6926  ;;  %6938 = vtanh.f32 %v1816_v35  ;;  %v1818_v57 = vadd.f32 %v1690_v49, %v11225_v19 }
 0x1e2   :  { %2167 = vadd.xlane.f32.xlu0 %v2007_v26  ;;  %v8826_v58 = vpop.xlane.xlu0 %2211  ;;  %v11221_v26 = vld [vmem:[#allocation60_spill] sm:$0xff]  ;;  %v6929_v20 = vpop.eup %6928  ;;  %v2009_v24 = vmul.f32 %v8587_v41, %v6927_v18 }
 0x1e3   :  { %11220 = vst [vmem:[#allocation51_spill] sm:$0xff] %v8826_v58  ;;  %v1749_v28 = vadd.f32 %v1621_v47, %v11221_v26  ;;  %v6931_v47 = vpop.eup %6930  ;;  %v2076_v26 = vmul.f32 %v8587_v41, %v6929_v20  ;;  %v1624_v18 = vld [vmem:[%s11053_s5 + $0x140] sm:$0xff] }
 0x1e4   :  { %v8841_v14 = vpop.xlane.xlu1 %2209  ;;  %v11228_v20 = vld [vmem:[#allocation68_spill] sm:$0xff] }
 0x1e5   :  { %2301 = vadd.xlane.f32.xlu1 %v2074_v25  ;;  %11222 = vst [vmem:[#allocation49_spill] sm:$0xff] %v8841_v14  ;;  %6940 = vtanh.f32 %v1749_v28  ;;  %v6933_v45 = vpop.eup %6932  ;;  %v1752_v49 = vadd.f32 %v1624_v18, %v11228_v20 }
 0x1e6   :  { %2303 = vadd.xlane.f32.xlu0 %v2075_v3  ;;  %v11224_v3 = vld [vmem:[#allocation61_spill] sm:$0xff]  ;;  %6942 = vtanh.f32 %v1750_v23  ;;  %v6935_v28 = vpop.eup %6934  ;;  %v1691_v23 = vld [vmem:[%s11053_s5 + $0x358] sm:$0xff]  ;;  %v2010_v19 = vmul.f32 %v8587_v41, %v6933_v45 }
 0x1e7   :  { %v1817_v35 = vadd.f32 %v1689_v51, %v11224_v3  ;;  %v11226_v51 = vld [vmem:[#allocation63_spill] sm:$0xff] }
 0x1e9   :  { %2169 = vadd.xlane.f32.xlu1 %v2008_v4  ;;  %v8844_v25 = vpop.xlane.xlu0 %2215  ;;  %v2077_v4 = vmul.f32 %v8587_v41, %v6931_v47  ;;  %6944 = vtanh.f32 %v1817_v35  ;;  %v1692_v35 = vld [vmem:[%s11053_s5 + $0x360] sm:$0xff] }
 0x1ea   :  { %11223 = vst [vmem:[#allocation54_spill] sm:$0xff] %v8844_v25  ;;  %2171 = vadd.xlane.f32.xlu0 %v2009_v24  ;;  %v1751_v24 = vadd.f32 %v1623_v29, %v11226_v51  ;;  %6946 = vtanh.f32 %v1818_v57  ;;  %v6937_v47 = vpop.eup %6936  ;;  %v2011_v29 = vmul.f32 %v8587_v41, %v6935_v28  ;;  %v1625_v57 = vld [vmem:[%s11053_s5 + $0x148] sm:$0xff]  ;;  %v1820_v45 = vadd.f32 %v1692_v35, %v8322_v27  ;;  %v1626_v28 = vld [vmem:[%s11053_s5 + $0x150] sm:$0xff] }
 0x1eb   :  { %v2078_v18 = vmul.f32 %v8587_v41, %v6937_v47  ;;  %v1693_v27 = vld [vmem:[%s11053_s5 + $0x368] sm:$0xff]  ;;  %v1754_v47 = vadd.f32 %v1626_v28, %v8336_v33  ;;  %v1627_v33 = vld [vmem:[%s11053_s5 + $0x158] sm:$0xff] }
 0x1ec   :  { %6948 = vtanh.f32 %v1751_v24 }
 0x1ed   :  { %2305 = vadd.xlane.f32.xlu1 %v2076_v26  ;;  %v6939_v26 = vpop.eup %6938  ;;  %6950 = vtanh.f32 %v1752_v49 }
 0x1ee   :  { %v8857_v3 = vpop.xlane.xlu1 %2213  ;;  %2307 = vadd.xlane.f32.xlu0 %v2077_v4  ;;  %v11230_v4 = vld [vmem:[#allocation65_spill] sm:$0xff] }
 0x1ef   :  { %11227 = vst [vmem:[#allocation50_spill] sm:$0xff] %v8857_v3  ;;  %v8864_v34 = vpop.xlane.xlu0 %2219  ;;  %v1819_v51 = vadd.f32 %v1691_v23, %v11230_v4  ;;  %v6941_v13 = vpop.eup %6940  ;;  %v2079_v23 = vmul.f32 %v8587_v41, %v6939_v26  ;;  %v1694_v26 = vld [vmem:[%s11053_s5 + $0x370] sm:$0xff] }
 0x1f0   :  { %11229 = vst [vmem:[#allocation53_spill] sm:$0xff] %v8864_v34  ;;  %v2012_v35 = vmul.f32 %v8587_v41, %v6941_v13  ;;  %v1822_v13 = vadd.f32 %v1694_v26, %v8347_v37  ;;  %v1695_v37 = vld [vmem:[%s11053_s5 + $0x378] sm:$0xff] }
 0x1f1   :  { %2173 = vadd.xlane.f32.xlu1 %v2010_v19  ;;  %v6943_v19 = vpop.eup %6942  ;;  %6952 = vtanh.f32 %v1819_v51 }
 0x1f2   :  { %2175 = vadd.xlane.f32.xlu0 %v2011_v29  ;;  %v8881_v24 = vpop.xlane.xlu1 %2217  ;;  %v11233_v29 = vld [vmem:[#allocation67_spill] sm:$0xff]  ;;  %6954 = vtanh.f32 %v1820_v45  ;;  %v2013_v51 = vmul.f32 %v8587_v41, %v6943_v19  ;;  %v1821_v45 = vadd.f32 %v1693_v27, %v8319_v38 }
 0x1f3   :  { %v8876_v20 = vpop.xlane.xlu0 %2223  ;;  %11232 = vst [vmem:[#allocation58_spill] sm:$0xff] %v8881_v24  ;;  %v1753_v49 = vadd.f32 %v1625_v57, %v11233_v29  ;;  %v6945_v63 = vpop.eup %6944  ;;  %v1628_v29 = vld [vmem:[%s11053_s5 + $0x160] sm:$0xff] }
 0x1f4   :  { %11231 = vst [vmem:[#allocation56_spill] sm:$0xff] %v8876_v20  ;;  %v6947_v57 = vpop.eup %6946  ;;  %v2080_v28 = vmul.f32 %v8587_v41, %v6945_v63  ;;  %v11237_v27 = vld [vmem:[#allocation71_spill] sm:$0xff]  ;;  %v1756_v63 = vadd.f32 %v1628_v29, %v8363_v6  ;;  %v1629_v6 = vld [vmem:[%s11053_s5 + $0x168] sm:$0xff] }
 0x1f5   :  { %2309 = vadd.xlane.f32.xlu1 %v2078_v18  ;;  %6956 = vtanh.f32 %v1753_v49  ;;  %v2081_v49 = vmul.f32 %v8587_v41, %v6947_v57 }
 0x1f6   :  { %2311 = vadd.xlane.f32.xlu0 %v2079_v23  ;;  %6958 = vtanh.f32 %v1754_v47  ;;  %v6949_v19 = vpop.eup %6948 }
 0x1f7   :  { %v8890_v4 = vpop.xlane.xlu0 %2227  ;;  %v6951_v38 = vpop.eup %6950  ;;  %6960 = vtanh.f32 %v1821_v45  ;;  %v2014_v47 = vmul.f32 %v8587_v41, %v6949_v19  ;;  %v1696_v45 = vld [vmem:[%s11053_s5 + $0x380] sm:$0xff] }
 0x1f8   :  { %11234 = vst [vmem:[#allocation60_spill] sm:$0xff] %v8890_v4  ;;  %v8896_v18 = vpop.xlane.xlu1 %2221  ;;  %6962 = vtanh.f32 %v1822_v13  ;;  %v1824_v13 = vadd.f32 %v1696_v45, %v8375_v40  ;;  %v1697_v40 = vld [vmem:[%s11053_s5 + $0x388] sm:$0xff] }
 0x1f9   :  { %2177 = vadd.xlane.f32.xlu1 %v2012_v35  ;;  %11235 = vst [vmem:[#allocation61_spill] sm:$0xff] %v8896_v18  ;;  %v1755_v35 = vadd.f32 %v1627_v33, %v11237_v27  ;;  %v2015_v33 = vmul.f32 %v8587_v41, %v6951_v38 }
 0x1fa   :  { %2179 = vadd.xlane.f32.xlu0 %v2013_v51 }
 0x1fb   :  { %v8904_v23 = vpop.xlane.xlu0 %2243  ;;  %v6953_v57 = vpop.eup %6952  ;;  %6964 = vtanh.f32 %v1755_v35  ;;  %v1630_v35 = vld [vmem:[%s11053_s5 + $0x170] sm:$0xff] }
 0x1fc   :  { %11236 = vst [vmem:[#allocation66_spill] sm:$0xff] %v8904_v23  ;;  %6966 = vtanh.f32 %v1756_v63  ;;  %v2082_v19 = vmul.f32 %v8587_v41, %v6953_v57  ;;  %v1758_v63 = vadd.f32 %v1630_v35, %v8387_v7  ;;  %v1631_v7 = vld [vmem:[%s11053_s5 + $0x178] sm:$0xff] }
 0x1fd   :  { %2313 = vadd.xlane.f32.xlu1 %v2080_v28  ;;  %v6955_v28 = vpop.eup %6954 }
 0x1fe   :  { %v8911_v51 = vpop.xlane.xlu1 %2225  ;;  %2315 = vadd.xlane.f32.xlu0 %v2081_v49  ;;  %v1823_v49 = vadd.f32 %v1695_v37, %v8343_v62  ;;  %v2083_v62 = vmul.f32 %v8587_v41, %v6955_v28 }
 0x1ff   :  { %11238 = vst [vmem:[#allocation63_spill] sm:$0xff] %v8911_v51  ;;  %v8918_v26 = vpop.xlane.xlu0 %2111  ;;  %v6957_v38 = vpop.eup %6956 }
 0x200   :  { %v6959_v37 = vpop.eup %6958  ;;  %6968 = vtanh.f32 %v1823_v49  ;;  %v2016_v57 = vmul.f32 %v8587_v41, %v6957_v38  ;;  %v1698_v49 = vld [vmem:[%s11053_s5 + $0x390] sm:$0xff] }
 0x201   :  { %2181 = vadd.xlane.f32.xlu1 %v2014_v47  ;;  %v1757_v47 = vadd.f32 %v1629_v6, %v8356_v44  ;;  %6970 = vtanh.f32 %v1824_v13  ;;  %v6961_v28 = vpop.eup %6960  ;;  %v2017_v44 = vmul.f32 %v8587_v41, %v6959_v37  ;;  %v1826_v13 = vadd.f32 %v1698_v49, %v8399_v12  ;;  %v11242_v38 = vld [vmem:[#allocation25_spill] sm:$0xff] }
 0x202   :  { %v8925_v27 = vpop.xlane.xlu1 %2229  ;;  %2183 = vadd.xlane.f32.xlu0 %v2015_v33  ;;  %v6963_v6 = vpop.eup %6962  ;;  %v1504_v35 = vadd.f32 %v11242_v38, %v8406_v30  ;;  %v2084_v37 = vmul.f32 %v8587_v41, %v6961_v28  ;;  %v1699_v30 = vld [vmem:[%s11053_s5 + $0x398] sm:$0xff] }
 0x203   :  { %11239 = vst [vmem:[#allocation68_spill] sm:$0xff] %v8925_v27  ;;  %v8932_v29 = vpop.xlane.xlu0 %2247  ;;  %6972 = vtanh.f32 %v1757_v47 }
 0x204   :  { %11240 = vst [vmem:[#allocation65_spill] sm:$0xff] %v8932_v29  ;;  %6974 = vtanh.f32 %v1758_v63  ;;  %v1759_v63 = vadd.f32 %v1631_v7, %v8380_v54  ;;  %v11244_v7 = vld [vmem:[#allocation75_spill] sm:$0xff] }
 0x205   :  { %2317 = vadd.xlane.f32.xlu1 %v2082_v19  ;;  %v1825_v19 = vadd.f32 %v1697_v40, %v8372_v0  ;;  %v6965_v47 = vpop.eup %6964  ;;  %v1632_v0 = vld [vmem:[%s11053_s5 + $0x180] sm:$0xff]  ;;  %v2085_v40 = vmul.f32 %v8587_v41, %v6963_v6 }
 0x206   :  { %v8939_v33 = vpop.xlane.xlu1 %2113  ;;  %2319 = vadd.xlane.f32.xlu0 %v2083_v62  ;;  %v1760_v28 = vadd.f32 %v1632_v0, %v1504_v35  ;;  %v2018_v49 = vmul.f32 %v8587_v41, %v6965_v47  ;;  %v1700_v6 = vld [vmem:[%s11053_s5 + $0x3a0] sm:$0xff]  ;;  %v1633_v47 = vld [vmem:[%s11053_s5 + $0x188] sm:$0xff] }
 0x207   :  { %v8946_v45 = vpop.xlane.xlu0 %2115  ;;  %6976 = vtanh.f32 %v1825_v19  ;;  %v1828_v0 = vadd.f32 %v1700_v6, %v8421_v39 }
 0x208   :  { %6978 = vtanh.f32 %v1826_v13 }
 0x209   :  { %2185 = vadd.xlane.f32.xlu1 %v2016_v57  ;;  %v6967_v57 = vpop.eup %6966  ;;  %6980 = vtanh.f32 %v1759_v63 }
 0x20a   :  { %v8953_v62 = vpop.xlane.xlu1 %2249  ;;  %2187 = vadd.xlane.f32.xlu0 %v2017_v44  ;;  %v2019_v54 = vmul.f32 %v8587_v41, %v6967_v57  ;;  %6982 = vtanh.f32 %v1760_v28  ;;  %v1506_v57 = vadd.f32 %v11242_v38, %v8428_v9  ;;  %v1701_v9 = vld [vmem:[%s11053_s5 + $0x3a8] sm:$0xff] }
 0x20b   :  { %11241 = vst [vmem:[#allocation67_spill] sm:$0xff] %v8953_v62  ;;  %v8962_v29 = vpop.xlane.xlu0 %2251 }
 0x20c   :  { %11243 = vst [vmem:[#allocation71_spill] sm:$0xff] %v8962_v29  ;;  %v6969_v29 = vpop.eup %6968 }
 0x20d   :  { %2321 = vadd.xlane.f32.xlu1 %v2084_v37  ;;  %v6971_v19 = vpop.eup %6970  ;;  %v1827_v37 = vadd.f32 %v1699_v30, %v11244_v7  ;;  %v2086_v63 = vmul.f32 %v8587_v41, %v6969_v29  ;;  %v1634_v7 = vld [vmem:[%s11053_s5 + $0x190] sm:$0xff] }
 0x20e   :  { %v8969_v12 = vpop.xlane.xlu1 %2117  ;;  %2323 = vadd.xlane.f32.xlu0 %v2085_v40  ;;  %v11245_v40 = vld [vmem:[#allocation76_spill] sm:$0xff]  ;;  %v6973_v30 = vpop.eup %6972  ;;  %v1762_v39 = vadd.f32 %v1634_v7, %v1506_v57 }
 0x20f   :  { %v8975_v44 = vpop.xlane.xlu0 %2119  ;;  %v1505_v13 = vadd.f32 %v11245_v40, %v11242_v38  ;;  %v6975_v40 = vpop.eup %6974  ;;  %6984 = vtanh.f32 %v1827_v37  ;;  %v2020_v29 = vmul.f32 %v8587_v41, %v6973_v30  ;;  %v1635_v30 = vld [vmem:[%s11053_s5 + $0x198] sm:$0xff] }
 0x210   :  { %6986 = vtanh.f32 %v1828_v0  ;;  %v2021_v37 = vmul.f32 %v8587_v41, %v6975_v40 }
 0x211   :  { %2189 = vadd.xlane.f32.xlu1 %v2018_v49  ;;  %v1761_v28 = vadd.f32 %v1633_v47, %v1505_v13  ;;  %v11248_v47 = vld [vmem:[#allocation78_spill] sm:$0xff] }
 0x212   :  { %v8984_v35 = vpop.xlane.xlu1 %2253  ;;  %2191 = vadd.xlane.f32.xlu0 %v2019_v54  ;;  %v2087_v54 = vmul.f32 %v8587_v41, %v6971_v19  ;;  %v1702_v19 = vld [vmem:[%s11053_s5 + $0x3b0] sm:$0xff] }
 0x213   :  { %11246 = vst [vmem:[#allocation25_spill] sm:$0xff] %v8984_v35  ;;  %v8993_v49 = vpop.xlane.xlu0 %2255  ;;  %6988 = vtanh.f32 %v1761_v28  ;;  %v1830_v7 = vadd.f32 %v1702_v19, %v8445_v43  ;;  %v1703_v43 = vld [vmem:[%s11053_s5 + $0x3b8] sm:$0xff] }
 0x214   :  { %11247 = vst [vmem:[#allocation75_spill] sm:$0xff] %v8993_v49  ;;  %v6977_v49 = vpop.eup %6976  ;;  %6990 = vtanh.f32 %v1762_v39 }
 0x215   :  { %2325 = vadd.xlane.f32.xlu1 %v2086_v63  ;;  %v6979_v13 = vpop.eup %6978  ;;  %v1829_v63 = vadd.f32 %v1701_v9, %v11248_v47  ;;  %v2088_v40 = vmul.f32 %v8587_v41, %v6977_v49  ;;  %v1704_v9 = vld [vmem:[%s11053_s5 + $0x3c0] sm:$0xff] }
 0x216   :  { %v8999_v35 = vpop.xlane.xlu1 %2121  ;;  %2327 = vadd.xlane.f32.xlu0 %v2087_v54  ;;  %v11249_v54 = vld [vmem:[#allocation79_spill] sm:$0xff]  ;;  %v6981_v28 = vpop.eup %6980  ;;  %v1832_v49 = vadd.f32 %v1704_v9, %v8463_v48  ;;  %v1705_v48 = vld [vmem:[%s11053_s5 + $0x3c8] sm:$0xff] }
 0x217   :  { %v9005_v6 = vpop.xlane.xlu0 %2123  ;;  %v1507_v0 = vadd.f32 %v11249_v54, %v11242_v38  ;;  %v2089_v38 = vmul.f32 %v8587_v41, %v6979_v13  ;;  %6992 = vtanh.f32 %v1829_v63  ;;  %v2022_v39 = vmul.f32 %v8587_v41, %v6981_v28  ;;  %v1706_v13 = vld [vmem:[%s11053_s5 + $0x3d0] sm:$0xff] }
 0x218   :  { %6994 = vtanh.f32 %v1830_v7  ;;  %v1834_v7 = vadd.f32 %v1706_v13, %v8481_v61  ;;  %v1707_v61 = vld [vmem:[%s11053_s5 + $0x3d8] sm:$0xff] }
 0x219   :  { %2193 = vadd.xlane.f32.xlu1 %v2020_v29  ;;  %v6983_v29 = vpop.eup %6982 }
 0x21a   :  { %v9014_v57 = vpop.xlane.xlu1 %2257  ;;  %2195 = vadd.xlane.f32.xlu0 %v2021_v37  ;;  %v1763_v37 = vadd.f32 %v1635_v30, %v1507_v0  ;;  %v6985_v54 = vpop.eup %6984  ;;  %v2023_v63 = vmul.f32 %v8587_v41, %v6983_v29  ;;  %v1831_v30 = vadd.f32 %v1703_v43, %v8442_v2  ;;  %v1708_v29 = vld [vmem:[%s11053_s5 + $0x3e0] sm:$0xff]  ;;  %v1833_v43 = vadd.f32 %v1705_v48, %v8460_v36 }
 0x21b   :  { %11250 = vst [vmem:[#allocation76_spill] sm:$0xff] %v9014_v57  ;;  %v9021_v62 = vpop.xlane.xlu0 %2259  ;;  %v6987_v0 = vpop.eup %6986  ;;  %v2090_v28 = vmul.f32 %v8587_v41, %v6985_v54  ;;  %v1835_v48 = vadd.f32 %v1707_v61, %v8478_v60 }
 0x21c   :  { %11251 = vst [vmem:[#allocation78_spill] sm:$0xff] %v9021_v62  ;;  %6996 = vtanh.f32 %v1763_v37  ;;  %v2091_v2 = vmul.f32 %v8587_v41, %v6987_v0  ;;  %v1710_v0 = vld [vmem:[%s11053_s5 + $0x3f0] sm:$0xff] }
 0x21d   :  { %2329 = vadd.xlane.f32.xlu1 %v2088_v40  ;;  %6998 = vtanh.f32 %v1832_v49  ;;  %v1836_v49 = vadd.f32 %v1708_v29, %v8501_v56  ;;  %v1709_v56 = vld [vmem:[%s11053_s5 + $0x3e8] sm:$0xff] }
 0x21e   :  { %v9027_v47 = vpop.xlane.xlu1 %2125  ;;  %2331 = vadd.xlane.f32.xlu0 %v2089_v38  ;;  %v6989_v38 = vpop.eup %6988  ;;  %7000 = vtanh.f32 %v1831_v30  ;;  %v1837_v60 = vadd.f32 %v1709_v56, %v8498_v52 }
 0x21f   :  { %v9034_v19 = vpop.xlane.xlu0 %2127  ;;  %v6991_v37 = vpop.eup %6990  ;;  %7002 = vtanh.f32 %v1834_v7  ;;  %v2024_v54 = vmul.f32 %v8587_v41, %v6989_v38  ;;  %v1838_v7 = vadd.f32 %v1710_v0, %v8519_v53  ;;  %v7021_v53 = vld [vmem:[%s11057_s9] ss:$0 sm:$0xff] }
 0x220   :  { %v2025_v36 = vmul.f32 %v8587_v41, %v6991_v37  ;;  %7004 = vtanh.f32 %v1833_v43 }
 0x221   :  { %2197 = vadd.xlane.f32.xlu1 %v2022_v39  ;;  %7006 = vtanh.f32 %v1836_v49  ;;  %v1711_v49 = vld [vmem:[%s11053_s5 + $0x3f8] sm:$0xff] }
 0x222   :  { %v9041_v40 = vpop.xlane.xlu1 %2261  ;;  %2199 = vadd.xlane.f32.xlu0 %v2023_v63  ;;  %v6993_v63 = vpop.eup %6992  ;;  %7008 = vtanh.f32 %v1835_v48  ;;  %v1839_v52 = vadd.f32 %v1711_v49, %v8516_v8 }
 0x223   :  { %11252 = vst [vmem:[#allocation79_spill] sm:$0xff] %v9041_v40  ;;  %v9048_v9 = vpop.xlane.xlu0 %2263  ;;  %v6995_v30 = vpop.eup %6994  ;;  %v2092_v38 = vmul.f32 %v8587_v41, %v6993_v63  ;;  %7010 = vtanh.f32 %v1838_v7 }
 0x224   :  { %11253 = vst [vmem:[#allocation88_spill] sm:$0xff] %v9048_v9  ;;  %v2093_v37 = vmul.f32 %v8587_v41, %v6995_v30  ;;  %7012 = vtanh.f32 %v1837_v60 }
 0x225   :  { %2333 = vadd.xlane.f32.xlu1 %v2090_v28  ;;  %7014 = vtanh.f32 %v1839_v52 }
 0x226   :  { %v9055_v39 = vpop.xlane.xlu1 %2129  ;;  %2335 = vadd.xlane.f32.xlu0 %v2091_v2  ;;  %v6997_v2 = vpop.eup %6996 }
 0x227   :  { %v9062_v13 = vpop.xlane.xlu0 %2131  ;;  %v6999_v43 = vpop.eup %6998 }
 0x228   :  { %v7001_v41 = vpop.eup %7000  ;;  %v2095_v0 = vmul.f32 %v7021_v53, %v6999_v43 }
 0x229   :  { %2201 = vadd.xlane.f32.xlu1 %v2024_v54  ;;  %v2026_v54 = vmul.f32 %v7021_v53, %v6997_v2  ;;  %v2094_v48 = vmul.f32 %v7021_v53, %v7001_v41 }
 0x22a   :  { %v9069_v28 = vpop.xlane.xlu1 %2265  ;;  %2203 = vadd.xlane.f32.xlu0 %v2025_v36  ;;  %v7003_v36 = vpop.eup %7002 }
 0x22b   :  { %11254 = vst [vmem:[#allocation89_spill] sm:$0xff] %v9069_v28  ;;  %v9076_v29 = vpop.xlane.xlu0 %2267  ;;  %v7005_v7 = vpop.eup %7004 }
 0x22c   :  { %11255 = vst [vmem:[#allocation90_spill] sm:$0xff] %v9076_v29  ;;  %v2096_v43 = vmul.f32 %v7021_v53, %v7005_v7 }
 0x22d   :  { %2337 = vadd.xlane.f32.xlu1 %v2092_v38  ;;  %v2097_v38 = vmul.f32 %v7021_v53, %v7003_v36 }
 0x22e   :  { %v9080_v61 = vpop.xlane.xlu1 %2133  ;;  %2339 = vadd.xlane.f32.xlu0 %v2093_v37  ;;  %v7007_v37 = vpop.eup %7006 }
 0x22f   :  { %v9088_v63 = vpop.xlane.xlu0 %2135  ;;  %v7009_v60 = vpop.eup %7008 }
 0x230   :  { %v7011_v8 = vpop.eup %7010  ;;  %v2098_v41 = vmul.f32 %v7021_v53, %v7009_v60 }
 0x231   :  { %2205 = vadd.xlane.f32.xlu1 %v2026_v54  ;;  %v2099_v54 = vmul.f32 %v7021_v53, %v7007_v37  ;;  %v7013_v36 = vpop.eup %7012  ;;  %v2101_v62 = vmul.f32 %v7021_v53, %v7011_v8 }
 0x232   :  { %v9091_v30 = vpop.xlane.xlu1 %2269  ;;  %2343 = vadd.xlane.f32.xlu0 %v2095_v0 }
 0x233   :  { %11256 = vst [vmem:[#allocation91_spill] sm:$0xff] %v9091_v30  ;;  %v9093_v56 = vpop.xlane.xlu0 %2271 }
 0x234   :  { %11257 = vst [vmem:[#allocation92_spill] sm:$0xff] %v9093_v56 }
 0x235   :  { %2341 = vadd.xlane.f32.xlu1 %v2094_v48  ;;  %v2100_v48 = vmul.f32 %v7021_v53, %v7013_v36 }
 0x236   :  { %v9095_v2 = vpop.xlane.xlu1 %2137  ;;  %2347 = vadd.xlane.f32.xlu0 %v2097_v38  ;;  %v7015_v38 = vpop.eup %7014 }
 0x237   :  { %v9097_v40 = vpop.xlane.xlu0 %2139 }
 0x239   :  { %2345 = vadd.xlane.f32.xlu1 %v2096_v43  ;;  %v2102_v43 = vmul.f32 %v7021_v53, %v7015_v38  ;;  %v11266_v53 = vld [vmem:[#allocation10_spill] sm:$0xff] }
 0x23a   :  { %v9099_v49 = vpop.xlane.xlu1 %2273  ;;  %2351 = vadd.xlane.f32.xlu0 %v2099_v54 }
 0x23b   :  { %11258 = vst [vmem:[#allocation93_spill] sm:$0xff] %v9099_v49  ;;  %v9101_v0 = vpop.xlane.xlu0 %2275 }
 0x23c   :  { %11259 = vst [vmem:[#allocation94_spill] sm:$0xff] %v9101_v0 }
 0x23d   :  { %2349 = vadd.xlane.f32.xlu1 %v2098_v41 }
 0x23e   :  { %v9103_v52 = vpop.xlane.xlu1 %2141  ;;  %2355 = vadd.xlane.f32.xlu0 %v2101_v62 }
 0x23f   :  { %v9105_v7 = vpop.xlane.xlu0 %2143 }
 0x241   :  { %2353 = vadd.xlane.f32.xlu1 %v2100_v48 }
 0x242   :  { %v9107_v37 = vpop.xlane.xlu1 %2277 }
 0x243   :  { %11260 = vst [vmem:[#allocation95_spill] sm:$0xff] %v9107_v37  ;;  %v9109_v57 = vpop.xlane.xlu0 %2279 }
 0x244   :  { %11261 = vst [vmem:[#allocation96_spill] sm:$0xff] %v9109_v57 }
 0x245   :  { %2357 = vadd.xlane.f32.xlu1 %v2102_v43 }
 0x246   :  { %v9111_v60 = vpop.xlane.xlu1 %2145 }
 0x247   :  { %v9113_v54 = vpop.xlane.xlu0 %2147 }
 0x24a   :  { %v9115_v8 = vpop.xlane.xlu1 %2281 }
 0x24b   :  { %11262 = vst [vmem:[#allocation97_spill] sm:$0xff] %v9115_v8  ;;  %v9117_v41 = vpop.xlane.xlu0 %2283 }
 0x24c   :  { %11263 = vst [vmem:[#allocation98_spill] sm:$0xff] %v9117_v41 }
 0x24e   :  { %v9119_v62 = vpop.xlane.xlu1 %2149 }
 0x24f   :  { %v9121_v36 = vpop.xlane.xlu0 %2151 }
 0x252   :  { %v9123_v0 = vpop.xlane.xlu1 %2285 }
 0x253   :  { %11264 = vst [vmem:[#allocation99_spill] sm:$0xff] %v9123_v0  ;;  %v9125_v48 = vpop.xlane.xlu0 %2287  ;;  %v11269_v0 = vld [vmem:[#allocation8_spill] sm:$0xff] }
 0x254   :  { %11265 = vst [vmem:[#allocation100_spill] sm:$0xff] %v9125_v48  ;;  %3124 = vbcast.lane.b32.xlu0 %v11266_v53, 320  ;;  %v11077_v48 = vsub.s32 4, %v11269_v0  ;;  %v11078_v51 = vsub.s32 5, %v11269_v0  ;;  %v11079_v14 = vsub.s32 6, %v11269_v0 }
 0x256   :  { %v9128_v38 = vpop.xlane.xlu1 %2153  ;;  %3120 = vbcast.lane.b32.xlu1 %v11266_v53, 312 }
 0x257   :  { %v9131_v43 = vpop.xlane.xlu0 %2155 }
 0x258   :  { %3132 = vbcast.lane.b32.xlu0 %v11266_v53, 336 }
 0x25a   :  { %v9134_v8 = vpop.xlane.xlu1 %2289  ;;  %3128 = vbcast.lane.b32.xlu1 %v11266_v53, 328 }
 0x25b   :  { %11267 = vst [vmem:[#allocation10_spill] sm:$0xff] %v9134_v8  ;;  %v9137_v41 = vpop.xlane.xlu0 %2291  ;;  %v9150_v8 = vld [vmem:[%s11051_s3] sm:$0xff] }
 0x25c   :  { %11268 = vst [vmem:[#allocation101_spill] sm:$0xff] %v9137_v41  ;;  %3140 = vbcast.lane.b32.xlu0 %v11266_v53, 352  ;;  %v3157_v41 = vrot.slane %v9150_v8, %v11077_v48 }
 0x25e   :  { %v9141_v57 = vpop.xlane.xlu1 %2157  ;;  %3136 = vbcast.lane.b32.xlu1 %v11266_v53, 344 }
 0x25f   :  { %v9144_v37 = vpop.xlane.xlu0 %2159 }
 0x260   :  { %3148 = vbcast.lane.b32.xlu0 %v11266_v53, 368 }
 0x262   :  { %v9155_v49 = vpop.xlane.xlu1 %2293  ;;  %3144 = vbcast.lane.b32.xlu1 %v11266_v53, 360 }
 0x263   :  { %11270 = vst [vmem:[#allocation102_spill] sm:$0xff] %v9155_v49  ;;  %v9158_v23 = vpop.xlane.xlu0 %2295 }
 0x264   :  { %11271 = vst [vmem:[#allocation103_spill] sm:$0xff] %v9158_v23  ;;  %3159 = vbcast.lane.b32.xlu0 %v3157_v41, 256 }
 0x266   :  { %v9160_v56 = vpop.xlane.xlu1 %2161  ;;  %3152 = vbcast.lane.b32.xlu1 %v11266_v53, 376 }
 0x267   :  { %v9163_v30 = vpop.xlane.xlu0 %2163 }
 0x268   :  { %3167 = vbcast.lane.b32.xlu0 %v3157_v41, 272 }
 0x26a   :  { %v9165_v29 = vpop.xlane.xlu1 %2297  ;;  %3163 = vbcast.lane.b32.xlu1 %v3157_v41, 264 }
 0x26b   :  { %11272 = vst [vmem:[#allocation104_spill] sm:$0xff] %v9165_v29  ;;  %v9167_v9 = vpop.xlane.xlu0 %2299 }
 0x26c   :  { %11273 = vst [vmem:[#allocation105_spill] sm:$0xff] %v9167_v9  ;;  %3175 = vbcast.lane.b32.xlu0 %v3157_v41, 288 }
 0x26e   :  { %v9169_v48 = vpop.xlane.xlu1 %2165  ;;  %3171 = vbcast.lane.b32.xlu1 %v3157_v41, 280 }
 0x26f   :  { %v9171_v49 = vpop.xlane.xlu0 %2167 }
 0x270   :  { %3183 = vbcast.lane.b32.xlu0 %v3157_v41, 304 }
 0x272   :  { %v9173_v23 = vpop.xlane.xlu1 %2301  ;;  %3179 = vbcast.lane.b32.xlu1 %v3157_v41, 296 }
 0x273   :  { %11274 = vst [vmem:[#allocation106_spill] sm:$0xff] %v9173_v23  ;;  %v9175_v28 = vpop.xlane.xlu0 %2303 }
 0x274   :  { %11275 = vst [vmem:[#allocation107_spill] sm:$0xff] %v9175_v28  ;;  %3191 = vbcast.lane.b32.xlu0 %v3157_v41, 320  ;;  %v3224_v28 = vrot.slane %v9150_v8, %v11078_v51 }
 0x276   :  { %v9177_v53 = vpop.xlane.xlu1 %2169  ;;  %3187 = vbcast.lane.b32.xlu1 %v3157_v41, 312 }
 0x277   :  { %v9179_v29 = vpop.xlane.xlu0 %2171 }
 0x278   :  { %3199 = vbcast.lane.b32.xlu0 %v3157_v41, 336 }
 0x27a   :  { %v9181_v9 = vpop.xlane.xlu1 %2305  ;;  %3195 = vbcast.lane.b32.xlu1 %v3157_v41, 328 }
 0x27b   :  { %11276 = vst [vmem:[#allocation108_spill] sm:$0xff] %v9181_v9  ;;  %v9183_v27 = vpop.xlane.xlu0 %2307 }
 0x27c   :  { %11277 = vst [vmem:[#allocation109_spill] sm:$0xff] %v9183_v27  ;;  %3207 = vbcast.lane.b32.xlu0 %v3157_v41, 352 }
 0x27e   :  { %v9186_v4 = vpop.xlane.xlu1 %2173  ;;  %3203 = vbcast.lane.b32.xlu1 %v3157_v41, 344 }
 0x27f   :  { %v9188_v23 = vpop.xlane.xlu0 %2175 }
 0x280   :  { %3215 = vbcast.lane.b32.xlu0 %v3157_v41, 368 }
 0x282   :  { %v9193_v18 = vpop.xlane.xlu1 %2309  ;;  %3211 = vbcast.lane.b32.xlu1 %v3157_v41, 360 }
 0x283   :  { %11278 = vst [vmem:[#allocation110_spill] sm:$0xff] %v9193_v18  ;;  %v9195_v9 = vpop.xlane.xlu0 %2311 }
 0x284   :  { %11279 = vst [vmem:[#allocation111_spill] sm:$0xff] %v9195_v9  ;;  %3226 = vbcast.lane.b32.xlu0 %v3224_v28, 256 }
 0x286   :  { %v9197_v27 = vpop.xlane.xlu1 %2177  ;;  %3219 = vbcast.lane.b32.xlu1 %v3157_v41, 376 }
 0x287   :  { %v9199_v20 = vpop.xlane.xlu0 %2179 }
 0x288   :  { %3234 = vbcast.lane.b32.xlu0 %v3224_v28, 272 }
 0x28a   :  { %v9201_v24 = vpop.xlane.xlu1 %2313  ;;  %3230 = vbcast.lane.b32.xlu1 %v3224_v28, 264 }
 0x28b   :  { %11280 = vst [vmem:[#allocation112_spill] sm:$0xff] %v9201_v24  ;;  %v9203_v34 = vpop.xlane.xlu0 %2315 }
 0x28c   :  { %11281 = vst [vmem:[#allocation113_spill] sm:$0xff] %v9203_v34  ;;  %3242 = vbcast.lane.b32.xlu0 %v3224_v28, 288 }
 0x28e   :  { %v9205_v3 = vpop.xlane.xlu1 %2181  ;;  %3238 = vbcast.lane.b32.xlu1 %v3224_v28, 280 }
 0x28f   :  { %v9207_v51 = vpop.xlane.xlu0 %2183 }
 0x290   :  { %3250 = vbcast.lane.b32.xlu0 %v3224_v28, 304 }
 0x292   :  { %v9209_v9 = vpop.xlane.xlu1 %2317  ;;  %3246 = vbcast.lane.b32.xlu1 %v3224_v28, 296 }
 0x293   :  { %11282 = vst [vmem:[#allocation114_spill] sm:$0xff] %v9209_v9  ;;  %v9211_v18 = vpop.xlane.xlu0 %2319 }
 0x294   :  { %11283 = vst [vmem:[#allocation115_spill] sm:$0xff] %v9211_v18  ;;  %3258 = vbcast.lane.b32.xlu0 %v3224_v28, 320  ;;  %v3291_v18 = vrot.slane %v9150_v8, %v11079_v14 }
 0x296   :  { %v9213_v41 = vpop.xlane.xlu1 %2185  ;;  %3254 = vbcast.lane.b32.xlu1 %v3224_v28, 312 }
 0x297   :  { %v9215_v24 = vpop.xlane.xlu0 %2187 }
 0x298   :  { %3266 = vbcast.lane.b32.xlu0 %v3224_v28, 336 }
 0x29a   :  { %v9217_v34 = vpop.xlane.xlu1 %2321  ;;  %3262 = vbcast.lane.b32.xlu1 %v3224_v28, 328 }
 0x29b   :  { %11284 = vst [vmem:[#allocation116_spill] sm:$0xff] %v9217_v34  ;;  %v9219_v25 = vpop.xlane.xlu0 %2323 }
 0x29c   :  { %11285 = vst [vmem:[#allocation117_spill] sm:$0xff] %v9219_v25  ;;  %3274 = vbcast.lane.b32.xlu0 %v3224_v28, 352 }
 0x29e   :  { %v9222_v58 = vpop.xlane.xlu1 %2189  ;;  %3270 = vbcast.lane.b32.xlu1 %v3224_v28, 344 }
 0x29f   :  { %v9224_v9 = vpop.xlane.xlu0 %2191 }
 0x2a0   :  { %3282 = vbcast.lane.b32.xlu0 %v3224_v28, 368 }
 0x2a2   :  { %v9229_v22 = vpop.xlane.xlu1 %2325  ;;  %3278 = vbcast.lane.b32.xlu1 %v3224_v28, 360 }
 0x2a3   :  { %11286 = vst [vmem:[#allocation118_spill] sm:$0xff] %v9229_v22  ;;  %v9231_v34 = vpop.xlane.xlu0 %2327 }
 0x2a4   :  { %11287 = vst [vmem:[#allocation119_spill] sm:$0xff] %v9231_v34  ;;  %3293 = vbcast.lane.b32.xlu0 %v3291_v18, 256 }
 0x2a6   :  { %v9233_v25 = vpop.xlane.xlu1 %2193  ;;  %3286 = vbcast.lane.b32.xlu1 %v3224_v28, 376 }
 0x2a7   :  { %11288 = vst [vmem:[#allocation120_spill] sm:$0xff] %v9233_v25  ;;  %v9235_v32 = vpop.xlane.xlu0 %2195 }
 0x2a8   :  { %3301 = vbcast.lane.b32.xlu0 %v3291_v18, 272 }
 0x2aa   :  { %v9237_v21 = vpop.xlane.xlu1 %2329  ;;  %3297 = vbcast.lane.b32.xlu1 %v3291_v18, 264 }
 0x2ab   :  { %11289 = vst [vmem:[#allocation121_spill] sm:$0xff] %v9237_v21  ;;  %v9239_v17 = vpop.xlane.xlu0 %2331 }
 0x2ac   :  { %11290 = vst [vmem:[#allocation122_spill] sm:$0xff] %v9239_v17  ;;  %3309 = vbcast.lane.b32.xlu0 %v3291_v18, 288 }
 0x2ae   :  { %v9241_v15 = vpop.xlane.xlu1 %2197  ;;  %3305 = vbcast.lane.b32.xlu1 %v3291_v18, 280 }
 0x2af   :  { %11291 = vst [vmem:[#allocation123_spill] sm:$0xff] %v9241_v15  ;;  %v9243_v14 = vpop.xlane.xlu0 %2199 }
 0x2b0   :  { %11292 = vst [vmem:[#allocation124_spill] sm:$0xff] %v9243_v14  ;;  %3317 = vbcast.lane.b32.xlu0 %v3291_v18, 304  ;;  %v11080_v14 = vsub.s32 7, %v11269_v0 }
 0x2b2   :  { %v9245_v22 = vpop.xlane.xlu1 %2333  ;;  %3313 = vbcast.lane.b32.xlu1 %v3291_v18, 296 }
 0x2b3   :  { %11293 = vst [vmem:[#allocation125_spill] sm:$0xff] %v9245_v22  ;;  %v9247_v34 = vpop.xlane.xlu0 %2335 }
 0x2b4   :  { %11294 = vst [vmem:[#allocation126_spill] sm:$0xff] %v9247_v34  ;;  %3325 = vbcast.lane.b32.xlu0 %v3291_v18, 320  ;;  %v3358_v34 = vrot.slane %v9150_v8, %v11080_v14 }
 0x2b6   :  { %v9249_v28 = vpop.xlane.xlu1 %2201  ;;  %3321 = vbcast.lane.b32.xlu1 %v3291_v18, 312 }
 0x2b7   :  { %11295 = vst [vmem:[#allocation127_spill] sm:$0xff] %v9249_v28  ;;  %v9251_v21 = vpop.xlane.xlu0 %2203 }
 0x2b8   :  { %11296 = vst [vmem:[#allocation128_spill] sm:$0xff] %v9251_v21  ;;  %3333 = vbcast.lane.b32.xlu0 %v3291_v18, 336 }
 0x2ba   :  { %v9253_v17 = vpop.xlane.xlu1 %2337  ;;  %3329 = vbcast.lane.b32.xlu1 %v3291_v18, 328 }
 0x2bb   :  { %11297 = vst [vmem:[#allocation129_spill] sm:$0xff] %v9253_v17  ;;  %v9255_v15 = vpop.xlane.xlu0 %2339 }
 0x2bc   :  { %11298 = vst [vmem:[#allocation130_spill] sm:$0xff] %v9255_v15  ;;  %3341 = vbcast.lane.b32.xlu0 %v3291_v18, 352 }
 0x2be   :  { %3337 = vbcast.lane.b32.xlu1 %v3291_v18, 344  ;;  %v9258_v22 = vpop.xlane.xlu1 %2205 }
 0x2bf   :  { %11299 = vst [vmem:[#allocation131_spill] sm:$0xff] %v9258_v22  ;;  %v9260_v25 = vpop.xlane.xlu0 %2343 }
 0x2c0   :  { %11300 = vst [vmem:[#allocation132_spill] sm:$0xff] %v9260_v25  ;;  %3349 = vbcast.lane.b32.xlu0 %v3291_v18, 368 }
 0x2c2   :  { %3345 = vbcast.lane.b32.xlu1 %v3291_v18, 360  ;;  %v9265_v28 = vpop.xlane.xlu1 %2341 }
 0x2c3   :  { %11301 = vst [vmem:[#allocation133_spill] sm:$0xff] %v9265_v28  ;;  %v9267_v17 = vpop.xlane.xlu0 %2347 }
 0x2c4   :  { %11302 = vst [vmem:[#allocation134_spill] sm:$0xff] %v9267_v17  ;;  %3360 = vbcast.lane.b32.xlu0 %v3358_v34, 256 }
 0x2c6   :  { %3353 = vbcast.lane.b32.xlu1 %v3291_v18, 376  ;;  %v9269_v15 = vpop.xlane.xlu1 %2345 }
 0x2c7   :  { %11303 = vst [vmem:[#allocation135_spill] sm:$0xff] %v9269_v15  ;;  %v9271_v21 = vpop.xlane.xlu0 %2351 }
 0x2c8   :  { %11304 = vst [vmem:[#allocation136_spill] sm:$0xff] %v9271_v21  ;;  %3368 = vbcast.lane.b32.xlu0 %v3358_v34, 272 }
 0x2ca   :  { %3364 = vbcast.lane.b32.xlu1 %v3358_v34, 264  ;;  %v9273_v22 = vpop.xlane.xlu1 %2349 }
 0x2cb   :  { %11305 = vst [vmem:[#allocation137_spill] sm:$0xff] %v9273_v22  ;;  %v9275_v25 = vpop.xlane.xlu0 %2355 }
 0x2cc   :  { %11306 = vst [vmem:[#allocation138_spill] sm:$0xff] %v9275_v25  ;;  %3376 = vbcast.lane.b32.xlu0 %v3358_v34, 288  ;;  %v11313_v25 = vld [vmem:[#allocation17_spill] sm:$0xff] }
 0x2cd   :  { %v2369_v22 = vadd.f32 %v11313_v25, %v8716_v11  ;;  %v2370_v28 = vadd.f32 %v11313_v25, %v8731_v1 }
 0x2ce   :  { %3372 = vbcast.lane.b32.xlu1 %v3358_v34, 280  ;;  %v9277_v8 = vpop.xlane.xlu1 %2353 }
 0x2cf   :  { %11307 = vst [vmem:[#allocation139_spill] sm:$0xff] %v9277_v8  ;;  %v9279_v14 = vpop.permute.xlu0 %3124  ;;  %vm2500_vm5 = vcmp.gt.f32.partialorder %v2369_v22, 0.0  ;;  %v11319_v22 = vld [vmem:[#allocation11_spill] sm:$0xff]  ;;  %vm2501_vm7 = vcmp.gt.f32.partialorder %v2370_v28, 0.0 }
 0x2d0   :  { %11308 = vst [vmem:[#allocation140_spill] sm:$0xff] %v9279_v14  ;;  %3384 = vbcast.lane.b32.xlu0 %v3358_v34, 304 }
 0x2d2   :  { %3380 = vbcast.lane.b32.xlu1 %v3358_v34, 296  ;;  %v9281_v0 = vpop.xlane.xlu1 %2357 }
 0x2d3   :  { %11309 = vst [vmem:[#allocation141_spill] sm:$0xff] %v9281_v0  ;;  %v9283_v18 = vpop.permute.xlu0 %3132  ;;  %v2371_v0 = vadd.f32 %v11313_v25, %v8804_v55  ;;  %v2372_v55 = vadd.f32 %v11313_v25, %v8728_v5  ;;  %v2374_v5 = vadd.f32 %v11313_v25, %v8939_v33 }
 0x2d4   :  { %11310 = vst [vmem:[#allocation142_spill] sm:$0xff] %v9283_v18  ;;  %3392 = vbcast.lane.b32.xlu0 %v3358_v34, 320 }
 0x2d5   :  { %vm2502_vm6 = vcmp.gt.f32.partialorder %v2371_v0, 0.0  ;;  %v2375_v0 = vadd.f32 %v11313_v25, %v8946_v45  ;;  %vm2503_vm9 = vcmp.gt.f32.partialorder %v2372_v55, 0.0  ;;  %vm2505_vm11 = vcmp.gt.f32.partialorder %v2374_v5, 0.0 }
 0x2d6   :  { %3388 = vbcast.lane.b32.xlu1 %v3358_v34, 312  ;;  %v9285_v21 = vpop.permute.xlu1 %3120 }
 0x2d7   :  { %11311 = vst [vmem:[#allocation143_spill] sm:$0xff] %v9285_v21  ;;  %v9287_v17 = vpop.permute.xlu0 %3140  ;;  %vm2506_vm10 = vcmp.gt.f32.partialorder %v2375_v0, 0.0  ;;  %v11326_v0 = vld [vmem:[#allocation14_spill] sm:$0xff] }
 0x2d8   :  { %11312 = vst [vmem:[#allocation144_spill] sm:$0xff] %v9287_v17  ;;  %3400 = vbcast.lane.b32.xlu0 %v3358_v34, 336  ;;  %v11317_v17 = vmov 0.0  }
 0x2d9   :  { %v6123_v21 = vsel %vm2500_vm5, 1.0, %v11317_v17  ;;  %v6126_v45 = vsel %vm2503_vm9, 1.0, %v11317_v17 }
 0x2da   :  { %3396 = vbcast.lane.b32.xlu1 %v3358_v34, 328  ;;  %v9291_v8 = vpop.permute.xlu1 %3128 }
 0x2db   :  { %11314 = vst [vmem:[#allocation17_spill] sm:$0xff] %v9291_v8  ;;  %v9293_v15 = vpop.permute.xlu0 %3148  ;;  %v2373_v8 = vadd.f32 %v11313_v25, %v8918_v26  ;;  %v6124_v26 = vsel %vm2501_vm7, 1.0, %v11317_v17 }
 0x2dc   :  { %11315 = vst [vmem:[#allocation145_spill] sm:$0xff] %v9293_v15  ;;  %3408 = vbcast.lane.b32.xlu0 %v3358_v34, 352  ;;  %v3550_v15 = vmul.f32 %v6123_v21, %v11319_v22  ;;  %v11322_v21 = vld [vmem:[#allocation13_spill] sm:$0xff] }
 0x2dd   :  { %vm2504_vm8 = vcmp.gt.f32.partialorder %v2373_v8, 0.0  ;;  %v11324_v8 = vld [vmem:[#allocation12_spill] sm:$0xff] }
 0x2de   :  { %3404 = vbcast.lane.b32.xlu1 %v3358_v34, 344  ;;  %v9299_v18 = vpop.permute.xlu1 %3136 }
 0x2df   :  { %11316 = vst [vmem:[#allocation146_spill] sm:$0xff] %v9299_v18  ;;  %v9302_v11 = vpop.permute.xlu0 %3159  ;;  %v6125_v18 = vsel %vm2502_vm6, 1.0, %v11317_v17 }
 0x2e0   :  { %11318 = vst [vmem:[#allocation147_spill] sm:$0xff] %v9302_v11  ;;  %3416 = vbcast.lane.b32.xlu0 %v3358_v34, 368  ;;  %v3552_v22 = vmul.f32 %v6125_v18, %v11322_v21  ;;  %v6127_v11 = vsel %vm2504_vm8, 1.0, %v11317_v17  ;;  %v11325_v18 = vld [vmem:[#allocation15_spill] sm:$0xff]  ;;  %v6129_v21 = vsel %vm2506_vm10, 1.0, %v11317_v17 }
 0x2e1   :  { %v3554_v55 = vmul.f32 %v6127_v11, %v11325_v18  ;;  %v6128_v11 = vsel %vm2505_vm11, 1.0, %v11317_v17 }
 0x2e2   :  { %3412 = vbcast.lane.b32.xlu1 %v3358_v34, 360  ;;  %v9309_v1 = vpop.permute.xlu1 %3144 }
 0x2e3   :  { %11320 = vst [vmem:[#allocation11_spill] sm:$0xff] %v9309_v1  ;;  %v9312_v14 = vpop.permute.xlu0 %3167 }
 0x2e4   :  { %11321 = vst [vmem:[#allocation148_spill] sm:$0xff] %v9312_v14  ;;  %3807 = vperm.xlu0 %6758, %v3550_v15   ;;  %v3551_v14 = vmul.f32 %v6124_v26, %v11324_v8  ;;  %v2377_v15 = vadd.f32 %v11313_v25, %v8975_v44  ;;  %v3553_v26 = vmul.f32 %v6126_v45, %v11326_v0 }
 0x2e5   :  { %v2379_v44 = vadd.f32 %v11313_v25, %v9005_v6  ;;  %v2381_v6 = vadd.f32 %v11313_v25, %v9034_v19  ;;  %v2383_v19 = vadd.f32 %v11313_v25, %v9062_v13  ;;  %v2385_v13 = vadd.f32 %v11313_v25, %v9088_v63 }
 0x2e6   :  { %3420 = vbcast.lane.b32.xlu1 %v3358_v34, 376  ;;  %v9320_v28 = vpop.permute.xlu1 %3152  ;;  %v2376_v34 = vadd.f32 %v11313_v25, %v8969_v12  ;;  %vm2508_vm12 = vcmp.gt.f32.partialorder %v2377_v15, 0.0  ;;  %v11328_v15 = vld [vmem:[#allocation16_spill] sm:$0xff]  ;;  %v2387_v63 = vadd.f32 %v11313_v25, %v9097_v40  ;;  %v2389_v40 = vadd.f32 %v11313_v25, %v9105_v7 }
 0x2e7   :  { %v9323_v1 = vpop.permute.xlu0 %3175  ;;  %v6131_v8 = vsel %vm2508_vm12, 1.0, %v11317_v17  ;;  %v3555_v45 = vmul.f32 %v6128_v11, %v11328_v15  ;;  %vm2510_vm14 = vcmp.gt.f32.partialorder %v2379_v44, 0.0  ;;  %v11330_v44 = vld [vmem:[#allocation22_spill] sm:$0xff]  ;;  %vm2512_vm1 = vcmp.gt.f32.partialorder %v2381_v6, 0.0  ;;  %v11332_v6 = vld [vmem:[#allocation31_spill] sm:$0xff] }
 0x2e8   :  { %11323 = vst [vmem:[#allocation13_spill] sm:$0xff] %v9323_v1  ;;  %3813 = vperm.xlu0 %6758, %v3552_v22   ;;  %v11327_v22 = vld [vmem:[#allocation18_spill] sm:$0xff]  ;;  %vm2507_vm13 = vcmp.gt.f32.partialorder %v2376_v34, 0.0  ;;  %v11329_v34 = vld [vmem:[#allocation19_spill] sm:$0xff]  ;;  %vm2514_vm3 = vcmp.gt.f32.partialorder %v2383_v19, 0.0  ;;  %vm2516_vm5 = vcmp.gt.f32.partialorder %v2385_v13, 0.0  ;;  %v2391_v7 = vadd.f32 %v11313_v25, %v9113_v54 }
 0x2e9   :  { %v3556_v5 = vmul.f32 %v6129_v21, %v11327_v22  ;;  %v3558_v21 = vmul.f32 %v6131_v8, %v11329_v34  ;;  %v11335_v19 = vld [vmem:[#allocation38_spill] sm:$0xff]  ;;  %vm2518_vm7 = vcmp.gt.f32.partialorder %v2387_v63, 0.0  ;;  %v11339_v63 = vld [vmem:[#allocation52_spill] sm:$0xff]  ;;  %vm2520_vm9 = vcmp.gt.f32.partialorder %v2389_v40, 0.0  ;;  %v11342_v40 = vld [vmem:[#allocation57_spill] sm:$0xff] }
 0x2ea   :  { %3810 = vperm.xlu1 %6759, %v3551_v14   ;;  %v9332_v33 = vpop.permute.xlu1 %3163  ;;  %v2378_v14 = vadd.f32 %v11313_v25, %v8999_v35  ;;  %v2380_v35 = vadd.f32 %v11313_v25, %v9027_v47  ;;  %v2382_v47 = vadd.f32 %v11313_v25, %v9055_v39  ;;  %v2384_v39 = vadd.f32 %v11313_v25, %v9080_v61  ;;  %v11337_v13 = vld [vmem:[#allocation46_spill] sm:$0xff] }
 0x2eb   :  { %v9335_v1 = vpop.permute.xlu0 %3183  ;;  %v2386_v61 = vadd.f32 %v11313_v25, %v9095_v2  ;;  %v2388_v2 = vadd.f32 %v11313_v25, %v9103_v52  ;;  %v2390_v52 = vadd.f32 %v11313_v25, %v9111_v60  ;;  %vm2522_vm11 = vcmp.gt.f32.partialorder %v2391_v7, 0.0  ;;  %v11344_v7 = vld [vmem:[#allocation62_spill] sm:$0xff] }
 0x2ec   :  { %3819 = vperm.xlu0 %6758, %v3554_v55   ;;  %v6130_v55 = vsel %vm2507_vm13, 1.0, %v11317_v17  ;;  %vm2509_vm15 = vcmp.gt.f32.partialorder %v2378_v14, 0.0  ;;  %v11331_v14 = vld [vmem:[#allocation26_spill] sm:$0xff]  ;;  %vm2511_vm2 = vcmp.gt.f32.partialorder %v2380_v35, 0.0  ;;  %vm2513_vm4 = vcmp.gt.f32.partialorder %v2382_v47, 0.0  ;;  %v11336_v47 = vld [vmem:[#allocation41_spill] sm:$0xff] }
 0x2ed   :  { %v3557_v11 = vmul.f32 %v6130_v55, %v11330_v44  ;;  %v11333_v35 = vld [vmem:[#allocation34_spill] sm:$0xff]  ;;  %vm2515_vm6 = vcmp.gt.f32.partialorder %v2384_v39, 0.0  ;;  %v11338_v39 = vld [vmem:[#allocation48_spill] sm:$0xff]  ;;  %vm2517_vm8 = vcmp.gt.f32.partialorder %v2386_v61, 0.0  ;;  %v11340_v61 = vld [vmem:[#allocation55_spill] sm:$0xff]  ;;  %vm2519_vm10 = vcmp.gt.f32.partialorder %v2388_v2, 0.0 }
 0x2ee   :  { %3816 = vperm.xlu1 %6759, %v3553_v26   ;;  %v9344_v12 = vpop.permute.xlu1 %3171  ;;  %v6133_v26 = vsel %vm2510_vm14, 1.0, %v11317_v17  ;;  %v2393_v54 = vadd.f32 %v11313_v25, %v9121_v36  ;;  %v11343_v2 = vld [vmem:[#allocation59_spill] sm:$0xff]  ;;  %vm2521_vm12 = vcmp.gt.f32.partialorder %v2390_v52, 0.0  ;;  %v2392_v60 = vadd.f32 %v11313_v25, %v9119_v62  ;;  %v11345_v52 = vld [vmem:[#allocation64_spill] sm:$0xff] }
 0x2ef   :  { %v9347_v18 = vpop.permute.xlu0 %3191  ;;  %v3560_v8 = vmul.f32 %v6133_v26, %v11331_v14  ;;  %v2395_v36 = vadd.f32 %v11313_v25, %v9131_v43  ;;  %v2394_v62 = vadd.f32 %v11313_v25, %v9128_v38  ;;  %v2397_v43 = vadd.f32 %v11313_v25, %v9144_v37 }
 0x2f0   :  { %3825 = vperm.xlu0 %6758, %v3556_v5   ;;  %v6132_v5 = vsel %vm2509_vm15, 1.0, %v11317_v17  ;;  %vm2524_vm13 = vcmp.gt.f32.partialorder %v2393_v54, 0.0  ;;  %vm2523_vm14 = vcmp.gt.f32.partialorder %v2392_v60, 0.0  ;;  %v11346_v54 = vld [vmem:[#allocation69_spill] sm:$0xff]  ;;  %v11347_v60 = vld [vmem:[#allocation70_spill] sm:$0xff]  ;;  %v2396_v38 = vadd.f32 %v11313_v25, %v9141_v57 }
 0x2f1   :  { %v3559_v55 = vmul.f32 %v6132_v5, %v11332_v6  ;;  %vm2526_vm15 = vcmp.gt.f32.partialorder %v2395_v36, 0.0  ;;  %v11348_v36 = vld [vmem:[#allocation72_spill] sm:$0xff]  ;;  %v2399_v37 = vadd.f32 %v11313_v25, %v9163_v30  ;;  %v2398_v57 = vadd.f32 %v11313_v25, %v9160_v56 }
 0x2f2   :  { %3822 = vperm.xlu1 %6759, %v3555_v45   ;;  %v9356_v0 = vpop.permute.xlu1 %3179  ;;  %v6135_v45 = vsel %vm2512_vm1, 1.0, %v11317_v17  ;;  %vm2525_vm1 = vcmp.gt.f32.partialorder %v2394_v62, 0.0  ;;  %v11349_v62 = vld [vmem:[#allocation73_spill] sm:$0xff]  ;;  %v2401_v30 = vadd.f32 %v11313_v25, %v9171_v49  ;;  %v2400_v56 = vadd.f32 %v11313_v25, %v9169_v48 }
 0x2f3   :  { %v9359_v22 = vpop.permute.xlu0 %3199  ;;  %v3562_v26 = vmul.f32 %v6135_v45, %v11333_v35  ;;  %v2403_v49 = vadd.f32 %v11313_v25, %v9179_v29  ;;  %v2402_v48 = vadd.f32 %v11313_v25, %v9177_v53  ;;  %v2405_v29 = vadd.f32 %v11313_v25, %v9188_v23 }
 0x2f4   :  { %3831 = vperm.xlu0 %6758, %v3558_v21   ;;  %v6134_v21 = vsel %vm2511_vm2, 1.0, %v11317_v17  ;;  %vm2528_vm2 = vcmp.gt.f32.partialorder %v2397_v43, 0.0  ;;  %v11351_v43 = vld [vmem:[#allocation74_spill] sm:$0xff]  ;;  %v2404_v53 = vadd.f32 %v11313_v25, %v9186_v4  ;;  %v2407_v23 = vadd.f32 %v11313_v25, %v9199_v20 }
 0x2f5   :  { %v3561_v5 = vmul.f32 %v6134_v21, %v11335_v19  ;;  %v2406_v4 = vadd.f32 %v11313_v25, %v9197_v27  ;;  %v2409_v20 = vadd.f32 %v11313_v25, %v9207_v51  ;;  %v2408_v27 = vadd.f32 %v11313_v25, %v9205_v3 }
 0x2f6   :  { %3828 = vperm.xlu1 %6759, %v3557_v11   ;;  %v9368_v15 = vpop.permute.xlu1 %3187  ;;  %v6137_v11 = vsel %vm2514_vm3, 1.0, %v11317_v17  ;;  %vm2527_vm3 = vcmp.gt.f32.partialorder %v2396_v38, 0.0  ;;  %v11352_v38 = vld [vmem:[#allocation77_spill] sm:$0xff]  ;;  %v2411_v51 = vadd.f32 %v11313_v25, %v9215_v24  ;;  %v2410_v3 = vadd.f32 %v11313_v25, %v9213_v41 }
 0x2f7   :  { %v9371_v34 = vpop.permute.xlu0 %3207  ;;  %v3564_v45 = vmul.f32 %v6137_v11, %v11336_v47  ;;  %v2413_v24 = vadd.f32 %v11313_v25, %v9224_v9  ;;  %v2412_v41 = vadd.f32 %v11313_v25, %v9222_v58  ;;  %v2415_v9 = vadd.f32 %v11313_v25, %v9235_v32  ;;  %v11363_v58 = vld [vmem:[#allocation120_spill] sm:$0xff] }
 0x2f8   :  { %3837 = vperm.xlu0 %6758, %v3560_v8   ;;  %v6136_v8 = vsel %vm2513_vm4, 1.0, %v11317_v17  ;;  %vm2530_vm4 = vcmp.gt.f32.partialorder %v2399_v37, 0.0  ;;  %v11354_v37 = vld [vmem:[#allocation80_spill] sm:$0xff] }
 0x2f9   :  { %v3563_v21 = vmul.f32 %v6136_v8, %v11337_v13  ;;  %v11366_v32 = vld [vmem:[#allocation124_spill] sm:$0xff] }
 0x2fa   :  { %3834 = vperm.xlu1 %6759, %v3559_v55   ;;  %v9380_v44 = vpop.permute.xlu1 %3195  ;;  %v6139_v55 = vsel %vm2516_vm5, 1.0, %v11317_v17  ;;  %vm2529_vm5 = vcmp.gt.f32.partialorder %v2398_v57, 0.0  ;;  %v11355_v57 = vld [vmem:[#allocation81_spill] sm:$0xff] }
 0x2fb   :  { %v9383_v14 = vpop.permute.xlu0 %3215  ;;  %v3566_v11 = vmul.f32 %v6139_v55, %v11338_v39 }
 0x2fc   :  { %11334 = vst [vmem:[#allocation12_spill] sm:$0xff] %v9383_v14  ;;  %3843 = vperm.xlu0 %6758, %v3562_v26   ;;  %v6138_v26 = vsel %vm2515_vm6, 1.0, %v11317_v17  ;;  %vm2532_vm6 = vcmp.gt.f32.partialorder %v2401_v30, 0.0  ;;  %v11356_v30 = vld [vmem:[#allocation82_spill] sm:$0xff]  ;;  %v11407_v14 = vld [vmem:[#allocation39_spill] sm:$0xff] }
 0x2fd   :  { %v3565_v8 = vmul.f32 %v6138_v26, %v11339_v63 }
 0x2fe   :  { %3840 = vperm.xlu1 %6759, %v3561_v5   ;;  %v9392_v6 = vpop.permute.xlu1 %3203  ;;  %v6141_v5 = vsel %vm2518_vm7, 1.0, %v11317_v17  ;;  %vm2531_vm7 = vcmp.gt.f32.partialorder %v2400_v56, 0.0  ;;  %v11357_v56 = vld [vmem:[#allocation83_spill] sm:$0xff] }
 0x2ff   :  { %v9395_v35 = vpop.permute.xlu0 %3226  ;;  %v3568_v55 = vmul.f32 %v6141_v5, %v11340_v61 }
 0x300   :  { %3849 = vperm.xlu0 %6758, %v3564_v45   ;;  %v6140_v45 = vsel %vm2517_vm8, 1.0, %v11317_v17  ;;  %vm2534_vm8 = vcmp.gt.f32.partialorder %v2403_v49, 0.0  ;;  %v11359_v49 = vld [vmem:[#allocation84_spill] sm:$0xff] }
 0x301   :  { %v3567_v26 = vmul.f32 %v6140_v45, %v11342_v40 }
 0x302   :  { %3846 = vperm.xlu1 %6759, %v3563_v21   ;;  %v9404_v19 = vpop.permute.xlu1 %3211  ;;  %v6143_v21 = vsel %vm2520_vm9, 1.0, %v11317_v17  ;;  %vm2533_vm9 = vcmp.gt.f32.partialorder %v2402_v48, 0.0  ;;  %v11360_v48 = vld [vmem:[#allocation85_spill] sm:$0xff] }
 0x303   :  { %v9407_v47 = vpop.permute.xlu0 %3234  ;;  %v3570_v5 = vmul.f32 %v6143_v21, %v11343_v2 }
 0x304   :  { %3855 = vperm.xlu0 %6758, %v3566_v11   ;;  %v6142_v11 = vsel %vm2519_vm10, 1.0, %v11317_v17  ;;  %vm2536_vm10 = vcmp.gt.f32.partialorder %v2405_v29, 0.0  ;;  %v11362_v29 = vld [vmem:[#allocation86_spill] sm:$0xff] }
 0x305   :  { %v3569_v45 = vmul.f32 %v6142_v11, %v11344_v7 }
 0x306   :  { %3852 = vperm.xlu1 %6759, %v3565_v8   ;;  %v9416_v13 = vpop.permute.xlu1 %3219  ;;  %v6145_v8 = vsel %vm2522_vm11, 1.0, %v11317_v17  ;;  %vm2535_vm11 = vcmp.gt.f32.partialorder %v2404_v53, 0.0 }
 0x307   :  { %11341 = vst [vmem:[#allocation15_spill] sm:$0xff] %v9416_v13  ;;  %v9419_v39 = vpop.permute.xlu0 %3242  ;;  %v3572_v21 = vmul.f32 %v6145_v8, %v11345_v52 }
 0x308   :  { %3861 = vperm.xlu0 %6758, %v3568_v55   ;;  %v6144_v55 = vsel %vm2521_vm12, 1.0, %v11317_v17  ;;  %vm2538_vm12 = vcmp.gt.f32.partialorder %v2407_v23, 0.0 }
 0x309   :  { %v3571_v11 = vmul.f32 %v6144_v55, %v11346_v54 }
 0x30a   :  { %3858 = vperm.xlu1 %6759, %v3567_v26   ;;  %v9428_v63 = vpop.permute.xlu1 %3230  ;;  %v6147_v26 = vsel %vm2524_vm13, 1.0, %v11317_v17  ;;  %vm2537_vm13 = vcmp.gt.f32.partialorder %v2406_v4, 0.0 }
 0x30b   :  { %v9431_v61 = vpop.permute.xlu0 %3250  ;;  %v3574_v8 = vmul.f32 %v6147_v26, %v11347_v60 }
 0x30c   :  { %3867 = vperm.xlu0 %6758, %v3570_v5   ;;  %v6146_v5 = vsel %vm2523_vm14, 1.0, %v11317_v17  ;;  %vm2540_vm14 = vcmp.gt.f32.partialorder %v2409_v20, 0.0 }
 0x30d   :  { %v3573_v55 = vmul.f32 %v6146_v5, %v11348_v36 }
 0x30e   :  { %3864 = vperm.xlu1 %6759, %v3569_v45   ;;  %v9440_v40 = vpop.permute.xlu1 %3238  ;;  %v6149_v45 = vsel %vm2526_vm15, 1.0, %v11317_v17  ;;  %vm2539_vm15 = vcmp.gt.f32.partialorder %v2408_v27, 0.0 }
 0x30f   :  { %v9443_v2 = vpop.permute.xlu0 %3258  ;;  %v3576_v26 = vmul.f32 %v6149_v45, %v11349_v62 }
 0x310   :  { %3873 = vperm.xlu0 %6758, %v3572_v21   ;;  %v6148_v21 = vsel %vm2525_vm1, 1.0, %v11317_v17  ;;  %vm2542_vm1 = vcmp.gt.f32.partialorder %v2411_v51, 0.0 }
 0x311   :  { %v3575_v5 = vmul.f32 %v6148_v21, %v11351_v43 }
 0x312   :  { %3870 = vperm.xlu1 %6759, %v3571_v11   ;;  %v9452_v7 = vpop.permute.xlu1 %3246  ;;  %v6151_v11 = vsel %vm2528_vm2, 1.0, %v11317_v17  ;;  %vm2541_vm2 = vcmp.gt.f32.partialorder %v2410_v3, 0.0 }
 0x313   :  { %v9455_v52 = vpop.permute.xlu0 %3266  ;;  %v3578_v45 = vmul.f32 %v6151_v11, %v11352_v38 }
 0x314   :  { %3879 = vperm.xlu0 %6758, %v3574_v8   ;;  %v6150_v8 = vsel %vm2527_vm3, 1.0, %v11317_v17  ;;  %vm2544_vm3 = vcmp.gt.f32.partialorder %v2413_v24, 0.0 }
 0x315   :  { %v3577_v21 = vmul.f32 %v6150_v8, %v11354_v37 }
 0x316   :  { %3876 = vperm.xlu1 %6759, %v3573_v55   ;;  %v9464_v54 = vpop.permute.xlu1 %3254  ;;  %v6153_v55 = vsel %vm2530_vm4, 1.0, %v11317_v17  ;;  %vm2543_vm4 = vcmp.gt.f32.partialorder %v2412_v41, 0.0  ;;  %v11370_v41 = vld [vmem:[#allocation24_spill] sm:$0xff] }
 0x317   :  { %v9467_v60 = vpop.permute.xlu0 %3274  ;;  %v3580_v11 = vmul.f32 %v6153_v55, %v11355_v57 }
 0x318   :  { %11350 = vst [vmem:[#allocation14_spill] sm:$0xff] %v9467_v60  ;;  %3885 = vperm.xlu0 %6758, %v3576_v26   ;;  %v6152_v26 = vsel %vm2529_vm5, 1.0, %v11317_v17  ;;  %vm2546_vm5 = vcmp.gt.f32.partialorder %v2415_v9, 0.0  ;;  %v11411_v60 = vld [vmem:[#allocation40_spill] sm:$0xff] }
 0x319   :  { %v3579_v8 = vmul.f32 %v6152_v26, %v11356_v30 }
 0x31a   :  { %3882 = vperm.xlu1 %6759, %v3575_v5   ;;  %v9476_v36 = vpop.permute.xlu1 %3262  ;;  %v6155_v5 = vsel %vm2532_vm6, 1.0, %v11317_v17 }
 0x31b   :  { %v9479_v62 = vpop.permute.xlu0 %3282  ;;  %v3582_v55 = vmul.f32 %v6155_v5, %v11357_v56 }
 0x31c   :  { %11353 = vst [vmem:[#allocation18_spill] sm:$0xff] %v9479_v62  ;;  %3891 = vperm.xlu0 %6758, %v3578_v45   ;;  %v6154_v45 = vsel %vm2531_vm7, 1.0, %v11317_v17 }
 0x31d   :  { %v3581_v26 = vmul.f32 %v6154_v45, %v11359_v49  ;;  %v6161_v49 = vsel %vm2538_vm12, 1.0, %v11317_v17 }
 0x31e   :  { %3888 = vperm.xlu1 %6759, %v3577_v21   ;;  %v9488_v43 = vpop.permute.xlu1 %3270  ;;  %v6157_v21 = vsel %vm2534_vm8, 1.0, %v11317_v17 }
 0x31f   :  { %v9491_v38 = vpop.permute.xlu0 %3293  ;;  %v3584_v5 = vmul.f32 %v6157_v21, %v11360_v48 }
 0x320   :  { %3897 = vperm.xlu0 %6758, %v3580_v11   ;;  %v6156_v11 = vsel %vm2533_vm9, 1.0, %v11317_v17 }
 0x321   :  { %v3583_v45 = vmul.f32 %v6156_v11, %v11362_v29  ;;  %v3588_v11 = vmul.f32 %v6161_v49, %v8544_v59  ;;  %v6162_v59 = vsel %vm2539_vm15, 1.0, %v11317_v17  ;;  %v6167_v49 = vsel %vm2544_vm3, 1.0, %v11317_v17 }
 0x322   :  { %3894 = vperm.xlu1 %6759, %v3579_v8   ;;  %v9500_v37 = vpop.permute.xlu1 %3278  ;;  %v6159_v8 = vsel %vm2536_vm10, 1.0, %v11317_v17 }
 0x323   :  { %11358 = vst [vmem:[#allocation16_spill] sm:$0xff] %v9500_v37  ;;  %v9503_v57 = vpop.permute.xlu0 %3301  ;;  %v3586_v53 = vmul.f32 %v6159_v8, %v8522_v10  ;;  %v6160_v10 = vsel %vm2537_vm13, 1.0, %v11317_v17 }
 0x324   :  { %3903 = vperm.xlu0 %6758, %v3582_v55   ;;  %v6158_v55 = vsel %vm2535_vm11, 1.0, %v11317_v17 }
 0x325   :  { %v3585_v23 = vmul.f32 %v6158_v55, %v8534_v50  ;;  %v3587_v50 = vmul.f32 %v6160_v10, %v8556_v16  ;;  %v3589_v16 = vmul.f32 %v6162_v59, %v8572_v46  ;;  %v11365_v46 = vld [vmem:[#allocation87_spill] sm:$0xff]  ;;  %v2417_v10 = vadd.f32 %v11313_v25, %v11366_v32 }
 0x326   :  { %3900 = vperm.xlu1 %6759, %v3581_v26   ;;  %v9512_v30 = vpop.permute.xlu1 %3286  ;;  %v6169_v59 = vsel %vm2546_vm5, 1.0, %v11317_v17 }
 0x327   :  { %11361 = vst [vmem:[#allocation19_spill] sm:$0xff] %v9512_v30  ;;  %v9515_v56 = vpop.permute.xlu0 %3309  ;;  %vm2548_vm7 = vcmp.gt.f32.partialorder %v2417_v10, 0.0  ;;  %v11374_v10 = vld [vmem:[#allocation44_spill] sm:$0xff] }
 0x328   :  { %3909 = vperm.xlu0 %6758, %v3584_v5   ;;  %v6163_v5 = vsel %vm2540_vm14, 1.0, %v11317_v17 }
 0x329   :  { %v3590_v8 = vmul.f32 %v6163_v5, %v8560_v42  ;;  %v6164_v42 = vsel %vm2541_vm2, 1.0, %v11317_v17  ;;  %v11368_v5 = vld [vmem:[#allocation123_spill] sm:$0xff] }
 0x32a   :  { %3906 = vperm.xlu1 %6759, %v3583_v45   ;;  %v9524_v21 = vpop.permute.xlu1 %3297  ;;  %v6165_v45 = vsel %vm2542_vm1, 1.0, %v11317_v17  ;;  %v3591_v51 = vmul.f32 %v6164_v42, %v11365_v46 }
 0x32b   :  { %v9527_v26 = vpop.permute.xlu0 %3317  ;;  %v3592_v55 = vmul.f32 %v6165_v45, %v8582_v31  ;;  %v6166_v31 = vsel %vm2543_vm4, 1.0, %v11317_v17 }
 0x32c   :  { %3915 = vperm.xlu0 %6758, %v3586_v53   ;;  %v2414_v53 = vadd.f32 %v11313_v25, %v11363_v58  ;;  %v3593_v45 = vmul.f32 %v6166_v31, %v11370_v41  ;;  %v2421_v31 = vadd.f32 %v11313_v25, %v11374_v10  ;;  %v11377_v41 = vld [vmem:[#allocation131_spill] sm:$0xff] }
 0x32d   :  { %v11379_v10 = vld [vmem:[#allocation51_spill] sm:$0xff] }
 0x32e   :  { %3912 = vperm.xlu1 %6759, %v3585_v23   ;;  %v9536_v48 = vpop.permute.xlu1 %3305  ;;  %vm2545_vm6 = vcmp.gt.f32.partialorder %v2414_v53, 0.0  ;;  %v11373_v53 = vld [vmem:[#allocation127_spill] sm:$0xff]  ;;  %vm2552_vm11 = vcmp.gt.f32.partialorder %v2421_v31, 0.0 }
 0x32f   :  { %v9539_v4 = vpop.permute.xlu0 %3325  ;;  %v6168_v42 = vsel %vm2545_vm6, 1.0, %v11317_v17 }
 0x330   :  { %3921 = vperm.xlu0 %6758, %v3588_v11   ;;  %v11367_v11 = vld [vmem:[#allocation20_spill] sm:$0xff] }
 0x331   :  { %v3594_v3 = vmul.f32 %v6167_v49, %v11367_v11  ;;  %v2418_v49 = vadd.f32 %v11313_v25, %v11373_v53  ;;  %v11375_v11 = vld [vmem:[#allocation28_spill] sm:$0xff] }
 0x332   :  { %3918 = vperm.xlu1 %6759, %v3587_v50   ;;  %v9548_v29 = vpop.permute.xlu1 %3313  ;;  %v2416_v50 = vadd.f32 %v11313_v25, %v11368_v5 }
 0x333   :  { %v9551_v20 = vpop.permute.xlu0 %3333  ;;  %vm2549_vm10 = vcmp.gt.f32.partialorder %v2418_v49, 0.0  ;;  %v11381_v49 = vld [vmem:[#allocation49_spill] sm:$0xff] }
 0x334   :  { %3927 = vperm.xlu0 %6758, %v3590_v8   ;;  %vm2547_vm8 = vcmp.gt.f32.partialorder %v2416_v50, 0.0  ;;  %v11376_v50 = vld [vmem:[#allocation23_spill] sm:$0xff] }
 0x335   :  { %v6170_v5 = vsel %vm2547_vm8, 1.0, %v11317_v17 }
 0x336   :  { %3924 = vperm.xlu1 %6759, %v3589_v16   ;;  %v9560_v27 = vpop.permute.xlu1 %3321  ;;  %v11371_v16 = vld [vmem:[#allocation128_spill] sm:$0xff] }
 0x337   :  { %v9563_v23 = vpop.permute.xlu0 %3341  ;;  %v2419_v9 = vadd.f32 %v11313_v25, %v11371_v16 }
 0x338   :  { %11364 = vst [vmem:[#allocation22_spill] sm:$0xff] %v9563_v23  ;;  %3933 = vperm.xlu0 %6758, %v3592_v55   ;;  %v11372_v55 = vld [vmem:[#allocation21_spill] sm:$0xff] }
 0x339   :  { %v3596_v58 = vmul.f32 %v6169_v59, %v11372_v55  ;;  %vm2550_vm9 = vcmp.gt.f32.partialorder %v2419_v9, 0.0  ;;  %v2423_v9 = vadd.f32 %v11313_v25, %v11379_v10  ;;  %v11384_v10 = vld [vmem:[#allocation33_spill] sm:$0xff] }
 0x33a   :  { %3930 = vperm.xlu1 %6759, %v3591_v51   ;;  %v9572_v24 = vpop.permute.xlu1 %3329  ;;  %v6171_v51 = vsel %vm2548_vm7, 1.0, %v11317_v17  ;;  %v6173_v55 = vsel %vm2550_vm9, 1.0, %v11317_v17 }
 0x33b   :  { %v9575_v8 = vpop.permute.xlu0 %3349  ;;  %v3598_v59 = vmul.f32 %v6171_v51, %v11376_v50  ;;  %v6172_v51 = vsel %vm2549_vm10, 1.0, %v11317_v17  ;;  %v11382_v50 = vld [vmem:[#allocation27_spill] sm:$0xff]  ;;  %vm2554_vm13 = vcmp.gt.f32.partialorder %v2423_v9, 0.0 }
 0x33c   :  { %11369 = vst [vmem:[#allocation26_spill] sm:$0xff] %v9575_v8  ;;  %3939 = vperm.xlu0 %6758, %v3594_v3   ;;  %v3595_v3 = vmul.f32 %v6168_v42, %v11375_v11  ;;  %v11380_v42 = vld [vmem:[#allocation30_spill] sm:$0xff]  ;;  %v2422_v11 = vadd.f32 %v11313_v25, %v11381_v49  ;;  %v6175_v8 = vsel %vm2552_vm11, 1.0, %v11317_v17  ;;  %v3599_v30 = vmul.f32 %v6172_v51, %v11384_v10  ;;  %v11388_v51 = vld [vmem:[#allocation32_spill] sm:$0xff] }
 0x33d   :  { %v11386_v49 = vld [vmem:[#allocation54_spill] sm:$0xff] }
 0x33e   :  { %3936 = vperm.xlu1 %6759, %v3593_v45   ;;  %v9584_v46 = vpop.permute.xlu1 %3337  ;;  %v2420_v45 = vadd.f32 %v11313_v25, %v11377_v41  ;;  %vm2553_vm14 = vcmp.gt.f32.partialorder %v2422_v11, 0.0 }
 0x33f   :  { %v9587_v32 = vpop.permute.xlu0 %3360  ;;  %v6176_v10 = vsel %vm2553_vm14, 1.0, %v11317_v17 }
 0x340   :  { %3945 = vperm.xlu0 %6758, %v3596_v58   ;;  %v3597_v58 = vmul.f32 %v6170_v5, %v11380_v42  ;;  %vm2551_vm12 = vcmp.gt.f32.partialorder %v2420_v45, 0.0 }
 0x341   :  { %v6174_v5 = vsel %vm2551_vm12, 1.0, %v11317_v17 }
 0x342   :  { %3942 = vperm.xlu1 %6759, %v3595_v3   ;;  %v9596_v16 = vpop.permute.xlu1 %3345  ;;  %v3600_v3 = vmul.f32 %v6173_v55, %v11382_v50  ;;  %v2425_v55 = vadd.f32 %v11313_v25, %v11386_v49 }
 0x343   :  { %11378 = vst [vmem:[#allocation31_spill] sm:$0xff] %v9596_v16  ;;  %v9599_v53 = vpop.permute.xlu0 %3368  ;;  %v11391_v16 = vld [vmem:[#allocation35_spill] sm:$0xff] }
 0x344   :  { %3951 = vperm.xlu0 %6758, %v3598_v59   ;;  %v11385_v59 = vld [vmem:[#allocation29_spill] sm:$0xff]  ;;  %vm2556_vm15 = vcmp.gt.f32.partialorder %v2425_v55, 0.0  ;;  %v3603_v13 = vmul.f32 %v6176_v10, %v11391_v16  ;;  %v11397_v10 = vld [vmem:[#allocation143_spill] sm:$0xff] }
 0x345   :  { %v3602_v42 = vmul.f32 %v6175_v8, %v11385_v59  ;;  %v11389_v8 = vld [vmem:[#allocation37_spill] sm:$0xff] }
 0x346   :  { %3948 = vperm.xlu1 %6759, %v3597_v58   ;;  %v9608_v41 = vpop.permute.xlu1 %3353  ;;  %v6177_v58 = vsel %vm2554_vm13, 1.0, %v11317_v17  ;;  %v11390_v59 = vld [vmem:[#allocation53_spill] sm:$0xff] }
 0x347   :  { %11383 = vst [vmem:[#allocation34_spill] sm:$0xff] %v9608_v41  ;;  %v9611_v31 = vpop.permute.xlu0 %3376  ;;  %v11387_v41 = vld [vmem:[#allocation50_spill] sm:$0xff]  ;;  %v3604_v11 = vmul.f32 %v6177_v58, %v11389_v8  ;;  %v11393_v58 = vld [vmem:[#allocation56_spill] sm:$0xff]  ;;  %v11396_v16 = vld [vmem:[#allocation61_spill] sm:$0xff] }
 0x348   :  { %3957 = vperm.xlu0 %6758, %v3600_v3   ;;  %v2424_v9 = vadd.f32 %v11313_v25, %v11387_v41  ;;  %v3601_v3 = vmul.f32 %v6174_v5, %v11388_v51  ;;  %v11392_v41 = vld [vmem:[#allocation58_spill] sm:$0xff]  ;;  %v2429_v55 = vadd.f32 %v11313_v25, %v11393_v58  ;;  %v11394_v51 = vld [vmem:[#allocation140_spill] sm:$0xff] }
 0x349   :  { %v2426_v5 = vadd.f32 %v11313_v25, %v11392_v41  ;;  %v11398_v41 = vld [vmem:[#allocation60_spill] sm:$0xff] }
 0x34a   :  { %3954 = vperm.xlu1 %6759, %v3599_v30   ;;  %v9618_v45 = vpop.permute.xlu1 %3364  ;;  %v2427_v30 = vadd.f32 %v11313_v25, %v11390_v59  ;;  %vm2555_vm1 = vcmp.gt.f32.partialorder %v2424_v9, 0.0  ;;  %v2428_v9 = vadd.f32 %v11313_v25, %v11396_v16  ;;  %vm2560_vm4 = vcmp.gt.f32.partialorder %v2429_v55, 0.0 }
 0x34b   :  { %v9621_v50 = vpop.permute.xlu0 %3384  ;;  %v6178_v59 = vsel %vm2555_vm1, 1.0, %v11317_v17  ;;  %vm2557_vm3 = vcmp.gt.f32.partialorder %v2426_v5, 0.0  ;;  %v11400_v5 = vld [vmem:[#allocation63_spill] sm:$0xff] }
 0x34c   :  { %3963 = vperm.xlu0 %6758, %v3602_v42   ;;  %v6179_v42 = vsel %vm2556_vm15, 1.0, %v11317_v17  ;;  %vm2558_vm2 = vcmp.gt.f32.partialorder %v2427_v30, 0.0  ;;  %v6180_v23 = vsel %vm2557_vm3, 1.0, %v11317_v17  ;;  %vm2559_vm5 = vcmp.gt.f32.partialorder %v2428_v9, 0.0 }
 0x34d   :  { %v3606_v8 = vmul.f32 %v6179_v42, %v11394_v51  ;;  %v6181_v30 = vsel %vm2558_vm2, 1.0, %v11317_v17  ;;  %v2431_v42 = vadd.f32 %v11313_v25, %v11398_v41  ;;  %v2430_v16 = vadd.f32 %v11313_v25, %v11400_v5  ;;  %v11405_v5 = vld [vmem:[#allocation68_spill] sm:$0xff] }
 0x34e   :  { %3960 = vperm.xlu1 %6759, %v3601_v3   ;;  %v9630_v49 = vpop.permute.xlu1 %3372  ;;  %v6182_v9 = vsel %vm2559_vm5, 1.0, %v11317_v17 }
 0x34f   :  { %v9632_v62 = vpop.permute.xlu0 %3392  ;;  %vm2562_vm6 = vcmp.gt.f32.partialorder %v2431_v42, 0.0  ;;  %vm2561_vm7 = vcmp.gt.f32.partialorder %v2430_v16, 0.0  ;;  %v2435_v42 = vadd.f32 %v11313_v25, %v11407_v14  ;;  %v11413_v14 = vld [vmem:[#allocation89_spill] sm:$0xff] }
 0x350   :  { %3969 = vperm.xlu0 %6758, %v3604_v11   ;;  %v3605_v11 = vmul.f32 %v6178_v59, %v11397_v10  ;;  %v11403_v10 = vld [vmem:[#allocation36_spill] sm:$0xff] }
 0x351   :  { %v2433_v41 = vadd.f32 %v11313_v25, %v11403_v10  ;;  %v11408_v10 = vld [vmem:[#allocation145_spill] sm:$0xff]  ;;  %vm2566_vm10 = vcmp.gt.f32.partialorder %v2435_v42, 0.0 }
 0x352   :  { %3966 = vperm.xlu1 %6759, %v3603_v13   ;;  %v9641_v3 = vpop.permute.xlu1 %3380  ;;  %v11399_v13 = vld [vmem:[#allocation142_spill] sm:$0xff]  ;;  %v6189_v42 = vsel %vm2566_vm10, 1.0, %v11317_v17 }
 0x353   :  { %v9644_v37 = vpop.permute.xlu0 %3400  ;;  %v3608_v58 = vmul.f32 %v6181_v30, %v11399_v13  ;;  %vm2564_vm8 = vcmp.gt.f32.partialorder %v2433_v41, 0.0 }
 0x354   :  { %11395 = vst [vmem:[#allocation38_spill] sm:$0xff] %v9644_v37  ;;  %3975 = vperm.xlu0 %6758, %v3606_v8   ;;  %v11401_v37 = vld [vmem:[#allocation17_spill] sm:$0xff]  ;;  %v6183_v8 = vsel %vm2560_vm4, 1.0, %v11317_v17  ;;  %v6187_v41 = vsel %vm2564_vm8, 1.0, %v11317_v17 }
 0x355   :  { %v3607_v59 = vmul.f32 %v6180_v23, %v11401_v37  ;;  %v2432_v37 = vadd.f32 %v11313_v25, %v11405_v5  ;;  %v11406_v23 = vld [vmem:[#allocation146_spill] sm:$0xff]  ;;  %v2434_v5 = vadd.f32 %v11313_v25, %v11411_v60  ;;  %v11416_v60 = vld [vmem:[#allocation88_spill] sm:$0xff] }
 0x356   :  { %3972 = vperm.xlu1 %6759, %v3605_v11   ;;  %v9653_v51 = vpop.permute.xlu1 %3388  ;;  %v11404_v11 = vld [vmem:[#allocation144_spill] sm:$0xff] }
 0x357   :  { %v9660_v55 = vpop.permute.xlu0 %3408  ;;  %v3610_v30 = vmul.f32 %v6183_v8, %v11404_v11  ;;  %v6184_v11 = vsel %vm2561_vm7, 1.0, %v11317_v17  ;;  %vm2563_vm9 = vcmp.gt.f32.partialorder %v2432_v37, 0.0  ;;  %vm2565_vm11 = vcmp.gt.f32.partialorder %v2434_v5, 0.0 }
 0x358   :  { %3981 = vperm.xlu0 %6758, %v3608_v58   ;;  %11402 = vst [vmem:[#allocation41_spill] sm:$0xff] %v9660_v55  ;;  %v3609_v58 = vmul.f32 %v6182_v9, %v11406_v23  ;;  %v6185_v55 = vsel %vm2562_vm6, 1.0, %v11317_v17  ;;  %v11414_v23 = vld [vmem:[#allocation147_spill] sm:$0xff]  ;;  %v2449_v37 = vadd.f32 %v11313_v25, %v11416_v60 }
 0x359   :  { %v3612_v8 = vmul.f32 %v6185_v55, %v11408_v10  ;;  %v2450_v55 = vadd.f32 %v11313_v25, %v11413_v14 }
 0x35a   :  { %3978 = vperm.xlu1 %6759, %v3607_v59   ;;  %v9665_v13 = vpop.permute.xlu1 %3396  ;;  %vm2580_vm13 = vcmp.gt.f32.partialorder %v2449_v37, 0.0 }
 0x35b   :  { %v9678_v16 = vpop.permute.xlu0 %3416  ;;  %vm2581_vm12 = vcmp.gt.f32.partialorder %v2450_v55, 0.0  ;;  %v11420_v55 = vld [vmem:[#allocation104_spill] sm:$0xff] }
 0x35c   :  { %3987 = vperm.xlu0 %6758, %v3610_v30   ;;  %11410 = vst [vmem:[#allocation48_spill] sm:$0xff] %v9678_v16  ;;  %v11412_v30 = vld [vmem:[#allocation11_spill] sm:$0xff]  ;;  %v6186_v16 = vsel %vm2563_vm9, 1.0, %v11317_v17 }
 0x35d   :  { %v3611_v9 = vmul.f32 %v6184_v11, %v11412_v30  ;;  %v11417_v11 = vld [vmem:[#allocation90_spill] sm:$0xff] }
 0x35e   :  { %3984 = vperm.xlu1 %6759, %v3609_v58   ;;  %v9675_v59 = vpop.permute.xlu1 %3404  ;;  %v3614_v58 = vmul.f32 %v6187_v41, %v11414_v23  ;;  %v2451_v30 = vadd.f32 %v11313_v25, %v11417_v11  ;;  %v6188_v23 = vsel %vm2565_vm11, 1.0, %v11317_v17  ;;  %v6203_v11 = vsel %vm2580_vm13, 1.0, %v11317_v17 }
 0x35f   :  { %11409 = vst [vmem:[#allocation46_spill] sm:$0xff] %v9675_v59  ;;  %v3630_v37 = vmul.f32 %v6203_v11, %v9395_v35 }
 0x360   :  { %3993 = vperm.xlu0 %6758, %v3612_v8   ;;  %v3613_v8 = vmul.f32 %v6186_v16, %v9320_v28  ;;  %v3615_v28 = vmul.f32 %v6188_v23, %v9332_v33  ;;  %v6204_v16 = vsel %vm2581_vm12, 1.0, %v11317_v17  ;;  %vm2582_vm14 = vcmp.gt.f32.partialorder %v2451_v30, 0.0 }
 0x361   :  { %v6205_v30 = vsel %vm2582_vm14, 1.0, %v11317_v17 }
 0x362   :  { %3990 = vperm.xlu1 %6759, %v3611_v9   ;;  %v9687_v10 = vpop.permute.xlu1 %3412  ;;  %v11418_v9 = vld [vmem:[#allocation148_spill] sm:$0xff] }
 0x363   :  { %v9690_v59 = vpop.permute.xlu0 %3807  ;;  %v3616_v41 = vmul.f32 %v6189_v42, %v11418_v9 }
 0x364   :  { %11415 = vst [vmem:[#allocation52_spill] sm:$0xff] %v9690_v59  ;;  %3999 = vperm.xlu0 %6758, %v3614_v58   ;;  %v11419_v59 = vld [vmem:[#allocation43_spill] sm:$0xff]  ;;  %v2466_v58 = vadd.f32 %v11313_v25, %v11420_v55  ;;  %v11423_v55 = vld [vmem:[#allocation42_spill] sm:$0xff] }
 0x365   :  { %v2436_v60 = vadd.f32 %v11313_v25, %v11419_v59  ;;  %v11421_v59 = vld [vmem:[#allocation103_spill] sm:$0xff] }
 0x366   :  { %3996 = vperm.xlu1 %6759, %v3613_v8   ;;  %v9699_v14 = vpop.permute.xlu1 %3420  ;;  %v3631_v8 = vmul.f32 %v6204_v16, %v9428_v63  ;;  %v2465_v33 = vadd.f32 %v11313_v25, %v11421_v59  ;;  %vm2597_vm1 = vcmp.gt.f32.partialorder %v2466_v58, 0.0  ;;  %v3632_v63 = vmul.f32 %v6205_v30, %v9407_v47  ;;  %v11424_v58 = vld [vmem:[#allocation119_spill] sm:$0xff] }
 0x367   :  { %v9702_v5 = vpop.permute.xlu0 %3813  ;;  %vm2567_vm15 = vcmp.gt.f32.partialorder %v2436_v60, 0.0  ;;  %v2437_v59 = vadd.f32 %v11313_v25, %v11423_v55  ;;  %v2481_v47 = vadd.f32 %v11313_v25, %v11424_v58  ;;  %v11428_v58 = vld [vmem:[#allocation121_spill] sm:$0xff] }
 0x368   :  { %4005 = vperm.xlu0 %6758, %v3616_v41   ;;  %v11422_v41 = vld [vmem:[#allocation91_spill] sm:$0xff]  ;;  %v6190_v16 = vsel %vm2567_vm15, 1.0, %v11317_v17  ;;  %vm2596_vm2 = vcmp.gt.f32.partialorder %v2465_v33, 0.0  ;;  %v11425_v33 = vld [vmem:[#allocation105_spill] sm:$0xff] }
 0x369   :  { %v2452_v23 = vadd.f32 %v11313_v25, %v11422_v41  ;;  %v3617_v35 = vmul.f32 %v6190_v16, %v9344_v12  ;;  %v6219_v30 = vsel %vm2596_vm2, 1.0, %v11317_v17  ;;  %vm2568_vm4 = vcmp.gt.f32.partialorder %v2437_v59, 0.0  ;;  %v11426_v16 = vld [vmem:[#allocation45_spill] sm:$0xff] }
 0x36a   :  { %4002 = vperm.xlu1 %6759, %v3615_v28   ;;  %v9711_v42 = vpop.permute.xlu1 %3810  ;;  %v2467_v12 = vadd.f32 %v11313_v25, %v11425_v33  ;;  %v2438_v55 = vadd.f32 %v11313_v25, %v11426_v16  ;;  %vm2612_vm5 = vcmp.gt.f32.partialorder %v2481_v47, 0.0  ;;  %v11430_v47 = vld [vmem:[#allocation106_spill] sm:$0xff] }
 0x36b   :  { %v9714_v9 = vpop.permute.xlu0 %3819  ;;  %vm2583_vm3 = vcmp.gt.f32.partialorder %v2452_v23, 0.0  ;;  %v6235_v33 = vsel %vm2612_vm5, 1.0, %v11317_v17 }
 0x36c   :  { %4050 = vperm.xlu0 %6758, %v3631_v8   ;;  %v6220_v8 = vsel %vm2597_vm1, 1.0, %v11317_v17  ;;  %v6206_v23 = vsel %vm2583_vm3, 1.0, %v11317_v17  ;;  %vm2598_vm6 = vcmp.gt.f32.partialorder %v2467_v12, 0.0  ;;  %vm2569_vm7 = vcmp.gt.f32.partialorder %v2438_v55, 0.0 }
 0x36d   :  { %v3647_v11 = vmul.f32 %v6220_v8, %v9524_v21  ;;  %v3633_v21 = vmul.f32 %v6206_v23, %v9440_v40  ;;  %v6191_v8 = vsel %vm2568_vm4, 1.0, %v11317_v17  ;;  %v2468_v40 = vadd.f32 %v11313_v25, %v11430_v47 }
 0x36e   :  { %v9723_v28 = vpop.permute.xlu1 %3816  ;;  %4047 = vperm.xlu1 %6759, %v3630_v37   ;;  %v3662_v23 = vmul.f32 %v6235_v33, %v9587_v32  ;;  %v6221_v16 = vsel %vm2598_vm6, 1.0, %v11317_v17  ;;  %v6192_v55 = vsel %vm2569_vm7, 1.0, %v11317_v17 }
 0x36f   :  { %v9726_v60 = vpop.permute.xlu0 %3825  ;;  %vm2599_vm9 = vcmp.gt.f32.partialorder %v2468_v40, 0.0  ;;  %v3619_v32 = vmul.f32 %v6192_v55, %v9356_v0  ;;  %v11436_v40 = vld [vmem:[#allocation107_spill] sm:$0xff] }
 0x370   :  { %4053 = vperm.xlu0 %6758, %v3632_v63   ;;  %v3646_v63 = vmul.f32 %v6219_v30, %v9491_v38  ;;  %v2482_v38 = vadd.f32 %v11313_v25, %v11428_v58  ;;  %v2469_v0 = vadd.f32 %v11313_v25, %v11436_v40 }
 0x372   :  { %v9735_v37 = vpop.permute.xlu1 %3822  ;;  %4008 = vperm.xlu1 %6759, %v3617_v35   ;;  %vm2613_vm8 = vcmp.gt.f32.partialorder %v2482_v38, 0.0  ;;  %vm2600_vm13 = vcmp.gt.f32.partialorder %v2469_v0, 0.0  ;;  %v11442_v0 = vld [vmem:[#allocation108_spill] sm:$0xff] }
 0x373   :  { %v9738_v41 = vpop.permute.xlu0 %3831  ;;  %v6236_v33 = vsel %vm2613_vm8, 1.0, %v11317_v17 }
 0x374   :  { %4098 = vperm.xlu0 %6758, %v3647_v11   ;;  %v11429_v11 = vld [vmem:[#allocation13_spill] sm:$0xff]  ;;  %v3663_v38 = vmul.f32 %v6236_v33, %v9618_v45 }
 0x375   :  { %v3618_v30 = vmul.f32 %v6191_v8, %v11429_v11  ;;  %v11433_v8 = vld [vmem:[#allocation66_spill] sm:$0xff] }
 0x376   :  { %v9747_v35 = vpop.permute.xlu1 %3828  ;;  %4095 = vperm.xlu1 %6759, %v3646_v63   ;;  %v2439_v11 = vadd.f32 %v11313_v25, %v11433_v8  ;;  %v11438_v8 = vld [vmem:[#allocation93_spill] sm:$0xff] }
 0x377   :  { %v9750_v59 = vpop.permute.xlu0 %3837 }
 0x378   :  { %11427 = vst [vmem:[#allocation55_spill] sm:$0xff] %v9750_v59  ;;  %4056 = vperm.xlu0 %6758, %v3633_v21   ;;  %v11432_v59 = vld [vmem:[#allocation92_spill] sm:$0xff]  ;;  %v3648_v21 = vmul.f32 %v6221_v16, %v9503_v57  ;;  %vm2570_vm11 = vcmp.gt.f32.partialorder %v2439_v11, 0.0 }
 0x379   :  { %v2453_v58 = vadd.f32 %v11313_v25, %v11432_v59  ;;  %v11435_v59 = vld [vmem:[#allocation122_spill] sm:$0xff]  ;;  %v6193_v11 = vsel %vm2570_vm11, 1.0, %v11317_v17 }
 0x37a   :  { %v9759_v63 = vpop.permute.xlu1 %3834  ;;  %4011 = vperm.xlu1 %6759, %v3618_v30   ;;  %v2483_v57 = vadd.f32 %v11313_v25, %v11435_v59  ;;  %v2454_v59 = vadd.f32 %v11313_v25, %v11438_v8 }
 0x37b   :  { %v9762_v12 = vpop.permute.xlu0 %3843  ;;  %vm2584_vm10 = vcmp.gt.f32.partialorder %v2453_v58, 0.0 }
 0x37c   :  { %11431 = vst [vmem:[#allocation57_spill] sm:$0xff] %v9762_v12  ;;  %4143 = vperm.xlu0 %6758, %v3662_v23   ;;  %v6222_v23 = vsel %vm2599_vm9, 1.0, %v11317_v17  ;;  %v6207_v55 = vsel %vm2584_vm10, 1.0, %v11317_v17  ;;  %vm2614_vm12 = vcmp.gt.f32.partialorder %v2483_v57, 0.0  ;;  %vm2585_vm14 = vcmp.gt.f32.partialorder %v2454_v59, 0.0  ;;  %v11441_v57 = vld [vmem:[#allocation125_spill] sm:$0xff] }
 0x37d   :  { %v3649_v16 = vmul.f32 %v6222_v23, %v9536_v48  ;;  %v3634_v45 = vmul.f32 %v6207_v55, %v9419_v39  ;;  %v3620_v48 = vmul.f32 %v6193_v11, %v9335_v1  ;;  %v6237_v23 = vsel %vm2614_vm12, 1.0, %v11317_v17 }
 0x37e   :  { %v9771_v30 = vpop.permute.xlu1 %3840  ;;  %4101 = vperm.xlu1 %6759, %v3648_v21   ;;  %v2484_v39 = vadd.f32 %v11313_v25, %v11441_v57  ;;  %v6223_v55 = vsel %vm2600_vm13, 1.0, %v11317_v17  ;;  %v2470_v1 = vadd.f32 %v11313_v25, %v11442_v0  ;;  %v6208_v11 = vsel %vm2585_vm14, 1.0, %v11317_v17 }
 0x37f   :  { %v9774_v47 = vpop.permute.xlu0 %3849  ;;  %v3650_v8 = vmul.f32 %v6223_v55, %v9515_v56 }
 0x380   :  { %11434 = vst [vmem:[#allocation59_spill] sm:$0xff] %v9774_v47  ;;  %4014 = vperm.xlu0 %6758, %v3619_v32   ;;  %v11439_v32 = vld [vmem:[#allocation47_spill] sm:$0xff]  ;;  %vm2615_vm1 = vcmp.gt.f32.partialorder %v2484_v39, 0.0  ;;  %vm2601_vm2 = vcmp.gt.f32.partialorder %v2470_v1, 0.0  ;;  %v11445_v39 = vld [vmem:[#allocation126_spill] sm:$0xff]  ;;  %v11446_v1 = vld [vmem:[#allocation109_spill] sm:$0xff] }
 0x381   :  { %v2440_v33 = vadd.f32 %v11313_v25, %v11439_v32  ;;  %v11443_v32 = vld [vmem:[#allocation94_spill] sm:$0xff]  ;;  %v6238_v55 = vsel %vm2615_vm1, 1.0, %v11317_v17 }
 0x382   :  { %v9783_v21 = vpop.permute.xlu1 %3846  ;;  %4146 = vperm.xlu1 %6759, %v3663_v38   ;;  %v2455_v57 = vadd.f32 %v11313_v25, %v11443_v32 }
 0x383   :  { %11437 = vst [vmem:[#allocation62_spill] sm:$0xff] %v9783_v21  ;;  %v9786_v58 = vpop.permute.xlu0 %3855  ;;  %vm2571_vm15 = vcmp.gt.f32.partialorder %v2440_v33, 0.0 }
 0x384   :  { %4104 = vperm.xlu0 %6758, %v3649_v16   ;;  %v3664_v16 = vmul.f32 %v6237_v23, %v9599_v53  ;;  %v3635_v53 = vmul.f32 %v6208_v11, %v9452_v7  ;;  %v6194_v33 = vsel %vm2571_vm15, 1.0, %v11317_v17  ;;  %vm2586_vm3 = vcmp.gt.f32.partialorder %v2455_v57, 0.0 }
 0x385   :  { %v3621_v56 = vmul.f32 %v6194_v33, %v9368_v15  ;;  %v2485_v7 = vadd.f32 %v11313_v25, %v11445_v39  ;;  %v6224_v11 = vsel %vm2601_vm2, 1.0, %v11317_v17  ;;  %v2471_v15 = vadd.f32 %v11313_v25, %v11446_v1 }
 0x386   :  { %v9795_v38 = vpop.permute.xlu1 %3852  ;;  %4059 = vperm.xlu1 %6759, %v3634_v45   ;;  %v3651_v32 = vmul.f32 %v6224_v11, %v9548_v29  ;;  %v6209_v33 = vsel %vm2586_vm3, 1.0, %v11317_v17 }
 0x387   :  { %11440 = vst [vmem:[#allocation64_spill] sm:$0xff] %v9795_v38  ;;  %v9798_v40 = vpop.permute.xlu0 %3861  ;;  %vm2616_vm5 = vcmp.gt.f32.partialorder %v2485_v7, 0.0  ;;  %vm2602_vm6 = vcmp.gt.f32.partialorder %v2471_v15, 0.0  ;;  %v11449_v7 = vld [vmem:[#allocation129_spill] sm:$0xff] }
 0x388   :  { %4017 = vperm.xlu0 %6758, %v3620_v48   ;;  %v11444_v48 = vld [vmem:[#allocation65_spill] sm:$0xff]  ;;  %v6239_v11 = vsel %vm2616_vm5, 1.0, %v11317_v17 }
 0x389   :  { %v2441_v23 = vadd.f32 %v11313_v25, %v11444_v48  ;;  %v11447_v48 = vld [vmem:[#allocation95_spill] sm:$0xff]  ;;  %v4878_v15 = vld [vmem:[%s11058_s10 + $0x8] sm:$0xff] }
 0x38a   :  { %v9807_v45 = vpop.permute.xlu1 %3858  ;;  %4149 = vperm.xlu1 %6759, %v3664_v16   ;;  %v2456_v39 = vadd.f32 %v11313_v25, %v11447_v48  ;;  %v11450_v48 = vld [vmem:[#allocation110_spill] sm:$0xff] }
 0x38b   :  { %v9810_v59 = vpop.permute.xlu0 %3867  ;;  %vm2572_vm4 = vcmp.gt.f32.partialorder %v2441_v23, 0.0 }
 0x38c   :  { %4107 = vperm.xlu0 %6758, %v3650_v8   ;;  %v3665_v8 = vmul.f32 %v6238_v55, %v9630_v49  ;;  %v3636_v49 = vmul.f32 %v6209_v33, %v9431_v61  ;;  %v6195_v23 = vsel %vm2572_vm4, 1.0, %v11317_v17  ;;  %vm2587_vm7 = vcmp.gt.f32.partialorder %v2456_v39, 0.0 }
 0x38d   :  { %v3622_v29 = vmul.f32 %v6195_v23, %v9347_v18  ;;  %v2486_v61 = vadd.f32 %v11313_v25, %v11449_v7  ;;  %v6225_v33 = vsel %vm2602_vm6, 1.0, %v11317_v17  ;;  %v4877_v18 = vld [vmem:[%s11058_s10] sm:$0xff]  ;;  %v2472_v39 = vadd.f32 %v11313_v25, %v11450_v48 }
 0x38e   :  { %v9819_v16 = vpop.permute.xlu1 %3864  ;;  %4062 = vperm.xlu1 %6759, %v3635_v53   ;;  %v11452_v48 = vmov 0.0|0.0  }
 0x38f   :  { %v9822_v0 = vpop.permute.xlu0 %3873  ;;  %vm2617_vm9 = vcmp.gt.f32.partialorder %v2486_v61, 0.0  ;;  %vm2603_vm10 = vcmp.gt.f32.partialorder %v2472_v39, 0.0  ;;  %v11456_v39 = vld [vmem:[#allocation111_spill] sm:$0xff] }
 0x390   :  { %4020 = vperm.xlu0 %6758, %v3621_v56   ;;  %v11448_v56 = vld [vmem:[#allocation67_spill] sm:$0xff] }
 0x391   :  { %v2442_v55 = vadd.f32 %v11313_v25, %v11448_v56  ;;  %v6210_v56 = vsel %vm2587_vm7, 1.0, %v11317_v17 }
 0x392   :  { %v9831_v53 = vpop.permute.xlu1 %3870  ;;  %4152 = vperm.xlu1 %6759, %v3665_v8   ;;  %v3637_v38 = vmul.f32 %v6210_v56, %v9464_v54  ;;  %v11455_v54 = vld [vmem:[#allocation130_spill] sm:$0xff]  ;;  %v6226_v56 = vsel %vm2603_vm10, 1.0, %v11317_v17 }
 0x393   :  { %v9834_v57 = vpop.permute.xlu0 %3879  ;;  %vm2573_vm8 = vcmp.gt.f32.partialorder %v2442_v55, 0.0 }
 0x394   :  { %4110 = vperm.xlu0 %6758, %v3651_v32   ;;  %v3666_v32 = vmul.f32 %v6239_v11, %v9611_v31  ;;  %v6723_v31 = vpack.c.bf16 %v4878_v15, %v4877_v18  ;;  %v11451_v11 = vld [vmem:[#allocation96_spill] sm:$0xff]  ;;  %v6196_v55 = vsel %vm2573_vm8, 1.0, %v11317_v17  ;;  %v6240_v15 = vsel %vm2617_vm9, 1.0, %v11317_v17 }
 0x395   :  { %v2457_v7 = vadd.f32 %v11313_v25, %v11451_v11  ;;  %v3653_v11 = vmul.f32 %v6226_v56, %v9560_v27  ;;  %v4879_v27 = vld [vmem:[%s11058_s10 + $0x10] sm:$0xff] }
 0x396   :  { %v9843_v8 = vpop.permute.xlu1 %3876  ;;  %4065 = vperm.xlu1 %6759, %v3636_v49   ;;  %v3652_v49 = vmul.f32 %v6225_v33, %v9527_v26  ;;  %6724 = vmatpush3.bf16.msra.mxu0 %v6723_v31  ;;  %v11453_v26 = vld [vmem:[#allocation71_spill] sm:$0xff]  ;;  %v3623_v33 = vmul.f32 %v6196_v55, %v9380_v44  ;;  %v3667_v31 = vmul.f32 %v6240_v15, %v9641_v3  ;;  %v11459_v15 = vld [vmem:[#allocation25_spill] sm:$0xff] }
 0x397   :  { %v9846_v1 = vpop.permute.xlu0 %3885  ;;  %6725 = vmatprep.subr.bf16.mxu0 %v11452_v48  ;;  %vm2588_vm11 = vcmp.gt.f32.partialorder %v2457_v7, 0.0  ;;  %v2473_v44 = vadd.f32 %v11313_v25, %v11456_v39 }
 0x398   :  { %4023 = vperm.xlu0 %6758, %v3622_v29   ;;  %v6211_v55 = vsel %vm2588_vm11, 1.0, %v11317_v17 }
 0x399   :  { %v3638_v3 = vmul.f32 %v6211_v55, %v9443_v2  ;;  %vm2604_vm14 = vcmp.gt.f32.partialorder %v2473_v44, 0.0  ;;  %v11461_v55 = vld [vmem:[#allocation133_spill] sm:$0xff] }
 0x39a   :  { %v9861_v23 = vpop.permute.xlu1 %3882  ;;  %4155 = vperm.xlu1 %6759, %v3666_v32   ;;  %v2443_v32 = vadd.f32 %v11313_v25, %v11453_v26  ;;  %v11458_v26 = vld [vmem:[#allocation97_spill] sm:$0xff]  ;;  %v6227_v44 = vsel %vm2604_vm14, 1.0, %v11317_v17 }
 0x39b   :  { %v9864_v29 = vpop.permute.xlu0 %3891 }
 0x39c   :  { %4113 = vperm.xlu0 %6758, %v3652_v49   ;;  %v2487_v49 = vadd.f32 %v11313_v25, %v11455_v54  ;;  %vm2574_vm12 = vcmp.gt.f32.partialorder %v2443_v32, 0.0  ;;  %v2458_v54 = vadd.f32 %v11313_v25, %v11458_v26  ;;  %v2488_v26 = vadd.f32 %v11313_v25, %v11461_v55 }
 0x39d   :  { %v6197_v32 = vsel %vm2574_vm12, 1.0, %v11317_v17 }
 0x39e   :  { %v9874_v18 = vpop.permute.xlu1 %3888  ;;  %4068 = vperm.xlu1 %6759, %v3637_v38   ;;  %vm2618_vm13 = vcmp.gt.f32.partialorder %v2487_v49, 0.0  ;;  %v3624_v56 = vmul.f32 %v6197_v32, %v9359_v22  ;;  %vm2589_vm15 = vcmp.gt.f32.partialorder %v2458_v54, 0.0  ;;  %v11462_v22 = vld [vmem:[#allocation112_spill] sm:$0xff]  ;;  %v3654_v32 = vmul.f32 %v6227_v44, %v9539_v4 }
 0x39f   :  { %v9877_v61 = vpop.permute.xlu0 %3897  ;;  %v6241_v39 = vsel %vm2618_vm13, 1.0, %v11317_v17  ;;  %v6212_v54 = vsel %vm2589_vm15, 1.0, %v11317_v17  ;;  %vm2619_vm2 = vcmp.gt.f32.partialorder %v2488_v26, 0.0  ;;  %v11465_v26 = vld [vmem:[#allocation132_spill] sm:$0xff] }
 0x3a0   :  { %11454 = vst [vmem:[#allocation69_spill] sm:$0xff] %v9877_v61  ;;  %4026 = vperm.xlu0 %6758, %v3623_v33   ;;  %v4880_v33 = vld [vmem:[%s11058_s10 + $0x18] sm:$0xff]  ;;  %v3668_v47 = vmul.f32 %v6241_v39, %v9621_v50  ;;  %v6242_v55 = vsel %vm2619_vm2, 1.0, %v11317_v17  ;;  %v11491_v61 = vld [vmem:[#allocation136_spill] sm:$0xff] }
 0x3a1   :  { %v6726_v2 = vpack.c.bf16 %v4880_v33, %v4879_v27  ;;  %v11463_v50 = vld [vmem:[#allocation98_spill] sm:$0xff]  ;;  %v2493_v21 = vadd.f32 %v11313_v25, %v11491_v61 }
 0x3a2   :  { %v9886_v38 = vpop.permute.xlu1 %3894  ;;  %4158 = vperm.xlu1 %6759, %v3667_v31   ;;  %v2444_v31 = vadd.f32 %v11313_v25, %v11459_v15  ;;  %v2459_v15 = vadd.f32 %v11313_v25, %v11463_v50 }
 0x3a3   :  { %11457 = vst [vmem:[#allocation70_spill] sm:$0xff] %v9886_v38  ;;  %v9889_v7 = vpop.permute.xlu0 %3903  ;;  %6727 = vmatpush3.bf16.msra.mxu0 %v6726_v2  ;;  %v11464_v2 = vld [vmem:[#allocation75_spill] sm:$0xff] }
 0x3a4   :  { %4116 = vperm.xlu0 %6758, %v3653_v11   ;;  %6728 = vmatprep.subr.bf16.mxu0 %v11452_v48  ;;  %vm2575_vm1 = vcmp.gt.f32.partialorder %v2444_v31, 0.0  ;;  %v2445_v39 = vadd.f32 %v11313_v25, %v11464_v2  ;;  %vm2590_vm4 = vcmp.gt.f32.partialorder %v2459_v15, 0.0 }
 0x3a5   :  { %v6198_v31 = vsel %vm2575_vm1, 1.0, %v11317_v17 }
 0x3a6   :  { %v9904_v49 = vpop.permute.xlu1 %3900  ;;  %4071 = vperm.xlu1 %6759, %v3638_v3   ;;  %v2474_v3 = vadd.f32 %v11313_v25, %v11462_v22  ;;  %v3625_v4 = vmul.f32 %v6198_v31, %v9392_v6  ;;  %v3669_v22 = vmul.f32 %v6242_v55, %v9653_v51  ;;  %v4881_v6 = vld [vmem:[%s11058_s10 + $0x20] sm:$0xff]  ;;  %vm2576_vm5 = vcmp.gt.f32.partialorder %v2445_v39, 0.0 }
 0x3a7   :  { %11460 = vst [vmem:[#allocation72_spill] sm:$0xff] %v9904_v49  ;;  %v9907_v11 = vpop.permute.xlu0 %3909  ;;  %v6213_v31 = vsel %vm2590_vm4, 1.0, %v11317_v17  ;;  %v6199_v39 = vsel %vm2576_vm5, 1.0, %v11317_v17 }
 0x3a8   :  { %4029 = vperm.xlu0 %6758, %v3624_v56   ;;  %v3639_v56 = vmul.f32 %v6212_v54, %v9476_v36  ;;  %vm2605_vm3 = vcmp.gt.f32.partialorder %v2474_v3, 0.0  ;;  %v2489_v36 = vadd.f32 %v11313_v25, %v11465_v26  ;;  %v4882_v3 = vld [vmem:[%s11058_s10 + $0x28] sm:$0xff]  ;;  %v3640_v26 = vmul.f32 %v6213_v31, %v9455_v52  ;;  %v11469_v52 = vld [vmem:[#allocation135_spill] sm:$0xff] }
 0x3a9   :  { %v11466_v54 = vld [vmem:[#allocation113_spill] sm:$0xff]  ;;  %v6729_v51 = vpack.c.bf16 %v4882_v3, %v4881_v6 }
 0x3aa   :  { %v9917_v27 = vpop.permute.xlu1 %3906  ;;  %4161 = vperm.xlu1 %6759, %v3668_v47   ;;  %v2475_v50 = vadd.f32 %v11313_v25, %v11466_v54  ;;  %vm2620_vm6 = vcmp.gt.f32.partialorder %v2489_v36, 0.0  ;;  %v2490_v54 = vadd.f32 %v11313_v25, %v11469_v52 }
 0x3ab   :  { %v9920_v33 = vpop.permute.xlu0 %3915  ;;  %6730 = vmatpush3.bf16.msra.mxu0 %v6729_v51  ;;  %v6243_v3 = vsel %vm2620_vm6, 1.0, %v11317_v17 }
 0x3ac   :  { %4119 = vperm.xlu0 %6758, %v3654_v32   ;;  %v6228_v32 = vsel %vm2605_vm3, 1.0, %v11317_v17  ;;  %6731 = vmatprep.subr.bf16.mxu0 %v11452_v48  ;;  %vm2606_vm7 = vcmp.gt.f32.partialorder %v2475_v50, 0.0  ;;  %v11470_v50 = vld [vmem:[#allocation114_spill] sm:$0xff]  ;;  %vm2621_vm10 = vcmp.gt.f32.partialorder %v2490_v54, 0.0 }
 0x3ad   :  { %v3655_v15 = vmul.f32 %v6228_v32, %v9572_v24  ;;  %v11468_v24 = vld [vmem:[#allocation76_spill] sm:$0xff]  ;;  %v3626_v32 = vmul.f32 %v6199_v39, %v9371_v34  ;;  %v6229_v51 = vsel %vm2606_vm7, 1.0, %v11317_v17  ;;  %v2476_v34 = vadd.f32 %v11313_v25, %v11470_v50  ;;  %v11475_v54 = vld [vmem:[#allocation134_spill] sm:$0xff] }
 0x3ae   :  { %v9929_v47 = vpop.permute.xlu1 %3912  ;;  %4074 = vperm.xlu1 %6759, %v3639_v56   ;;  %v3656_v31 = vmul.f32 %v6229_v51, %v9551_v20  ;;  %v11472_v39 = vld [vmem:[#allocation100_spill] sm:$0xff]  ;;  %vm2624_vm7 = vcmp.gt.f32.partialorder %v2493_v21, 0.0  ;;  %v11500_v21 = vld [vmem:[#allocation118_spill] sm:$0xff] }
 0x3af   :  { %v9932_v44 = vpop.permute.xlu0 %3921  ;;  %vm2607_vm11 = vcmp.gt.f32.partialorder %v2476_v34, 0.0  ;;  %v4884_v34 = vld [vmem:[%s11058_s10 + $0x38] sm:$0xff]  ;;  %v6247_v12 = vsel %vm2624_vm7, 1.0, %v11317_v17  ;;  %vm4262_vm7 = vcmask 720512  }
 0x3b0   :  { %4032 = vperm.xlu0 %6758, %v3625_v4   ;;  %v11467_v4 = vld [vmem:[#allocation99_spill] sm:$0xff] }
 0x3b1   :  { %v2460_v55 = vadd.f32 %v11313_v25, %v11467_v4 }
 0x3b2   :  { %v9947_v56 = vpop.permute.xlu1 %3918  ;;  %4164 = vperm.xlu1 %6759, %v3669_v22   ;;  %v2446_v22 = vadd.f32 %v11313_v25, %v11468_v24  ;;  %v2461_v24 = vadd.f32 %v11313_v25, %v11472_v39 }
 0x3b3   :  { %v9950_v2 = vpop.permute.xlu0 %3927  ;;  %vm2591_vm8 = vcmp.gt.f32.partialorder %v2460_v55, 0.0 }
 0x3b4   :  { %4122 = vperm.xlu0 %6758, %v3655_v15   ;;  %v3670_v15 = vmul.f32 %v6243_v3, %v9632_v62  ;;  %vm2577_vm9 = vcmp.gt.f32.partialorder %v2446_v22, 0.0  ;;  %vm2592_vm12 = vcmp.gt.f32.partialorder %v2461_v24, 0.0 }
 0x3b5   :  { %v6200_v22 = vsel %vm2577_vm9, 1.0, %v11317_v17 }
 0x3b6   :  { %v9960_v6 = vpop.permute.xlu1 %3924  ;;  %4077 = vperm.xlu1 %6759, %v3640_v26   ;;  %v6214_v26 = vsel %vm2591_vm8, 1.0, %v11317_v17  ;;  %v3627_v20 = vmul.f32 %v6200_v22, %v9404_v19  ;;  %v4883_v19 = vld [vmem:[%s11058_s10 + $0x30] sm:$0xff]  ;;  %v6215_v22 = vsel %vm2592_vm12, 1.0, %v11317_v17 }
 0x3b7   :  { %v9963_v36 = vpop.permute.xlu0 %3933  ;;  %v3641_v62 = vmul.f32 %v6214_v26, %v9488_v43  ;;  %v2491_v43 = vadd.f32 %v11313_v25, %v11475_v54  ;;  %v11476_v26 = vld [vmem:[#allocation115_spill] sm:$0xff]  ;;  %v11479_v54 = vld [vmem:[#allocation14_spill] sm:$0xff] }
 0x3b8   :  { %4035 = vperm.xlu0 %6758, %v3626_v32   ;;  %v11473_v32 = vld [vmem:[#allocation78_spill] sm:$0xff]  ;;  %v2477_v39 = vadd.f32 %v11313_v25, %v11476_v26  ;;  %v3642_v49 = vmul.f32 %v6215_v22, %v11479_v54 }
 0x3b9   :  { %v2447_v3 = vadd.f32 %v11313_v25, %v11473_v32  ;;  %vm2622_vm14 = vcmp.gt.f32.partialorder %v2491_v43, 0.0  ;;  %v11484_v22 = vld [vmem:[#allocation38_spill] sm:$0xff] }
 0x3ba   :  { %v9972_v4 = vpop.permute.xlu1 %3930  ;;  %4167 = vperm.xlu1 %6759, %v3670_v15   ;;  %v6244_v15 = vsel %vm2621_vm10, 1.0, %v11317_v17  ;;  %vm2608_vm15 = vcmp.gt.f32.partialorder %v2477_v39, 0.0  ;;  %v6245_v26 = vsel %vm2622_vm14, 1.0, %v11317_v17  ;;  %v11485_v39 = vld [vmem:[#allocation116_spill] sm:$0xff]  ;;  %vm4206_vm14 = vcmask 195712  }
 0x3bb   :  { %v9975_v55 = vpop.permute.xlu0 %3939  ;;  %v3671_v50 = vmul.f32 %v6244_v15, %v9665_v13  ;;  %vm2578_vm13 = vcmp.gt.f32.partialorder %v2447_v3, 0.0  ;;  %v6732_v13 = vpack.c.bf16 %v4884_v34, %v4883_v19  ;;  %v6231_v54 = vsel %vm2608_vm15, 1.0, %v11317_v17 }
 0x3bc   :  { %11471 = vst [vmem:[#allocation73_spill] sm:$0xff] %v9975_v55  ;;  %4125 = vperm.xlu0 %6758, %v3656_v31   ;;  %v6230_v31 = vsel %vm2607_vm11, 1.0, %v11317_v17  ;;  %v6201_v3 = vsel %vm2578_vm13, 1.0, %v11317_v17  ;;  %vm4199_vm13 = vcmask 130112   ;;  %vm4213_vm15 = vcmask 261312  }
 0x3bd   :  { %v3657_v24 = vmul.f32 %v6230_v31, %v9584_v46  ;;  %6733 = vmatpush3.bf16.msra.mxu0 %v6732_v13  ;;  %v11480_v46 = vld [vmem:[#allocation79_spill] sm:$0xff]  ;;  %v11481_v31 = vld [vmem:[#allocation12_spill] sm:$0xff] }
 0x3be   :  { %v9984_v52 = vpop.permute.xlu1 %3936  ;;  %4080 = vperm.xlu1 %6759, %v3641_v62   ;;  %6734 = vmatprep.subr.bf16.mxu0 %v11452_v48  ;;  %v3628_v19 = vmul.f32 %v6201_v3, %v11481_v31  ;;  %v2478_v3 = vadd.f32 %v11313_v25, %v11485_v39 }
 0x3bf   :  { %v9987_v51 = vpop.permute.xlu0 %3945 }
 0x3c0   :  { %11474 = vst [vmem:[#allocation74_spill] sm:$0xff] %v9987_v51  ;;  %4038 = vperm.xlu0 %6758, %v3627_v20   ;;  %v11478_v20 = vld [vmem:[#allocation10_spill] sm:$0xff]  ;;  %v11487_v51 = vld [vmem:[#allocation101_spill] sm:$0xff]  ;;  %vm2609_vm4 = vcmp.gt.f32.partialorder %v2478_v3, 0.0 }
 0x3c1   :  { %v2462_v15 = vadd.f32 %v11313_v25, %v11478_v20  ;;  %v3672_v20 = vmul.f32 %v6245_v26, %v11484_v22  ;;  %v4885_v22 = vld [vmem:[%s11058_s10 + $0x40] sm:$0xff]  ;;  %v6232_v3 = vsel %vm2609_vm4, 1.0, %v11317_v17  ;;  %vm4241_vm4 = vcmask 523712  }
 0x3c2   :  { %v10002_v62 = vpop.permute.xlu1 %3942  ;;  %4170 = vperm.xlu1 %6759, %v3671_v50   ;;  %v2448_v50 = vadd.f32 %v11313_v25, %v11480_v46  ;;  %v11486_v46 = vld [vmem:[#allocation22_spill] sm:$0xff] }
 0x3c3   :  { %11477 = vst [vmem:[#allocation77_spill] sm:$0xff] %v10002_v62  ;;  %v10005_v32 = vpop.permute.xlu0 %3951  ;;  %vm2593_vm1 = vcmp.gt.f32.partialorder %v2462_v15, 0.0  ;;  %v3658_v31 = vmul.f32 %v6231_v54, %v11486_v46  ;;  %v11489_v54 = vld [vmem:[#allocation102_spill] sm:$0xff]  ;;  %v11490_v46 = vld [vmem:[#allocation15_spill] sm:$0xff] }
 0x3c4   :  { %4128 = vperm.xlu0 %6758, %v3657_v24   ;;  %v11483_v24 = vld [vmem:[#allocation137_spill] sm:$0xff]  ;;  %vm2579_vm2 = vcmp.gt.f32.partialorder %v2448_v50, 0.0  ;;  %v2464_v39 = vadd.f32 %v11313_v25, %v11489_v54  ;;  %v11492_v62 = vld [vmem:[#allocation46_spill] sm:$0xff] }
 0x3c5   :  { %v2492_v13 = vadd.f32 %v11313_v25, %v11483_v24  ;;  %v2463_v24 = vadd.f32 %v11313_v25, %v11487_v51  ;;  %v6202_v50 = vsel %vm2579_vm2, 1.0, %v11317_v17  ;;  %vm4227_vm2 = vcmask 392512  }
 0x3c6   :  { %v10015_v34 = vpop.permute.xlu1 %3948  ;;  %4083 = vperm.xlu1 %6759, %v3642_v49   ;;  %v3629_v51 = vmul.f32 %v6202_v50, %v11490_v46  ;;  %vm2595_vm6 = vcmp.gt.f32.partialorder %v2464_v39, 0.0  ;;  %v11493_v50 = vld [vmem:[#allocation139_spill] sm:$0xff] }
 0x3c7   :  { %11482 = vst [vmem:[#allocation80_spill] sm:$0xff] %v10015_v34  ;;  %v10018_v43 = vpop.permute.xlu0 %3957  ;;  %v6216_v34 = vsel %vm2593_vm1, 1.0, %v11317_v17  ;;  %vm2623_vm3 = vcmp.gt.f32.partialorder %v2492_v13, 0.0  ;;  %vm2594_vm5 = vcmp.gt.f32.partialorder %v2463_v24, 0.0  ;;  %v6218_v39 = vsel %vm2595_vm6, 1.0, %v11317_v17 }
 0x3c8   :  { %4041 = vperm.xlu0 %6758, %v3628_v19   ;;  %v11488_v19 = vld [vmem:[#allocation16_spill] sm:$0xff]  ;;  %v6217_v24 = vsel %vm2594_vm5, 1.0, %v11317_v17  ;;  %vm4220_vm1 = vcmask 326912   ;;  %vm4248_vm5 = vcmask 589312   ;;  %vm4255_vm6 = vcmask 654912  }
 0x3c9   :  { %v3643_v26 = vmul.f32 %v6216_v34, %v11488_v19 }
 0x3ca   :  { %v10027_v49 = vpop.permute.xlu1 %3954  ;;  %4173 = vperm.xlu1 %6759, %v3672_v20   ;;  %v4886_v20 = vld [vmem:[%s11058_s10 + $0x48] sm:$0xff] }
 0x3cb   :  { %v10030_v15 = vpop.permute.xlu0 %3963  ;;  %v6735_v34 = vpack.c.bf16 %v4886_v20, %v4885_v22  ;;  %v11494_v22 = vld [vmem:[#allocation31_spill] sm:$0xff] }
 0x3cc   :  { %4131 = vperm.xlu0 %6758, %v3658_v31   ;;  %v6246_v31 = vsel %vm2623_vm3, 1.0, %v11317_v17  ;;  %v3659_v20 = vmul.f32 %v6232_v3, %v11494_v22  ;;  %vm4234_vm3 = vcmask 458112  }
 0x3cd   :  { %v3673_v38 = vmul.f32 %v6246_v31, %v11492_v62  ;;  %6736 = vmatpush3.bf16.msra.mxu0 %v6735_v34  ;;  %v11495_v62 = vld [vmem:[#allocation117_spill] sm:$0xff]  ;;  %v11497_v31 = vld [vmem:[#allocation138_spill] sm:$0xff] }
 0x3ce   :  { %v10045_v13 = vpop.permute.xlu1 %3960  ;;  %4086 = vperm.xlu1 %6759, %v3643_v26   ;;  %6737 = vmatprep.subr.bf16.mxu0 %v11452_v48  ;;  %v2494_v26 = vadd.f32 %v11313_v25, %v11493_v50  ;;  %v2479_v46 = vadd.f32 %v11313_v25, %v11495_v62  ;;  %v2495_v3 = vadd.f32 %v11313_v25, %v11497_v31  ;;  %v11498_v50 = vld [vmem:[#allocation19_spill] sm:$0xff] }
 0x3cf   :  { %v10048_v19 = vpop.permute.xlu0 %3969  ;;  %v3645_v22 = vmul.f32 %v6218_v39, %v11498_v50 }
 0x3d0   :  { %4044 = vperm.xlu0 %6758, %v3629_v51   ;;  %v11496_v51 = vld [vmem:[#allocation18_spill] sm:$0xff]  ;;  %vm2625_vm8 = vcmp.gt.f32.partialorder %v2494_v26, 0.0  ;;  %vm2610_vm9 = vcmp.gt.f32.partialorder %v2479_v46, 0.0  ;;  %vm2626_vm10 = vcmp.gt.f32.partialorder %v2495_v3, 0.0 }
 0x3d1   :  { %v3644_v34 = vmul.f32 %v6217_v24, %v11496_v51  ;;  %v2480_v24 = vadd.f32 %v11313_v25, %v11500_v21  ;;  %v6248_v26 = vsel %vm2625_vm8, 1.0, %v11317_v17  ;;  %v4887_v51 = vld [vmem:[%s11058_s10 + $0x50] sm:$0xff]  ;;  %v6249_v3 = vsel %vm2626_vm10, 1.0, %v11317_v17 }
 0x3d2   :  { %v10058_v54 = vpop.permute.xlu1 %3966  ;;  %4176 = vperm.xlu1 %6759, %v3673_v38   ;;  %v3675_v39 = vmul.f32 %v6248_v26, %v9687_v10  ;;  %v11504_v10 = vld [vmem:[#allocation48_spill] sm:$0xff]  ;;  %vm11085_vm8 = vcmask 786112   ;;  %vm4283_vm10 = vcmask 917312  }
 0x3d3   :  { %v10061_v61 = vpop.permute.xlu0 %3975  ;;  %vm2611_vm11 = vcmp.gt.f32.partialorder %v2480_v24, 0.0  ;;  %v3676_v26 = vmul.f32 %v6249_v3, %v11504_v10  ;;  %v11506_v24 = vld [vmem:[#allocation34_spill] sm:$0xff] }
 0x3d4   :  { %4134 = vperm.xlu0 %6758, %v3659_v20   ;;  %v11501_v20 = vld [vmem:[#allocation41_spill] sm:$0xff] }
 0x3d5   :  { %v3674_v62 = vmul.f32 %v6247_v12, %v11501_v20  ;;  %v6233_v12 = vsel %vm2610_vm9, 1.0, %v11317_v17  ;;  %v11503_v20 = vld [vmem:[#allocation26_spill] sm:$0xff]  ;;  %vm4276_vm9 = vcmask 851712  }
 0x3d6   :  { %v10070_v38 = vpop.permute.xlu1 %3972  ;;  %4089 = vperm.xlu1 %6759, %v3644_v34   ;;  %v4888_v34 = vld [vmem:[%s11058_s10 + $0x58] sm:$0xff] }
 0x3d7   :  { %v10073_v55 = vpop.permute.xlu0 %3981  ;;  %v6738_v31 = vpack.c.bf16 %v4888_v34, %v4887_v51  ;;  %v6234_v51 = vsel %vm2611_vm11, 1.0, %v11317_v17  ;;  %vm4290_vm11 = vcmask 982912  }
 0x3d8   :  { %11499 = vst [vmem:[#allocation81_spill] sm:$0xff] %v10073_v55  ;;  %4092 = vperm.xlu0 %6758, %v3645_v22   ;;  %v11502_v22 = vld [vmem:[#allocation141_spill] sm:$0xff]  ;;  %v3660_v55 = vmul.f32 %v6233_v12, %v11503_v20 }
 0x3d9   :  { %v2496_v21 = vadd.f32 %v11313_v25, %v11502_v22  ;;  %6739 = vmatpush3.bf16.msra.mxu0 %v6738_v31  ;;  %v3661_v25 = vmul.f32 %v6234_v51, %v11506_v24 }
 0x3da   :  { %v10086_v46 = vpop.permute.xlu1 %3978  ;;  %4179 = vperm.xlu1 %6759, %v3674_v62   ;;  %6740 = vmatprep.subr.bf16.mxu0 %v11452_v48 }
 0x3db   :  { %v10089_v50 = vpop.permute.xlu0 %3987  ;;  %vm2627_vm12 = vcmp.gt.f32.partialorder %v2496_v21, 0.0  ;;  %v4890_v21 = vld [vmem:[%s11058_s10 + $0x68] sm:$0xff] }
 0x3dc   :  { %4182 = vperm.xlu0 %6758, %v3675_v39   ;;  %v6250_v39 = vsel %vm2627_vm12, 1.0, %v11317_v17  ;;  %vm4297_vm12 = vcmask 1048512  }
 0x3dd   :  { %v3677_v22 = vmul.f32 %v6250_v39, %v9699_v14  ;;  %v4892_v39 = vld [vmem:[%s11058_s10 + $0x78] sm:$0xff] }
 0x3de   :  { %v10097_v62 = vpop.permute.xlu1 %3984  ;;  %4137 = vperm.xlu1 %6759, %v3660_v55   ;;  %v4889_v55 = vld [vmem:[%s11058_s10 + $0x60] sm:$0xff] }
 0x3df   :  { %v10100_v34 = vpop.permute.xlu0 %3993  ;;  %v6741_v10 = vpack.c.bf16 %v4890_v21, %v4889_v55 }
 0x3e0   :  { %11505 = vst [vmem:[#allocation82_spill] sm:$0xff] %v10100_v34  ;;  %4185 = vperm.xlu0 %6758, %v3676_v26  }
 0x3e1   :  { %6742 = vmatpush3.bf16.msra.mxu0 %v6741_v10 }
 0x3e2   :  { %v10103_v12 = vpop.permute.xlu1 %3990  ;;  %4140 = vperm.xlu1 %6759, %v3661_v25   ;;  %6743 = vmatprep.subr.bf16.mxu0 %v11452_v48  ;;  %v4891_v25 = vld [vmem:[%s11058_s10 + $0x70] sm:$0xff] }
 0x3e3   :  { %v10106_v31 = vpop.permute.xlu0 %3999  ;;  %v6744_v55 = vpack.c.bf16 %v4892_v39, %v4891_v25 }
 0x3e4   :  { %11507 = vst [vmem:[#allocation83_spill] sm:$0xff] %v10106_v31 }
 0x3e5   :  { %6745 = vmatpush3.bf16.msra.mxu0 %v6744_v55 }
 0x3e6   :  { %v10109_v20 = vpop.permute.xlu1 %3996  ;;  %4188 = vperm.xlu1 %6759, %v3677_v22  }
 0x3e7   :  { %11508 = vst [vmem:[#allocation84_spill] sm:$0xff] %v10109_v20  ;;  %v10117_v3 = vpop.permute.xlu0 %4005 }
 0x3e8   :  { %11509 = vst [vmem:[#allocation85_spill] sm:$0xff] %v10117_v3 }
 0x3ea   :  { %v10119_v26 = vpop.permute.xlu1 %4002 }
 0x3eb   :  { %11510 = vst [vmem:[#allocation86_spill] sm:$0xff] %v10119_v26  ;;  %v10122_v14 = vpop.permute.xlu0 %4050 }
 0x3ec   :  { %11511 = vst [vmem:[#allocation120_spill] sm:$0xff] %v10122_v14 }
 0x3ee   :  { %v10124_v51 = vpop.permute.xlu1 %4047 }
 0x3ef   :  { %11512 = vst [vmem:[#allocation87_spill] sm:$0xff] %v10124_v51  ;;  %v10126_v24 = vpop.permute.xlu0 %4053 }
 0x3f0   :  { %11513 = vst [vmem:[#allocation124_spill] sm:$0xff] %v10126_v24 }
 0x3f2   :  { %v10134_v22 = vpop.permute.xlu1 %4008 }
 0x3f3   :  { %11514 = vst [vmem:[#allocation20_spill] sm:$0xff] %v10134_v22  ;;  %v10136_v21 = vpop.permute.xlu0 %4098 }
 0x3f4   :  { %11515 = vst [vmem:[#allocation123_spill] sm:$0xff] %v10136_v21 }
 0x3f6   :  { %v10138_v48 = vpop.permute.xlu1 %4095 }
 0x3f7   :  { %11516 = vst [vmem:[#allocation24_spill] sm:$0xff] %v10138_v48  ;;  %v10140_v10 = vpop.permute.xlu0 %4056 }
 0x3f8   :  { %11517 = vst [vmem:[#allocation128_spill] sm:$0xff] %v10140_v10  ;;  %v11528_v10 = vlaneseq }
 0x3fa   :  { %v10142_v17 = vpop.permute.xlu1 %4011 }
 0x3fb   :  { %11518 = vst [vmem:[#allocation21_spill] sm:$0xff] %v10142_v17  ;;  %v10144_v51 = vpop.permute.xlu0 %4143  ;;  %v10163_v17 = vand.u32 127, %v11528_v10 }
 0x3fc   :  { %11519 = vst [vmem:[#allocation127_spill] sm:$0xff] %v10144_v51 }
 0x3fd   :  { %11529 = vst [vmem:[#allocation33_spill] sm:$0xff] %v10163_v17 }
 0x3fe   :  { %v10146_v24 = vpop.permute.xlu1 %4101 }
 0x3ff   :  { %11520 = vst [vmem:[#allocation44_spill] sm:$0xff] %v10146_v24  ;;  %v10148_v3 = vpop.permute.xlu0 %4014 }
 0x400   :  { %11521 = vst [vmem:[#allocation28_spill] sm:$0xff] %v10148_v3  ;;  %v4194_v3 = vadd.s32 4294967288, %v10163_v17 }
 0x402   :  { %v10150_v20 = vpop.permute.xlu1 %4146 }
 0x403   :  { %11522 = vst [vmem:[#allocation23_spill] sm:$0xff] %v10150_v20  ;;  %v10152_v14 = vpop.permute.xlu0 %4104 }
 0x404   :  { %11523 = vst [vmem:[#allocation131_spill] sm:$0xff] %v10152_v14 }
 0x406   :  { %v10154_v25 = vpop.permute.xlu1 %4059 }
 0x407   :  { %11524 = vst [vmem:[#allocation51_spill] sm:$0xff] %v10154_v25  ;;  %v10156_v39 = vpop.permute.xlu0 %4017  ;;  %v4201_v25 = vadd.s32 4294967280, %v10163_v17 }
 0x408   :  { %11525 = vst [vmem:[#allocation30_spill] sm:$0xff] %v10156_v39  ;;  %v11534_v39 = vld [vmem:[#allocation8_spill] sm:$0xff] }
 0x409   :  { %v10176_v21 = vsub.s32 %v4194_v3, %v11534_v39  ;;  %v10184_v10 = vsub.s32 %v10163_v17, %v11534_v39 }
 0x40a   :  { %v10158_v55 = vpop.permute.xlu1 %4149 }
 0x40b   :  { %11526 = vst [vmem:[#allocation49_spill] sm:$0xff] %v10158_v55  ;;  %v10160_v48 = vpop.permute.xlu0 %4107  ;;  %v4198_v3 = vrot.slane %v9711_v42, %v10176_v21  ;;  %v11539_v42 = vld [vmem:[#allocation52_spill] sm:$0xff] }
 0x40c   :  { %11527 = vst [vmem:[#allocation27_spill] sm:$0xff] %v10160_v48  ;;  %v4193_v34 = vrot.slane %v11539_v42, %v10184_v10 }
 0x40e   :  { %v10165_v51 = vpop.permute.xlu1 %4062 }
 0x40f   :  { %11530 = vst [vmem:[#allocation29_spill] sm:$0xff] %v10165_v51  ;;  %v10167_v24 = vpop.permute.xlu0 %4020  ;;  %v10192_v51 = vsub.s32 %v4201_v25, %v11534_v39 }
 0x410   :  { %11531 = vst [vmem:[#allocation54_spill] sm:$0xff] %v10167_v24  ;;  %v4208_v24 = vadd.s32 4294967272, %v10163_v17 }
 0x411   :  { %v4390_v25 = vrot.slane %v9907_v11, %v10192_v51  ;;  %v4205_v26 = vrot.slane %v9702_v5, %v10192_v51  ;;  %v4200_v11 = vsel %vm4199_vm13, %v4198_v3, %v4193_v34 }
 0x412   :  { %v10170_v20 = vpop.permute.xlu1 %4152 }
 0x413   :  { %11532 = vst [vmem:[#allocation50_spill] sm:$0xff] %v10170_v20  ;;  %v10172_v14 = vpop.permute.xlu0 %4110  ;;  %v4306_v20 = vrot.slane %v9807_v45, %v10176_v21  ;;  %v4215_v45 = vadd.s32 4294967264, %v10163_v17  ;;  %v4207_v34 = vsel %vm4206_vm14, %v4205_v26, %v4200_v11 }
 0x414   :  { %11533 = vst [vmem:[#allocation32_spill] sm:$0xff] %v10172_v14  ;;  %v4385_v14 = vrot.slane %v9917_v27, %v10176_v21  ;;  %v4311_v27 = vrot.slane %v9798_v40, %v10192_v51  ;;  %v4222_v40 = vadd.s32 4294967256, %v10163_v17 }
 0x416   :  { %v10178_v55 = vpop.permute.xlu1 %4065 }
 0x417   :  { %11535 = vst [vmem:[#allocation37_spill] sm:$0xff] %v10178_v55  ;;  %v10180_v48 = vpop.permute.xlu0 %4023  ;;  %v4381_v55 = vrot.slane %v9889_v7, %v10184_v10 }
 0x418   :  { %11536 = vst [vmem:[#allocation53_spill] sm:$0xff] %v10180_v48  ;;  %v4302_v48 = vrot.slane %v9786_v58, %v10184_v10  ;;  %v10212_v58 = vsub.s32 %v4208_v24, %v11534_v39  ;;  %v4464_v24 = vrot.slane %v10027_v49, %v10176_v21  ;;  %v4460_v49 = vrot.slane %v10005_v32, %v10184_v10 }
 0x41a   :  { %v10200_v22 = vpop.permute.xlu1 %4155  ;;  %v4307_v7 = vsel %vm4199_vm13, %v4306_v20, %v4302_v48  ;;  %v4395_v42 = vrot.slane %v9929_v47, %v10212_v58  ;;  %v4229_v47 = vadd.s32 4294967248, %v10163_v17  ;;  %v4465_v32 = vsel %vm4199_vm13, %v4464_v24, %v4460_v49 }
 0x41b   :  { %11537 = vst [vmem:[#allocation35_spill] sm:$0xff] %v10200_v22  ;;  %v10207_v31 = vpop.permute.xlu0 %4113  ;;  %v4386_v22 = vsel %vm4199_vm13, %v4385_v14, %v4381_v55  ;;  %v10229_v14 = vsub.s32 %v4215_v45, %v11534_v39  ;;  %v4312_v5 = vsel %vm4206_vm14, %v4311_v27, %v4307_v7  ;;  %v10248_v27 = vsub.s32 %v4222_v40, %v11534_v39 }
 0x41c   :  { %11538 = vst [vmem:[#allocation58_spill] sm:$0xff] %v10207_v31  ;;  %v4316_v31 = vrot.slane %v9819_v16, %v10212_v58  ;;  %v4391_v48 = vsel %vm4206_vm14, %v4390_v25, %v4386_v22  ;;  %v4212_v16 = vrot.slane %v9723_v28, %v10212_v58  ;;  %v4469_v22 = vrot.slane %v10018_v43, %v10192_v51 }
 0x41d   :  { %v4321_v3 = vrot.slane %v9810_v59, %v10229_v14  ;;  %v4400_v45 = vrot.slane %v9920_v33, %v10229_v14  ;;  %v4396_v25 = vsel %vm4213_vm15, %v4395_v42, %v4391_v48  ;;  %v4219_v59 = vrot.slane %v9714_v9, %v10229_v14 }
 0x41e   :  { %v10226_v20 = vpop.permute.xlu1 %4068  ;;  %v4317_v28 = vsel %vm4213_vm15, %v4316_v31, %v4312_v5  ;;  %v4236_v33 = vadd.s32 4294967240, %v10163_v17  ;;  %v4214_v43 = vsel %vm4213_vm15, %v4212_v16, %v4207_v34  ;;  %v4326_v40 = vrot.slane %v9831_v53, %v10248_v27 }
 0x41f   :  { %v10233_v55 = vpop.permute.xlu0 %4026  ;;  %v4405_v31 = vrot.slane %v9947_v56, %v10248_v27  ;;  %v4474_v11 = vrot.slane %v10045_v13, %v10212_v58  ;;  %v10268_v42 = vsub.s32 %v4229_v47, %v11534_v39  ;;  %v4322_v9 = vsel %vm4220_vm1, %v4321_v3, %v4317_v28 }
 0x420   :  { %v4401_v24 = vsel %vm4220_vm1, %v4400_v45, %v4396_v25  ;;  %v4470_v5 = vsel %vm4206_vm14, %v4469_v22, %v4465_v32  ;;  %v4226_v48 = vrot.slane %v9735_v37, %v10248_v27  ;;  %v4243_v53 = vadd.s32 4294967232, %v10163_v17 }
 0x421   :  { %v4221_v56 = vsel %vm4220_vm1, %v4219_v59, %v4214_v43  ;;  %v4331_v13 = vrot.slane %v9822_v0, %v10268_v42  ;;  %v4410_v47 = vrot.slane %v9932_v44, %v10268_v42  ;;  %v4479_v49 = vrot.slane %v10030_v15, %v10229_v14 }
 0x422   :  { %v10253_v7 = vpop.permute.xlu1 %4158  ;;  %v10288_v3 = vsub.s32 %v4236_v33, %v11534_v39  ;;  %v4327_v37 = vsel %vm4227_vm2, %v4326_v40, %v4322_v9  ;;  %v4406_v45 = vsel %vm4227_vm2, %v4405_v31, %v4401_v24  ;;  %v4475_v22 = vsel %vm4213_vm15, %v4474_v11, %v4470_v5 }
 0x423   :  { %v10258_v26 = vpop.permute.xlu0 %4116  ;;  %v4233_v0 = vrot.slane %v9726_v60, %v10268_v42  ;;  %v4250_v44 = vadd.s32 4294967224, %v10163_v17  ;;  %v4228_v28 = vsel %vm4227_vm2, %v4226_v48, %v4221_v56  ;;  %v4484_v32 = vrot.slane %v10058_v54, %v10248_v27 }
 0x424   :  { %v4336_v15 = vrot.slane %v9843_v8, %v10288_v3  ;;  %v4415_v25 = vrot.slane %v9960_v6, %v10288_v3  ;;  %v10306_v33 = vsub.s32 %v4243_v53, %v11534_v39  ;;  %v4332_v60 = vsel %vm4234_vm3, %v4331_v13, %v4327_v37 }
 0x425   :  { %v4411_v43 = vsel %vm4234_vm3, %v4410_v47, %v4406_v45  ;;  %v4480_v40 = vsel %vm4220_vm1, %v4479_v49, %v4475_v22  ;;  %v4240_v8 = vrot.slane %v9747_v35, %v10288_v3  ;;  %v4257_v6 = vadd.s32 4294967216, %v10163_v17 }
 0x426   :  { %v10276_v16 = vpop.permute.xlu1 %4071  ;;  %v4235_v54 = vsel %vm4234_vm3, %v4233_v0, %v4228_v28  ;;  %v4341_v11 = vrot.slane %v9834_v57, %v10306_v33  ;;  %v4420_v9 = vrot.slane %v9950_v2, %v10306_v33  ;;  %v4489_v24 = vrot.slane %v10048_v19, %v10268_v42 }
 0x427   :  { %v10285_v34 = vpop.permute.xlu0 %4029  ;;  %v10324_v5 = vsub.s32 %v4250_v44, %v11534_v39  ;;  %v4337_v48 = vsel %vm4241_vm4, %v4336_v15, %v4332_v60  ;;  %v4416_v35 = vsel %vm4241_vm4, %v4415_v25, %v4411_v43  ;;  %v4485_v53 = vsel %vm4227_vm2, %v4484_v32, %v4480_v40 }
 0x428   :  { %v4247_v57 = vrot.slane %v9738_v41, %v10306_v33  ;;  %v4264_v2 = vadd.s32 4294967208, %v10163_v17  ;;  %v4242_v19 = vsel %vm4241_vm4, %v4240_v8, %v4235_v54  ;;  %v4494_v37 = vrot.slane %v10070_v38, %v10288_v3 }
 0x429   :  { %v4346_v47 = vrot.slane %v9861_v23, %v10324_v5  ;;  %v4425_v49 = vrot.slane %v9972_v4, %v10324_v5  ;;  %v10344_v45 = vsub.s32 %v4257_v6, %v11534_v39  ;;  %v4342_v41 = vsel %vm4248_vm5, %v4341_v11, %v4337_v48 }
 0x42a   :  { %v10303_v59 = vpop.permute.xlu1 %4161  ;;  %v4421_v22 = vsel %vm4248_vm5, %v4420_v9, %v4416_v35  ;;  %v4490_v0 = vsel %vm4234_vm3, %v4489_v24, %v4485_v53  ;;  %v4254_v44 = vrot.slane %v9759_v63, %v10324_v5  ;;  %v4271_v23 = vadd.s32 4294967200, %v10163_v17 }
 0x42b   :  { %v10311_v31 = vpop.permute.xlu0 %4119  ;;  %v4249_v4 = vsel %vm4248_vm5, %v4247_v57, %v4242_v19  ;;  %v4351_v38 = vrot.slane %v9846_v1, %v10344_v45  ;;  %v4430_v15 = vrot.slane %v9963_v36, %v10344_v45  ;;  %v4499_v25 = vrot.slane %v10061_v61, %v10306_v33  ;;  %v11540_v1 = vld [vmem:[#allocation55_spill] sm:$0xff]  ;;  %v11541_v19 = vld [vmem:[#allocation73_spill] sm:$0xff] }
 0x42c   :  { %v10364_v60 = vsub.s32 %v4264_v2, %v11534_v39  ;;  %v4347_v63 = vsel %vm4255_vm6, %v4346_v47, %v4342_v41  ;;  %v4426_v43 = vsel %vm4255_vm6, %v4425_v49, %v4421_v22  ;;  %v4495_v40 = vsel %vm4241_vm4, %v4494_v37, %v4490_v0  ;;  %v11542_v49 = vld [vmem:[#allocation81_spill] sm:$0xff] }
 0x42d   :  { %v4261_v8 = vrot.slane %v11540_v1, %v10344_v45  ;;  %v4278_v36 = vadd.s32 4294967192, %v10163_v17  ;;  %v4256_v6 = vsel %vm4255_vm6, %v4254_v44, %v4249_v4  ;;  %v4504_v11 = vrot.slane %v10086_v46, %v10324_v5 }
 0x42e   :  { %v10329_v56 = vpop.permute.xlu1 %4074  ;;  %v4356_v61 = vrot.slane %v9874_v18, %v10364_v60  ;;  %v4435_v54 = vrot.slane %v9984_v52, %v10364_v60  ;;  %v10382_v24 = vsub.s32 %v4271_v23, %v11534_v39  ;;  %v4352_v48 = vsel %vm4262_vm7, %v4351_v38, %v4347_v63 }
 0x42f   :  { %v10334_v13 = vpop.permute.xlu0 %4032  ;;  %v4431_v35 = vsel %vm4262_vm7, %v4430_v15, %v4426_v43  ;;  %v4500_v53 = vsel %vm4248_vm5, %v4499_v25, %v4495_v40  ;;  %v4268_v18 = vrot.slane %v9771_v30, %v10364_v60  ;;  %v4285_v52 = vadd.s32 4294967184, %v10163_v17  ;;  %v11544_v25 = vld [vmem:[#allocation70_spill] sm:$0xff]  ;;  %v11545_v43 = vld [vmem:[#allocation77_spill] sm:$0xff] }
 0x430   :  { %v4263_v46 = vsel %vm4262_vm7, %v4261_v8, %v4256_v6  ;;  %v4361_v2 = vrot.slane %v9864_v29, %v10382_v24  ;;  %v4440_v47 = vrot.slane %v11541_v19, %v10382_v24  ;;  %v4509_v37 = vrot.slane %v11542_v49, %v10344_v45  ;;  %v11543_v29 = vld [vmem:[#allocation57_spill] sm:$0xff] }
 0x431   :  { %v10400_v41 = vsub.s32 %v4278_v36, %v11534_v39  ;;  %v4357_v22 = vsel %vm11085_vm8, %v4356_v61, %v4352_v48  ;;  %v4436_v30 = vsel %vm11085_vm8, %v4435_v54, %v4431_v35  ;;  %v4505_v0 = vsel %vm4255_vm6, %v4504_v11, %v4500_v53  ;;  %v11546_v54 = vld [vmem:[#allocation62_spill] sm:$0xff]  ;;  %v11547_v53 = vld [vmem:[#allocation69_spill] sm:$0xff] }
 0x432   :  { %v10352_v28 = vpop.permute.xlu1 %4164  ;;  %v4275_v23 = vrot.slane %v11543_v29, %v10382_v24  ;;  %v4292_v4 = vadd.s32 4294967176, %v10163_v17  ;;  %v4270_v15 = vsel %vm11085_vm8, %v4268_v18, %v4263_v46  ;;  %v4514_v1 = vrot.slane %v10097_v62, %v10364_v60  ;;  %v11548_v18 = vld [vmem:[#allocation74_spill] sm:$0xff]  ;;  %v11551_v29 = vld [vmem:[#allocation72_spill] sm:$0xff] }
 0x433   :  { %v10361_v32 = vpop.permute.xlu0 %4122  ;;  %v4366_v63 = vrot.slane %v11544_v25, %v10400_v41  ;;  %v4445_v40 = vrot.slane %v11545_v43, %v10400_v41  ;;  %v10420_v8 = vsub.s32 %v4285_v52, %v11534_v39  ;;  %v4362_v36 = vsel %vm4276_vm9, %v4361_v2, %v4357_v22  ;;  %v11550_v22 = vld [vmem:[#allocation59_spill] sm:$0xff]  ;;  %v11568_v17 = vld [vmem:[#allocation24_spill] sm:$0xff] }
 0x434   :  { %v4441_v6 = vsel %vm4276_vm9, %v4440_v47, %v4436_v30  ;;  %v4510_v61 = vsel %vm4262_vm7, %v4509_v37, %v4505_v0  ;;  %v4282_v11 = vrot.slane %v11546_v54, %v10400_v41  ;;  %v4277_v35 = vsel %vm4276_vm9, %v4275_v23, %v4270_v15  ;;  %v11552_v23 = vld [vmem:[#allocation80_spill] sm:$0xff] }
 0x435   :  { %v4371_v62 = vrot.slane %v11547_v53, %v10420_v8  ;;  %v4450_v52 = vrot.slane %v11548_v18, %v10420_v8  ;;  %v4519_v46 = vrot.slane %v10089_v50, %v10382_v24  ;;  %v10439_v19 = vsub.s32 %v4292_v4, %v11534_v39  ;;  %v11556_v53 = vld [vmem:[#allocation83_spill] sm:$0xff] }
 0x436   :  { %v10379_v9 = vpop.permute.xlu1 %4077  ;;  %v4367_v47 = vsel %vm4283_vm10, %v4366_v63, %v4362_v36  ;;  %v4446_v49 = vsel %vm4283_vm10, %v4445_v40, %v4441_v6  ;;  %v4515_v37 = vsel %vm11085_vm8, %v4514_v1, %v4510_v61  ;;  %v4289_v30 = vrot.slane %v11550_v22, %v10420_v8  ;;  %v11553_v1 = vld [vmem:[#allocation86_spill] sm:$0xff]  ;;  %v11558_v22 = vld [vmem:[#allocation84_spill] sm:$0xff] }
 0x437   :  { %v10387_v57 = vpop.permute.xlu0 %4035  ;;  %11549 = vst [vmem:[#allocation56_spill] sm:$0xff] %v10439_v19  ;;  %v4284_v0 = vsel %vm4283_vm10, %v4282_v11, %v4277_v35  ;;  %v4376_v50 = vrot.slane %v11551_v29, %v10439_v19  ;;  %v4455_v15 = vrot.slane %v11552_v23, %v10439_v19  ;;  %v4524_v4 = vrot.slane %v10103_v12, %v10400_v41  ;;  %v11554_v12 = vld [vmem:[#allocation64_spill] sm:$0xff]  ;;  %v11555_v11 = vld [vmem:[#allocation82_spill] sm:$0xff]  ;;  %v11559_v29 = vld [vmem:[#allocation85_spill] sm:$0xff] }
 0x438   :  { %v4372_v63 = vsel %vm4290_vm11, %v4371_v62, %v4367_v47  ;;  %v4451_v43 = vsel %vm4290_vm11, %v4450_v52, %v4446_v49  ;;  %v4520_v40 = vsel %vm4276_vm9, %v4519_v46, %v4515_v37  ;;  %v4543_v36 = vrot.slane %v11553_v1, %v10176_v21  ;;  %v11557_v47 = vld [vmem:[#allocation120_spill] sm:$0xff] }
 0x439   :  { %vm4854_vm8 = vcmask 1042434   ;;  %v4291_v61 = vsel %vm4290_vm11, %v4289_v30, %v4284_v0  ;;  %v4296_v54 = vrot.slane %v11554_v12, %v10439_v19  ;;  %v4529_v35 = vrot.slane %v11555_v11, %v10420_v8  ;;  %v11560_v1 = vld [vmem:[#allocation124_spill] sm:$0xff]  ;;  %v11564_v12 = vld [vmem:[#allocation123_spill] sm:$0xff] }
 0x43a   :  { %v10405_v44 = vpop.permute.xlu1 %4167  ;;  %v4539_v62 = vrot.slane %v11556_v53, %v10184_v10  ;;  %v4377_v18 = vsel %vm4297_vm12, %v4376_v50, %v4372_v63  ;;  %v4456_v52 = vsel %vm4297_vm12, %v4455_v15, %v4451_v43  ;;  %v4525_v46 = vsel %vm4283_vm10, %v4524_v4, %v4520_v40  ;;  %v11562_v15 = vld [vmem:[#allocation87_spill] sm:$0xff]  ;;  %v11563_v43 = vld [vmem:[#allocation20_spill] sm:$0xff] }
 0x43b   :  { %v10410_v38 = vpop.permute.xlu0 %4125  ;;  %v4622_v49 = vrot.slane %v11557_v47, %v10176_v21  ;;  %v4534_v30 = vrot.slane %v11558_v22, %v10439_v19  ;;  %v4548_v23 = vrot.slane %v11559_v29, %v10192_v51  ;;  %v4627_v50 = vrot.slane %v11560_v1, %v10192_v51  ;;  %v11565_v53 = vld [vmem:[#allocation128_spill] sm:$0xff]  ;;  %v11566_v22 = vld [vmem:[#allocation21_spill] sm:$0xff] }
 0x43c   :  { %v4544_v0 = vsel %vm4199_vm13, %v4543_v36, %v4539_v62  ;;  %v4618_v4 = vrot.slane %v11562_v15, %v10184_v10  ;;  %v4553_v40 = vrot.slane %v11563_v43, %v10212_v58  ;;  %v4701_v11 = vrot.slane %v11564_v12, %v10176_v21  ;;  %v11567_v1 = vld [vmem:[#allocation44_spill] sm:$0xff] }
 0x43d   :  { %v4632_v36 = vrot.slane %v11565_v53, %v10212_v58  ;;  %v4298_v62 = vsel %vm4297_vm12, %v4296_v54, %v4291_v61  ;;  %v4530_v47 = vsel %vm4290_vm11, %v4529_v35, %v4525_v46  ;;  %v4558_v29 = vrot.slane %v11566_v22, %v10229_v14  ;;  %v11569_v19 = vld [vmem:[#allocation28_spill] sm:$0xff]  ;;  %v11570_v46 = vld [vmem:[#allocation23_spill] sm:$0xff] }
 0x43e   :  { %v10427_v48 = vpop.permute.xlu1 %4080  ;;  %v4706_v39 = vrot.slane %v11567_v1, %v10192_v51  ;;  %v4853_v15 = vsel %vm4852_vm0, %v4377_v18, %v4298_v62  ;;  %v4623_v43 = vsel %vm4199_vm13, %v4622_v49, %v4618_v4  ;;  %v4697_v12 = vrot.slane %v11568_v17, %v10184_v10 }
 0x43f   :  { %v10436_v2 = vpop.permute.xlu0 %4038  ;;  %v4563_v53 = vrot.slane %v11569_v19, %v10248_v27  ;;  %v10508_v61 = vsel %vm4854_vm8, %v4456_v52, %v4853_v15  ;;  %v4549_v54 = vsel %vm4206_vm14, %v4548_v23, %v4544_v0  ;;  %v4628_v35 = vsel %vm4206_vm14, %v4627_v50, %v4623_v43  ;;  %v11571_v23 = vld [vmem:[#allocation127_spill] sm:$0xff] }
 0x440   :  { %v4780_v18 = vrot.slane %v11570_v46, %v10176_v21  ;;  %v10517_v49 = vsel %vm4297_vm12, %v4534_v30, %v4530_v47  ;;  %v4554_v17 = vsel %vm4213_vm15, %v4553_v40, %v4549_v54  ;;  %v4702_v19 = vsel %vm4199_vm13, %v4701_v11, %v4697_v12  ;;  %v11572_v21 = vld [vmem:[#allocation131_spill] sm:$0xff]  ;;  %v11574_v40 = vld [vmem:[#allocation49_spill] sm:$0xff] }
 0x441   :  { %v4633_v4 = vsel %vm4213_vm15, %v4632_v36, %v4628_v35  ;;  %v4559_v52 = vsel %vm4220_vm1, %v4558_v29, %v4554_v17  ;;  %v4707_v0 = vsel %vm4206_vm14, %v4706_v39, %v4702_v19  ;;  %v4776_v50 = vrot.slane %v11571_v23, %v10184_v10  ;;  %v11573_v30 = vld [vmem:[#allocation51_spill] sm:$0xff]  ;;  %v11575_v36 = vld [vmem:[#allocation30_spill] sm:$0xff]  ;;  %v11576_v10 = vld [vmem:[#allocation29_spill] sm:$0xff] }
 0x442   :  { %v10453_v25 = vpop.permute.xlu1 %4170  ;;  %v4711_v22 = vrot.slane %v11572_v21, %v10212_v58  ;;  %v4564_v1 = vsel %vm4227_vm2, %v4563_v53, %v4559_v52  ;;  %v4637_v47 = vrot.slane %v11573_v30, %v10229_v14  ;;  %v4785_v11 = vrot.slane %v11574_v40, %v10192_v51  ;;  %v11577_v12 = vld [vmem:[#allocation27_spill] sm:$0xff]  ;;  %v11578_v53 = vld [vmem:[#allocation54_spill] sm:$0xff]  ;;  %v11580_v19 = vld [vmem:[#allocation37_spill] sm:$0xff] }
 0x443   :  { %v10460_v6 = vpop.permute.xlu0 %4128  ;;  %v4568_v15 = vrot.slane %v11575_v36, %v10268_v42  ;;  %v4781_v39 = vsel %vm4199_vm13, %v4780_v18, %v4776_v50  ;;  %v4642_v43 = vrot.slane %v11576_v10, %v10248_v27  ;;  %v4716_v54 = vrot.slane %v11577_v12, %v10229_v14  ;;  %v11579_v51 = vld [vmem:[#allocation50_spill] sm:$0xff]  ;;  %v11581_v23 = vld [vmem:[#allocation32_spill] sm:$0xff]  ;;  %v11582_v50 = vld [vmem:[#allocation53_spill] sm:$0xff] }
 0x444   :  { %v4573_v35 = vrot.slane %v11578_v53, %v10288_v3  ;;  %v4790_v17 = vrot.slane %v11579_v51, %v10212_v58  ;;  %v4647_v52 = vrot.slane %v11580_v19, %v10268_v42  ;;  %v4721_v18 = vrot.slane %v11581_v23, %v10248_v27  ;;  %v11583_v40 = vld [vmem:[#allocation35_spill] sm:$0xff]  ;;  %v11584_v12 = vld [vmem:[#allocation58_spill] sm:$0xff] }
 0x445   :  { %v4578_v21 = vrot.slane %v11582_v50, %v10306_v33  ;;  %v4712_v30 = vsel %vm4213_vm15, %v4711_v22, %v4707_v0  ;;  %v4795_v36 = vrot.slane %v11583_v40, %v10229_v14  ;;  %v4652_v10 = vrot.slane %v10226_v20, %v10288_v3 }
 0x446   :  { %v10474_v37 = vpop.permute.xlu1 %4083  ;;  %v4726_v58 = vrot.slane %v11584_v12, %v10268_v42  ;;  %v4638_v53 = vsel %vm4220_vm1, %v4637_v47, %v4633_v4  ;;  %v4786_v51 = vsel %vm4206_vm14, %v4785_v11, %v4781_v39  ;;  %v4569_v19 = vsel %vm4234_vm3, %v4568_v15, %v4564_v1 }
 0x447   :  { %v10483_v63 = vpop.permute.xlu0 %4041  ;;  %v4583_v23 = vrot.slane %v10233_v55, %v10324_v5  ;;  %v4643_v0 = vsel %vm4227_vm2, %v4642_v43, %v4638_v53  ;;  %v4717_v14 = vsel %vm4220_vm1, %v4716_v54, %v4712_v30  ;;  %v4574_v20 = vsel %vm4241_vm4, %v4573_v35, %v4569_v19 }
 0x448   :  { %11561 = vst [vmem:[#allocation140_spill] sm:$0xff] %v10483_v63  ;;  %v4800_v22 = vrot.slane %v10253_v7, %v10248_v27  ;;  %v4791_v4 = vsel %vm4213_vm15, %v4790_v17, %v4786_v51  ;;  %v4648_v1 = vsel %vm4234_vm3, %v4647_v52, %v4643_v0  ;;  %v4722_v47 = vsel %vm4227_vm2, %v4721_v18, %v4717_v14 }
 0x449   :  { %v4579_v55 = vsel %vm4248_vm5, %v4578_v21, %v4574_v20  ;;  %v4796_v11 = vsel %vm4220_vm1, %v4795_v36, %v4791_v4  ;;  %v4653_v15 = vsel %vm4241_vm4, %v4652_v10, %v4648_v1  ;;  %v4727_v39 = vsel %vm4234_vm3, %v4726_v58, %v4722_v47 }
 0x44a   :  { %v10505_v63 = vpop.permute.xlu1 %4173  ;;  %v4731_v43 = vrot.slane %v10258_v26, %v10288_v3  ;;  %v4584_v27 = vsel %vm4255_vm6, %v4583_v23, %v4579_v55  ;;  %v4657_v7 = vrot.slane %v10276_v16, %v10306_v33  ;;  %v4805_v54 = vrot.slane %v10303_v59, %v10268_v42 }
 0x44b   :  { %v10514_v62 = vpop.permute.xlu0 %4131  ;;  %v4588_v35 = vrot.slane %v10285_v34, %v10344_v45  ;;  %v4801_v52 = vsel %vm4227_vm2, %v4800_v22, %v4796_v11  ;;  %v4662_v18 = vrot.slane %v10329_v56, %v10324_v5  ;;  %v4736_v26 = vrot.slane %v10311_v31, %v10306_v33 }
 0x44c   :  { %v4593_v21 = vrot.slane %v10334_v13, %v10364_v60  ;;  %v4810_v42 = vrot.slane %v10352_v28, %v10288_v3  ;;  %v4667_v34 = vrot.slane %v10379_v9, %v10344_v45  ;;  %v4741_v59 = vrot.slane %v10361_v32, %v10324_v5 }
 0x44d   :  { %v4598_v56 = vrot.slane %v10387_v57, %v10382_v24  ;;  %v4732_v30 = vsel %vm4241_vm4, %v4731_v43, %v4727_v39  ;;  %v4815_v31 = vrot.slane %v10405_v44, %v10306_v33  ;;  %v4672_v13 = vrot.slane %v10427_v48, %v10364_v60 }
 0x44e   :  { %v10535_v29 = vpop.permute.xlu1 %4086  ;;  %v4746_v3 = vrot.slane %v10410_v38, %v10344_v45  ;;  %v4658_v28 = vsel %vm4248_vm5, %v4657_v7, %v4653_v15  ;;  %v4806_v9 = vsel %vm4234_vm3, %v4805_v54, %v4801_v52  ;;  %v4589_v32 = vsel %vm4262_vm7, %v4588_v35, %v4584_v27 }
 0x44f   :  { %v10544_v46 = vpop.permute.xlu0 %4044  ;;  %v4603_v57 = vrot.slane %v10436_v2, %v10400_v41  ;;  %vm4856_vm13 = vcmask 1043459   ;;  %v4663_v10 = vsel %vm4255_vm6, %v4662_v18, %v4658_v28  ;;  %v4737_v33 = vsel %vm4248_vm5, %v4736_v26, %v4732_v30  ;;  %v11587_v20 = vld [vmem:[#allocation140_spill] sm:$0xff] }
 0x450   :  { %vm11585_vm14 = vcmask 786112   ;;  %v4820_v38 = vrot.slane %v10453_v25, %v10324_v5  ;;  %v4811_v12 = vsel %vm4241_vm4, %v4810_v42, %v4806_v9  ;;  %v4668_v58 = vsel %vm4262_vm7, %v4667_v34, %v4663_v10 }
 0x451   :  { %v4594_v44 = vsel %vm11585_vm14, %v4593_v21, %v4589_v32  ;;  %v4742_v53 = vsel %vm4255_vm6, %v4741_v59, %v4737_v33  ;;  %vm4858_vm15 = vcmask 1044484   ;;  %v4816_v51 = vsel %vm4248_vm5, %v4815_v31, %v4811_v12  ;;  %vm11586_vm1 = vmmov %vm11585_vm14 }
 0x452   :  { %v10566_v50 = vpop.permute.xlu1 %4176  ;;  %v4599_v2 = vsel %vm4276_vm9, %v4598_v56, %v4594_v44  ;;  %v4673_v19 = vsel %vm11586_vm1, %v4672_v13, %v4668_v58  ;;  %v4747_v23 = vsel %vm4262_vm7, %v4746_v3, %v4742_v53  ;;  %v4751_v0 = vrot.slane %v10460_v6, %v10364_v60  ;;  %vm11589_vm2 = vmmov %vm11586_vm1  ;;  %v11591_v3 = vld [vmem:[#allocation33_spill] sm:$0xff] }
 0x453   :  { %v10573_v40 = vpop.permute.xlu0 %4134  ;;  %v4604_v5 = vsel %vm4283_vm10, %v4603_v57, %v4599_v2  ;;  %v4677_v25 = vrot.slane %v10474_v37, %v10382_v24  ;;  %v4825_v14 = vrot.slane %v10505_v63, %v10344_v45  ;;  %v4608_v22 = vrot.slane %v11587_v20, %v10420_v8  ;;  %v11588_v37 = vld [vmem:[#allocation56_spill] sm:$0xff]  ;;  %vm11590_vm3 = vmmov %vm11586_vm1 }
 0x454   :  { %v4821_v1 = vsel %vm4255_vm6, %v4820_v38, %v4816_v51  ;;  %v4682_v47 = vrot.slane %v10535_v29, %v10400_v41  ;;  %v4756_v6 = vrot.slane %v10514_v62, %v10382_v24  ;;  %v4830_v55 = vrot.slane %v10566_v50, %v10364_v60 }
 0x455   :  { %v4613_v15 = vrot.slane %v10544_v46, %v11588_v37  ;;  %v4761_v63 = vrot.slane %v10573_v40, %v10400_v41  ;;  %v4752_v29 = vsel %vm11589_vm2, %v4751_v0, %v4747_v23  ;;  %v4678_v50 = vsel %vm4276_vm9, %v4677_v25, %v4673_v19 }
 0x456   :  { %v10591_v17 = vpop.permute.xlu1 %4089  ;;  %v4826_v46 = vsel %vm4262_vm7, %v4825_v14, %v4821_v1  ;;  %v4609_v27 = vsel %vm4290_vm11, %v4608_v22, %v4604_v5  ;;  %v4757_v54 = vsel %vm4276_vm9, %v4756_v6, %v4752_v29  ;;  %vm4860_vm4 = vcmask 1045509   ;;  %v11595_v29 = vld [vmem:[#allocation8_spill] sm:$0xff] }
 0x457   :  { %v10600_v16 = vpop.permute.xlu0 %4092  ;;  %v4687_v45 = vrot.slane %v10591_v17, %v10420_v8  ;;  %v4831_v35 = vsel %vm11590_vm3, %v4830_v55, %v4826_v46  ;;  %v4614_v52 = vsel %vm4297_vm12, %v4613_v15, %v4609_v27  ;;  %v4762_v18 = vsel %vm4283_vm10, %v4761_v63, %v4757_v54  ;;  %v11594_v63 = vld [vmem:[#allocation9_spill] sm:$0xff] }
 0x458   :  { %v4692_v62 = vrot.slane %v10600_v16, %v11588_v37  ;;  %v4857_v42 = vsel %vm4856_vm13, %v10517_v49, %v10508_v61  ;;  %vm4862_vm5 = vcmask 1046534   ;;  %vm4864_vm6 = vcmask 1047559  }
 0x459   :  { %v4859_v30 = vsel %vm4858_vm15, %v4614_v52, %v4857_v42  ;;  %vm2499_vm7 = vcmp.lt.s32.totalorder %v11591_v3, 16  ;;  %v11592_v44 = vmov 0.0   ;;  %v7056_v38 = vmov 1.0  }
 0x45a   :  { %v4180_v36 = vpop.permute.xlu1 %4179  ;;  %vm4996_vm1 = vcmp.eq.s32.totalorder %v11591_v3, 0  ;;  %vm4986_vm2 = vcmp.eq.s32.totalorder %v11591_v3, 15  ;;  %v5002_v55 = vstv %s5001_s23  ;;  %v11598_v46 = vsub.s32 3, %v11595_v29 }
 0x45b   :  { %v4183_v48 = vpop.permute.xlu0 %4182  ;;  %v4835_v39 = vrot.slane %v4180_v36, %v10382_v24  ;;  %v4683_v24 = vsel %vm4283_vm10, %v4682_v47, %v4678_v50  ;;  %v6253_v1 = vsel %vm4996_vm1, 1.0, %v11592_v44  ;;  %v4999_v47 = vstv %s4995_s22 }
 0x45c   :  { %v4840_v60 = vrot.slane %v4183_v48, %v10400_v41  ;;  %v4688_v41 = vsel %vm4290_vm11, %v4687_v45, %v4683_v24 }
 0x45d   :  { %v4836_v26 = vsel %vm4276_vm9, %v4835_v39, %v4831_v35  ;;  %v4693_v21 = vsel %vm4297_vm12, %v4692_v62, %v4688_v41  ;;  %v11596_v62 = vsub.s32 1, %v11595_v29 }
 0x45e   :  { %v4138_v4 = vpop.permute.xlu1 %4137  ;;  %v4841_v16 = vsel %vm4283_vm10, %v4840_v60, %v4836_v26  ;;  %v4861_v13 = vsel %vm4860_vm4, %v4693_v21, %v4859_v30  ;;  %vm11593_vm10 = vmmov 0   ;;  %v11597_v60 = vsub.s32 2, %v11595_v29 }
 0x45f   :  { %v4186_v11 = vpop.permute.xlu0 %4185  ;;  %v4766_v43 = vrot.slane %v4138_v4, %v10420_v8 }
 0x460   :  { %v4845_v40 = vrot.slane %v4186_v11, %v10420_v8  ;;  %v5000_v11 = vmul.f32 %v6253_v1, %v4999_v47 }
 0x461   :  { %v4767_v8 = vsel %vm4290_vm11, %v4766_v43, %v4762_v18  ;;  %v11600_v18 = vsub.s32 5, %v11595_v29 }
 0x462   :  { %v4141_v7 = vpop.permute.xlu1 %4140  ;;  %v4846_v59 = vsel %vm4290_vm11, %v4845_v40, %v4841_v16  ;;  %v11601_v16 = vsub.s32 6, %v11595_v29 }
 0x463   :  { %v4771_v17 = vrot.slane %v4141_v7, %v11588_v37  ;;  %v11599_v7 = vsub.s32 4, %v11595_v29 }
 0x465   :  { %v4772_v34 = vsel %vm4297_vm12, %v4771_v17, %v4767_v8 }
 0x466   :  { %v4189_v56 = vpop.permute.xlu1 %4188  ;;  %v4863_v28 = vsel %vm4862_vm5, %v4772_v34, %v4861_v13 }
 0x467   :  { %v4850_v31 = vrot.slane %v4189_v56, %v11588_v37 }
 0x469   :  { %v4851_v9 = vsel %vm4297_vm12, %v4850_v31, %v4846_v59  ;;  %v11602_v31 = vsub.s32 7, %v11595_v29 }
 0x46a   :  { %v4865_v61 = vsel %vm4864_vm6, %v4851_v9, %v4863_v28 }
 0x46b   :  { %v4867_v49 = vsel %vm2499_vm7, %v4865_v61, 0.0 }
 0x46c   :  { %v4868_v32 = vsub.f32 1.0, %v4867_v49 }
 0x46e   :  { %v4869_v57 = vand.u32 2147483647, %v4868_v32  ;;  %vm4875_vm11 = vcmp.lt.f32.partialorder %v4868_v32, 0.0 }
 0x470   :  { %vm4870_vm9 = vcmp.eq.f32.partialorder %v4869_v57, 0.0 }
 0x471   :  { %v4871_v36 = vsel %vm4870_vm9, 1.0, %v4869_v57 }
 0x472   :  { %7016 = vlog2.f32 %v4871_v36 }
 0x47c   :  { %v7017_v10 = vpop.eup %7016 }
 0x47d   :  { %v4873_v33 = vmul.f32 0.6931472, %v7017_v10 }
 0x47f   :  { %6684 = vmatmul.mubr.f32.vlgmr.msra.gmra.mrb[54].mxu0 %v4873_v33 }
 0x480   :  { %6686 = vmatprep.mubr.msk.f32.mxu0 %vm11593_vm10, %v11592_v44 }
 0x483   :  { %6687 = vmatmul.mubr.msk.f32.gmra.mrb[56].mxu0 %vm4870_vm9, %v7056_v38 }
 0x484   :  { %6689 = vmatprep.mubr.msk.f32.mxu0 %vm11593_vm10, %v11592_v44 }
 0x487   :  { %6690 = vmatmul.mubr.msk.f32.gmra.mrb[58].mxu0 %vm4875_vm11, %v7056_v38 }
 0x552   :  { %v4959_v48 = vpop.f32.mrb[54].mxu0 }
 0x553   :  { %v6685_v12 = vpop.f32.mrb[55].mxu0  ;;  %v4979_v58 = vmul.f32 1.442695, %v4959_v48 }
 0x555   :  { %7018 = vpow2.f32 %v4979_v58 }
 0x556   :  { %v4964_v53 = vpop.f32.mrb[56].mxu0 }
 0x557   :  { %v6688_v2 = vpop.f32.mrb[57].mxu0  ;;  %vm4978_vm14 = vcmp.gt.f32.partialorder %v4964_v53, 0.0 }
 0x558   :  { %v5558_v2 = vld [vmem:[#allocation5 + $0x80] sm:$0xff] }
 0x55a   :  { %v4969_v51 = vpop.f32.mrb[58].mxu0 }
 0x55b   :  { %v4973_v19 = vmul.f32 0.5, %v4969_v51  ;;  %v6691_v23 = vpop.f32.mrb[59].mxu0  ;;  %v5559_v51 = vld [vmem:[#allocation5 + $0x88] sm:$0xff] }
 0x55d   :  { %v4974_v0 = vfloor.f32 %v4973_v19 }
 0x55f   :  { %v4975_v5 = vsub.f32 %v4973_v19, %v4974_v0  ;;  %v7019_v25 = vpop.eup %7018  ;;  %v5560_v19 = vld [vmem:[#allocation5 + $0x90] sm:$0xff] }
 0x561   :  { %vm4976_vm12 = vcmp.gt.f32.partialorder %v4975_v5, 0.25 }
 0x562   :  { %v4977_v14 = vsel %vm4976_vm12, -1.0, %v7056_v38 }
 0x563   :  { %v4981_v20 = vmul.f32 %v7019_v25, %v4977_v14  ;;  %v5561_v14 = vld [vmem:[#allocation5 + $0x98] sm:$0xff] }
 0x565   :  { %v4982_v22 = vsel %vm4978_vm14, 0.0, %v4981_v20 }
 0x566   :  { %v4983_v4 = vmul.f32 %v4982_v22, %v4867_v49 }
 0x568   :  { %4984 = vadd.xlane.f32.xlu0 %v4983_v4 }
 0x5f5   :  { %v4985_v6 = vpop.xlane.xlu0 %4984 }
 0x5f6   :  { %vm4987_vm3 = vcmp.eq.f32.partialorder %v4985_v6, 0.0 }
 0x5f7   :  { %vm4990_vm7 = vmand %vm4986_vm2, %vm4987_vm3 }
 0x5f8   :  { %v4991_v37 = vsel %vm4990_vm7, 1.0, %v4983_v4  ;;  %v5562_v4 = vld [vmem:[#allocation5 + $0xa0] sm:$0xff] }
 0x5f9   :  { %v5003_v15 = vmul.f32 %v5002_v55, %v4991_v37  ;;  %v5543_v37 = vld [vmem:[#allocation5 + $0x8] sm:$0xff] }
 0x5fb   :  { %v10699_v45 = vadd.f32 %v5003_v15, %v5000_v11  ;;  %v5563_v11 = vld [vmem:[#allocation5 + $0xa8] sm:$0xff] }
 0x5fd   :  { %5005 = vst [vmem:[%s11060_s12] sm:$0xff] %v10699_v45  ;;  %v5009_v39 = vrot.slane %v10699_v45, %v11594_v63  ;;  %v5076_v43 = vrot.slane %v10699_v45, %v11596_v62  ;;  %v5143_v50 = vrot.slane %v10699_v45, %v11597_v60  ;;  %v5210_v27 = vrot.slane %v10699_v45, %v11598_v46  ;;  %v5564_v63 = vld [vmem:[#allocation5 + $0xb0] sm:$0xff]  ;;  %v5542_v62 = vld [vmem:[#allocation5] sm:$0xff] }
 0x5fe   :  { %v10719_v40 = vrot.slane %v10699_v45, %v11599_v7  ;;  %v10740_v26 = vrot.slane %v10699_v45, %v11600_v18  ;;  %v10748_v42 = vrot.slane %v10699_v45, %v11601_v16  ;;  %v10761_v13 = vrot.slane %v10699_v45, %v11602_v31  ;;  %v5545_v7 = vld [vmem:[#allocation5 + $0x18] sm:$0xff] }
 0x5ff   :  { %5043 = vbcast.lane.b32.xlu0 %v5009_v39, 320  ;;  %5011 = vbcast.lane.b32.xlu1 %v5009_v39, 256 }
 0x603   :  { %5067 = vbcast.lane.b32.xlu0 %v5009_v39, 368  ;;  %5015 = vbcast.lane.b32.xlu1 %v5009_v39, 264 }
 0x607   :  { %5078 = vbcast.lane.b32.xlu0 %v5076_v43, 256  ;;  %5019 = vbcast.lane.b32.xlu1 %v5009_v39, 272 }
 0x60b   :  { %5086 = vbcast.lane.b32.xlu0 %v5076_v43, 272  ;;  %5023 = vbcast.lane.b32.xlu1 %v5009_v39, 280 }
 0x60f   :  { %5094 = vbcast.lane.b32.xlu0 %v5076_v43, 288  ;;  %5027 = vbcast.lane.b32.xlu1 %v5009_v39, 288 }
 0x613   :  { %5102 = vbcast.lane.b32.xlu0 %v5076_v43, 304  ;;  %5031 = vbcast.lane.b32.xlu1 %v5009_v39, 296 }
 0x617   :  { %5110 = vbcast.lane.b32.xlu0 %v5076_v43, 320  ;;  %5035 = vbcast.lane.b32.xlu1 %v5009_v39, 304 }
 0x61b   :  { %5118 = vbcast.lane.b32.xlu0 %v5076_v43, 336  ;;  %5039 = vbcast.lane.b32.xlu1 %v5009_v39, 312 }
 0x61f   :  { %5126 = vbcast.lane.b32.xlu0 %v5076_v43, 352  ;;  %5047 = vbcast.lane.b32.xlu1 %v5009_v39, 328 }
 0x623   :  { %5134 = vbcast.lane.b32.xlu0 %v5076_v43, 368  ;;  %5051 = vbcast.lane.b32.xlu1 %v5009_v39, 336 }
 0x627   :  { %5145 = vbcast.lane.b32.xlu0 %v5143_v50, 256  ;;  %5055 = vbcast.lane.b32.xlu1 %v5009_v39, 344 }
 0x62b   :  { %5153 = vbcast.lane.b32.xlu0 %v5143_v50, 272  ;;  %5059 = vbcast.lane.b32.xlu1 %v5009_v39, 352 }
 0x62f   :  { %5161 = vbcast.lane.b32.xlu0 %v5143_v50, 288  ;;  %5063 = vbcast.lane.b32.xlu1 %v5009_v39, 360 }
 0x633   :  { %5169 = vbcast.lane.b32.xlu0 %v5143_v50, 304  ;;  %5071 = vbcast.lane.b32.xlu1 %v5009_v39, 376 }
 0x637   :  { %5177 = vbcast.lane.b32.xlu0 %v5143_v50, 320  ;;  %5082 = vbcast.lane.b32.xlu1 %v5076_v43, 264 }
 0x63b   :  { %5185 = vbcast.lane.b32.xlu0 %v5143_v50, 336  ;;  %5090 = vbcast.lane.b32.xlu1 %v5076_v43, 280 }
 0x63f   :  { %5193 = vbcast.lane.b32.xlu0 %v5143_v50, 352  ;;  %5098 = vbcast.lane.b32.xlu1 %v5076_v43, 296 }
 0x643   :  { %5201 = vbcast.lane.b32.xlu0 %v5143_v50, 368  ;;  %5106 = vbcast.lane.b32.xlu1 %v5076_v43, 312 }
 0x647   :  { %5212 = vbcast.lane.b32.xlu0 %v5210_v27, 256  ;;  %5114 = vbcast.lane.b32.xlu1 %v5076_v43, 328 }
 0x64b   :  { %5220 = vbcast.lane.b32.xlu0 %v5210_v27, 272  ;;  %5122 = vbcast.lane.b32.xlu1 %v5076_v43, 344 }
 0x64f   :  { %5228 = vbcast.lane.b32.xlu0 %v5210_v27, 288  ;;  %5130 = vbcast.lane.b32.xlu1 %v5076_v43, 360 }
 0x653   :  { %5236 = vbcast.lane.b32.xlu0 %v5210_v27, 304  ;;  %5138 = vbcast.lane.b32.xlu1 %v5076_v43, 376  ;;  %v5544_v43 = vld [vmem:[#allocation5 + $0x10] sm:$0xff] }
 0x657   :  { %5244 = vbcast.lane.b32.xlu0 %v5210_v27, 320  ;;  %5149 = vbcast.lane.b32.xlu1 %v5143_v50, 264 }
 0x65b   :  { %5252 = vbcast.lane.b32.xlu0 %v5210_v27, 336  ;;  %5157 = vbcast.lane.b32.xlu1 %v5143_v50, 280 }
 0x65f   :  { %5260 = vbcast.lane.b32.xlu0 %v5210_v27, 352  ;;  %5165 = vbcast.lane.b32.xlu1 %v5143_v50, 296 }
 0x663   :  { %5268 = vbcast.lane.b32.xlu0 %v5210_v27, 368  ;;  %5173 = vbcast.lane.b32.xlu1 %v5143_v50, 312 }
 0x667   :  { %5279 = vbcast.lane.b32.xlu0 %v10719_v40, 256  ;;  %5181 = vbcast.lane.b32.xlu1 %v5143_v50, 328 }
 0x66b   :  { %5287 = vbcast.lane.b32.xlu0 %v10719_v40, 272  ;;  %5189 = vbcast.lane.b32.xlu1 %v5143_v50, 344 }
 0x66f   :  { %5295 = vbcast.lane.b32.xlu0 %v10719_v40, 288  ;;  %5197 = vbcast.lane.b32.xlu1 %v5143_v50, 360 }
 0x671   :  { %v10724_v24 = vpop.permute.xlu0 %5043  ;;  %v10726_v54 = vpop.permute.xlu1 %5011 }
 0x673   :  { %5303 = vbcast.lane.b32.xlu0 %v10719_v40, 304  ;;  %5205 = vbcast.lane.b32.xlu1 %v5143_v50, 376 }
 0x675   :  { %v10729_v35 = vpop.permute.xlu0 %5067  ;;  %v10731_v17 = vpop.permute.xlu1 %5015 }
 0x676   :  { %v5671_v46 = vmul.f32 %v5543_v37, %v10731_v17 }
 0x677   :  { %5311 = vbcast.lane.b32.xlu0 %v10719_v40, 320  ;;  %5216 = vbcast.lane.b32.xlu1 %v5210_v27, 264 }
 0x679   :  { %v5079_v52 = vpop.permute.xlu0 %5078  ;;  %v10734_v41 = vpop.permute.xlu1 %5019 }
 0x67a   :  { %v5686_v5 = vmul.f32 %v5558_v2, %v5079_v52  ;;  %v5672_v16 = vmul.f32 %v5544_v43, %v10734_v41 }
 0x67b   :  { %5319 = vbcast.lane.b32.xlu0 %v10719_v40, 336  ;;  %5224 = vbcast.lane.b32.xlu1 %v5210_v27, 280 }
 0x67d   :  { %v5087_v21 = vpop.permute.xlu0 %5086  ;;  %v10742_v8 = vpop.permute.xlu1 %5023 }
 0x67e   :  { %v5688_v20 = vmul.f32 %v5560_v19, %v5087_v21  ;;  %v5670_v21 = vmul.f32 %v5542_v62, %v10726_v54  ;;  %v5570_v62 = vld [vmem:[#allocation5 + $0xe0] sm:$0xff] }
 0x67f   :  { %5346 = vbcast.lane.b32.xlu0 %v10740_v26, 256  ;;  %5232 = vbcast.lane.b32.xlu1 %v5210_v27, 296 }
 0x681   :  { %v5095_v34 = vpop.permute.xlu0 %5094  ;;  %v10750_v59 = vpop.permute.xlu1 %5027 }
 0x682   :  { %v5690_v15 = vmul.f32 %v5562_v4, %v5095_v34  ;;  %v5566_v34 = vld [vmem:[#allocation5 + $0xc0] sm:$0xff] }
 0x683   :  { %5413 = vbcast.lane.b32.xlu0 %v10748_v42, 256  ;;  %5240 = vbcast.lane.b32.xlu1 %v5210_v27, 312 }
 0x685   :  { %v10753_v56 = vpop.permute.xlu0 %5102  ;;  %v10755_v30 = vpop.permute.xlu1 %5031 }
 0x686   :  { %v5692_v52 = vmul.f32 %v5564_v63, %v10753_v56  ;;  %v5567_v56 = vld [vmem:[#allocation5 + $0xc8] sm:$0xff] }
 0x687   :  { %5354 = vbcast.lane.b32.xlu0 %v10740_v26, 272  ;;  %5248 = vbcast.lane.b32.xlu1 %v5210_v27, 328 }
 0x689   :  { %v10763_v3 = vpop.permute.xlu0 %5110  ;;  %v10765_v28 = vpop.permute.xlu1 %5035 }
 0x68a   :  { %v5694_v54 = vmul.f32 %v5566_v34, %v10763_v3  ;;  %v5550_v34 = vld [vmem:[#allocation5 + $0x40] sm:$0xff] }
 0x68b   :  { %5484 = vbcast.lane.b32.xlu0 %v10761_v13, 264  ;;  %5256 = vbcast.lane.b32.xlu1 %v5210_v27, 344 }
 0x68d   :  { %v10768_v9 = vpop.permute.xlu0 %5118  ;;  %v10770_v61 = vpop.permute.xlu1 %5039 }
 0x68f   :  { %5358 = vbcast.lane.b32.xlu0 %v10740_v26, 280  ;;  %5264 = vbcast.lane.b32.xlu1 %v5210_v27, 360 }
 0x691   :  { %v10773_v49 = vpop.permute.xlu0 %5126  ;;  %v10775_v32 = vpop.permute.xlu1 %5047 }
 0x693   :  { %5425 = vbcast.lane.b32.xlu0 %v10748_v42, 280  ;;  %5272 = vbcast.lane.b32.xlu1 %v5210_v27, 376  ;;  %v5565_v27 = vld [vmem:[#allocation5 + $0xb8] sm:$0xff] }
 0x695   :  { %v10778_v57 = vpop.permute.xlu0 %5134  ;;  %v10780_v36 = vpop.permute.xlu1 %5051 }
 0x697   :  { %5492 = vbcast.lane.b32.xlu0 %v10761_v13, 280  ;;  %5283 = vbcast.lane.b32.xlu1 %v10719_v40, 264 }
 0x699   :  { %v10784_v10 = vpop.permute.xlu0 %5145  ;;  %v10786_v33 = vpop.permute.xlu1 %5055 }
 0x69b   :  { %5366 = vbcast.lane.b32.xlu0 %v10740_v26, 296  ;;  %5291 = vbcast.lane.b32.xlu1 %v10719_v40, 280 }
 0x69d   :  { %v10790_v44 = vpop.permute.xlu0 %5153  ;;  %v10792_v38 = vpop.permute.xlu1 %5059 }
 0x69f   :  { %5433 = vbcast.lane.b32.xlu0 %v10748_v42, 296  ;;  %5299 = vbcast.lane.b32.xlu1 %v10719_v40, 296 }
 0x6a1   :  { %v10796_v48 = vpop.permute.xlu0 %5161  ;;  %v10798_v12 = vpop.permute.xlu1 %5063 }
 0x6a3   :  { %5500 = vbcast.lane.b32.xlu0 %v10761_v13, 296  ;;  %5307 = vbcast.lane.b32.xlu1 %v10719_v40, 312 }
 0x6a5   :  { %v10802_v58 = vpop.permute.xlu0 %5169  ;;  %v10804_v53 = vpop.permute.xlu1 %5071 }
 0x6a7   :  { %5374 = vbcast.lane.b32.xlu0 %v10740_v26, 312  ;;  %5315 = vbcast.lane.b32.xlu1 %v10719_v40, 328 }
 0x6a9   :  { %v10808_v23 = vpop.permute.xlu0 %5177  ;;  %v5083_v0 = vpop.permute.xlu1 %5082 }
 0x6aa   :  { %v5687_v25 = vmul.f32 %v5559_v51, %v5083_v0  ;;  %v5546_v51 = vld [vmem:[#allocation5 + $0x20] sm:$0xff]  ;;  %v5798_v0 = vadd.f32 %v5671_v46, %v5670_v21  ;;  %v5572_v21 = vld [vmem:[#allocation5 + $0xf0] sm:$0xff] }
 0x6ab   :  { %5441 = vbcast.lane.b32.xlu0 %v10748_v42, 312  ;;  %5323 = vbcast.lane.b32.xlu1 %v10719_v40, 344 }
 0x6ac   :  { %v5819_v22 = vadd.f32 %v5687_v25, %v5686_v5  ;;  %v5673_v5 = vmul.f32 %v5545_v7, %v10742_v8  ;;  %v5547_v25 = vld [vmem:[#allocation5 + $0x28] sm:$0xff]  ;;  %v5799_v41 = vadd.f32 %v5798_v0, %v5672_v16  ;;  %v5700_v0 = vmul.f32 %v5572_v21, %v10778_v57 }
 0x6ad   :  { %v10812_v1 = vpop.permute.xlu0 %5185  ;;  %v5091_v47 = vpop.permute.xlu1 %5090  ;;  %v5675_v37 = vmul.f32 %v5547_v25, %v10755_v30  ;;  %v5571_v7 = vld [vmem:[#allocation5 + $0xe8] sm:$0xff] }
 0x6ae   :  { %v5820_v6 = vadd.f32 %v5819_v22, %v5688_v20  ;;  %v5689_v55 = vmul.f32 %v5561_v14, %v5091_v47  ;;  %v5674_v20 = vmul.f32 %v5546_v51, %v10750_v59  ;;  %v5568_v22 = vld [vmem:[#allocation5 + $0xd0] sm:$0xff]  ;;  %v5800_v8 = vadd.f32 %v5799_v41, %v5673_v5 }
 0x6af   :  { %5508 = vbcast.lane.b32.xlu0 %v10761_v13, 312  ;;  %5350 = vbcast.lane.b32.xlu1 %v10740_v26, 264  ;;  %v5696_v3 = vmul.f32 %v5568_v22, %v10768_v9  ;;  %v5698_v9 = vmul.f32 %v5570_v62, %v10773_v49  ;;  %v5678_v49 = vmul.f32 %v5550_v34, %v10724_v24  ;;  %v5555_v62 = vld [vmem:[#allocation5 + $0x68] sm:$0xff] }
 0x6b0   :  { %v5821_v45 = vadd.f32 %v5820_v6, %v5689_v55  ;;  %v5548_v6 = vld [vmem:[#allocation5 + $0x30] sm:$0xff]  ;;  %v5801_v59 = vadd.f32 %v5800_v8, %v5674_v20 }
 0x6b1   :  { %v10816_v39 = vpop.permute.xlu0 %5193  ;;  %v5099_v29 = vpop.permute.xlu1 %5098 }
 0x6b2   :  { %v5822_v60 = vadd.f32 %v5821_v45, %v5690_v15  ;;  %v5691_v50 = vmul.f32 %v5563_v11, %v5099_v29  ;;  %v5569_v15 = vld [vmem:[#allocation5 + $0xd8] sm:$0xff]  ;;  %v5676_v29 = vmul.f32 %v5548_v6, %v10765_v28  ;;  %v5575_v6 = vld [vmem:[#allocation5 + $0x108] sm:$0xff] }
 0x6b3   :  { %5382 = vbcast.lane.b32.xlu0 %v10740_v26, 328  ;;  %5417 = vbcast.lane.b32.xlu1 %v10748_v42, 264  ;;  %v5549_v45 = vld [vmem:[#allocation5 + $0x38] sm:$0xff] }
 0x6b4   :  { %v5823_v18 = vadd.f32 %v5822_v60, %v5691_v50  ;;  %v5677_v30 = vmul.f32 %v5549_v45, %v10770_v61  ;;  %v5573_v61 = vld [vmem:[#allocation5 + $0xf8] sm:$0xff] }
 0x6b5   :  { %v10824_v31 = vpop.permute.xlu0 %5201  ;;  %v5107_v2 = vpop.permute.xlu1 %5106 }
 0x6b6   :  { %v5824_v19 = vadd.f32 %v5823_v18, %v5692_v52  ;;  %v5693_v17 = vmul.f32 %v5565_v27, %v5107_v2  ;;  %v5802_v27 = vadd.f32 %v5801_v59, %v5675_v37  ;;  %v5577_v59 = vld [vmem:[#allocation5 + $0x118] sm:$0xff] }
 0x6b7   :  { %5449 = vbcast.lane.b32.xlu0 %v10748_v42, 328  ;;  %5480 = vbcast.lane.b32.xlu1 %v10761_v13, 256 }
 0x6b8   :  { %v5825_v14 = vadd.f32 %v5824_v19, %v5693_v17  ;;  %v5803_v18 = vadd.f32 %v5802_v27, %v5676_v29  ;;  %v5551_v17 = vld [vmem:[#allocation5 + $0x48] sm:$0xff] }
 0x6b9   :  { %v10831_v4 = vpop.permute.xlu0 %5212  ;;  %v5115_v47 = vpop.permute.xlu1 %5114  ;;  %v5679_v22 = vmul.f32 %v5551_v17, %v10775_v32 }
 0x6ba   :  { %v5826_v55 = vadd.f32 %v5825_v14, %v5694_v54  ;;  %v5695_v11 = vmul.f32 %v5567_v56, %v5115_v47  ;;  %v5804_v19 = vadd.f32 %v5803_v18, %v5677_v30  ;;  %v5552_v54 = vld [vmem:[#allocation5 + $0x50] sm:$0xff]  ;;  %v5574_v47 = vld [vmem:[#allocation5 + $0x100] sm:$0xff] }
 0x6bb   :  { %5516 = vbcast.lane.b32.xlu0 %v10761_v13, 328  ;;  %5421 = vbcast.lane.b32.xlu1 %v10748_v42, 272  ;;  %v5680_v24 = vmul.f32 %v5552_v54, %v10780_v36 }
 0x6bc   :  { %v5827_v63 = vadd.f32 %v5826_v55, %v5695_v11  ;;  %v5805_v20 = vadd.f32 %v5804_v19, %v5678_v49  ;;  %v5553_v55 = vld [vmem:[#allocation5 + $0x58] sm:$0xff]  ;;  %v5576_v11 = vld [vmem:[#allocation5 + $0x110] sm:$0xff]  ;;  %v5582_v49 = vld [vmem:[#allocation5 + $0x140] sm:$0xff] }
 0x6bd   :  { %v10838_v43 = vpop.permute.xlu0 %5220  ;;  %v5123_v60 = vpop.permute.xlu1 %5122  ;;  %v5704_v29 = vmul.f32 %v5576_v11, %v10790_v44 }
 0x6be   :  { %v5828_v50 = vadd.f32 %v5827_v63, %v5696_v3  ;;  %v5697_v46 = vmul.f32 %v5569_v15, %v5123_v60  ;;  %v5702_v15 = vmul.f32 %v5574_v47, %v10784_v10  ;;  %v5554_v3 = vld [vmem:[#allocation5 + $0x60] sm:$0xff]  ;;  %v5806_v32 = vadd.f32 %v5805_v20, %v5679_v22  ;;  %v5583_v47 = vld [vmem:[#allocation5 + $0x148] sm:$0xff] }
 0x6bf   :  { %5390 = vbcast.lane.b32.xlu0 %v10740_v26, 344  ;;  %5488 = vbcast.lane.b32.xlu1 %v10761_v13, 272  ;;  %v5681_v63 = vmul.f32 %v5553_v55, %v10786_v33  ;;  %v5683_v33 = vmul.f32 %v5555_v62, %v10798_v12  ;;  %v5581_v12 = vld [vmem:[#allocation5 + $0x138] sm:$0xff]  ;;  %v5584_v55 = vld [vmem:[#allocation5 + $0x150] sm:$0xff] }
 0x6c0   :  { %v5829_v52 = vadd.f32 %v5828_v50, %v5697_v46  ;;  %v5807_v60 = vadd.f32 %v5806_v32, %v5680_v24  ;;  %v5682_v50 = vmul.f32 %v5554_v3, %v10792_v38  ;;  %v5578_v46 = vld [vmem:[#allocation5 + $0x120] sm:$0xff]  ;;  %v5712_v3 = vmul.f32 %v5584_v55, %v10812_v1 }
 0x6c1   :  { %v10844_v28 = vpop.permute.xlu0 %5228  ;;  %v5131_v16 = vpop.permute.xlu1 %5130  ;;  %v5706_v44 = vmul.f32 %v5578_v46, %v10796_v48  ;;  %v5586_v32 = vld [vmem:[#allocation5 + $0x160] sm:$0xff]  ;;  %v5588_v46 = vld [vmem:[#allocation5 + $0x170] sm:$0xff] }
 0x6c2   :  { %v5830_v2 = vadd.f32 %v5829_v52, %v5698_v9  ;;  %v5699_v51 = vmul.f32 %v5571_v7, %v5131_v16  ;;  %v5808_v9 = vadd.f32 %v5807_v60, %v5681_v63  ;;  %v5579_v52 = vld [vmem:[#allocation5 + $0x128] sm:$0xff]  ;;  %v5580_v16 = vld [vmem:[#allocation5 + $0x130] sm:$0xff]  ;;  %v5714_v60 = vmul.f32 %v5586_v32, %v10816_v39 }
 0x6c3   :  { %5327 = vbcast.lane.b32.xlu0 %v10719_v40, 352  ;;  %5362 = vbcast.lane.b32.xlu1 %v10740_v26, 288  ;;  %v5708_v17 = vmul.f32 %v5580_v16, %v10802_v58  ;;  %v5710_v58 = vmul.f32 %v5582_v49, %v10808_v23 }
 0x6c4   :  { %v5831_v5 = vadd.f32 %v5830_v2, %v5699_v51  ;;  %v5809_v21 = vadd.f32 %v5808_v9, %v5682_v50  ;;  %v5556_v2 = vld [vmem:[#allocation5 + $0x70] sm:$0xff] }
 0x6c5   :  { %v10850_v56 = vpop.permute.xlu0 %5236  ;;  %v5139_v25 = vpop.permute.xlu1 %5138  ;;  %v5684_v48 = vmul.f32 %v5556_v2, %v10729_v35 }
 0x6c6   :  { %v5832_v14 = vadd.f32 %v5831_v5, %v5700_v0  ;;  %v5701_v41 = vmul.f32 %v5573_v61, %v5139_v25  ;;  %v5810_v61 = vadd.f32 %v5809_v21, %v5683_v33  ;;  %v5557_v0 = vld [vmem:[#allocation5 + $0x78] sm:$0xff] }
 0x6c7   :  { %5394 = vbcast.lane.b32.xlu0 %v10740_v26, 352  ;;  %5429 = vbcast.lane.b32.xlu1 %v10748_v42, 288  ;;  %v5685_v22 = vmul.f32 %v5557_v0, %v10804_v53  ;;  %v5585_v53 = vld [vmem:[#allocation5 + $0x158] sm:$0xff] }
 0x6c8   :  { %v10855_v57 = vadd.f32 %v5832_v14, %v5701_v41  ;;  %v5811_v20 = vadd.f32 %v5810_v61, %v5684_v48 }
 0x6c9   :  { %v10858_v8 = vpop.permute.xlu0 %5244  ;;  %v5150_v37 = vpop.permute.xlu1 %5149 }
 0x6ca   :  { %v5703_v45 = vmul.f32 %v5575_v6, %v5150_v37  ;;  %v5834_v63 = vrot.slane %v10855_v57, 4 }
 0x6cb   :  { %5331 = vbcast.lane.b32.xlu0 %v10719_v40, 360  ;;  %5496 = vbcast.lane.b32.xlu1 %v10761_v13, 288 }
 0x6cc   :  { %v5840_v36 = vadd.f32 %v5703_v45, %v5702_v15  ;;  %v5812_v15 = vadd.f32 %v5811_v20, %v5685_v22  ;;  %v5835_v1 = vadd.f32 %v5834_v63, %v10855_v57 }
 0x6cd   :  { %v10866_v27 = vpop.permute.xlu0 %5252  ;;  %v5158_v10 = vpop.permute.xlu1 %5157 }
 0x6ce   :  { %v5841_v30 = vadd.f32 %v5840_v36, %v5704_v29  ;;  %v5705_v7 = vmul.f32 %v5577_v59, %v5158_v10  ;;  %v5813_v36 = vrot.slane %v5812_v15, 4  ;;  %v5836_v21 = vrot.slane %v5835_v1, 2 }
 0x6cf   :  { %5398 = vbcast.lane.b32.xlu0 %v10740_v26, 360  ;;  %5370 = vbcast.lane.b32.xlu1 %v10740_v26, 304 }
 0x6d0   :  { %v5842_v18 = vadd.f32 %v5841_v30, %v5705_v7  ;;  %v5814_v33 = vadd.f32 %v5813_v36, %v5812_v15 }
 0x6d1   :  { %v10872_v38 = vpop.permute.xlu0 %5260  ;;  %v5166_v34 = vpop.permute.xlu1 %5165 }
 0x6d2   :  { %v5843_v51 = vadd.f32 %v5842_v18, %v5706_v44  ;;  %v5707_v19 = vmul.f32 %v5579_v52, %v5166_v34  ;;  %v5589_v52 = vld [vmem:[#allocation5 + $0x178] sm:$0xff]  ;;  %v5716_v44 = vmul.f32 %v5588_v46, %v10824_v31  ;;  %v5815_v2 = vrot.slane %v5814_v33, 2 }
 0x6d3   :  { %5335 = vbcast.lane.b32.xlu0 %v10719_v40, 368  ;;  %5437 = vbcast.lane.b32.xlu1 %v10748_v42, 304 }
 0x6d4   :  { %v5844_v5 = vadd.f32 %v5843_v51, %v5707_v19  ;;  %v5590_v51 = vld [vmem:[#allocation5 + $0x180] sm:$0xff]  ;;  %v5591_v19 = vld [vmem:[#allocation5 + $0x188] sm:$0xff] }
 0x6d5   :  { %v10878_v25 = vpop.permute.xlu0 %5268  ;;  %v5174_v54 = vpop.permute.xlu1 %5173  ;;  %v5718_v31 = vmul.f32 %v5590_v51, %v10831_v4  ;;  %v5595_v4 = vld [vmem:[#allocation5 + $0x1a8] sm:$0xff]  ;;  %v5601_v51 = vld [vmem:[#allocation5 + $0x1d8] sm:$0xff] }
 0x6d6   :  { %v5845_v14 = vadd.f32 %v5844_v5, %v5708_v17  ;;  %v5709_v41 = vmul.f32 %v5581_v12, %v5174_v54  ;;  %v5592_v12 = vld [vmem:[#allocation5 + $0x190] sm:$0xff]  ;;  %v5837_v17 = vadd.f32 %v5836_v21, %v5835_v1  ;;  %v5816_v54 = vadd.f32 %v5815_v2, %v5814_v33  ;;  %v5598_v1 = vld [vmem:[#allocation5 + $0x1c0] sm:$0xff] }
 0x6d7   :  { %5402 = vbcast.lane.b32.xlu0 %v10740_v26, 368  ;;  %5504 = vbcast.lane.b32.xlu1 %v10761_v13, 304 }
 0x6d8   :  { %v5846_v6 = vadd.f32 %v5845_v14, %v5709_v41  ;;  %v5593_v14 = vld [vmem:[#allocation5 + $0x198] sm:$0xff]  ;;  %v5720_v41 = vmul.f32 %v5592_v12, %v10838_v43  ;;  %v5602_v12 = vld [vmem:[#allocation5 + $0x1e0] sm:$0xff] }
 0x6d9   :  { %v10884_v24 = vpop.permute.xlu0 %5279  ;;  %v5182_v35 = vpop.permute.xlu1 %5181 }
 0x6da   :  { %v5847_v11 = vadd.f32 %v5846_v6, %v5710_v58  ;;  %v5711_v37 = vmul.f32 %v5583_v47, %v5182_v35  ;;  %v5838_v47 = vrot.slane %v5837_v17, 1 }
 0x6db   :  { %5339 = vbcast.lane.b32.xlu0 %v10719_v40, 376  ;;  %5378 = vbcast.lane.b32.xlu1 %v10740_v26, 320  ;;  %v5587_v40 = vld [vmem:[#allocation5 + $0x168] sm:$0xff] }
 0x6dc   :  { %v5848_v45 = vadd.f32 %v5847_v11, %v5711_v37  ;;  %v5817_v37 = vrot.slane %v5816_v54, 1  ;;  %v5839_v43 = vadd.f32 %v5838_v47, %v5837_v17 }
 0x6dd   :  { %v10890_v23 = vpop.permute.xlu0 %5287  ;;  %v5190_v59 = vpop.permute.xlu1 %5189 }
 0x6de   :  { %v5849_v29 = vadd.f32 %v5848_v45, %v5712_v3  ;;  %v5713_v62 = vmul.f32 %v5585_v53, %v5190_v59  ;;  %v5596_v45 = vld [vmem:[#allocation5 + $0x1b0] sm:$0xff]  ;;  %v5818_v36 = vadd.f32 %v5817_v37, %v5816_v54 }
 0x6df   :  { %5406 = vbcast.lane.b32.xlu0 %v10740_v26, 376  ;;  %5445 = vbcast.lane.b32.xlu1 %v10748_v42, 320 }
 0x6e0   :  { %v5850_v50 = vadd.f32 %v5849_v29, %v5713_v62 }
 0x6e1   :  { %v10896_v10 = vpop.permute.xlu0 %5295  ;;  %v5198_v30 = vpop.permute.xlu1 %5197 }
 0x6e2   :  { %v5851_v7 = vadd.f32 %v5850_v50, %v5714_v60  ;;  %v5715_v9 = vmul.f32 %v5587_v40, %v5198_v30  ;;  %v5597_v40 = vld [vmem:[#allocation5 + $0x1b8] sm:$0xff]  ;;  %v5724_v60 = vmul.f32 %v5596_v45, %v10850_v56  ;;  %v5600_v56 = vld [vmem:[#allocation5 + $0x1d0] sm:$0xff] }
 0x6e3   :  { %5473 = vbcast.lane.b32.xlu0 %v10748_v42, 376  ;;  %5512 = vbcast.lane.b32.xlu1 %v10761_v13, 320 }
 0x6e4   :  { %v5852_v18 = vadd.f32 %v5851_v7, %v5715_v9 }
 0x6e5   :  { %v10901_v39 = vpop.permute.xlu0 %5303  ;;  %v5206_v16 = vpop.permute.xlu1 %5205 }
 0x6e6   :  { %v5853_v34 = vadd.f32 %v5852_v18, %v5716_v44  ;;  %v5717_v57 = vmul.f32 %v5589_v52, %v5206_v16  ;;  %v5599_v44 = vld [vmem:[#allocation5 + $0x1c8] sm:$0xff]  ;;  %v5726_v18 = vmul.f32 %v5598_v1, %v10858_v8 }
 0x6e7   :  { %5386 = vbcast.lane.b32.xlu1 %v10740_v26, 336  ;;  %v5594_v26 = vld [vmem:[#allocation5 + $0x1a0] sm:$0xff]  ;;  %v5603_v8 = vld [vmem:[#allocation5 + $0x1e8] sm:$0xff] }
 0x6e8   :  { %v5854_v61 = vadd.f32 %v5853_v34, %v5717_v57  ;;  %v5722_v15 = vmul.f32 %v5594_v26, %v10844_v28  ;;  %v5974_v28 = vsel %vm4852_vm0, %v5839_v43, %v5818_v36 }
 0x6e9   :  { %v10904_v0 = vpop.permute.xlu0 %5311  ;;  %v5217_v5 = vpop.permute.xlu1 %5216 }
 0x6ea   :  { %v5855_v48 = vrot.slane %v5854_v61, 4  ;;  %v5719_v49 = vmul.f32 %v5591_v19, %v5217_v5  ;;  %v5728_v19 = vmul.f32 %v5600_v56, %v10866_v27  ;;  %v5605_v27 = vld [vmem:[#allocation5 + $0x1f8] sm:$0xff] }
 0x6eb   :  { %5453 = vbcast.lane.b32.xlu1 %v10748_v42, 336 }
 0x6ec   :  { %v5856_v20 = vadd.f32 %v5855_v48, %v5854_v61  ;;  %v5861_v22 = vadd.f32 %v5719_v49, %v5718_v31  ;;  %v5730_v49 = vmul.f32 %v5602_v12, %v10872_v38  ;;  %v5607_v38 = vld [vmem:[#allocation5 + $0x208] sm:$0xff] }
 0x6ed   :  { %v10909_v58 = vpop.permute.xlu0 %5319  ;;  %v5225_v6 = vpop.permute.xlu1 %5224 }
 0x6ee   :  { %v5857_v55 = vrot.slane %v5856_v20, 2  ;;  %v5862_v35 = vadd.f32 %v5861_v22, %v5720_v41  ;;  %v5721_v11 = vmul.f32 %v5593_v14, %v5225_v6  ;;  %v5604_v14 = vld [vmem:[#allocation5 + $0x1f0] sm:$0xff] }
 0x6ef   :  { %5520 = vbcast.lane.b32.xlu1 %v10761_v13, 336  ;;  %v5732_v47 = vmul.f32 %v5604_v14, %v10878_v25  ;;  %v5609_v25 = vld [vmem:[#allocation5 + $0x218] sm:$0xff] }
 0x6f0   :  { %v5858_v53 = vadd.f32 %v5857_v55, %v5856_v20  ;;  %v5863_v3 = vadd.f32 %v5862_v35, %v5721_v11 }
 0x6f1   :  { %v10913_v32 = vpop.permute.xlu0 %5346  ;;  %v5233_v63 = vpop.permute.xlu1 %5232 }
 0x6f2   :  { %v5859_v59 = vrot.slane %v5858_v53, 1  ;;  %v5864_v29 = vadd.f32 %v5863_v3, %v5722_v15  ;;  %v5723_v62 = vmul.f32 %v5595_v4, %v5233_v63  ;;  %v5606_v4 = vld [vmem:[#allocation5 + $0x200] sm:$0xff] }
 0x6f3   :  { %5457 = vbcast.lane.b32.xlu1 %v10748_v42, 344  ;;  %v5734_v43 = vmul.f32 %v5606_v4, %v10884_v24 }
 0x6f4   :  { %v5860_v50 = vadd.f32 %v5859_v59, %v5858_v53  ;;  %v5865_v46 = vadd.f32 %v5864_v29, %v5723_v62  ;;  %v5608_v53 = vld [vmem:[#allocation5 + $0x210] sm:$0xff] }
 0x6f5   :  { %v10918_v30 = vpop.permute.xlu0 %5413  ;;  %v5241_v7 = vpop.permute.xlu1 %5240  ;;  %v5736_v29 = vmul.f32 %v5608_v53, %v10890_v23 }
 0x6f6   :  { %v10921_v9 = vsel %vm4854_vm8, %v5860_v50, %v5974_v28  ;;  %v5866_v33 = vadd.f32 %v5865_v46, %v5724_v60  ;;  %v5725_v52 = vmul.f32 %v5597_v40, %v5241_v7  ;;  %v5610_v40 = vld [vmem:[#allocation5 + $0x220] sm:$0xff]  ;;  %v5611_v7 = vld [vmem:[#allocation5 + $0x228] sm:$0xff] }
 0x6f7   :  { %5524 = vbcast.lane.b32.xlu1 %v10761_v13, 344  ;;  %v5738_v24 = vmul.f32 %v5610_v40, %v10896_v10 }
 0x6f8   :  { %v5867_v21 = vadd.f32 %v5866_v33, %v5725_v52 }
 0x6f9   :  { %v10925_v16 = vpop.permute.xlu0 %5354  ;;  %v5249_v34 = vpop.permute.xlu1 %5248 }
 0x6fa   :  { %v5868_v57 = vadd.f32 %v5867_v21, %v5726_v18  ;;  %v5727_v2 = vmul.f32 %v5599_v44, %v5249_v34  ;;  %v5613_v34 = vld [vmem:[#allocation5 + $0x238] sm:$0xff] }
 0x6fb   :  { %5461 = vbcast.lane.b32.xlu1 %v10748_v42, 352 }
 0x6fc   :  { %v5869_v61 = vadd.f32 %v5868_v57, %v5727_v2 }
 0x6fd   :  { %v10929_v17 = vpop.permute.xlu0 %5484  ;;  %v5257_v5 = vpop.permute.xlu1 %5256 }
 0x6fe   :  { %v5870_v31 = vadd.f32 %v5869_v61, %v5728_v19  ;;  %v5729_v48 = vmul.f32 %v5601_v51, %v5257_v5  ;;  %v5614_v19 = vld [vmem:[#allocation5 + $0x240] sm:$0xff] }
 0x6ff   :  { %5528 = vbcast.lane.b32.xlu1 %v10761_v13, 352 }
 0x700   :  { %v5871_v54 = vadd.f32 %v5870_v31, %v5729_v48  ;;  %v5615_v48 = vld [vmem:[#allocation5 + $0x248] sm:$0xff] }
 0x701   :  { %v10933_v41 = vpop.permute.xlu0 %5358  ;;  %v5265_v20 = vpop.permute.xlu1 %5264 }
 0x702   :  { %v5872_v22 = vadd.f32 %v5871_v54, %v5730_v49  ;;  %v5731_v26 = vmul.f32 %v5603_v8, %v5265_v20  ;;  %v5742_v8 = vmul.f32 %v5614_v19, %v10904_v0  ;;  %v5624_v0 = vld [vmem:[#allocation5 + $0x290] sm:$0xff] }
 0x703   :  { %5465 = vbcast.lane.b32.xlu1 %v10748_v42, 360 }
 0x704   :  { %v5873_v6 = vadd.f32 %v5872_v22, %v5731_v26  ;;  %v5617_v22 = vld [vmem:[#allocation5 + $0x258] sm:$0xff] }
 0x705   :  { %v10937_v55 = vpop.permute.xlu0 %5425  ;;  %v5273_v35 = vpop.permute.xlu1 %5272 }
 0x706   :  { %v5874_v11 = vadd.f32 %v5873_v6, %v5732_v47  ;;  %v5733_v37 = vmul.f32 %v5605_v27, %v5273_v35 }
 0x707   :  { %5532 = vbcast.lane.b32.xlu1 %v10761_v13, 360 }
 0x708   :  { %v5875_v15 = vadd.f32 %v5874_v11, %v5733_v37  ;;  %v5622_v11 = vld [vmem:[#allocation5 + $0x280] sm:$0xff]  ;;  %v5623_v37 = vld [vmem:[#allocation5 + $0x288] sm:$0xff] }
 0x709   :  { %v10940_v3 = vpop.permute.xlu0 %5492  ;;  %v5284_v45 = vpop.permute.xlu1 %5283  ;;  %v5750_v53 = vmul.f32 %v5622_v11, %v10913_v32 }
 0x70a   :  { %v5876_v63 = vrot.slane %v5875_v15, 4  ;;  %v5735_v59 = vmul.f32 %v5607_v38, %v5284_v45 }
 0x70b   :  { %5469 = vbcast.lane.b32.xlu1 %v10748_v42, 368  ;;  %v5612_v42 = vld [vmem:[#allocation5 + $0x230] sm:$0xff] }
 0x70c   :  { %v5877_v62 = vadd.f32 %v5876_v63, %v5875_v15  ;;  %v5882_v36 = vadd.f32 %v5735_v59, %v5734_v43  ;;  %v5740_v57 = vmul.f32 %v5612_v42, %v10901_v39  ;;  %v5638_v43 = vld [vmem:[#allocation5 + $0x300] sm:$0xff]  ;;  %v5639_v63 = vld [vmem:[#allocation5 + $0x308] sm:$0xff] }
 0x70d   :  { %v10945_v60 = vpop.permute.xlu0 %5366  ;;  %v5292_v50 = vpop.permute.xlu1 %5291 }
 0x70e   :  { %v5878_v46 = vrot.slane %v5877_v62, 2  ;;  %v5883_v28 = vadd.f32 %v5882_v36, %v5736_v29  ;;  %v5737_v1 = vmul.f32 %v5609_v25, %v5292_v50 }
 0x70f   :  { %5536 = vbcast.lane.b32.xlu1 %v10761_v13, 368 }
 0x710   :  { %v5879_v33 = vadd.f32 %v5878_v46, %v5877_v62  ;;  %v5884_v52 = vadd.f32 %v5883_v28, %v5737_v1  ;;  %v5766_v62 = vmul.f32 %v5638_v43, %v10918_v30  ;;  %v5630_v43 = vld [vmem:[#allocation5 + $0x2c0] sm:$0xff] }
 0x711   :  { %v10949_v44 = vpop.permute.xlu0 %5433  ;;  %v5300_v23 = vpop.permute.xlu1 %5299 }
 0x712   :  { %v5880_v18 = vrot.slane %v5879_v33, 1  ;;  %v5885_v21 = vadd.f32 %v5884_v52, %v5738_v24  ;;  %v5739_v56 = vmul.f32 %v5611_v7, %v5300_v23 }
 0x713   :  { %5540 = vbcast.lane.b32.xlu1 %v10761_v13, 376  ;;  %v5616_v13 = vld [vmem:[#allocation5 + $0x250] sm:$0xff] }
 0x714   :  { %v5881_v2 = vadd.f32 %v5880_v18, %v5879_v33  ;;  %v5886_v51 = vadd.f32 %v5885_v21, %v5739_v56  ;;  %v5744_v26 = vmul.f32 %v5616_v13, %v10909_v58  ;;  %v5752_v58 = vmul.f32 %v5624_v0, %v10925_v16  ;;  %v5625_v56 = vld [vmem:[#allocation5 + $0x298] sm:$0xff]  ;;  %v5627_v13 = vld [vmem:[#allocation5 + $0x2a8] sm:$0xff] }
 0x715   :  { %v10953_v61 = vpop.permute.xlu0 %5500  ;;  %v5308_v10 = vpop.permute.xlu1 %5307 }
 0x716   :  { %v10957_v12 = vsel %vm4856_vm13, %v5881_v2, %v10921_v9  ;;  %v5887_v5 = vadd.f32 %v5886_v51, %v5740_v57  ;;  %v5741_v31 = vmul.f32 %v5613_v34, %v5308_v10  ;;  %v5618_v34 = vld [vmem:[#allocation5 + $0x260] sm:$0xff]  ;;  %v5619_v2 = vld [vmem:[#allocation5 + $0x268] sm:$0xff]  ;;  %v5753_v10 = vmul.f32 %v5625_v56, %v10933_v41 }
 0x717   :  { %v5626_v57 = vld [vmem:[#allocation5 + $0x2a0] sm:$0xff] }
 0x718   :  { %v5888_v49 = vadd.f32 %v5887_v5, %v5741_v31 }
 0x719   :  { %v10960_v54 = vpop.permute.xlu0 %5374  ;;  %v5316_v39 = vpop.permute.xlu1 %5315 }
 0x71a   :  { %v5889_v14 = vadd.f32 %v5888_v49, %v5742_v8  ;;  %v5743_v20 = vmul.f32 %v5615_v48, %v5316_v39  ;;  %v5620_v48 = vld [vmem:[#allocation5 + $0x270] sm:$0xff] }
 0x71b   :  { %v5628_v39 = vld [vmem:[#allocation5 + $0x2b0] sm:$0xff] }
 0x71c   :  { %v5890_v27 = vadd.f32 %v5889_v14, %v5743_v20 }
 0x71d   :  { %v10963_v47 = vpop.permute.xlu0 %5441  ;;  %v5324_v9 = vpop.permute.xlu1 %5323 }
 0x71e   :  { %v5891_v6 = vadd.f32 %v5890_v27, %v5744_v26  ;;  %v5745_v35 = vmul.f32 %v5617_v22, %v5324_v9  ;;  %v5621_v9 = vld [vmem:[#allocation5 + $0x278] sm:$0xff] }
 0x720   :  { %v5892_v4 = vadd.f32 %v5891_v6, %v5745_v35  ;;  %v5755_v6 = vmul.f32 %v5627_v13, %v10945_v60  ;;  %v5631_v60 = vld [vmem:[#allocation5 + $0x2c8] sm:$0xff] }
 0x721   :  { %v10965_v38 = vpop.permute.xlu0 %5508  ;;  %v5351_v15 = vpop.permute.xlu1 %5350 }
 0x722   :  { %v5751_v45 = vmul.f32 %v5623_v37, %v5351_v15 }
 0x724   :  { %v5903_v59 = vadd.f32 %v5751_v45, %v5750_v53  ;;  %v5629_v45 = vld [vmem:[#allocation5 + $0x2b8] sm:$0xff] }
 0x725   :  { %v10969_v25 = vpop.permute.xlu0 %5382  ;;  %v5418_v29 = vpop.permute.xlu1 %5417 }
 0x726   :  { %v5904_v36 = vadd.f32 %v5903_v59, %v5752_v58  ;;  %v5767_v40 = vmul.f32 %v5639_v63, %v5418_v29  ;;  %v5759_v56 = vmul.f32 %v5631_v60, %v10969_v25  ;;  %v5641_v25 = vld [vmem:[#allocation5 + $0x318] sm:$0xff]  ;;  %v5644_v60 = vld [vmem:[#allocation5 + $0x330] sm:$0xff] }
 0x728   :  { %v10972_v50 = vadd.f32 %v5767_v40, %v5766_v62  ;;  %v5905_v8 = vadd.f32 %v5904_v36, %v5753_v10 }
 0x729   :  { %v10974_v46 = vpop.permute.xlu0 %5449  ;;  %v10976_v28 = vpop.permute.xlu1 %5480 }
 0x72d   :  { %v10978_v32 = vpop.permute.xlu0 %5516  ;;  %v10980_v1 = vpop.permute.xlu1 %5421 }
 0x731   :  { %v10982_v7 = vpop.permute.xlu0 %5390  ;;  %v10984_v16 = vpop.permute.xlu1 %5488 }
 0x735   :  { %v5328_v24 = vpop.permute.xlu0 %5327  ;;  %v5363_v33 = vpop.permute.xlu1 %5362 }
 0x736   :  { %v5746_v5 = vmul.f32 %v5618_v34, %v5328_v24  ;;  %v5754_v31 = vmul.f32 %v5626_v57, %v5363_v33  ;;  %v5640_v57 = vld [vmem:[#allocation5 + $0x310] sm:$0xff] }
 0x738   :  { %v5893_v22 = vadd.f32 %v5892_v4, %v5746_v5  ;;  %v5906_v26 = vadd.f32 %v5905_v8, %v5754_v31  ;;  %v5757_v4 = vmul.f32 %v5629_v45, %v10960_v54  ;;  %v5634_v54 = vld [vmem:[#allocation5 + $0x2e0] sm:$0xff]  ;;  %v5769_v45 = vmul.f32 %v5641_v25, %v10937_v55 }
 0x739   :  { %v10986_v52 = vpop.permute.xlu0 %5394  ;;  %v10988_v30 = vpop.permute.xlu1 %5429 }
 0x73a   :  { %v5907_v0 = vadd.f32 %v5906_v26, %v5755_v6 }
 0x73d   :  { %v5332_v42 = vpop.permute.xlu0 %5331  ;;  %v10990_v23 = vpop.permute.xlu1 %5496 }
 0x73e   :  { %v5747_v49 = vmul.f32 %v5619_v2, %v5332_v42  ;;  %v5633_v2 = vld [vmem:[#allocation5 + $0x2d8] sm:$0xff] }
 0x73f   :  { %v5761_v8 = vmul.f32 %v5633_v2, %v10982_v7  ;;  %v5659_v2 = vld [vmem:[#allocation5 + $0x3a8] sm:$0xff] }
 0x740   :  { %v5894_v35 = vadd.f32 %v5893_v22, %v5747_v49  ;;  %v5635_v22 = vld [vmem:[#allocation5 + $0x2e8] sm:$0xff] }
 0x741   :  { %v10992_v18 = vpop.permute.xlu0 %5398  ;;  %v5371_v21 = vpop.permute.xlu1 %5370 }
 0x742   :  { %v5756_v11 = vmul.f32 %v5628_v39, %v5371_v21  ;;  %v5632_v21 = vld [vmem:[#allocation5 + $0x2d0] sm:$0xff]  ;;  %v5654_v39 = vld [vmem:[#allocation5 + $0x380] sm:$0xff] }
 0x743   :  { %v5782_v7 = vmul.f32 %v5654_v39, %v10976_v28 }
 0x744   :  { %v5908_v63 = vadd.f32 %v5907_v0, %v5756_v11  ;;  %v5656_v11 = vld [vmem:[#allocation5 + $0x390] sm:$0xff]  ;;  %v5763_v0 = vmul.f32 %v5635_v22, %v10992_v18 }
 0x745   :  { %v5336_v51 = vpop.permute.xlu0 %5335  ;;  %v10994_v19 = vpop.permute.xlu1 %5437 }
 0x746   :  { %v5748_v27 = vmul.f32 %v5620_v48, %v5336_v51  ;;  %v5909_v40 = vadd.f32 %v5908_v63, %v5757_v4  ;;  %v5768_v48 = vmul.f32 %v5640_v57, %v10980_v1  ;;  %v5636_v1 = vld [vmem:[#allocation5 + $0x2f0] sm:$0xff] }
 0x748   :  { %v5895_v15 = vadd.f32 %v5894_v35, %v5748_v27  ;;  %v5655_v27 = vld [vmem:[#allocation5 + $0x388] sm:$0xff] }
 0x749   :  { %v10997_v14 = vpop.permute.xlu0 %5402  ;;  %v10999_v20 = vpop.permute.xlu1 %5504 }
 0x74a   :  { %v5764_v4 = vmul.f32 %v5636_v1, %v10997_v14  ;;  %v5772_v14 = vmul.f32 %v5644_v60, %v10994_v19  ;;  %v5648_v1 = vld [vmem:[#allocation5 + $0x350] sm:$0xff] }
 0x74b   :  { %v5652_v60 = vld [vmem:[#allocation5 + $0x370] sm:$0xff] }
 0x74d   :  { %v5340_v41 = vpop.permute.xlu0 %5339  ;;  %v5379_v37 = vpop.permute.xlu1 %5378 }
 0x74e   :  { %v5749_v53 = vmul.f32 %v5621_v9, %v5340_v41  ;;  %v5758_v62 = vmul.f32 %v5630_v43, %v5379_v37  ;;  %v5762_v9 = vmul.f32 %v5634_v54, %v10986_v52  ;;  %v5642_v41 = vld [vmem:[#allocation5 + $0x320] sm:$0xff]  ;;  %v5925_v37 = vadd.f32 %v10972_v50, %v5768_v48  ;;  %v5637_v52 = vld [vmem:[#allocation5 + $0x2f8] sm:$0xff]  ;;  %v5660_v54 = vld [vmem:[#allocation5 + $0x3b0] sm:$0xff] }
 0x74f   :  { %v5646_v48 = vld [vmem:[#allocation5 + $0x340] sm:$0xff] }
 0x750   :  { %v5896_v58 = vadd.f32 %v5895_v15, %v5749_v53  ;;  %v5910_v42 = vadd.f32 %v5909_v40, %v5758_v62  ;;  %v5783_v53 = vmul.f32 %v5655_v27, %v10929_v17  ;;  %v5926_v62 = vadd.f32 %v5925_v37, %v5769_v45  ;;  %v5643_v40 = vld [vmem:[#allocation5 + $0x328] sm:$0xff]  ;;  %v5658_v17 = vld [vmem:[#allocation5 + $0x3a0] sm:$0xff]  ;;  %v5661_v27 = vld [vmem:[#allocation5 + $0x3b8] sm:$0xff] }
 0x751   :  { %v11002_v59 = vpop.permute.xlu1 %5445  ;;  %v5407_v43 = vpop.permute.xlu0 %5406 }
 0x752   :  { %v5897_v29 = vrot.slane %v5896_v58, 4  ;;  %v5911_v5 = vadd.f32 %v5910_v42, %v5759_v56  ;;  %v5945_v50 = vadd.f32 %v5783_v53, %v5782_v7  ;;  %v5765_v18 = vmul.f32 %v5637_v52, %v5407_v43  ;;  %v5649_v53 = vld [vmem:[#allocation5 + $0x358] sm:$0xff]  ;;  %v5650_v52 = vld [vmem:[#allocation5 + $0x360] sm:$0xff] }
 0x753   :  { %v5774_v19 = vmul.f32 %v5646_v48, %v11002_v59 }
 0x754   :  { %v5898_v36 = vadd.f32 %v5897_v29, %v5896_v58  ;;  %v5770_v58 = vmul.f32 %v5642_v41, %v10988_v30  ;;  %v5657_v29 = vld [vmem:[#allocation5 + $0x398] sm:$0xff]  ;;  %v5786_v30 = vmul.f32 %v5658_v17, %v10990_v23  ;;  %v5788_v23 = vmul.f32 %v5660_v54, %v10999_v20  ;;  %v5662_v41 = vld [vmem:[#allocation5 + $0x3c0] sm:$0xff] }
 0x755   :  { %v11005_v24 = vpop.permute.xlu1 %5512  ;;  %v5785_v56 = vmul.f32 %v5657_v29, %v10940_v3  ;;  %v5787_v3 = vmul.f32 %v5659_v2, %v10953_v61  ;;  %v5789_v61 = vmul.f32 %v5661_v27, %v10965_v38  ;;  %v5664_v29 = vld [vmem:[#allocation5 + $0x3d0] sm:$0xff] }
 0x756   :  { %v5899_v33 = vrot.slane %v5898_v36, 2  ;;  %v5927_v42 = vadd.f32 %v5926_v62, %v5770_v58  ;;  %v5790_v20 = vmul.f32 %v5662_v41, %v11005_v24 }
 0x758   :  { %v5900_v34 = vadd.f32 %v5899_v33, %v5898_v36 }
 0x759   :  { %v5387_v51 = vpop.permute.xlu1 %5386 }
 0x75a   :  { %v5901_v10 = vrot.slane %v5900_v34, 1  ;;  %v5760_v31 = vmul.f32 %v5632_v21, %v5387_v51 }
 0x75c   :  { %v5902_v49 = vadd.f32 %v5901_v10, %v5900_v34  ;;  %v5912_v13 = vadd.f32 %v5911_v5, %v5760_v31  ;;  %v5645_v31 = vld [vmem:[#allocation5 + $0x338] sm:$0xff] }
 0x75d   :  { %v11010_v26 = vpop.permute.xlu1 %5453 }
 0x75e   :  { %v11015_v6 = vsel %vm4858_vm15, %v5902_v49, %v10957_v12  ;;  %v5913_v35 = vadd.f32 %v5912_v13, %v5761_v8  ;;  %v5784_v12 = vmul.f32 %v5656_v11, %v10984_v16  ;;  %v5771_v16 = vmul.f32 %v5643_v40, %v10949_v44  ;;  %v5647_v11 = vld [vmem:[#allocation5 + $0x348] sm:$0xff] }
 0x75f   :  { %v5773_v44 = vmul.f32 %v5645_v31, %v10963_v47  ;;  %v5775_v47 = vmul.f32 %v5647_v11, %v10974_v46  ;;  %v5776_v59 = vmul.f32 %v5648_v1, %v11010_v26 }
 0x760   :  { %v5914_v15 = vadd.f32 %v5913_v35, %v5762_v9  ;;  %v5946_v33 = vadd.f32 %v5945_v50, %v5784_v12  ;;  %v5928_v10 = vadd.f32 %v5927_v42, %v5771_v16  ;;  %v5651_v50 = vld [vmem:[#allocation5 + $0x368] sm:$0xff] }
 0x761   :  { %v11022_v63 = vpop.permute.xlu1 %5520  ;;  %v5667_v16 = vld [vmem:[#allocation5 + $0x3e8] sm:$0xff] }
 0x762   :  { %v5915_v28 = vadd.f32 %v5914_v15, %v5763_v0  ;;  %v5947_v51 = vadd.f32 %v5946_v33, %v5785_v56  ;;  %v5929_v49 = vadd.f32 %v5928_v10, %v5772_v14  ;;  %v5792_v26 = vmul.f32 %v5664_v29, %v11022_v63  ;;  %v5474_v56 = vpop.permute.xlu0 %5473  ;;  %v5668_v10 = vld [vmem:[#allocation5 + $0x3f0] sm:$0xff] }
 0x764   :  { %v5916_v36 = vadd.f32 %v5915_v28, %v5764_v4  ;;  %v5948_v8 = vadd.f32 %v5947_v51, %v5786_v30  ;;  %v5930_v9 = vadd.f32 %v5929_v49, %v5773_v44  ;;  %v5663_v28 = vld [vmem:[#allocation5 + $0x3c8] sm:$0xff] }
 0x765   :  { %v5458_v55 = vpop.permute.xlu1 %5457  ;;  %v5791_v24 = vmul.f32 %v5663_v28, %v10978_v32 }
 0x766   :  { %v5917_v21 = vadd.f32 %v5916_v36, %v5765_v18  ;;  %v5949_v25 = vadd.f32 %v5948_v8, %v5787_v3  ;;  %v5931_v0 = vadd.f32 %v5930_v9, %v5774_v19  ;;  %v5777_v4 = vmul.f32 %v5649_v53, %v5458_v55  ;;  %v5665_v36 = vld [vmem:[#allocation5 + $0x3d8] sm:$0xff] }
 0x767   :  { %v5653_v55 = vld [vmem:[#allocation5 + $0x378] sm:$0xff] }
 0x768   :  { %v5918_v34 = vrot.slane %v5917_v21, 4  ;;  %v5950_v37 = vadd.f32 %v5949_v25, %v5788_v23  ;;  %v5932_v58 = vadd.f32 %v5931_v0, %v5775_v47 }
 0x769   :  { %v5525_v57 = vpop.permute.xlu1 %5524 }
 0x76a   :  { %v5919_v5 = vadd.f32 %v5918_v34, %v5917_v21  ;;  %v5951_v12 = vadd.f32 %v5950_v37, %v5789_v61  ;;  %v5933_v38 = vadd.f32 %v5932_v58, %v5776_v59  ;;  %v5793_v42 = vmul.f32 %v5665_v36, %v5525_v57 }
 0x76c   :  { %v5920_v13 = vrot.slane %v5919_v5, 2  ;;  %v5952_v62 = vadd.f32 %v5951_v12, %v5790_v20  ;;  %v5934_v40 = vadd.f32 %v5933_v38, %v5777_v4 }
 0x76d   :  { %v5462_v39 = vpop.permute.xlu1 %5461 }
 0x76e   :  { %v5921_v22 = vadd.f32 %v5920_v13, %v5919_v5  ;;  %v5778_v18 = vmul.f32 %v5650_v52, %v5462_v39  ;;  %v5953_v33 = vadd.f32 %v5952_v62, %v5791_v24  ;;  %v5781_v5 = vmul.f32 %v5653_v55, %v5474_v56  ;;  %v5669_v13 = vld [vmem:[#allocation5 + $0x3f8] sm:$0xff] }
 0x770   :  { %v5922_v35 = vrot.slane %v5921_v22, 1  ;;  %v5935_v21 = vadd.f32 %v5934_v40, %v5778_v18  ;;  %v5954_v14 = vadd.f32 %v5953_v33, %v5792_v26 }
 0x771   :  { %v5529_v7 = vpop.permute.xlu1 %5528 }
 0x772   :  { %v5923_v15 = vadd.f32 %v5922_v35, %v5921_v22  ;;  %v5955_v32 = vadd.f32 %v5954_v14, %v5793_v42 }
 0x774   :  { %v5978_v45 = vsel %vm4860_vm4, %v5923_v15, %v11015_v6  ;;  %v5666_v6 = vld [vmem:[#allocation5 + $0x3e0] sm:$0xff] }
 0x775   :  { %v5466_v43 = vpop.permute.xlu1 %5465  ;;  %v5794_v34 = vmul.f32 %v5666_v6, %v5529_v7 }
 0x776   :  { %v5779_v17 = vmul.f32 %v5651_v50, %v5466_v43 }
 0x777   :  { %v5956_v48 = vadd.f32 %v5955_v32, %v5794_v34 }
 0x778   :  { %v5936_v2 = vadd.f32 %v5935_v21, %v5779_v17 }
 0x779   :  { %v5533_v46 = vpop.permute.xlu1 %5532 }
 0x77a   :  { %v5795_v31 = vmul.f32 %v5667_v16, %v5533_v46 }
 0x77c   :  { %v5957_v57 = vadd.f32 %v5956_v48, %v5795_v31 }
 0x77d   :  { %v5470_v30 = vpop.permute.xlu1 %5469 }
 0x77e   :  { %v5780_v51 = vmul.f32 %v5652_v60, %v5470_v30 }
 0x780   :  { %v5937_v63 = vadd.f32 %v5936_v2, %v5780_v51 }
 0x781   :  { %v5537_v54 = vpop.permute.xlu1 %5536 }
 0x782   :  { %v5938_v8 = vadd.f32 %v5937_v63, %v5781_v5  ;;  %v5796_v49 = vmul.f32 %v5668_v10, %v5537_v54 }
 0x784   :  { %v5939_v3 = vrot.slane %v5938_v8, 4  ;;  %v5958_v23 = vadd.f32 %v5957_v57, %v5796_v49 }
 0x785   :  { %v5541_v39 = vpop.permute.xlu1 %5540 }
 0x786   :  { %v5940_v44 = vadd.f32 %v5939_v3, %v5938_v8  ;;  %v5797_v19 = vmul.f32 %v5669_v13, %v5541_v39 }
 0x788   :  { %v5941_v22 = vrot.slane %v5940_v44, 2  ;;  %v5959_v27 = vadd.f32 %v5958_v23, %v5797_v19 }
 0x78a   :  { %v5942_v25 = vadd.f32 %v5941_v22, %v5940_v44  ;;  %v5960_v9 = vrot.slane %v5959_v27, 4 }
 0x78c   :  { %v5943_v35 = vrot.slane %v5942_v25, 1  ;;  %v5961_v11 = vadd.f32 %v5960_v9, %v5959_v27 }
 0x78e   :  { %v5944_v41 = vadd.f32 %v5943_v35, %v5942_v25  ;;  %v5962_v1 = vrot.slane %v5961_v11, 2 }
 0x790   :  { %v5979_v7 = vsel %vm4862_vm5, %v5944_v41, %v5978_v45  ;;  %v5963_v37 = vadd.f32 %v5962_v1, %v5961_v11 }
 0x792   :  { %v5964_v0 = vrot.slane %v5963_v37, 1 }
 0x794   :  { %v5965_v15 = vadd.f32 %v5964_v0, %v5963_v37 }
 0x796   :  { %v5980_v61 = vsel %vm4864_vm6, %v5965_v15, %v5979_v7 }
 0x797   :  { %5982 = vst [vmem:[%s11059_s11] sm:$0xff] %v5980_v61 }
 0x798   :  { %5991 = vsyncpa [#allocation6], 1 }

</bundles_post_ra>
